<compile_context>
chip_gen: v6e
topology: v6e:2x2x1
jax: 0.10.0
libtpu: 0.0.40
codegen_flags: <defaults>
</compile_context>

<pallas_src>
import functools

import jax
import jax.numpy as jnp
from jax.experimental import pallas as pl
from jax.experimental.pallas import tpu as pltpu

LANE = 128       # channel dims padded to multiples of this (lane-dense stores / deep K)
EPS = 1e-5
STAT_ROWS = 8    # BN-stat accumulators carried as sublane-aligned (8, C) blocks


def _round_up(x, m):
    return ((x + m - 1) // m) * m


def _pick_row_tile(m):
    # Largest row tile <= 512 dividing M; prefer an even tile count so the row axis can be
    # split 2-way across TensorCores (v7x). Fall back to a padded-M path only if needed.
    candidates = (512, 256, 128, 64, 32, 16, 8)
    for t in candidates:
        if m % t == 0 and (m // t) % 2 == 0:
            return t
    for t in candidates:
        if m % t == 0:
            return t
    return 512


# ------------------------------------------------------------------ pass 1: conv1 + bn1 stats
def _conv1_stats_kernel(x_ref, w_ref, o_ref, s_ref, q_ref):
    @pl.when(pl.program_id(1) == 0)
    def _():
        s_ref[...] = jnp.zeros_like(s_ref)
        q_ref[...] = jnp.zeros_like(q_ref)

    t = jnp.dot(x_ref[...], w_ref[...], preferred_element_type=jnp.float32)
    o_ref[...] = t.astype(o_ref.dtype)
    # (1, C) broadcasts over the 8 identical stat rows of this core's block.
    s_ref[...] += jnp.sum(t, axis=0, keepdims=True)
    q_ref[...] += jnp.sum(t * t, axis=0, keepdims=True)


# --------------------------- pass 2: fused bn1+relu -> 3x3x3 conv (pad 1) + bn2 stats
def _conv2_kernel(xm_ref, x0_ref, xp_ref, scale_ref, bias_ref, w_ref,
                  o_ref, s_ref, q_ref, pad_ref, acc_ref):
    i = pl.program_id(1)
    d = pl.program_id(2)
    n_d = pl.num_programs(2)
    H, W = o_ref.shape[2], o_ref.shape[3]

    @pl.when((i == 0) & (d == 0))
    def _():
        s_ref[...] = jnp.zeros_like(s_ref)
        q_ref[...] = jnp.zeros_like(q_ref)
        # Zero the halo scratch once per core; only its interior is ever rewritten, so the
        # spatial zero-padding of conv2 stays exact with no XLA pad pass and no mask.
        pad_ref[...] = jnp.zeros_like(pad_ref)

    acc_ref[...] = jnp.zeros_like(acc_ref)

    def contribute(x_slice_ref, kd):
        # fused bn1 + relu in f32 -> bf16 MXU operand, staged into the halo scratch.
        a = jnp.maximum(
            x_slice_ref[0, 0].astype(jnp.float32) * scale_ref[...] + bias_ref[...], 0.0)
        pad_ref[1:H + 1, 1:W + 1, :] = a.astype(pad_ref.dtype)
        for kh in range(3):
            # kw-only im2col: K = 3*C1 still feeds the 256-deep MXU, but the patch temp
            # (and its copy traffic) is 3x smaller than a full 9*C1 concat.
            patch = jnp.concatenate(
                [pad_ref[kh:kh + H, kw:kw + W, :] for kw in range(3)], axis=-1)
            acc_ref[...] += jax.lax.dot_general(
                patch, w_ref[kd, kh],
                dimension_numbers=(((2,), (0,)), ((), ())),
                preferred_element_type=jnp.float32)

    @pl.when(d > 0)                 # kd = 0 hits the depth zero-pad when d == 0
    def _():
        contribute(xm_ref, 0)

    contribute(x0_ref, 1)           # kd = 1 always valid

    @pl.when(d < n_d - 1)           # kd = 2 hits the depth zero-pad when d == D-1
    def _():
        contribute(xp_ref, 2)

    acc = acc_ref[...]
    o_ref[0, 0] = acc.astype(o_ref.dtype)
    flat = acc.reshape(H * W, acc.shape[-1])
    s_ref[...] += jnp.sum(flat, axis=0, keepdims=True)
    q_ref[...] += jnp.sum(flat * flat, axis=0, keepdims=True)


# ------------------------------------------- pass 3: fused bn2+relu -> conv3 + bn3 stats
def _conv3_stats_kernel(x_ref, scale_ref, bias_ref, w_ref, o_ref, s_ref, q_ref,
                        *, valid_rows):
    @pl.when(pl.program_id(1) == 0)
    def _():
        s_ref[...] = jnp.zeros_like(s_ref)
        q_ref[...] = jnp.zeros_like(q_ref)

    a = jnp.maximum(
        x_ref[...].astype(jnp.float32) * scale_ref[...] + bias_ref[...], 0.0)
    if valid_rows is not None:
        # zero rows that exist only for M-padding so bn3 stats stay exact (fallback path)
        tm = x_ref.shape[0]
        tile = pl.program_id(0) * pl.num_programs(1) + pl.program_id(1)
        row = tile * tm + jax.lax.broadcasted_iota(jnp.int32, (tm, 1), 0)
        a = jnp.where(row < valid_rows, a, 0.0)

    t = jnp.dot(a.astype(w_ref.dtype), w_ref[...], preferred_element_type=jnp.float32)
    o_ref[...] = t.astype(o_ref.dtype)
    s_ref[...] += jnp.sum(t, axis=0, keepdims=True)
    q_ref[...] += jnp.sum(t * t, axis=0, keepdims=True)


# ------------------------------------------------ pass 4: bn3 + residual + relu epilogue
def _bn_add_relu_kernel(x_ref, res_ref, scale_ref, bias_ref, o_ref):
    o_ref[...] = jnp.maximum(
        x_ref[...].astype(jnp.float32) * scale_ref[...] + bias_ref[...]
        + res_ref[...].astype(jnp.float32), 0.0).astype(o_ref.dtype)


# ---------------------------------------------------------------------------- helpers
def _bn_coeffs(s, q, count, gamma_p, beta_p):
    # s, q: (NC*8, C) per-core partials; the 8 rows inside each core group are identical.
    nc = s.shape[0] // STAT_ROWS
    c = s.shape[1]
    s_tot = s.reshape(nc, STAT_ROWS, c)[:, 0, :].sum(axis=0)
    q_tot = q.reshape(nc, STAT_ROWS, c)[:, 0, :].sum(axis=0)
    mean = s_tot / count
    # NOTE: E[x^2]-mean^2 in f32; fine at these magnitudes. Switch to shifted / Welford
    # accumulation before trusting it at very large M.
    var = q_tot / count - mean * mean          # biased variance (PyTorch training-mode BN)
    scale = gamma_p * jax.lax.rsqrt(var + EPS)
    bias = beta_p - mean * scale
    return scale[None, :], bias[None, :]


# ---------------------------------------------------------------------------- forward
@jax.jit
def bottleneck_forward(x_ncdhw, params):
    w1, w2, w3 = params["w1"], params["w2"], params["w3"]
    g1, b1 = params["g1"], params["b1"]
    g2, b2 = params["g2"], params["b2"]
    g3, b3 = params["g3"], params["b3"]

    N, cin, D, H, W = x_ncdhw.shape
    planes = w1.shape[0]
    cout = 4 * planes
    assert cin == cout, "identity residual requires inplanes == 4 * planes"

    C0 = _round_up(cin, LANE)        # conv1 input / residual channels (padded)
    C1 = _round_up(planes, LANE)     # conv1 out / conv2 in
    C2 = C1                          # conv2 out / conv3 in
    C3 = _round_up(cout, LANE)       # conv3 out
    M = N * D * H * W

    TM = _pick_row_tile(M)
    Mp = _round_up(M, TM)
    n_tiles = Mp // TM
    NC1 = 2 if n_tiles % 2 == 0 else 1     # 2-way core split for the row-tiled passes
    half = n_tiles // NC1
    NC2 = 2 if N % 2 == 0 else 1           # 2-way core split over batch for pass 2
    Nh = N // NC2

    f32, bf16 = jnp.float32, jnp.bfloat16

    # NCDHW -> flattened channels-last bf16 (Mp, C0); also reused as the residual.
    # TODO(synk): fold this layout change + channel pad into the pass-1/4 BlockSpec DMAs
    # (or keep the surrounding model channels-last) instead of standalone XLA passes.
    x2d = jnp.transpose(x_ncdhw, (0, 2, 3, 4, 1)).reshape(M, cin).astype(bf16)
    if Mp != M or C0 != cin:
        x2d = jnp.pad(x2d, ((0, Mp - M), (0, C0 - cin)))

    # Weights -> channels-last bf16, zero-padded to lane-dense widths (padded gammas/betas
    # are 0, so padded channels stay exactly zero through every stage).
    w1m = jnp.zeros((C0, C1), bf16).at[:cin, :planes].set(w1[:, :, 0, 0, 0].T.astype(bf16))
    w2t = jnp.transpose(w2, (2, 3, 4, 1, 0)).astype(bf16)        # (kd,kh,kw,ci,co)
    w2m = jnp.zeros((3, 3, 3, C1, C2), bf16).at[:, :, :, :planes, :planes].set(w2t)
    w2m = w2m.reshape(3, 3, 3 * C1, C2)
    w3m = jnp.zeros((C2, C3), bf16).at[:planes, :cout].set(w3[:, :, 0, 0, 0].T.astype(bf16))
    g1p = jnp.zeros((C1,), f32).at[:planes].set(g1)
    b1p = jnp.zeros((C1,), f32).at[:planes].set(b1)
    g2p = jnp.zeros((C2,), f32).at[:planes].set(g2)
    b2p = jnp.zeros((C2,), f32).at[:planes].set(b2)
    g3p = jnp.zeros((C3,), f32).at[:cout].set(g3)
    b3p = jnp.zeros((C3,), f32).at[:cout].set(b3)

    # ------------------------------------------------ pass 1: conv1 + bn1 stats
    y1, s1, q1 = pl.pallas_call(
        _conv1_stats_kernel,
        out_shape=(jax.ShapeDtypeStruct((Mp, C1), bf16),
                   jax.ShapeDtypeStruct((NC1 * STAT_ROWS, C1), f32),
                   jax.ShapeDtypeStruct((NC1 * STAT_ROWS, C1), f32)),
        grid=(NC1, half),
        in_specs=[pl.BlockSpec((TM, C0), lambda c, i: (c * half + i, 0)),
                  pl.BlockSpec((C0, C1), lambda c, i: (0, 0))],
        out_specs=(pl.BlockSpec((TM, C1), lambda c, i: (c * half + i, 0)),
                   pl.BlockSpec((STAT_ROWS, C1), lambda c, i: (c, 0)),
                   pl.BlockSpec((STAT_ROWS, C1), lambda c, i: (c, 0))),
        compiler_params=pltpu.CompilerParams(
            dimension_semantics=("parallel", "arbitrary")),
    )(x2d, w1m)
    scale1, bias1 = _bn_coeffs(s1, q1, float(M), g1p, b1p)

    # -------------------- pass 2: fused bn1+relu -> conv2 (3x3x3, pad 1) + bn2 stats
    y1v = (y1 if Mp == M else y1[:M]).reshape(N, D, H, W, C1)

    y2, s2, q2 = pl.pallas_call(
        _conv2_kernel,
        out_shape=(jax.ShapeDtypeStruct((N, D, H, W, C2), bf16),
                   jax.ShapeDtypeStruct((NC2 * STAT_ROWS, C2), f32),
                   jax.ShapeDtypeStruct((NC2 * STAT_ROWS, C2), f32)),
        grid=(NC2, Nh, D),
        in_specs=[
            # previous / current / next depth slice (clamped; boundary kd's skipped in-kernel)
            pl.BlockSpec((1, 1, H, W, C1),
                         lambda c, i, d: (c * Nh + i, jnp.maximum(d - 1, 0), 0, 0, 0)),
            pl.BlockSpec((1, 1, H, W, C1),
                         lambda c, i, d: (c * Nh + i, d, 0, 0, 0)),
            pl.BlockSpec((1, 1, H, W, C1),
                         lambda c, i, d: (c * Nh + i, jnp.minimum(d + 1, D - 1), 0, 0, 0)),
            pl.BlockSpec((1, C1), lambda c, i, d: (0, 0)),
            pl.BlockSpec((1, C1), lambda c, i, d: (0, 0)),
            pl.BlockSpec((3, 3, 3 * C1, C2), lambda c, i, d: (0, 0, 0, 0)),
        ],
        out_specs=(pl.BlockSpec((1, 1, H, W, C2),
                                lambda c, i, d: (c * Nh + i, d, 0, 0, 0)),
                   pl.BlockSpec((STAT_ROWS, C2), lambda c, i, d: (c, 0)),
                   pl.BlockSpec((STAT_ROWS, C2), lambda c, i, d: (c, 0))),
        scratch_shapes=[pltpu.VMEM((H + 2, W + 2, C1), bf16),   # halo-padded activation
                        pltpu.VMEM((H, W, C2), f32)],           # f32 conv accumulator
        compiler_params=pltpu.CompilerParams(
            dimension_semantics=("parallel", "arbitrary", "arbitrary")),
    )(y1v, y1v, y1v, scale1, bias1, w2m)
    scale2, bias2 = _bn_coeffs(s2, q2, float(M), g2p, b2p)

    # ------------------------------------ pass 3: fused bn2+relu -> conv3 + bn3 stats
    y2f = y2.reshape(M, C2)
    if Mp != M:
        y2f = jnp.pad(y2f, ((0, Mp - M), (0, 0)))
    kernel3 = functools.partial(_conv3_stats_kernel,
                                valid_rows=(M if Mp != M else None))
    y3, s3, q3 = pl.pallas_call(
        kernel3,
        out_shape=(jax.ShapeDtypeStruct((Mp, C3), bf16),
                   jax.ShapeDtypeStruct((NC1 * STAT_ROWS, C3), f32),
                   jax.ShapeDtypeStruct((NC1 * STAT_ROWS, C3), f32)),
        grid=(NC1, half),
        in_specs=[pl.BlockSpec((TM, C2), lambda c, i: (c * half + i, 0)),
                  pl.BlockSpec((1, C2), lambda c, i: (0, 0)),
                  pl.BlockSpec((1, C2), lambda c, i: (0, 0)),
                  pl.BlockSpec((C2, C3), lambda c, i: (0, 0))],
        out_specs=(pl.BlockSpec((TM, C3), lambda c, i: (c * half + i, 0)),
                   pl.BlockSpec((STAT_ROWS, C3), lambda c, i: (c, 0)),
                   pl.BlockSpec((STAT_ROWS, C3), lambda c, i: (c, 0))),
        compiler_params=pltpu.CompilerParams(
            dimension_semantics=("parallel", "arbitrary")),
    )(y2f, scale2, bias2, w3m)
    scale3, bias3 = _bn_coeffs(s3, q3, float(M), g3p, b3p)

    # ------------------------------------------ pass 4: bn3 + residual + relu epilogue
    out2d = pl.pallas_call(
        _bn_add_relu_kernel,
        out_shape=jax.ShapeDtypeStruct((Mp, C3), bf16),
        grid=(n_tiles,),
        in_specs=[pl.BlockSpec((TM, C3), lambda i: (i, 0)),
                  pl.BlockSpec((TM, C3), lambda i: (i, 0)),
                  pl.BlockSpec((1, C3), lambda i: (0, 0)),
                  pl.BlockSpec((1, C3), lambda i: (0, 0))],
        out_specs=pl.BlockSpec((TM, C3), lambda i: (i, 0)),
        input_output_aliases={0: 0},     # write the epilogue in place over y3
        compiler_params=pltpu.CompilerParams(dimension_semantics=("parallel",)),
    )(y3, x2d, scale3, bias3)

    out = out2d[:M, :cout].astype(f32).reshape(N, D, H, W, cout)
    # TODO(synk): keep the surrounding model NDHWC to drop this final transpose as well.
    return jnp.transpose(out, (0, 4, 1, 2, 3))          # NDHWC -> NCDHW


# ---------------------------------------------------------------- pure-JAX reference
def reference(x, w1, w2, w3, g1, b1, g2, b2, g3, b3):
    dn = ("NCDHW", "OIDHW", "NCDHW")

    def bn(y, g, b):
        mean = jnp.mean(y, axis=(0, 2, 3, 4), keepdims=True)
        var = jnp.var(y, axis=(0, 2, 3, 4), keepdims=True)
        return ((y - mean) / jnp.sqrt(var + EPS)) * g.reshape(1, -1, 1, 1, 1) \
               + b.reshape(1, -1, 1, 1, 1)

    conv = lambda y, w, pad: jax.lax.conv_general_dilated(
        y, w, (1, 1, 1), pad, dimension_numbers=dn)
    out = jax.nn.relu(bn(conv(x, w1, "VALID"), g1, b1))
    out = jax.nn.relu(bn(conv(out, w2, [(1, 1)] * 3), g2, b2))
    out = bn(conv(out, w3, "VALID"), g3, b3)
    return jax.nn.relu(out + x)


if __name__ == "__main__":
    N, planes, D, H, W = 2, 4, 4, 8, 8
    inplanes = planes * 4        # identity residual requires inplanes == 4 * planes

    key = jax.random.PRNGKey(0)
    ks = jax.random.split(key, 10)
    # PyTorch-layout weights (O, I, kd, kh, kw), deterministic init
    w1 = 0.1 * jax.random.normal(ks[0], (planes, inplanes, 1, 1, 1), jnp.float32)
    w2 = 0.1 * jax.random.normal(ks[1], (planes, planes, 3, 3, 3), jnp.float32)
    w3 = 0.1 * jax.random.normal(ks[2], (planes * 4, planes, 1, 1, 1), jnp.float32)
    g1 = 1.0 + 0.1 * jax.random.normal(ks[3], (planes,), jnp.float32)
    b1 = 0.1 * jax.random.normal(ks[4], (planes,), jnp.float32)
    g2 = 1.0 + 0.1 * jax.random.normal(ks[5], (planes,), jnp.float32)
    b2 = 0.1 * jax.random.normal(ks[6], (planes,), jnp.float32)
    g3 = 1.0 + 0.1 * jax.random.normal(ks[7], (planes * 4,), jnp.float32)
    b3 = 0.1 * jax.random.normal(ks[8], (planes * 4,), jnp.float32)
    x = jax.random.normal(ks[9], (N, inplanes, D, H, W), jnp.float32)

    params = {"w1": w1, "w2": w2, "w3": w3,
              "g1": g1, "b1": b1, "g2": g2, "b2": b2, "g3": g3, "b3": b3}

    out = jax.block_until_ready(bottleneck_forward(x, params))
    ref = reference(x, w1, w2, w3, g1, b1, g2, b2, g3, b3)

    assert out.shape == ref.shape == (N, inplanes, D, H, W)
    max_err = float(jnp.max(jnp.abs(out - ref)))
    ref_scale = float(jnp.max(jnp.abs(ref))) + 1e-6
    # bf16 MXU operands / bf16 inter-pass activations bound the error at ~1% of the
    # output range vs the f32 reference.
    rel_err = max_err / ref_scale
    assert rel_err < 5e-2, f"relative error {rel_err} (abs {max_err})"
    print("KERNEL_OK")
</pallas_src>

<mosaic_0001>
module attributes {stable_mosaic.version = 11 : i64} {
  func.func @_conv1_stats_kernel(%arg0: i32, %arg1: i32, %arg2: memref<256x128xbf16, #tpu.memory_space<vmem>>, %arg3: memref<128x128xbf16, #tpu.memory_space<vmem>>, %arg4: memref<256x128xbf16, #tpu.memory_space<vmem>>, %arg5: memref<8x128xf32, #tpu.memory_space<vmem>>, %arg6: memref<8x128xf32, #tpu.memory_space<vmem>>) attributes {dimension_semantics = [#tpu.dimension_semantics<parallel>, #tpu.dimension_semantics<arbitrary>], iteration_bounds = array<i64: 2, 1>, scalar_prefetch = 0 : i64, scratch_operands = 0 : i64, tpu.core_type = #tpu.core_type<tc>, window_params = [{transform_indices = @transform_0, window_bounds = array<i64: 256, 128>}, {pipeline_mode = #tpu.pipeline_mode<synchronous>, transform_indices = @transform_1, window_bounds = array<i64: 128, 128>}, {transform_indices = @transform_2, window_bounds = array<i64: 256, 128>}, {transform_indices = @transform_3, window_bounds = array<i64: 8, 128>}, {transform_indices = @transform_4, window_bounds = array<i64: 8, 128>}]} {
    %c0_i32 = arith.constant 0 : i32
    %0 = arith.cmpi eq, %arg1, %c0_i32 : i32
    %1 = arith.extui %0 : i1 to i32
    %c0_i32_0 = arith.constant 0 : i32
    %2 = arith.cmpi ne, %1, %c0_i32_0 : i32
    scf.if %2 {
      %cst_16 = arith.constant 0.000000e+00 : f32
      %21 = vector.broadcast %cst_16 : f32 to vector<8x128xf32>
      %c0_17 = arith.constant 0 : index
      %c0_18 = arith.constant 0 : index
      %22 = vector.load %arg5[%c0_17, %c0_18] : memref<8x128xf32, #tpu.memory_space<vmem>>, vector<8x128xf32>
      tpu.vector_store %arg5[%c0_17, %c0_18], %21 {strides = array<i32>} : memref<8x128xf32, #tpu.memory_space<vmem>>, vector<8x128xf32>,
      %cst_19 = arith.constant 0.000000e+00 : f32
      %23 = vector.broadcast %cst_19 : f32 to vector<8x128xf32>
      %c0_20 = arith.constant 0 : index
      %c0_21 = arith.constant 0 : index
      %24 = vector.load %arg6[%c0_20, %c0_21] : memref<8x128xf32, #tpu.memory_space<vmem>>, vector<8x128xf32>
      tpu.vector_store %arg6[%c0_20, %c0_21], %23 {strides = array<i32>} : memref<8x128xf32, #tpu.memory_space<vmem>>, vector<8x128xf32>,
    } else {
    }
    %c0 = arith.constant 0 : index
    %c0_1 = arith.constant 0 : index
    %3 = vector.load %arg2[%c0, %c0_1] : memref<256x128xbf16, #tpu.memory_space<vmem>>, vector<256x128xbf16>
    %c0_2 = arith.constant 0 : index
    %c0_3 = arith.constant 0 : index
    %4 = vector.load %arg3[%c0_2, %c0_3] : memref<128x128xbf16, #tpu.memory_space<vmem>>, vector<128x128xbf16>
    %cst = arith.constant dense<0.000000e+00> : vector<256x128xf32>
    %5 = tpu.matmul %3, %4, %cst {dimension_numbers = #tpu.dot_dimension_numbers<[1], [0], [0], [1], [0, 0, 1, 1], [], []>} : vector<256x128xbf16>, vector<128x128xbf16>, vector<256x128xf32> -> vector<256x128xf32>
    %6 = arith.truncf %5 : vector<256x128xf32> to vector<256x128xbf16>
    %c0_4 = arith.constant 0 : index
    %c0_5 = arith.constant 0 : index
    %7 = vector.load %arg4[%c0_4, %c0_5] : memref<256x128xbf16, #tpu.memory_space<vmem>>, vector<256x128xbf16>
    tpu.vector_store %arg4[%c0_4, %c0_5], %6 {strides = array<i32>} : memref<256x128xbf16, #tpu.memory_space<vmem>>, vector<256x128xbf16>,
    %c0_6 = arith.constant 0 : index
    %c0_7 = arith.constant 0 : index
    %8 = vector.load %arg5[%c0_6, %c0_7] : memref<8x128xf32, #tpu.memory_space<vmem>>, vector<8x128xf32>
    %cst_8 = arith.constant dense<0.000000e+00> : vector<128xf32>
    %9 = vector.multi_reduction <add>, %5, %cst_8 [0] : vector<256x128xf32> to vector<128xf32>
    %10 = vector.shape_cast %9 : vector<128xf32> to vector<1x128xf32>
    %11 = vector.broadcast %10 : vector<1x128xf32> to vector<8x128xf32>
    %12 = arith.addf %8, %11 : vector<8x128xf32>
    %c0_9 = arith.constant 0 : index
    %c0_10 = arith.constant 0 : index
    %13 = vector.load %arg5[%c0_9, %c0_10] : memref<8x128xf32, #tpu.memory_space<vmem>>, vector<8x128xf32>
    tpu.vector_store %arg5[%c0_9, %c0_10], %12 {strides = array<i32>} : memref<8x128xf32, #tpu.memory_space<vmem>>, vector<8x128xf32>,
    %c0_11 = arith.constant 0 : index
    %c0_12 = arith.constant 0 : index
    %14 = vector.load %arg6[%c0_11, %c0_12] : memref<8x128xf32, #tpu.memory_space<vmem>>, vector<8x128xf32>
    %15 = arith.mulf %5, %5 : vector<256x128xf32>
    %cst_13 = arith.constant dense<0.000000e+00> : vector<128xf32>
    %16 = vector.multi_reduction <add>, %15, %cst_13 [0] : vector<256x128xf32> to vector<128xf32>
    %17 = vector.shape_cast %16 : vector<128xf32> to vector<1x128xf32>
    %18 = vector.broadcast %17 : vector<1x128xf32> to vector<8x128xf32>
    %19 = arith.addf %14, %18 : vector<8x128xf32>
    %c0_14 = arith.constant 0 : index
    %c0_15 = arith.constant 0 : index
    %20 = vector.load %arg6[%c0_14, %c0_15] : memref<8x128xf32, #tpu.memory_space<vmem>>, vector<8x128xf32>
    tpu.vector_store %arg6[%c0_14, %c0_15], %19 {strides = array<i32>} : memref<8x128xf32, #tpu.memory_space<vmem>>, vector<8x128xf32>,
    return
  }
  func.func @transform_0(%arg0: i32, %arg1: i32) -> (i32, i32) {
    %c1_i32 = arith.constant 1 : i32
    %0 = arith.muli %arg0, %c1_i32 : i32
    %1 = arith.addi %0, %arg1 : i32
    %c0_i32 = arith.constant 0 : i32
    %c0_i32_0 = arith.constant 0 : i32
    return %1, %c0_i32 : i32, i32
  }
  func.func @transform_1(%arg0: i32, %arg1: i32) -> (i32, i32) {
    %c0_i32 = arith.constant 0 : i32
    %c0_i32_0 = arith.constant 0 : i32
    %c0_i32_1 = arith.constant 0 : i32
    return %c0_i32, %c0_i32_0 : i32, i32
  }
  func.func @transform_2(%arg0: i32, %arg1: i32) -> (i32, i32) {
    %c1_i32 = arith.constant 1 : i32
    %0 = arith.muli %arg0, %c1_i32 : i32
    %1 = arith.addi %0, %arg1 : i32
    %c0_i32 = arith.constant 0 : i32
    %c0_i32_0 = arith.constant 0 : i32
    return %1, %c0_i32 : i32, i32
  }
  func.func @transform_3(%arg0: i32, %arg1: i32) -> (i32, i32) {
    %c0_i32 = arith.constant 0 : i32
    %c0_i32_0 = arith.constant 0 : i32
    return %arg0, %c0_i32 : i32, i32
  }
  func.func @transform_4(%arg0: i32, %arg1: i32) -> (i32, i32) {
    %c0_i32 = arith.constant 0 : i32
    %c0_i32_0 = arith.constant 0 : i32
    return %arg0, %c0_i32 : i32, i32
  }
}

module attributes {stable_mosaic.version = 11 : i64} {
  func.func @_conv2_kernel(%arg0: i32, %arg1: i32, %arg2: i32, %arg3: memref<1x1x8x8x128xbf16, #tpu.memory_space<vmem>>, %arg4: memref<1x1x8x8x128xbf16, #tpu.memory_space<vmem>>, %arg5: memref<1x1x8x8x128xbf16, #tpu.memory_space<vmem>>, %arg6: memref<1x128xf32, #tpu.memory_space<vmem>>, %arg7: memref<1x128xf32, #tpu.memory_space<vmem>>, %arg8: memref<3x3x384x128xbf16, #tpu.memory_space<vmem>>, %arg9: memref<1x1x8x8x128xbf16, #tpu.memory_space<vmem>>, %arg10: memref<8x128xf32, #tpu.memory_space<vmem>>, %arg11: memref<8x128xf32, #tpu.memory_space<vmem>>, %arg12: memref<10x10x128xbf16, #tpu.memory_space<vmem>>, %arg13: memref<8x8x128xf32, #tpu.memory_space<vmem>>) attributes {dimension_semantics = [#tpu.dimension_semantics<parallel>, #tpu.dimension_semantics<arbitrary>, #tpu.dimension_semantics<arbitrary>], iteration_bounds = array<i64: 2, 1, 4>, scalar_prefetch = 0 : i64, scratch_operands = 2 : i64, tpu.core_type = #tpu.core_type<tc>, window_params = [{transform_indices = @transform_0, window_bounds = array<i64: 1, 1, 8, 8, 128>}, {transform_indices = @transform_1, window_bounds = array<i64: 1, 1, 8, 8, 128>}, {transform_indices = @transform_2, window_bounds = array<i64: 1, 1, 8, 8, 128>}, {pipeline_mode = #tpu.pipeline_mode<synchronous>, transform_indices = @transform_3, window_bounds = array<i64: 1, 128>}, {pipeline_mode = #tpu.pipeline_mode<synchronous>, transform_indices = @transform_4, window_bounds = array<i64: 1, 128>}, {pipeline_mode = #tpu.pipeline_mode<synchronous>, transform_indices = @transform_5, window_bounds = array<i64: 3, 3, 384, 128>}, {transform_indices = @transform_6, window_bounds = array<i64: 1, 1, 8, 8, 128>}, {transform_indices = @transform_7, window_bounds = array<i64: 8, 128>}, {transform_indices = @transform_8, window_bounds = array<i64: 8, 128>}]} {
    %c0_i32 = arith.constant 0 : i32
    %0 = arith.cmpi eq, %arg1, %c0_i32 : i32
    %c0_i32_0 = arith.constant 0 : i32
    %1 = arith.cmpi eq, %arg2, %c0_i32_0 : i32
    %2 = arith.andi %0, %1 : i1
    %3 = arith.extui %2 : i1 to i32
    %c0_i32_1 = arith.constant 0 : i32
    %4 = arith.cmpi ne, %3, %c0_i32_1 : i32
    scf.if %4 {
      %cst_96 = arith.constant 0.000000e+00 : f32
      %77 = vector.broadcast %cst_96 : f32 to vector<8x128xf32>
      %c0_97 = arith.constant 0 : index
      %c0_98 = arith.constant 0 : index
      %78 = vector.load %arg10[%c0_97, %c0_98] : memref<8x128xf32, #tpu.memory_space<vmem>>, vector<8x128xf32>
      tpu.vector_store %arg10[%c0_97, %c0_98], %77 {strides = array<i32>} : memref<8x128xf32, #tpu.memory_space<vmem>>, vector<8x128xf32>,
      %cst_99 = arith.constant 0.000000e+00 : f32
      %79 = vector.broadcast %cst_99 : f32 to vector<8x128xf32>
      %c0_100 = arith.constant 0 : index
      %c0_101 = arith.constant 0 : index
      %80 = vector.load %arg11[%c0_100, %c0_101] : memref<8x128xf32, #tpu.memory_space<vmem>>, vector<8x128xf32>
      tpu.vector_store %arg11[%c0_100, %c0_101], %79 {strides = array<i32>} : memref<8x128xf32, #tpu.memory_space<vmem>>, vector<8x128xf32>,
      %cst_102 = arith.constant 0.000000e+00 : bf16
      %81 = vector.broadcast %cst_102 : bf16 to vector<10x10x128xbf16>
      %c0_103 = arith.constant 0 : index
      %c0_104 = arith.constant 0 : index
      %c0_105 = arith.constant 0 : index
      %82 = vector.load %arg12[%c0_103, %c0_104, %c0_105] : memref<10x10x128xbf16, #tpu.memory_space<vmem>>, vector<10x10x128xbf16>
      tpu.vector_store %arg12[%c0_103, %c0_104, %c0_105], %81 {strides = array<i32>} : memref<10x10x128xbf16, #tpu.memory_space<vmem>>, vector<10x10x128xbf16>,
    } else {
    }
    %cst = arith.constant 0.000000e+00 : f32
    %5 = vector.broadcast %cst : f32 to vector<8x8x128xf32>
    %c0 = arith.constant 0 : index
    %c0_2 = arith.constant 0 : index
    %c0_3 = arith.constant 0 : index
    %6 = vector.load %arg13[%c0, %c0_2, %c0_3] : memref<8x8x128xf32, #tpu.memory_space<vmem>>, vector<8x8x128xf32>
    tpu.vector_store %arg13[%c0, %c0_2, %c0_3], %5 {strides = array<i32>} : memref<8x8x128xf32, #tpu.memory_space<vmem>>, vector<8x8x128xf32>,
    %c0_i32_4 = arith.constant 0 : i32
    %7 = arith.cmpi sgt, %arg2, %c0_i32_4 : i32
    %8 = arith.extui %7 : i1 to i32
    %c0_i32_5 = arith.constant 0 : i32
    %9 = arith.cmpi ne, %8, %c0_i32_5 : i32
    scf.if %9 {
      %c0_96 = arith.constant 0 : index
      %c0_97 = arith.constant 0 : index
      %c0_98 = arith.constant 0 : index
      %c0_99 = arith.constant 0 : index
      %c0_100 = arith.constant 0 : index
      %77 = vector.load %arg3[%c0_96, %c0_97, %c0_98, %c0_99, %c0_100] : memref<1x1x8x8x128xbf16, #tpu.memory_space<vmem>>, vector<1x1x8x8x128xbf16>
      %78 = vector.shape_cast %77 : vector<1x1x8x8x128xbf16> to vector<8x8x128xbf16>
      %79 = arith.extf %78 : vector<8x8x128xbf16> to vector<8x8x128xf32>
      %c0_101 = arith.constant 0 : index
      %c0_102 = arith.constant 0 : index
      %80 = vector.load %arg6[%c0_101, %c0_102] : memref<1x128xf32, #tpu.memory_space<vmem>>, vector<1x128xf32>
      %81 = vector.shape_cast %80 : vector<1x128xf32> to vector<1x1x128xf32>
      %82 = vector.broadcast %81 : vector<1x1x128xf32> to vector<8x8x128xf32>
      %83 = arith.mulf %79, %82 : vector<8x8x128xf32>
      %c0_103 = arith.constant 0 : index
      %c0_104 = arith.constant 0 : index
      %84 = vector.load %arg7[%c0_103, %c0_104] : memref<1x128xf32, #tpu.memory_space<vmem>>, vector<1x128xf32>
      %85 = vector.shape_cast %84 : vector<1x128xf32> to vector<1x1x128xf32>
      %86 = vector.broadcast %85 : vector<1x1x128xf32> to vector<8x8x128xf32>
      %87 = arith.addf %83, %86 : vector<8x8x128xf32>
      %cst_105 = arith.constant 0.000000e+00 : f32
      %88 = vector.broadcast %cst_105 : f32 to vector<8x8x128xf32>
      %89 = arith.maximumf %87, %88 : vector<8x8x128xf32>
      %90 = arith.truncf %89 : vector<8x8x128xf32> to vector<8x8x128xbf16>
      %c1_106 = arith.constant 1 : index
      %c1_107 = arith.constant 1 : index
      %c0_108 = arith.constant 0 : index
      %91 = vector.load %arg12[%c1_106, %c1_107, %c0_108] : memref<10x10x128xbf16, #tpu.memory_space<vmem>>, vector<8x8x128xbf16>
      tpu.vector_store %arg12[%c1_106, %c1_107, %c0_108], %90 {strides = array<i32>} : memref<10x10x128xbf16, #tpu.memory_space<vmem>>, vector<8x8x128xbf16>,
      %c0_109 = arith.constant 0 : index
      %c0_110 = arith.constant 0 : index
      %c0_111 = arith.constant 0 : index
      %92 = vector.load %arg12[%c0_109, %c0_110, %c0_111] : memref<10x10x128xbf16, #tpu.memory_space<vmem>>, vector<8x8x128xbf16>
      %c0_112 = arith.constant 0 : index
      %c1_113 = arith.constant 1 : index
      %c0_114 = arith.constant 0 : index
      %93 = vector.load %arg12[%c0_112, %c1_113, %c0_114] : memref<10x10x128xbf16, #tpu.memory_space<vmem>>, vector<8x8x128xbf16>
      %c0_115 = arith.constant 0 : index
      %c2_116 = arith.constant 2 : index
      %c0_117 = arith.constant 0 : index
      %94 = vector.load %arg12[%c0_115, %c2_116, %c0_117] : memref<10x10x128xbf16, #tpu.memory_space<vmem>>, vector<8x8x128xbf16>
      %95 = tpu.concatenate %92, %93, %94 in 2 : vector<8x8x128xbf16>, vector<8x8x128xbf16>, vector<8x8x128xbf16> -> vector<8x8x384xbf16>
      %c0_118 = arith.constant 0 : index
      %c0_119 = arith.constant 0 : index
      %c0_120 = arith.constant 0 : index
      %96 = vector.load %arg13[%c0_118, %c0_119, %c0_120] : memref<8x8x128xf32, #tpu.memory_space<vmem>>, vector<8x8x128xf32>
      %c0_121 = arith.constant 0 : index
      %c0_122 = arith.constant 0 : index
      %c0_123 = arith.constant 0 : index
      %c0_124 = arith.constant 0 : index
      %97 = vector.load %arg8[%c0_121, %c0_122, %c0_123, %c0_124] : memref<3x3x384x128xbf16, #tpu.memory_space<vmem>>, vector<1x1x384x128xbf16>
      %98 = vector.shape_cast %97 : vector<1x1x384x128xbf16> to vector<384x128xbf16>
      %cst_125 = arith.constant dense<0.000000e+00> : vector<8x8x128xf32>
      %99 = tpu.matmul %95, %98, %cst_125 {dimension_numbers = #tpu.dot_dimension_numbers<[2], [0], [0, 1], [1], [0, 0, 0, 1, 1, 1], [], []>} : vector<8x8x384xbf16>, vector<384x128xbf16>, vector<8x8x128xf32> -> vector<8x8x128xf32>
      %100 = arith.addf %96, %99 : vector<8x8x128xf32>
      %c0_126 = arith.constant 0 : index
      %c0_127 = arith.constant 0 : index
      %c0_128 = arith.constant 0 : index
      %101 = vector.load %arg13[%c0_126, %c0_127, %c0_128] : memref<8x8x128xf32, #tpu.memory_space<vmem>>, vector<8x8x128xf32>
      tpu.vector_store %arg13[%c0_126, %c0_127, %c0_128], %100 {strides = array<i32>} : memref<8x8x128xf32, #tpu.memory_space<vmem>>, vector<8x8x128xf32>,
      %c1_129 = arith.constant 1 : index
      %c0_130 = arith.constant 0 : index
      %c0_131 = arith.constant 0 : index
      %102 = vector.load %arg12[%c1_129, %c0_130, %c0_131] : memref<10x10x128xbf16, #tpu.memory_space<vmem>>, vector<8x8x128xbf16>
      %c1_132 = arith.constant 1 : index
      %c1_133 = arith.constant 1 : index
      %c0_134 = arith.constant 0 : index
      %103 = vector.load %arg12[%c1_132, %c1_133, %c0_134] : memref<10x10x128xbf16, #tpu.memory_space<vmem>>, vector<8x8x128xbf16>
      %c1_135 = arith.constant 1 : index
      %c2_136 = arith.constant 2 : index
      %c0_137 = arith.constant 0 : index
      %104 = vector.load %arg12[%c1_135, %c2_136, %c0_137] : memref<10x10x128xbf16, #tpu.memory_space<vmem>>, vector<8x8x128xbf16>
      %105 = tpu.concatenate %102, %103, %104 in 2 : vector<8x8x128xbf16>, vector<8x8x128xbf16>, vector<8x8x128xbf16> -> vector<8x8x384xbf16>
      %c0_138 = arith.constant 0 : index
      %c0_139 = arith.constant 0 : index
      %c0_140 = arith.constant 0 : index
      %106 = vector.load %arg13[%c0_138, %c0_139, %c0_140] : memref<8x8x128xf32, #tpu.memory_space<vmem>>, vector<8x8x128xf32>
      %c0_141 = arith.constant 0 : index
      %c1_142 = arith.constant 1 : index
      %c0_143 = arith.constant 0 : index
      %c0_144 = arith.constant 0 : index
      %107 = vector.load %arg8[%c0_141, %c1_142, %c0_143, %c0_144] : memref<3x3x384x128xbf16, #tpu.memory_space<vmem>>, vector<1x1x384x128xbf16>
      %108 = vector.shape_cast %107 : vector<1x1x384x128xbf16> to vector<384x128xbf16>
      %cst_145 = arith.constant dense<0.000000e+00> : vector<8x8x128xf32>
      %109 = tpu.matmul %105, %108, %cst_145 {dimension_numbers = #tpu.dot_dimension_numbers<[2], [0], [0, 1], [1], [0, 0, 0, 1, 1, 1], [], []>} : vector<8x8x384xbf16>, vector<384x128xbf16>, vector<8x8x128xf32> -> vector<8x8x128xf32>
      %110 = arith.addf %106, %109 : vector<8x8x128xf32>
      %c0_146 = arith.constant 0 : index
      %c0_147 = arith.constant 0 : index
      %c0_148 = arith.constant 0 : index
      %111 = vector.load %arg13[%c0_146, %c0_147, %c0_148] : memref<8x8x128xf32, #tpu.memory_space<vmem>>, vector<8x8x128xf32>
      tpu.vector_store %arg13[%c0_146, %c0_147, %c0_148], %110 {strides = array<i32>} : memref<8x8x128xf32, #tpu.memory_space<vmem>>, vector<8x8x128xf32>,
      %c2_149 = arith.constant 2 : index
      %c0_150 = arith.constant 0 : index
      %c0_151 = arith.constant 0 : index
      %112 = vector.load %arg12[%c2_149, %c0_150, %c0_151] : memref<10x10x128xbf16, #tpu.memory_space<vmem>>, vector<8x8x128xbf16>
      %c2_152 = arith.constant 2 : index
      %c1_153 = arith.constant 1 : index
      %c0_154 = arith.constant 0 : index
      %113 = vector.load %arg12[%c2_152, %c1_153, %c0_154] : memref<10x10x128xbf16, #tpu.memory_space<vmem>>, vector<8x8x128xbf16>
      %c2_155 = arith.constant 2 : index
      %c2_156 = arith.constant 2 : index
      %c0_157 = arith.constant 0 : index
      %114 = vector.load %arg12[%c2_155, %c2_156, %c0_157] : memref<10x10x128xbf16, #tpu.memory_space<vmem>>, vector<8x8x128xbf16>
      %115 = tpu.concatenate %112, %113, %114 in 2 : vector<8x8x128xbf16>, vector<8x8x128xbf16>, vector<8x8x128xbf16> -> vector<8x8x384xbf16>
      %c0_158 = arith.constant 0 : index
      %c0_159 = arith.constant 0 : index
      %c0_160 = arith.constant 0 : index
      %116 = vector.load %arg13[%c0_158, %c0_159, %c0_160] : memref<8x8x128xf32, #tpu.memory_space<vmem>>, vector<8x8x128xf32>
      %c0_161 = arith.constant 0 : index
      %c2_162 = arith.constant 2 : index
      %c0_163 = arith.constant 0 : index
      %c0_164 = arith.constant 0 : index
      %117 = vector.load %arg8[%c0_161, %c2_162, %c0_163, %c0_164] : memref<3x3x384x128xbf16, #tpu.memory_space<vmem>>, vector<1x1x384x128xbf16>
      %118 = vector.shape_cast %117 : vector<1x1x384x128xbf16> to vector<384x128xbf16>
      %cst_165 = arith.constant dense<0.000000e+00> : vector<8x8x128xf32>
      %119 = tpu.matmul %115, %118, %cst_165 {dimension_numbers = #tpu.dot_dimension_numbers<[2], [0], [0, 1], [1], [0, 0, 0, 1, 1, 1], [], []>} : vector<8x8x384xbf16>, vector<384x128xbf16>, vector<8x8x128xf32> -> vector<8x8x128xf32>
      %120 = arith.addf %116, %119 : vector<8x8x128xf32>
      %c0_166 = arith.constant 0 : index
      %c0_167 = arith.constant 0 : index
      %c0_168 = arith.constant 0 : index
      %121 = vector.load %arg13[%c0_166, %c0_167, %c0_168] : memref<8x8x128xf32, #tpu.memory_space<vmem>>, vector<8x8x128xf32>
      tpu.vector_store %arg13[%c0_166, %c0_167, %c0_168], %120 {strides = array<i32>} : memref<8x8x128xf32, #tpu.memory_space<vmem>>, vector<8x8x128xf32>,
    } else {
    }
    %c0_6 = arith.constant 0 : index
    %c0_7 = arith.constant 0 : index
    %c0_8 = arith.constant 0 : index
    %c0_9 = arith.constant 0 : index
    %c0_10 = arith.constant 0 : index
    %10 = vector.load %arg4[%c0_6, %c0_7, %c0_8, %c0_9, %c0_10] : memref<1x1x8x8x128xbf16, #tpu.memory_space<vmem>>, vector<1x1x8x8x128xbf16>
    %11 = vector.shape_cast %10 : vector<1x1x8x8x128xbf16> to vector<8x8x128xbf16>
    %12 = arith.extf %11 : vector<8x8x128xbf16> to vector<8x8x128xf32>
    %c0_11 = arith.constant 0 : index
    %c0_12 = arith.constant 0 : index
    %13 = vector.load %arg6[%c0_11, %c0_12] : memref<1x128xf32, #tpu.memory_space<vmem>>, vector<1x128xf32>
    %14 = vector.shape_cast %13 : vector<1x128xf32> to vector<1x1x128xf32>
    %15 = vector.broadcast %14 : vector<1x1x128xf32> to vector<8x8x128xf32>
    %16 = arith.mulf %12, %15 : vector<8x8x128xf32>
    %c0_13 = arith.constant 0 : index
    %c0_14 = arith.constant 0 : index
    %17 = vector.load %arg7[%c0_13, %c0_14] : memref<1x128xf32, #tpu.memory_space<vmem>>, vector<1x128xf32>
    %18 = vector.shape_cast %17 : vector<1x128xf32> to vector<1x1x128xf32>
    %19 = vector.broadcast %18 : vector<1x1x128xf32> to vector<8x8x128xf32>
    %20 = arith.addf %16, %19 : vector<8x8x128xf32>
    %cst_15 = arith.constant 0.000000e+00 : f32
    %21 = vector.broadcast %cst_15 : f32 to vector<8x8x128xf32>
    %22 = arith.maximumf %20, %21 : vector<8x8x128xf32>
    %23 = arith.truncf %22 : vector<8x8x128xf32> to vector<8x8x128xbf16>
    %c1 = arith.constant 1 : index
    %c1_16 = arith.constant 1 : index
    %c0_17 = arith.constant 0 : index
    %24 = vector.load %arg12[%c1, %c1_16, %c0_17] : memref<10x10x128xbf16, #tpu.memory_space<vmem>>, vector<8x8x128xbf16>
    tpu.vector_store %arg12[%c1, %c1_16, %c0_17], %23 {strides = array<i32>} : memref<10x10x128xbf16, #tpu.memory_space<vmem>>, vector<8x8x128xbf16>,
    %c0_18 = arith.constant 0 : index
    %c0_19 = arith.constant 0 : index
    %c0_20 = arith.constant 0 : index
    %25 = vector.load %arg12[%c0_18, %c0_19, %c0_20] : memref<10x10x128xbf16, #tpu.memory_space<vmem>>, vector<8x8x128xbf16>
    %c0_21 = arith.constant 0 : index
    %c1_22 = arith.constant 1 : index
    %c0_23 = arith.constant 0 : index
    %26 = vector.load %arg12[%c0_21, %c1_22, %c0_23] : memref<10x10x128xbf16, #tpu.memory_space<vmem>>, vector<8x8x128xbf16>
    %c0_24 = arith.constant 0 : index
    %c2 = arith.constant 2 : index
    %c0_25 = arith.constant 0 : index
    %27 = vector.load %arg12[%c0_24, %c2, %c0_25] : memref<10x10x128xbf16, #tpu.memory_space<vmem>>, vector<8x8x128xbf16>
    %28 = tpu.concatenate %25, %26, %27 in 2 : vector<8x8x128xbf16>, vector<8x8x128xbf16>, vector<8x8x128xbf16> -> vector<8x8x384xbf16>
    %c0_26 = arith.constant 0 : index
    %c0_27 = arith.constant 0 : index
    %c0_28 = arith.constant 0 : index
    %29 = vector.load %arg13[%c0_26, %c0_27, %c0_28] : memref<8x8x128xf32, #tpu.memory_space<vmem>>, vector<8x8x128xf32>
    %c1_29 = arith.constant 1 : index
    %c0_30 = arith.constant 0 : index
    %c0_31 = arith.constant 0 : index
    %c0_32 = arith.constant 0 : index
    %30 = vector.load %arg8[%c1_29, %c0_30, %c0_31, %c0_32] : memref<3x3x384x128xbf16, #tpu.memory_space<vmem>>, vector<1x1x384x128xbf16>
    %31 = vector.shape_cast %30 : vector<1x1x384x128xbf16> to vector<384x128xbf16>
    %cst_33 = arith.constant dense<0.000000e+00> : vector<8x8x128xf32>
    %32 = tpu.matmul %28, %31, %cst_33 {dimension_numbers = #tpu.dot_dimension_numbers<[2], [0], [0, 1], [1], [0, 0, 0, 1, 1, 1], [], []>} : vector<8x8x384xbf16>, vector<384x128xbf16>, vector<8x8x128xf32> -> vector<8x8x128xf32>
    %33 = arith.addf %29, %32 : vector<8x8x128xf32>
    %c0_34 = arith.constant 0 : index
    %c0_35 = arith.constant 0 : index
    %c0_36 = arith.constant 0 : index
    %34 = vector.load %arg13[%c0_34, %c0_35, %c0_36] : memref<8x8x128xf32, #tpu.memory_space<vmem>>, vector<8x8x128xf32>
    tpu.vector_store %arg13[%c0_34, %c0_35, %c0_36], %33 {strides = array<i32>} : memref<8x8x128xf32, #tpu.memory_space<vmem>>, vector<8x8x128xf32>,
    %c1_37 = arith.constant 1 : index
    %c0_38 = arith.constant 0 : index
    %c0_39 = arith.constant 0 : index
    %35 = vector.load %arg12[%c1_37, %c0_38, %c0_39] : memref<10x10x128xbf16, #tpu.memory_space<vmem>>, vector<8x8x128xbf16>
    %c1_40 = arith.constant 1 : index
    %c1_41 = arith.constant 1 : index
    %c0_42 = arith.constant 0 : index
    %36 = vector.load %arg12[%c1_40, %c1_41, %c0_42] : memref<10x10x128xbf16, #tpu.memory_space<vmem>>, vector<8x8x128xbf16>
    %c1_43 = arith.constant 1 : index
    %c2_44 = arith.constant 2 : index
    %c0_45 = arith.constant 0 : index
    %37 = vector.load %arg12[%c1_43, %c2_44, %c0_45] : memref<10x10x128xbf16, #tpu.memory_space<vmem>>, vector<8x8x128xbf16>
    %38 = tpu.concatenate %35, %36, %37 in 2 : vector<8x8x128xbf16>, vector<8x8x128xbf16>, vector<8x8x128xbf16> -> vector<8x8x384xbf16>
    %c0_46 = arith.constant 0 : index
    %c0_47 = arith.constant 0 : index
    %c0_48 = arith.constant 0 : index
    %39 = vector.load %arg13[%c0_46, %c0_47, %c0_48] : memref<8x8x128xf32, #tpu.memory_space<vmem>>, vector<8x8x128xf32>
    %c1_49 = arith.constant 1 : index
    %c1_50 = arith.constant 1 : index
    %c0_51 = arith.constant 0 : index
    %c0_52 = arith.constant 0 : index
    %40 = vector.load %arg8[%c1_49, %c1_50, %c0_51, %c0_52] : memref<3x3x384x128xbf16, #tpu.memory_space<vmem>>, vector<1x1x384x128xbf16>
    %41 = vector.shape_cast %40 : vector<1x1x384x128xbf16> to vector<384x128xbf16>
    %cst_53 = arith.constant dense<0.000000e+00> : vector<8x8x128xf32>
    %42 = tpu.matmul %38, %41, %cst_53 {dimension_numbers = #tpu.dot_dimension_numbers<[2], [0], [0, 1], [1], [0, 0, 0, 1, 1, 1], [], []>} : vector<8x8x384xbf16>, vector<384x128xbf16>, vector<8x8x128xf32> -> vector<8x8x128xf32>
    %43 = arith.addf %39, %42 : vector<8x8x128xf32>
    %c0_54 = arith.constant 0 : index
    %c0_55 = arith.constant 0 : index
    %c0_56 = arith.constant 0 : index
    %44 = vector.load %arg13[%c0_54, %c0_55, %c0_56] : memref<8x8x128xf32, #tpu.memory_space<vmem>>, vector<8x8x128xf32>
    tpu.vector_store %arg13[%c0_54, %c0_55, %c0_56], %43 {strides = array<i32>} : memref<8x8x128xf32, #tpu.memory_space<vmem>>, vector<8x8x128xf32>,
    %c2_57 = arith.constant 2 : index
    %c0_58 = arith.constant 0 : index
    %c0_59 = arith.constant 0 : index
    %45 = vector.load %arg12[%c2_57, %c0_58, %c0_59] : memref<10x10x128xbf16, #tpu.memory_space<vmem>>, vector<8x8x128xbf16>
    %c2_60 = arith.constant 2 : index
    %c1_61 = arith.constant 1 : index
    %c0_62 = arith.constant 0 : index
    %46 = vector.load %arg12[%c2_60, %c1_61, %c0_62] : memref<10x10x128xbf16, #tpu.memory_space<vmem>>, vector<8x8x128xbf16>
    %c2_63 = arith.constant 2 : index
    %c2_64 = arith.constant 2 : index
    %c0_65 = arith.constant 0 : index
    %47 = vector.load %arg12[%c2_63, %c2_64, %c0_65] : memref<10x10x128xbf16, #tpu.memory_space<vmem>>, vector<8x8x128xbf16>
    %48 = tpu.concatenate %45, %46, %47 in 2 : vector<8x8x128xbf16>, vector<8x8x128xbf16>, vector<8x8x128xbf16> -> vector<8x8x384xbf16>
    %c0_66 = arith.constant 0 : index
    %c0_67 = arith.constant 0 : index
    %c0_68 = arith.constant 0 : index
    %49 = vector.load %arg13[%c0_66, %c0_67, %c0_68] : memref<8x8x128xf32, #tpu.memory_space<vmem>>, vector<8x8x128xf32>
    %c1_69 = arith.constant 1 : index
    %c2_70 = arith.constant 2 : index
    %c0_71 = arith.constant 0 : index
    %c0_72 = arith.constant 0 : index
    %50 = vector.load %arg8[%c1_69, %c2_70, %c0_71, %c0_72] : memref<3x3x384x128xbf16, #tpu.memory_space<vmem>>, vector<1x1x384x128xbf16>
    %51 = vector.shape_cast %50 : vector<1x1x384x128xbf16> to vector<384x128xbf16>
    %cst_73 = arith.constant dense<0.000000e+00> : vector<8x8x128xf32>
    %52 = tpu.matmul %48, %51, %cst_73 {dimension_numbers = #tpu.dot_dimension_numbers<[2], [0], [0, 1], [1], [0, 0, 0, 1, 1, 1], [], []>} : vector<8x8x384xbf16>, vector<384x128xbf16>, vector<8x8x128xf32> -> vector<8x8x128xf32>
    %53 = arith.addf %49, %52 : vector<8x8x128xf32>
    %c0_74 = arith.constant 0 : index
    %c0_75 = arith.constant 0 : index
    %c0_76 = arith.constant 0 : index
    %54 = vector.load %arg13[%c0_74, %c0_75, %c0_76] : memref<8x8x128xf32, #tpu.memory_space<vmem>>, vector<8x8x128xf32>
    tpu.vector_store %arg13[%c0_74, %c0_75, %c0_76], %53 {strides = array<i32>} : memref<8x8x128xf32, #tpu.memory_space<vmem>>, vector<8x8x128xf32>,
    %c3_i32 = arith.constant 3 : i32
    %55 = arith.cmpi slt, %arg2, %c3_i32 : i32
    %56 = arith.extui %55 : i1 to i32
    %c0_i32_77 = arith.constant 0 : i32
    %57 = arith.cmpi ne, %56, %c0_i32_77 : i32
    scf.if %57 {
      %c0_96 = arith.constant 0 : index
      %c0_97 = arith.constant 0 : index
      %c0_98 = arith.constant 0 : index
      %c0_99 = arith.constant 0 : index
      %c0_100 = arith.constant 0 : index
      %77 = vector.load %arg5[%c0_96, %c0_97, %c0_98, %c0_99, %c0_100] : memref<1x1x8x8x128xbf16, #tpu.memory_space<vmem>>, vector<1x1x8x8x128xbf16>
      %78 = vector.shape_cast %77 : vector<1x1x8x8x128xbf16> to vector<8x8x128xbf16>
      %79 = arith.extf %78 : vector<8x8x128xbf16> to vector<8x8x128xf32>
      %c0_101 = arith.constant 0 : index
      %c0_102 = arith.constant 0 : index
      %80 = vector.load %arg6[%c0_101, %c0_102] : memref<1x128xf32, #tpu.memory_space<vmem>>, vector<1x128xf32>
      %81 = vector.shape_cast %80 : vector<1x128xf32> to vector<1x1x128xf32>
      %82 = vector.broadcast %81 : vector<1x1x128xf32> to vector<8x8x128xf32>
      %83 = arith.mulf %79, %82 : vector<8x8x128xf32>
      %c0_103 = arith.constant 0 : index
      %c0_104 = arith.constant 0 : index
      %84 = vector.load %arg7[%c0_103, %c0_104] : memref<1x128xf32, #tpu.memory_space<vmem>>, vector<1x128xf32>
      %85 = vector.shape_cast %84 : vector<1x128xf32> to vector<1x1x128xf32>
      %86 = vector.broadcast %85 : vector<1x1x128xf32> to vector<8x8x128xf32>
      %87 = arith.addf %83, %86 : vector<8x8x128xf32>
      %cst_105 = arith.constant 0.000000e+00 : f32
      %88 = vector.broadcast %cst_105 : f32 to vector<8x8x128xf32>
      %89 = arith.maximumf %87, %88 : vector<8x8x128xf32>
      %90 = arith.truncf %89 : vector<8x8x128xf32> to vector<8x8x128xbf16>
      %c1_106 = arith.constant 1 : index
      %c1_107 = arith.constant 1 : index
      %c0_108 = arith.constant 0 : index
      %91 = vector.load %arg12[%c1_106, %c1_107, %c0_108] : memref<10x10x128xbf16, #tpu.memory_space<vmem>>, vector<8x8x128xbf16>
      tpu.vector_store %arg12[%c1_106, %c1_107, %c0_108], %90 {strides = array<i32>} : memref<10x10x128xbf16, #tpu.memory_space<vmem>>, vector<8x8x128xbf16>,
      %c0_109 = arith.constant 0 : index
      %c0_110 = arith.constant 0 : index
      %c0_111 = arith.constant 0 : index
      %92 = vector.load %arg12[%c0_109, %c0_110, %c0_111] : memref<10x10x128xbf16, #tpu.memory_space<vmem>>, vector<8x8x128xbf16>
      %c0_112 = arith.constant 0 : index
      %c1_113 = arith.constant 1 : index
      %c0_114 = arith.constant 0 : index
      %93 = vector.load %arg12[%c0_112, %c1_113, %c0_114] : memref<10x10x128xbf16, #tpu.memory_space<vmem>>, vector<8x8x128xbf16>
      %c0_115 = arith.constant 0 : index
      %c2_116 = arith.constant 2 : index
      %c0_117 = arith.constant 0 : index
      %94 = vector.load %arg12[%c0_115, %c2_116, %c0_117] : memref<10x10x128xbf16, #tpu.memory_space<vmem>>, vector<8x8x128xbf16>
      %95 = tpu.concatenate %92, %93, %94 in 2 : vector<8x8x128xbf16>, vector<8x8x128xbf16>, vector<8x8x128xbf16> -> vector<8x8x384xbf16>
      %c0_118 = arith.constant 0 : index
      %c0_119 = arith.constant 0 : index
      %c0_120 = arith.constant 0 : index
      %96 = vector.load %arg13[%c0_118, %c0_119, %c0_120] : memref<8x8x128xf32, #tpu.memory_space<vmem>>, vector<8x8x128xf32>
      %c2_121 = arith.constant 2 : index
      %c0_122 = arith.constant 0 : index
      %c0_123 = arith.constant 0 : index
      %c0_124 = arith.constant 0 : index
      %97 = vector.load %arg8[%c2_121, %c0_122, %c0_123, %c0_124] : memref<3x3x384x128xbf16, #tpu.memory_space<vmem>>, vector<1x1x384x128xbf16>
      %98 = vector.shape_cast %97 : vector<1x1x384x128xbf16> to vector<384x128xbf16>
      %cst_125 = arith.constant dense<0.000000e+00> : vector<8x8x128xf32>
      %99 = tpu.matmul %95, %98, %cst_125 {dimension_numbers = #tpu.dot_dimension_numbers<[2], [0], [0, 1], [1], [0, 0, 0, 1, 1, 1], [], []>} : vector<8x8x384xbf16>, vector<384x128xbf16>, vector<8x8x128xf32> -> vector<8x8x128xf32>
      %100 = arith.addf %96, %99 : vector<8x8x128xf32>
      %c0_126 = arith.constant 0 : index
      %c0_127 = arith.constant 0 : index
      %c0_128 = arith.constant 0 : index
      %101 = vector.load %arg13[%c0_126, %c0_127, %c0_128] : memref<8x8x128xf32, #tpu.memory_space<vmem>>, vector<8x8x128xf32>
      tpu.vector_store %arg13[%c0_126, %c0_127, %c0_128], %100 {strides = array<i32>} : memref<8x8x128xf32, #tpu.memory_space<vmem>>, vector<8x8x128xf32>,
      %c1_129 = arith.constant 1 : index
      %c0_130 = arith.constant 0 : index
      %c0_131 = arith.constant 0 : index
      %102 = vector.load %arg12[%c1_129, %c0_130, %c0_131] : memref<10x10x128xbf16, #tpu.memory_space<vmem>>, vector<8x8x128xbf16>
      %c1_132 = arith.constant 1 : index
      %c1_133 = arith.constant 1 : index
      %c0_134 = arith.constant 0 : index
      %103 = vector.load %arg12[%c1_132, %c1_133, %c0_134] : memref<10x10x128xbf16, #tpu.memory_space<vmem>>, vector<8x8x128xbf16>
      %c1_135 = arith.constant 1 : index
      %c2_136 = arith.constant 2 : index
      %c0_137 = arith.constant 0 : index
      %104 = vector.load %arg12[%c1_135, %c2_136, %c0_137] : memref<10x10x128xbf16, #tpu.memory_space<vmem>>, vector<8x8x128xbf16>
      %105 = tpu.concatenate %102, %103, %104 in 2 : vector<8x8x128xbf16>, vector<8x8x128xbf16>, vector<8x8x128xbf16> -> vector<8x8x384xbf16>
      %c0_138 = arith.constant 0 : index
      %c0_139 = arith.constant 0 : index
      %c0_140 = arith.constant 0 : index
      %106 = vector.load %arg13[%c0_138, %c0_139, %c0_140] : memref<8x8x128xf32, #tpu.memory_space<vmem>>, vector<8x8x128xf32>
      %c2_141 = arith.constant 2 : index
      %c1_142 = arith.constant 1 : index
      %c0_143 = arith.constant 0 : index
      %c0_144 = arith.constant 0 : index
      %107 = vector.load %arg8[%c2_141, %c1_142, %c0_143, %c0_144] : memref<3x3x384x128xbf16, #tpu.memory_space<vmem>>, vector<1x1x384x128xbf16>
      %108 = vector.shape_cast %107 : vector<1x1x384x128xbf16> to vector<384x128xbf16>
      %cst_145 = arith.constant dense<0.000000e+00> : vector<8x8x128xf32>
      %109 = tpu.matmul %105, %108, %cst_145 {dimension_numbers = #tpu.dot_dimension_numbers<[2], [0], [0, 1], [1], [0, 0, 0, 1, 1, 1], [], []>} : vector<8x8x384xbf16>, vector<384x128xbf16>, vector<8x8x128xf32> -> vector<8x8x128xf32>
      %110 = arith.addf %106, %109 : vector<8x8x128xf32>
      %c0_146 = arith.constant 0 : index
      %c0_147 = arith.constant 0 : index
      %c0_148 = arith.constant 0 : index
      %111 = vector.load %arg13[%c0_146, %c0_147, %c0_148] : memref<8x8x128xf32, #tpu.memory_space<vmem>>, vector<8x8x128xf32>
      tpu.vector_store %arg13[%c0_146, %c0_147, %c0_148], %110 {strides = array<i32>} : memref<8x8x128xf32, #tpu.memory_space<vmem>>, vector<8x8x128xf32>,
      %c2_149 = arith.constant 2 : index
      %c0_150 = arith.constant 0 : index
      %c0_151 = arith.constant 0 : index
      %112 = vector.load %arg12[%c2_149, %c0_150, %c0_151] : memref<10x10x128xbf16, #tpu.memory_space<vmem>>, vector<8x8x128xbf16>
      %c2_152 = arith.constant 2 : index
      %c1_153 = arith.constant 1 : index
      %c0_154 = arith.constant 0 : index
      %113 = vector.load %arg12[%c2_152, %c1_153, %c0_154] : memref<10x10x128xbf16, #tpu.memory_space<vmem>>, vector<8x8x128xbf16>
      %c2_155 = arith.constant 2 : index
      %c2_156 = arith.constant 2 : index
      %c0_157 = arith.constant 0 : index
      %114 = vector.load %arg12[%c2_155, %c2_156, %c0_157] : memref<10x10x128xbf16, #tpu.memory_space<vmem>>, vector<8x8x128xbf16>
      %115 = tpu.concatenate %112, %113, %114 in 2 : vector<8x8x128xbf16>, vector<8x8x128xbf16>, vector<8x8x128xbf16> -> vector<8x8x384xbf16>
      %c0_158 = arith.constant 0 : index
      %c0_159 = arith.constant 0 : index
      %c0_160 = arith.constant 0 : index
      %116 = vector.load %arg13[%c0_158, %c0_159, %c0_160] : memref<8x8x128xf32, #tpu.memory_space<vmem>>, vector<8x8x128xf32>
      %c2_161 = arith.constant 2 : index
      %c2_162 = arith.constant 2 : index
      %c0_163 = arith.constant 0 : index
      %c0_164 = arith.constant 0 : index
      %117 = vector.load %arg8[%c2_161, %c2_162, %c0_163, %c0_164] : memref<3x3x384x128xbf16, #tpu.memory_space<vmem>>, vector<1x1x384x128xbf16>
      %118 = vector.shape_cast %117 : vector<1x1x384x128xbf16> to vector<384x128xbf16>
      %cst_165 = arith.constant dense<0.000000e+00> : vector<8x8x128xf32>
      %119 = tpu.matmul %115, %118, %cst_165 {dimension_numbers = #tpu.dot_dimension_numbers<[2], [0], [0, 1], [1], [0, 0, 0, 1, 1, 1], [], []>} : vector<8x8x384xbf16>, vector<384x128xbf16>, vector<8x8x128xf32> -> vector<8x8x128xf32>
      %120 = arith.addf %116, %119 : vector<8x8x128xf32>
      %c0_166 = arith.constant 0 : index
      %c0_167 = arith.constant 0 : index
      %c0_168 = arith.constant 0 : index
      %121 = vector.load %arg13[%c0_166, %c0_167, %c0_168] : memref<8x8x128xf32, #tpu.memory_space<vmem>>, vector<8x8x128xf32>
      tpu.vector_store %arg13[%c0_166, %c0_167, %c0_168], %120 {strides = array<i32>} : memref<8x8x128xf32, #tpu.memory_space<vmem>>, vector<8x8x128xf32>,
    } else {
    }
    %c0_78 = arith.constant 0 : index
    %c0_79 = arith.constant 0 : index
    %c0_80 = arith.constant 0 : index
    %58 = vector.load %arg13[%c0_78, %c0_79, %c0_80] : memref<8x8x128xf32, #tpu.memory_space<vmem>>, vector<8x8x128xf32>
    %59 = arith.truncf %58 : vector<8x8x128xf32> to vector<8x8x128xbf16>
    %c0_81 = arith.constant 0 : index
    %c0_82 = arith.constant 0 : index
    %c0_83 = arith.constant 0 : index
    %c0_84 = arith.constant 0 : index
    %c0_85 = arith.constant 0 : index
    %60 = vector.load %arg9[%c0_81, %c0_82, %c0_83, %c0_84, %c0_85] : memref<1x1x8x8x128xbf16, #tpu.memory_space<vmem>>, vector<1x1x8x8x128xbf16>
    %61 = vector.shape_cast %60 : vector<1x1x8x8x128xbf16> to vector<8x8x128xbf16>
    %62 = vector.shape_cast %59 : vector<8x8x128xbf16> to vector<1x1x8x8x128xbf16>
    tpu.vector_store %arg9[%c0_81, %c0_82, %c0_83, %c0_84, %c0_85], %62 {strides = array<i32>} : memref<1x1x8x8x128xbf16, #tpu.memory_space<vmem>>, vector<1x1x8x8x128xbf16>,
    %63 = vector.shape_cast %58 : vector<8x8x128xf32> to vector<64x128xf32>
    %c0_86 = arith.constant 0 : index
    %c0_87 = arith.constant 0 : index
    %64 = vector.load %arg10[%c0_86, %c0_87] : memref<8x128xf32, #tpu.memory_space<vmem>>, vector<8x128xf32>
    %cst_88 = arith.constant dense<0.000000e+00> : vector<128xf32>
    %65 = vector.multi_reduction <add>, %63, %cst_88 [0] : vector<64x128xf32> to vector<128xf32>
    %66 = vector.shape_cast %65 : vector<128xf32> to vector<1x128xf32>
    %67 = vector.broadcast %66 : vector<1x128xf32> to vector<8x128xf32>
    %68 = arith.addf %64, %67 : vector<8x128xf32>
    %c0_89 = arith.constant 0 : index
    %c0_90 = arith.constant 0 : index
    %69 = vector.load %arg10[%c0_89, %c0_90] : memref<8x128xf32, #tpu.memory_space<vmem>>, vector<8x128xf32>
    tpu.vector_store %arg10[%c0_89, %c0_90], %68 {strides = array<i32>} : memref<8x128xf32, #tpu.memory_space<vmem>>, vector<8x128xf32>,
    %c0_91 = arith.constant 0 : index
    %c0_92 = arith.constant 0 : index
    %70 = vector.load %arg11[%c0_91, %c0_92] : memref<8x128xf32, #tpu.memory_space<vmem>>, vector<8x128xf32>
    %71 = arith.mulf %63, %63 : vector<64x128xf32>
    %cst_93 = arith.constant dense<0.000000e+00> : vector<128xf32>
    %72 = vector.multi_reduction <add>, %71, %cst_93 [0] : vector<64x128xf32> to vector<128xf32>
    %73 = vector.shape_cast %72 : vector<128xf32> to vector<1x128xf32>
    %74 = vector.broadcast %73 : vector<1x128xf32> to vector<8x128xf32>
    %75 = arith.addf %70, %74 : vector<8x128xf32>
    %c0_94 = arith.constant 0 : index
    %c0_95 = arith.constant 0 : index
    %76 = vector.load %arg11[%c0_94, %c0_95] : memref<8x128xf32, #tpu.memory_space<vmem>>, vector<8x128xf32>
    tpu.vector_store %arg11[%c0_94, %c0_95], %75 {strides = array<i32>} : memref<8x128xf32, #tpu.memory_space<vmem>>, vector<8x128xf32>,
    return
  }
  func.func @transform_0(%arg0: i32, %arg1: i32, %arg2: i32) -> (i32, i32, i32, i32, i32) {
    %c1_i32 = arith.constant 1 : i32
    %0 = arith.muli %arg0, %c1_i32 : i32
    %1 = arith.addi %0, %arg1 : i32
    %c1_i32_0 = arith.constant 1 : i32
    %2 = arith.subi %arg2, %c1_i32_0 : i32
    %c0_i32 = arith.constant 0 : i32
    %3 = arith.maxsi %2, %c0_i32 : i32
    %c0_i32_1 = arith.constant 0 : i32
    %c0_i32_2 = arith.constant 0 : i32
    %c0_i32_3 = arith.constant 0 : i32
    %c0_i32_4 = arith.constant 0 : i32
    return %1, %3, %c0_i32_1, %c0_i32_2, %c0_i32_3 : i32, i32, i32, i32, i32
  }
  func.func @transform_1(%arg0: i32, %arg1: i32, %arg2: i32) -> (i32, i32, i32, i32, i32) {
    %c1_i32 = arith.constant 1 : i32
    %0 = arith.muli %arg0, %c1_i32 : i32
    %1 = arith.addi %0, %arg1 : i32
    %c0_i32 = arith.constant 0 : i32
    %c0_i32_0 = arith.constant 0 : i32
    %c0_i32_1 = arith.constant 0 : i32
    %c0_i32_2 = arith.constant 0 : i32
    return %1, %arg2, %c0_i32, %c0_i32_0, %c0_i32_1 : i32, i32, i32, i32, i32
  }
  func.func @transform_2(%arg0: i32, %arg1: i32, %arg2: i32) -> (i32, i32, i32, i32, i32) {
    %c1_i32 = arith.constant 1 : i32
    %0 = arith.muli %arg0, %c1_i32 : i32
    %1 = arith.addi %0, %arg1 : i32
    %c1_i32_0 = arith.constant 1 : i32
    %2 = arith.addi %arg2, %c1_i32_0 : i32
    %c3_i32 = arith.constant 3 : i32
    %3 = arith.minsi %2, %c3_i32 : i32
    %c0_i32 = arith.constant 0 : i32
    %c0_i32_1 = arith.constant 0 : i32
    %c0_i32_2 = arith.constant 0 : i32
    %c0_i32_3 = arith.constant 0 : i32
    return %1, %3, %c0_i32, %c0_i32_1, %c0_i32_2 : i32, i32, i32, i32, i32
  }
  func.func @transform_3(%arg0: i32, %arg1: i32, %arg2: i32) -> (i32, i32) {
    %c0_i32 = arith.constant 0 : i32
    %c0_i32_0 = arith.constant 0 : i32
    %c0_i32_1 = arith.constant 0 : i32
    return %c0_i32, %c0_i32_0 : i32, i32
  }
  func.func @transform_4(%arg0: i32, %arg1: i32, %arg2: i32) -> (i32, i32) {
    %c0_i32 = arith.constant 0 : i32
    %c0_i32_0 = arith.constant 0 : i32
    %c0_i32_1 = arith.constant 0 : i32
    return %c0_i32, %c0_i32_0 : i32, i32
  }
  func.func @transform_5(%arg0: i32, %arg1: i32, %arg2: i32) -> (i32, i32, i32, i32) {
    %c0_i32 = arith.constant 0 : i32
    %c0_i32_0 = arith.constant 0 : i32
    %c0_i32_1 = arith.constant 0 : i32
    %c0_i32_2 = arith.constant 0 : i32
    %c0_i32_3 = arith.constant 0 : i32
    return %c0_i32, %c0_i32_0, %c0_i32_1, %c0_i32_2 : i32, i32, i32, i32
  }
  func.func @transform_6(%arg0: i32, %arg1: i32, %arg2: i32) -> (i32, i32, i32, i32, i32) {
    %c1_i32 = arith.constant 1 : i32
    %0 = arith.muli %arg0, %c1_i32 : i32
    %1 = arith.addi %0, %arg1 : i32
    %c0_i32 = arith.constant 0 : i32
    %c0_i32_0 = arith.constant 0 : i32
    %c0_i32_1 = arith.constant 0 : i32
    %c0_i32_2 = arith.constant 0 : i32
    return %1, %arg2, %c0_i32, %c0_i32_0, %c0_i32_1 : i32, i32, i32, i32, i32
  }
  func.func @transform_7(%arg0: i32, %arg1: i32, %arg2: i32) -> (i32, i32) {
    %c0_i32 = arith.constant 0 : i32
    %c0_i32_0 = arith.constant 0 : i32
    return %arg0, %c0_i32 : i32, i32
  }
  func.func @transform_8(%arg0: i32, %arg1: i32, %arg2: i32) -> (i32, i32) {
    %c0_i32 = arith.constant 0 : i32
    %c0_i32_0 = arith.constant 0 : i32
    return %arg0, %c0_i32 : i32, i32
  }
}

module attributes {stable_mosaic.version = 11 : i64} {
  func.func @_conv3_stats_kernel(%arg0: i32, %arg1: i32, %arg2: memref<256x128xbf16, #tpu.memory_space<vmem>>, %arg3: memref<1x128xf32, #tpu.memory_space<vmem>>, %arg4: memref<1x128xf32, #tpu.memory_space<vmem>>, %arg5: memref<128x128xbf16, #tpu.memory_space<vmem>>, %arg6: memref<256x128xbf16, #tpu.memory_space<vmem>>, %arg7: memref<8x128xf32, #tpu.memory_space<vmem>>, %arg8: memref<8x128xf32, #tpu.memory_space<vmem>>) attributes {dimension_semantics = [#tpu.dimension_semantics<parallel>, #tpu.dimension_semantics<arbitrary>], iteration_bounds = array<i64: 2, 1>, scalar_prefetch = 0 : i64, scratch_operands = 0 : i64, tpu.core_type = #tpu.core_type<tc>, window_params = [{transform_indices = @transform_0, window_bounds = array<i64: 256, 128>}, {pipeline_mode = #tpu.pipeline_mode<synchronous>, transform_indices = @transform_1, window_bounds = array<i64: 1, 128>}, {pipeline_mode = #tpu.pipeline_mode<synchronous>, transform_indices = @transform_2, window_bounds = array<i64: 1, 128>}, {pipeline_mode = #tpu.pipeline_mode<synchronous>, transform_indices = @transform_3, window_bounds = array<i64: 128, 128>}, {transform_indices = @transform_4, window_bounds = array<i64: 256, 128>}, {transform_indices = @transform_5, window_bounds = array<i64: 8, 128>}, {transform_indices = @transform_6, window_bounds = array<i64: 8, 128>}]} {
    %c0_i32 = arith.constant 0 : i32
    %0 = arith.cmpi eq, %arg1, %c0_i32 : i32
    %1 = arith.extui %0 : i1 to i32
    %c0_i32_0 = arith.constant 0 : i32
    %2 = arith.cmpi ne, %1, %c0_i32_0 : i32
    scf.if %2 {
      %cst_21 = arith.constant 0.000000e+00 : f32
      %31 = vector.broadcast %cst_21 : f32 to vector<8x128xf32>
      %c0_22 = arith.constant 0 : index
      %c0_23 = arith.constant 0 : index
      %32 = vector.load %arg7[%c0_22, %c0_23] : memref<8x128xf32, #tpu.memory_space<vmem>>, vector<8x128xf32>
      tpu.vector_store %arg7[%c0_22, %c0_23], %31 {strides = array<i32>} : memref<8x128xf32, #tpu.memory_space<vmem>>, vector<8x128xf32>,
      %cst_24 = arith.constant 0.000000e+00 : f32
      %33 = vector.broadcast %cst_24 : f32 to vector<8x128xf32>
      %c0_25 = arith.constant 0 : index
      %c0_26 = arith.constant 0 : index
      %34 = vector.load %arg8[%c0_25, %c0_26] : memref<8x128xf32, #tpu.memory_space<vmem>>, vector<8x128xf32>
      tpu.vector_store %arg8[%c0_25, %c0_26], %33 {strides = array<i32>} : memref<8x128xf32, #tpu.memory_space<vmem>>, vector<8x128xf32>,
    } else {
    }
    %c0 = arith.constant 0 : index
    %c0_1 = arith.constant 0 : index
    %3 = vector.load %arg2[%c0, %c0_1] : memref<256x128xbf16, #tpu.memory_space<vmem>>, vector<256x128xbf16>
    %4 = arith.extf %3 : vector<256x128xbf16> to vector<256x128xf32>
    %c0_2 = arith.constant 0 : index
    %c0_3 = arith.constant 0 : index
    %5 = vector.load %arg3[%c0_2, %c0_3] : memref<1x128xf32, #tpu.memory_space<vmem>>, vector<1x128xf32>
    %6 = vector.broadcast %5 : vector<1x128xf32> to vector<256x128xf32>
    %7 = arith.mulf %4, %6 : vector<256x128xf32>
    %c0_4 = arith.constant 0 : index
    %c0_5 = arith.constant 0 : index
    %8 = vector.load %arg4[%c0_4, %c0_5] : memref<1x128xf32, #tpu.memory_space<vmem>>, vector<1x128xf32>
    %9 = vector.broadcast %8 : vector<1x128xf32> to vector<256x128xf32>
    %10 = arith.addf %7, %9 : vector<256x128xf32>
    %cst = arith.constant 0.000000e+00 : f32
    %11 = vector.broadcast %cst : f32 to vector<256x128xf32>
    %12 = arith.maximumf %10, %11 : vector<256x128xf32>
    %13 = arith.truncf %12 : vector<256x128xf32> to vector<256x128xbf16>
    %c0_6 = arith.constant 0 : index
    %c0_7 = arith.constant 0 : index
    %14 = vector.load %arg5[%c0_6, %c0_7] : memref<128x128xbf16, #tpu.memory_space<vmem>>, vector<128x128xbf16>
    %cst_8 = arith.constant dense<0.000000e+00> : vector<256x128xf32>
    %15 = tpu.matmul %13, %14, %cst_8 {dimension_numbers = #tpu.dot_dimension_numbers<[1], [0], [0], [1], [0, 0, 1, 1], [], []>} : vector<256x128xbf16>, vector<128x128xbf16>, vector<256x128xf32> -> vector<256x128xf32>
    %16 = arith.truncf %15 : vector<256x128xf32> to vector<256x128xbf16>
    %c0_9 = arith.constant 0 : index
    %c0_10 = arith.constant 0 : index
    %17 = vector.load %arg6[%c0_9, %c0_10] : memref<256x128xbf16, #tpu.memory_space<vmem>>, vector<256x128xbf16>
    tpu.vector_store %arg6[%c0_9, %c0_10], %16 {strides = array<i32>} : memref<256x128xbf16, #tpu.memory_space<vmem>>, vector<256x128xbf16>,
    %c0_11 = arith.constant 0 : index
    %c0_12 = arith.constant 0 : index
    %18 = vector.load %arg7[%c0_11, %c0_12] : memref<8x128xf32, #tpu.memory_space<vmem>>, vector<8x128xf32>
    %cst_13 = arith.constant dense<0.000000e+00> : vector<128xf32>
    %19 = vector.multi_reduction <add>, %15, %cst_13 [0] : vector<256x128xf32> to vector<128xf32>
    %20 = vector.shape_cast %19 : vector<128xf32> to vector<1x128xf32>
    %21 = vector.broadcast %20 : vector<1x128xf32> to vector<8x128xf32>
    %22 = arith.addf %18, %21 : vector<8x128xf32>
    %c0_14 = arith.constant 0 : index
    %c0_15 = arith.constant 0 : index
    %23 = vector.load %arg7[%c0_14, %c0_15] : memref<8x128xf32, #tpu.memory_space<vmem>>, vector<8x128xf32>
    tpu.vector_store %arg7[%c0_14, %c0_15], %22 {strides = array<i32>} : memref<8x128xf32, #tpu.memory_space<vmem>>, vector<8x128xf32>,
    %c0_16 = arith.constant 0 : index
    %c0_17 = arith.constant 0 : index
    %24 = vector.load %arg8[%c0_16, %c0_17] : memref<8x128xf32, #tpu.memory_space<vmem>>, vector<8x128xf32>
    %25 = arith.mulf %15, %15 : vector<256x128xf32>
    %cst_18 = arith.constant dense<0.000000e+00> : vector<128xf32>
    %26 = vector.multi_reduction <add>, %25, %cst_18 [0] : vector<256x128xf32> to vector<128xf32>
    %27 = vector.shape_cast %26 : vector<128xf32> to vector<1x128xf32>
    %28 = vector.broadcast %27 : vector<1x128xf32> to vector<8x128xf32>
    %29 = arith.addf %24, %28 : vector<8x128xf32>
    %c0_19 = arith.constant 0 : index
    %c0_20 = arith.constant 0 : index
    %30 = vector.load %arg8[%c0_19, %c0_20] : memref<8x128xf32, #tpu.memory_space<vmem>>, vector<8x128xf32>
    tpu.vector_store %arg8[%c0_19, %c0_20], %29 {strides = array<i32>} : memref<8x128xf32, #tpu.memory_space<vmem>>, vector<8x128xf32>,
    return
  }
  func.func @transform_0(%arg0: i32, %arg1: i32) -> (i32, i32) {
    %c1_i32 = arith.constant 1 : i32
    %0 = arith.muli %arg0, %c1_i32 : i32
    %1 = arith.addi %0, %arg1 : i32
    %c0_i32 = arith.constant 0 : i32
    %c0_i32_0 = arith.constant 0 : i32
    return %1, %c0_i32 : i32, i32
  }
  func.func @transform_1(%arg0: i32, %arg1: i32) -> (i32, i32) {
    %c0_i32 = arith.constant 0 : i32
    %c0_i32_0 = arith.constant 0 : i32
    %c0_i32_1 = arith.constant 0 : i32
    return %c0_i32, %c0_i32_0 : i32, i32
  }
  func.func @transform_2(%arg0: i32, %arg1: i32) -> (i32, i32) {
    %c0_i32 = arith.constant 0 : i32
    %c0_i32_0 = arith.constant 0 : i32
    %c0_i32_1 = arith.constant 0 : i32
    return %c0_i32, %c0_i32_0 : i32, i32
  }
  func.func @transform_3(%arg0: i32, %arg1: i32) -> (i32, i32) {
    %c0_i32 = arith.constant 0 : i32
    %c0_i32_0 = arith.constant 0 : i32
    %c0_i32_1 = arith.constant 0 : i32
    return %c0_i32, %c0_i32_0 : i32, i32
  }
  func.func @transform_4(%arg0: i32, %arg1: i32) -> (i32, i32) {
    %c1_i32 = arith.constant 1 : i32
    %0 = arith.muli %arg0, %c1_i32 : i32
    %1 = arith.addi %0, %arg1 : i32
    %c0_i32 = arith.constant 0 : i32
    %c0_i32_0 = arith.constant 0 : i32
    return %1, %c0_i32 : i32, i32
  }
  func.func @transform_5(%arg0: i32, %arg1: i32) -> (i32, i32) {
    %c0_i32 = arith.constant 0 : i32
    %c0_i32_0 = arith.constant 0 : i32
    return %arg0, %c0_i32 : i32, i32
  }
  func.func @transform_6(%arg0: i32, %arg1: i32) -> (i32, i32) {
    %c0_i32 = arith.constant 0 : i32
    %c0_i32_0 = arith.constant 0 : i32
    return %arg0, %c0_i32 : i32, i32
  }
}

module attributes {stable_mosaic.version = 11 : i64} {
  func.func @_bn_add_relu_kernel(%arg0: i32, %arg1: memref<256x128xbf16, #tpu.memory_space<vmem>>, %arg2: memref<256x128xbf16, #tpu.memory_space<vmem>>, %arg3: memref<1x128xf32, #tpu.memory_space<vmem>>, %arg4: memref<1x128xf32, #tpu.memory_space<vmem>>, %arg5: memref<256x128xbf16, #tpu.memory_space<vmem>>) attributes {dimension_semantics = [#tpu.dimension_semantics<parallel>], iteration_bounds = array<i64: 2>, scalar_prefetch = 0 : i64, scratch_operands = 0 : i64, tpu.core_type = #tpu.core_type<tc>, window_params = [{transform_indices = @transform_0, window_bounds = array<i64: 256, 128>}, {transform_indices = @transform_1, window_bounds = array<i64: 256, 128>}, {pipeline_mode = #tpu.pipeline_mode<synchronous>, transform_indices = @transform_2, window_bounds = array<i64: 1, 128>}, {pipeline_mode = #tpu.pipeline_mode<synchronous>, transform_indices = @transform_3, window_bounds = array<i64: 1, 128>}, {transform_indices = @transform_4, window_bounds = array<i64: 256, 128>}]} {
    %c0 = arith.constant 0 : index
    %c0_0 = arith.constant 0 : index
    %0 = vector.load %arg1[%c0, %c0_0] : memref<256x128xbf16, #tpu.memory_space<vmem>>, vector<256x128xbf16>
    %1 = arith.extf %0 : vector<256x128xbf16> to vector<256x128xf32>
    %c0_1 = arith.constant 0 : index
    %c0_2 = arith.constant 0 : index
    %2 = vector.load %arg3[%c0_1, %c0_2] : memref<1x128xf32, #tpu.memory_space<vmem>>, vector<1x128xf32>
    %3 = vector.broadcast %2 : vector<1x128xf32> to vector<256x128xf32>
    %4 = arith.mulf %1, %3 : vector<256x128xf32>
    %c0_3 = arith.constant 0 : index
    %c0_4 = arith.constant 0 : index
    %5 = vector.load %arg4[%c0_3, %c0_4] : memref<1x128xf32, #tpu.memory_space<vmem>>, vector<1x128xf32>
    %6 = vector.broadcast %5 : vector<1x128xf32> to vector<256x128xf32>
    %7 = arith.addf %4, %6 : vector<256x128xf32>
    %c0_5 = arith.constant 0 : index
    %c0_6 = arith.constant 0 : index
    %8 = vector.load %arg2[%c0_5, %c0_6] : memref<256x128xbf16, #tpu.memory_space<vmem>>, vector<256x128xbf16>
    %9 = arith.extf %8 : vector<256x128xbf16> to vector<256x128xf32>
    %10 = arith.addf %7, %9 : vector<256x128xf32>
    %cst = arith.constant 0.000000e+00 : f32
    %11 = vector.broadcast %cst : f32 to vector<256x128xf32>
    %12 = arith.maximumf %10, %11 : vector<256x128xf32>
    %13 = arith.truncf %12 : vector<256x128xf32> to vector<256x128xbf16>
    %c0_7 = arith.constant 0 : index
    %c0_8 = arith.constant 0 : index
    %14 = vector.load %arg5[%c0_7, %c0_8] : memref<256x128xbf16, #tpu.memory_space<vmem>>, vector<256x128xbf16>
    tpu.vector_store %arg5[%c0_7, %c0_8], %13 {strides = array<i32>} : memref<256x128xbf16, #tpu.memory_space<vmem>>, vector<256x128xbf16>,
    return
  }
  func.func @transform_0(%arg0: i32) -> (i32, i32) {
    %c0_i32 = arith.constant 0 : i32
    %c0_i32_0 = arith.constant 0 : i32
    return %arg0, %c0_i32 : i32, i32
  }
  func.func @transform_1(%arg0: i32) -> (i32, i32) {
    %c0_i32 = arith.constant 0 : i32
    %c0_i32_0 = arith.constant 0 : i32
    return %arg0, %c0_i32 : i32, i32
  }
  func.func @transform_2(%arg0: i32) -> (i32, i32) {
    %c0_i32 = arith.constant 0 : i32
    %c0_i32_0 = arith.constant 0 : i32
    %c0_i32_1 = arith.constant 0 : i32
    return %c0_i32, %c0_i32_0 : i32, i32
  }
  func.func @transform_3(%arg0: i32) -> (i32, i32) {
    %c0_i32 = arith.constant 0 : i32
    %c0_i32_0 = arith.constant 0 : i32
    %c0_i32_1 = arith.constant 0 : i32
    return %c0_i32, %c0_i32_0 : i32, i32
  }
  func.func @transform_4(%arg0: i32) -> (i32, i32) {
    %c0_i32 = arith.constant 0 : i32
    %c0_i32_0 = arith.constant 0 : i32
    return %arg0, %c0_i32 : i32, i32
  }
}

</mosaic_0001>

<bundles_post_ra>
// kernel: bottleneck_forward.4
= control target key start
LH: loop header
LB: loop body
LE: loop exit
PB: predicated region body
PF: predicated region fallthrough
CT: control target
= control target key end

     0   :  { %s1390_s15 = smov 0   ;;  %s1392_s16 = smov 0   ;;  %s1591_s0 = inlined_call_operand.vmem [shape: bf16[512,128], index: 0, kind: input, shape index: {}]   ;;  %s1592_s1 = inlined_call_operand.vmem [shape: bf16[128,128], index: 1, kind: input, shape index: {}]   ;;  %s1593_s2 = inlined_call_operand.vmem [shape: bf16[512,128], index: 2, kind: output, shape index: {0}]   ;;  %s1594_s3 = inlined_call_operand.vmem [shape: f32[16,128], index: 3, kind: output, shape index: {1}]   ;;  %s1595_s4 = inlined_call_operand.vmem [shape: f32[16,128], index: 4, kind: output, shape index: {2}]  }
   0x1   :  { %s1394_s17 = smov 0  }
   0x2 LB: > { %s27_s18 = sadd.s32 1, %s1359_s16  ;;  %p1012_p0 = scmp.ge.s32.totalorder %s1363_s17, 1  ;;  %s1363_s17 = sphi %s1394_s17, %s15_s17   ;;  %s1359_s16 = sphi %s1392_s16, %s1597_s16   ;;  %s1355_s15 = sphi %s1390_s15, %s1596_s15  }
   0x3   : > { %p29_p1 = scmp.ge.s32.totalorder %s27_s18, 2  ;;  %p186_p2 = scmp.lt.s32.totalorder %s1363_s17, 3 }
   0x5   : > { %s1599_s18 = smov (%p29_p1, %s27_s18), 0  ;;  %p187_p3 = pnand %p1012_p0, %p186_p2 }
   0x6   : > { %s1013_s21 = sshll.u32 (!%p187_p3), %s1355_s15, 5  ;;  %p238_p5 = scmp.lt.s32.totalorder (!%p187_p3), %s1355_s15, 1 }
   0x7   : > { %190 = sbr.rel (%p187_p3) target bundleno = 321 (0x141), region = 28  ;;  %p224_p4 = scmp.lt.s32.totalorder (!%p187_p3), %s1013_s21, 63 }
   0xc   : > { %v1317_v0 = vld [vmem:[%s1592_s1 + $0x38] sm:$0xff]   ;;  %v1318_v1 = vld [vmem:[%s1592_s1 + $0x30] sm:$0xff]   ;;  %s1601_s21 = smov (!%p224_p4, %s1013_s21), 63  ;;  %v1319_v2 = vld [vmem:[%s1592_s1 + $0x28] sm:$0xff]   ;;  %s1603_s15 = smov (!%p238_p5, %s1355_s15), 1 }
   0xd   : > { %1228 = vmatprep.subr.bf16.mxu0 %v1317_v0  ;;  %1276 = vmatprep.subr.bf16.mxu1 %v1317_v0  ;;  %s1014_s26 = sshll.u32 %s1601_s21, 2  ;;  %v1320_v3 = vld [vmem:[%s1592_s1 + $0x20] sm:$0xff]   ;;  %v1321_v5 = vld [vmem:[%s1592_s1 + $0x18] sm:$0xff]   ;;  %v1322_v6 = vld [vmem:[%s1592_s1 + $0x10] sm:$0xff]   ;;  %s1017_s21 = sshll.u32 %s1603_s15, 3 }
   0xe   : > { %1229 = vmatpush3.bf16.msra.mxu0 %v1317_v0  ;;  %1284 = vmatpush3.bf16.msra.mxu1 %v1317_v0  ;;  %s1428_s29 = scalar_lea.vmem %s1591_s0, %s1014_s26  ;;  %v1323_v8 = vld [vmem:[%s1592_s1 + $0x8] sm:$0xff]   ;;  %v1324_v9 = vld [vmem:[%s1592_s1] sm:$0xff]   ;;  %s1470_s20 = scalar_lea.vmem %s1593_s2, %s1014_s26 }
   0xf   : > { %1230 = vmatprep.subr.bf16.mxu0 %v1318_v1  ;;  %1277 = vmatprep.subr.bf16.mxu1 %v1318_v1  ;;  %v1325_v4 = vld [vmem:[%s1428_s29] sm:$0xff]   ;;  %v1326_v10 = vld [vmem:[%s1428_s29 + $0x8] sm:$0xff]   ;;  %v1327_v12 = vld [vmem:[%s1428_s29 + $0x10] sm:$0xff]   ;;  %s241_s24 = scalar_lea.vmem %s1594_s3, %s1017_s21  ;;  %s245_s27 = scalar_lea.vmem %s1595_s4, %s1017_s21 }
  0x10   : > { %1244 = vmatprep.mubr.bf16.mxu0 %v1325_v4  ;;  %v1333_v7 = vld [vmem:[%s1428_s29 + $0x40] sm:$0xff]   ;;  %v1334_v11 = vld [vmem:[%s1428_s29 + $0x48] sm:$0xff]   ;;  %v1335_v13 = vld [vmem:[%s1428_s29 + $0x50] sm:$0xff]  }
  0x11   : > { %1260 = vmatprep.mubr.bf16.mxu1 %v1333_v7  ;;  %v1328_v14 = vld [vmem:[%s1428_s29 + $0x18] sm:$0xff]   ;;  %v1329_v16 = vld [vmem:[%s1428_s29 + $0x20] sm:$0xff]   ;;  %v1330_v18 = vld [vmem:[%s1428_s29 + $0x28] sm:$0xff]  }
  0x12   : > { %1231 = vmatpush3.bf16.msra.mxu0 %v1318_v1  ;;  %1285 = vmatpush3.bf16.msra.mxu1 %v1318_v1  ;;  %v1336_v15 = vld [vmem:[%s1428_s29 + $0x58] sm:$0xff]   ;;  %v1337_v17 = vld [vmem:[%s1428_s29 + $0x60] sm:$0xff]   ;;  %v1338_v19 = vld [vmem:[%s1428_s29 + $0x68] sm:$0xff]  }
  0x13   : > { %1232 = vmatprep.subr.bf16.mxu0 %v1319_v2  ;;  %1278 = vmatprep.subr.bf16.mxu1 %v1319_v2  ;;  %v1331_v20 = vld [vmem:[%s1428_s29 + $0x30] sm:$0xff]   ;;  %v1332_v22 = vld [vmem:[%s1428_s29 + $0x38] sm:$0xff]  }
  0x14   : > { %v1339_v21 = vld [vmem:[%s1428_s29 + $0x70] sm:$0xff]   ;;  %v1340_v23 = vld [vmem:[%s1428_s29 + $0x78] sm:$0xff]  }
  0x16   : > { %1233 = vmatpush3.bf16.msra.mxu0 %v1319_v2  ;;  %1286 = vmatpush3.bf16.msra.mxu1 %v1319_v2 }
  0x17   : > { %1234 = vmatprep.subr.bf16.mxu0 %v1320_v3  ;;  %1279 = vmatprep.subr.bf16.mxu1 %v1320_v3 }
  0x1a   : > { %1235 = vmatpush3.bf16.msra.mxu0 %v1320_v3  ;;  %1287 = vmatpush3.bf16.msra.mxu1 %v1320_v3 }
  0x1b   : > { %1236 = vmatprep.subr.bf16.mxu0 %v1321_v5  ;;  %1280 = vmatprep.subr.bf16.mxu1 %v1321_v5 }
  0x1e   : > { %1237 = vmatpush3.bf16.msra.mxu0 %v1321_v5  ;;  %1288 = vmatpush3.bf16.msra.mxu1 %v1321_v5 }
  0x1f   : > { %1238 = vmatprep.subr.bf16.mxu0 %v1322_v6  ;;  %1281 = vmatprep.subr.bf16.mxu1 %v1322_v6 }
  0x22   : > { %1239 = vmatpush3.bf16.msra.mxu0 %v1322_v6  ;;  %1289 = vmatpush3.bf16.msra.mxu1 %v1322_v6 }
  0x23   : > { %1240 = vmatprep.subr.bf16.mxu0 %v1323_v8  ;;  %1282 = vmatprep.subr.bf16.mxu1 %v1323_v8 }
  0x26   : > { %1241 = vmatpush3.bf16.msra.mxu0 %v1323_v8  ;;  %1290 = vmatpush3.bf16.msra.mxu1 %v1323_v8 }
  0x27   : > { %1242 = vmatprep.subr.bf16.mxu0 %v1324_v9  ;;  %1283 = vmatprep.subr.bf16.mxu1 %v1324_v9 }
  0x2a   : > { %1243 = vmatpush3.bf16.msra.mxu0 %v1324_v9  ;;  %1291 = vmatpush3.bf16.msra.mxu1 %v1324_v9 }
  0x2d   : > { %1245 = vmatmul.mubr.bf16.vlgmr.msra.gmra.mxu0 %v1326_v10  ;;  %1261 = vmatmul.mubr.bf16.vlgmr.msra.gmra.mxu1 %v1334_v11 }
  0x2e   : > { %1248 = vmatprep.mubr.bf16.mxu0 %v1327_v12  ;;  %1264 = vmatprep.mubr.bf16.mxu1 %v1335_v13 }
  0x35   : > { %1249 = vmatmul.mubr.bf16.gmra.mxu0 %v1328_v14  ;;  %1265 = vmatmul.mubr.bf16.gmra.mxu1 %v1336_v15 }
  0x36   : > { %1252 = vmatprep.mubr.bf16.mxu0 %v1329_v16  ;;  %1268 = vmatprep.mubr.bf16.mxu1 %v1337_v17 }
  0x3d   : > { %1253 = vmatmul.mubr.bf16.gmra.mxu0 %v1330_v18  ;;  %1269 = vmatmul.mubr.bf16.gmra.mxu1 %v1338_v19 }
  0x3e   : > { %1256 = vmatprep.mubr.bf16.mxu0 %v1331_v20  ;;  %1272 = vmatprep.mubr.bf16.mxu1 %v1339_v21 }
  0x45   : > { %1257 = vmatmul.mubr.bf16.gmra.mxu0 %v1332_v22  ;;  %1273 = vmatmul.mubr.bf16.gmra.mxu1 %v1340_v23 }
  0xed   : > { %v1246_v24 = vpop.f32.mrf.mxu0  ;;  %v1461_v25 = vpop.f32.mrf.mxu1 }
  0xee   : > { %v809_v41 = vmul.f32 %v1246_v24, %v1246_v24 }
  0xef   : > { %v479_v26 = vpop.f32.mrf.mxu0  ;;  %v1463_v27 = vpop.f32.mrf.mxu1 }
  0xf0   : > { %v807_v32 = vmul.f32 %v479_v26, %v479_v26 }
  0xf1   : > { %v1247_v28 = vpop.f32.mrf.mxu0  ;;  %v1472_v29 = vpop.f32.mrf.mxu1 }
  0xf2   : > { %v1117_v30 = vpack.c.bf16 %v1247_v28, %v1246_v24  ;;  %v1157_v31 = vpack.c.bf16 %v1472_v29, %v1461_v25  ;;  %v810_v46 = vmul.f32 %v1247_v28, %v1247_v28 }
  0xf3   : > { %v482_v33 = vpop.f32.mrf.mxu0  ;;  %v1476_v34 = vpop.f32.mrf.mxu1 }
  0xf4   : > { %1189 = vst [vmem:[%s1470_s20 + $0x8] sm:$0xff] %v1117_v30   ;;  %v1112_v35 = vpack.c.bf16 %v482_v33, %v479_v26  ;;  %v767_v36 = vadd.f32 %v482_v33, %v479_v26  ;;  %v808_v37 = vmul.f32 %v482_v33, %v482_v33  ;;  %1197 = vst [vmem:[%s1470_s20 + $0x48] sm:$0xff] %v1157_v31  }
  0xf5   : > { %v1152_v38 = vpack.c.bf16 %v1476_v34, %v1463_v27  ;;  %v1250_v39 = vpop.f32.mrf.mxu0  ;;  %v1482_v40 = vpop.f32.mrf.mxu1 }
  0xf6   : > { %1113 = vst [vmem:[%s1470_s20] sm:$0xff] %v1112_v35   ;;  %v768_v42 = vadd.f32 %v1246_v24, %v767_v36  ;;  %v839_v43 = vadd.f32 %v808_v37, %v807_v32  ;;  %v813_v1 = vmul.f32 %v1250_v39, %v1250_v39 }
  0xf7   : > { %1196 = vst [vmem:[%s1470_s20 + $0x40] sm:$0xff] %v1152_v38   ;;  %v495_v44 = vpop.f32.mrf.mxu0  ;;  %v1486_v45 = vpop.f32.mrf.mxu1 }
  0xf8   : > { %v840_v47 = vadd.f32 %v839_v43, %v809_v41  ;;  %v769_v48 = vadd.f32 %v1247_v28, %v768_v42  ;;  %v811_v52 = vmul.f32 %v495_v44, %v495_v44 }
  0xf9   : > { %v1251_v49 = vpop.f32.mrf.mxu0  ;;  %v1488_v50 = vpop.f32.mrf.mxu1 }
  0xfa   : > { %v770_v51 = vadd.f32 %v769_v48, %v495_v44  ;;  %v841_v53 = vadd.f32 %v840_v47, %v810_v46  ;;  %v1127_v54 = vpack.c.bf16 %v1251_v49, %v1250_v39  ;;  %v1167_v56 = vpack.c.bf16 %v1488_v50, %v1482_v40 }
  0xfb   : > { %v498_v55 = vpop.f32.mrf.mxu0  ;;  %v1492_v57 = vpop.f32.mrf.mxu1  ;;  %v814_v6 = vmul.f32 %v1251_v49, %v1251_v49 }
  0xfc   : > { %v842_v58 = vadd.f32 %v841_v53, %v811_v52  ;;  %1191 = vst [vmem:[%s1470_s20 + $0x18] sm:$0xff] %v1127_v54   ;;  %v1122_v59 = vpack.c.bf16 %v498_v55, %v495_v44  ;;  %v771_v60 = vadd.f32 %v770_v51, %v498_v55  ;;  %v812_v61 = vmul.f32 %v498_v55, %v498_v55 }
  0xfd   : > { %v1254_v62 = vpop.f32.mrf.mxu0  ;;  %1199 = vst [vmem:[%s1470_s20 + $0x58] sm:$0xff] %v1167_v56   ;;  %v1162_v63 = vpack.c.bf16 %v1492_v57, %v1486_v45  ;;  %v1498_v0 = vpop.f32.mrf.mxu1 }
  0xfe   : > { %1190 = vst [vmem:[%s1470_s20 + $0x10] sm:$0xff] %v1122_v59   ;;  %v772_v2 = vadd.f32 %v1250_v39, %v771_v60  ;;  %v843_v3 = vadd.f32 %v842_v58, %v812_v61  ;;  %v817_v26 = vmul.f32 %v1254_v62, %v1254_v62  ;;  %v823_v61 = vmul.f32 %v1463_v27, %v1463_v27 }
  0xff   : > { %v511_v4 = vpop.f32.mrf.mxu0  ;;  %1198 = vst [vmem:[%s1470_s20 + $0x50] sm:$0xff] %v1162_v63   ;;  %v1502_v5 = vpop.f32.mrf.mxu1 }
 0x100   : > { %v844_v7 = vadd.f32 %v843_v3, %v813_v1  ;;  %v773_v8 = vadd.f32 %v1251_v49, %v772_v2  ;;  %v815_v12 = vmul.f32 %v511_v4, %v511_v4  ;;  %v824_v2 = vmul.f32 %v1476_v34, %v1476_v34 }
 0x101   : > { %v1255_v9 = vpop.f32.mrf.mxu0  ;;  %v1504_v10 = vpop.f32.mrf.mxu1 }
 0x102   : > { %v774_v11 = vadd.f32 %v773_v8, %v511_v4  ;;  %v845_v13 = vadd.f32 %v844_v7, %v814_v6  ;;  %v1137_v14 = vpack.c.bf16 %v1255_v9, %v1254_v62  ;;  %v1177_v16 = vpack.c.bf16 %v1504_v10, %v1498_v0 }
 0x103   : > { %v514_v15 = vpop.f32.mrf.mxu0  ;;  %v1508_v17 = vpop.f32.mrf.mxu1  ;;  %v818_v33 = vmul.f32 %v1255_v9, %v1255_v9  ;;  %v826_v8 = vmul.f32 %v1472_v29, %v1472_v29 }
 0x104   : > { %v846_v18 = vadd.f32 %v845_v13, %v815_v12  ;;  %1193 = vst [vmem:[%s1470_s20 + $0x28] sm:$0xff] %v1137_v14   ;;  %v1132_v19 = vpack.c.bf16 %v514_v15, %v511_v4  ;;  %v775_v20 = vadd.f32 %v774_v11, %v514_v15  ;;  %v816_v21 = vmul.f32 %v514_v15, %v514_v15 }
 0x105   : > { %v1258_v22 = vpop.f32.mrf.mxu0  ;;  %1201 = vst [vmem:[%s1470_s20 + $0x68] sm:$0xff] %v1177_v16   ;;  %v1172_v23 = vpack.c.bf16 %v1508_v17, %v1502_v5  ;;  %v1514_v24 = vpop.f32.mrf.mxu1  ;;  %v825_v4 = vmul.f32 %v1461_v25, %v1461_v25  ;;  %v827_v12 = vmul.f32 %v1486_v45, %v1486_v45  ;;  %v828_v15 = vmul.f32 %v1492_v57, %v1492_v57 }
 0x106   : > { %1192 = vst [vmem:[%s1470_s20 + $0x20] sm:$0xff] %v1132_v19   ;;  %v776_v28 = vadd.f32 %v1254_v62, %v775_v20  ;;  %v847_v30 = vadd.f32 %v846_v18, %v816_v21  ;;  %v821_v54 = vmul.f32 %v1258_v22, %v1258_v22  ;;  %v831_v21 = vmul.f32 %v1502_v5, %v1502_v5 }
 0x107   : > { %v527_v31 = vpop.f32.mrf.mxu0  ;;  %1200 = vst [vmem:[%s1470_s20 + $0x60] sm:$0xff] %v1172_v23   ;;  %v1518_v32 = vpop.f32.mrf.mxu1 }
 0x108   : > { %v848_v35 = vadd.f32 %v847_v30, %v817_v26  ;;  %v777_v36 = vadd.f32 %v1255_v9, %v776_v28  ;;  %v819_v41 = vmul.f32 %v527_v31, %v527_v31  ;;  %v832_v26 = vmul.f32 %v1508_v17, %v1508_v17 }
 0x109   : > { %v1259_v37 = vpop.f32.mrf.mxu0  ;;  %v1520_v38 = vpop.f32.mrf.mxu1 }
 0x10a   : > { %v778_v39 = vadd.f32 %v777_v36, %v527_v31  ;;  %v849_v42 = vadd.f32 %v848_v35, %v818_v33  ;;  %v1147_v43 = vpack.c.bf16 %v1259_v37, %v1258_v22  ;;  %v1187_v46 = vpack.c.bf16 %v1520_v38, %v1514_v24 }
 0x10b   : > { %v530_v44 = vpop.f32.mrf.mxu0  ;;  %v594_v47 = vpop.f32.mrf.mxu1  ;;  %v822_v58 = vmul.f32 %v1259_v37, %v1259_v37  ;;  %v835_v35 = vmul.f32 %v1518_v32, %v1518_v32 }
 0x10c   : > { %v850_v48 = vadd.f32 %v849_v42, %v819_v41  ;;  %1195 = vst [vmem:[%s1470_s20 + $0x38] sm:$0xff] %v1147_v43   ;;  %v1142_v49 = vpack.c.bf16 %v530_v44, %v527_v31  ;;  %v779_v51 = vadd.f32 %v778_v39, %v530_v44  ;;  %v820_v52 = vmul.f32 %v530_v44, %v530_v44 }
 0x10d   : > { %1203 = vst [vmem:[%s1470_s20 + $0x78] sm:$0xff] %v1187_v46   ;;  %v1182_v53 = vpack.c.bf16 %v594_v47, %v1518_v32  ;;  %v836_v39 = vmul.f32 %v594_v47, %v594_v47  ;;  %v838_v43 = vmul.f32 %v1520_v38, %v1520_v38 }
 0x10e   : > { %1194 = vst [vmem:[%s1470_s20 + $0x30] sm:$0xff] %v1142_v49   ;;  %v780_v55 = vadd.f32 %v1258_v22, %v779_v51  ;;  %v851_v56 = vadd.f32 %v850_v48, %v820_v52 }
 0x10f   : > { %1202 = vst [vmem:[%s1470_s20 + $0x70] sm:$0xff] %v1182_v53  }
 0x110   : > { %v781_v59 = vadd.f32 %v1259_v37, %v780_v55  ;;  %v852_v60 = vadd.f32 %v851_v56, %v821_v54 }
 0x112   : > { %v853_v62 = vadd.f32 %v852_v60, %v822_v58  ;;  %v782_v63 = vadd.f32 %v781_v59, %v1463_v27 }
 0x114   : > { %v783_v1 = vadd.f32 %v782_v63, %v1476_v34  ;;  %v854_v3 = vadd.f32 %v853_v62, %v823_v61 }
 0x116   : > { %v784_v6 = vadd.f32 %v1461_v25, %v783_v1  ;;  %v855_v7 = vadd.f32 %v854_v3, %v824_v2  ;;  %v829_v25 = vmul.f32 %v1482_v40, %v1482_v40 }
 0x118   : > { %v856_v9 = vadd.f32 %v855_v7, %v825_v4  ;;  %v785_v11 = vadd.f32 %v1472_v29, %v784_v6  ;;  %v830_v29 = vmul.f32 %v1488_v50, %v1488_v50 }
 0x11a   : > { %v786_v27 = vadd.f32 %v785_v11, %v1486_v45  ;;  %v857_v13 = vadd.f32 %v856_v9, %v826_v8 }
 0x11c   : > { %v858_v34 = vadd.f32 %v857_v13, %v827_v12  ;;  %v787_v14 = vadd.f32 %v786_v27, %v1492_v57 }
 0x11e   : > { %v788_v16 = vadd.f32 %v1482_v40, %v787_v14  ;;  %v859_v18 = vadd.f32 %v858_v34, %v828_v15  ;;  %v833_v40 = vmul.f32 %v1498_v0, %v1498_v0 }
 0x120   : > { %v860_v19 = vadd.f32 %v859_v18, %v829_v25  ;;  %v789_v20 = vadd.f32 %v1488_v50, %v788_v16  ;;  %v834_v50 = vmul.f32 %v1504_v10, %v1504_v10 }
 0x122   : > { %v790_v45 = vadd.f32 %v789_v20, %v1502_v5  ;;  %v861_v22 = vadd.f32 %v860_v19, %v830_v29 }
 0x124   : > { %v862_v23 = vadd.f32 %v861_v22, %v831_v21  ;;  %v791_v57 = vadd.f32 %v790_v45, %v1508_v17 }
 0x126   : > { %v792_v28 = vadd.f32 %v1498_v0, %v791_v57  ;;  %v863_v30 = vadd.f32 %v862_v23, %v832_v26  ;;  %v837_v0 = vmul.f32 %v1514_v24, %v1514_v24 }
 0x128   : > { %v864_v31 = vadd.f32 %v863_v30, %v833_v40  ;;  %v793_v5 = vadd.f32 %v1504_v10, %v792_v28 }
 0x12a   : > { %v794_v33 = vadd.f32 %v793_v5, %v1518_v32  ;;  %v865_v17 = vadd.f32 %v864_v31, %v834_v50 }
 0x12c   : > { %v866_v36 = vadd.f32 %v865_v17, %v835_v35  ;;  %v795_v37 = vadd.f32 %v794_v33, %v594_v47 }
 0x12e   : > { %v796_v41 = vadd.f32 %v1514_v24, %v795_v37  ;;  %v867_v42 = vadd.f32 %v866_v36, %v836_v39 }
 0x130   : > { %v797_v10 = vadd.f32 %v1520_v38, %v796_v41  ;;  %v868_v44 = vadd.f32 %v867_v42, %v837_v0 }
 0x132   : > { %v798_v46 = vrot.slane %v797_v10, 4  ;;  %v869_v32 = vadd.f32 %v868_v44, %v838_v43 }
 0x134   : > { %v799_v48 = vadd.f32 %v798_v46, %v797_v10  ;;  %v870_v49 = vrot.slane %v869_v32, 4 }
 0x136   : > { %v800_v51 = vrot.slane %v799_v48, 2  ;;  %v871_v47 = vadd.f32 %v870_v49, %v869_v32 }
 0x138   : > { %v801_v52 = vadd.f32 %v800_v51, %v799_v48  ;;  %v872_v53 = vrot.slane %v871_v47, 2 }
 0x13a   : > { %v802_v54 = vrot.slane %v801_v52, 1  ;;  %v873_v24 = vadd.f32 %v872_v53, %v871_v47 }
 0x13c   : > { %v803_v55 = vadd.f32 %v802_v54, %v801_v52  ;;  %v874_v56 = vrot.slane %v873_v24, 1 }
 0x13e   : > { %v875_v38 = vadd.f32 %v874_v56, %v873_v24  ;;  %805 = vst [vmem:[%s241_s24] sm:$0xff] %v803_v55 }
 0x140   : > { %877 = vst [vmem:[%s245_s27] sm:$0xff] %v875_v38 }
 0x141 PF: > { %s15_s17 = sadd.s32 1, %s1363_s17   ;;  %s1596_s15 = smov %s1359_s16 }
 0x142   : > { %p12_p6 = scmp.ge.s32.totalorder %s15_s17, 4   ;;  %s1597_s16 = smov %s1599_s18 }
 0x144   :  { %14 = sbr.rel (!%p12_p6) target bundleno = 2 (0x2), region = 86 }

// kernel: bottleneck_forward.6
= control target key start
LH: loop header
LB: loop body
LE: loop exit
PB: predicated region body
PF: predicated region fallthrough
CT: control target
= control target key end

     0   :  { %s1565_s21 = smov 0   ;;  %s1567_s22 = smov 0   ;;  %s1858_s0 = inlined_call_operand.vmem [shape: bf16[512,128], index: 0, kind: input, shape index: {}]   ;;  %s1859_s1 = inlined_call_operand.vmem [shape: f32[1,128], index: 1, kind: input, shape index: {}]   ;;  %s1860_s2 = inlined_call_operand.vmem [shape: f32[1,128], index: 2, kind: input, shape index: {}]   ;;  %s1861_s3 = inlined_call_operand.vmem [shape: bf16[128,128], index: 3, kind: input, shape index: {}]   ;;  %s1862_s4 = inlined_call_operand.vmem [shape: bf16[512,128], index: 4, kind: output, shape index: {0}]   ;;  %s1863_s5 = inlined_call_operand.vmem [shape: f32[16,128], index: 5, kind: output, shape index: {1}]   ;;  %s1864_s6 = inlined_call_operand.vmem [shape: f32[16,128], index: 6, kind: output, shape index: {2}]  }
   0x1   :  { %s1569_s23 = smov 0  }
   0x2 LB: > { %s29_s24 = sadd.s32 1, %s1524_s22  ;;  %p1128_p0 = scmp.ge.s32.totalorder %s1528_s23, 1  ;;  %s1528_s23 = sphi %s1569_s23, %s17_s23   ;;  %s1524_s22 = sphi %s1567_s22, %s1866_s22   ;;  %s1520_s21 = sphi %s1565_s21, %s1865_s21  }
   0x3   : > { %p31_p1 = scmp.ge.s32.totalorder %s29_s24, 2  ;;  %p236_p2 = scmp.lt.s32.totalorder %s1528_s23, 3 }
   0x5   : > { %s1868_s24 = smov (%p31_p1, %s29_s24), 0  ;;  %p237_p3 = pnand %p1128_p0, %p236_p2 }
   0x6   : > { %s1129_s27 = sshll.u32 (!%p237_p3), %s1520_s21, 5  ;;  %p292_p5 = scmp.lt.s32.totalorder (!%p237_p3), %s1520_s21, 1 }
   0x7   : > { %240 = sbr.rel (%p237_p3) target bundleno = 321 (0x141), region = 36  ;;  %p278_p4 = scmp.lt.s32.totalorder (!%p237_p3), %s1129_s27, 63 }
   0xc   : > { %v1498_v0 = vld [vmem:[%s1861_s3 + $0x38] sm:$0xff]   ;;  %v1499_v1 = vld [vmem:[%s1861_s3 + $0x30] sm:$0xff]   ;;  %s1870_s27 = smov (!%p278_p4, %s1129_s27), 63  ;;  %v1500_v2 = vld [vmem:[%s1861_s3 + $0x28] sm:$0xff]   ;;  %s1872_s21 = smov (!%p292_p5, %s1520_s21), 1 }
   0xd   : > { %1409 = vmatprep.subr.bf16.mxu0 %v1498_v0  ;;  %1457 = vmatprep.subr.bf16.mxu1 %v1498_v0  ;;  %s1130_s8 = sshll.u32 %s1870_s27, 2  ;;  %v1501_v3 = vld [vmem:[%s1861_s3 + $0x20] sm:$0xff]   ;;  %v1502_v21 = vld [vmem:[%s1861_s3 + $0x18] sm:$0xff]   ;;  %v1503_v35 = vld [vmem:[%s1861_s3 + $0x10] sm:$0xff]   ;;  %s1133_s27 = sshll.u32 %s1872_s21, 3 }
   0xe   : > { %1410 = vmatpush3.bf16.msra.mxu0 %v1498_v0  ;;  %1465 = vmatpush3.bf16.msra.mxu1 %v1498_v0  ;;  %s1603_s11 = scalar_lea.vmem %s1858_s0, %s1130_s8  ;;  %v1612_v5 = vld [vmem:[%s1859_s1] ss:$0 sm:$0xff]  ;;  %v1504_v50 = vld [vmem:[%s1861_s3 + $0x8] sm:$0xff]   ;;  %s1753_s10 = scalar_lea.vmem %s1862_s4, %s1130_s8 }
   0xf   : > { %1411 = vmatprep.subr.bf16.mxu0 %v1499_v1  ;;  %1458 = vmatprep.subr.bf16.mxu1 %v1499_v1  ;;  %v1212_v4 = vld [vmem:[%s1603_s11] sm:$0xff]   ;;  %v1355_v8 = vld [vmem:[%s1603_s11 + $0x8] sm:$0xff]   ;;  %v1356_v9 = vld [vmem:[%s1603_s11 + $0x10] sm:$0xff]   ;;  %s295_s12 = scalar_lea.vmem %s1863_s5, %s1133_s27  ;;  %s299_s15 = scalar_lea.vmem %s1864_s6, %s1133_s27 }
  0x10   : > { %v1213_v6 = vunpack.c.l.bf16 %v1212_v4  ;;  %v1214_v7 = vunpack.c.h.bf16 %v1212_v4  ;;  %v1357_v10 = vld [vmem:[%s1603_s11 + $0x18] sm:$0xff]   ;;  %v1620_v11 = vld [vmem:[%s1860_s2] ss:$0 sm:$0xff]  ;;  %v1217_v12 = vunpack.c.l.bf16 %v1355_v8  ;;  %v1218_v13 = vunpack.c.h.bf16 %v1355_v8  ;;  %v1359_v34 = vld [vmem:[%s1603_s11 + $0x28] sm:$0xff]  }
  0x11   : > { %v1221_v14 = vunpack.c.l.bf16 %v1356_v9  ;;  %v1222_v15 = vunpack.c.h.bf16 %v1356_v9  ;;  %v1225_v18 = vunpack.c.l.bf16 %v1357_v10  ;;  %v1226_v19 = vunpack.c.h.bf16 %v1357_v10  ;;  %v1358_v20 = vld [vmem:[%s1603_s11 + $0x20] sm:$0xff]   ;;  %v1360_v39 = vld [vmem:[%s1603_s11 + $0x30] sm:$0xff]   ;;  %v1657_v59 = vld [vmem:[%s1603_s11 + $0x38] sm:$0xff]  }
  0x12   : > { %1412 = vmatpush3.bf16.msra.mxu0 %v1499_v1  ;;  %1466 = vmatpush3.bf16.msra.mxu1 %v1499_v1  ;;  %v378_v16 = vmul.f32 %v1213_v6, %v1612_v5  ;;  %v379_v17 = vmul.f32 %v1214_v7, %v1612_v5  ;;  %v380_v22 = vmul.f32 %v1217_v12, %v1612_v5  ;;  %v1229_v30 = vunpack.c.l.bf16 %v1358_v20  ;;  %v1362_v60 = vld [vmem:[%s1603_s11 + $0x40] sm:$0xff]   ;;  %v1363_v6 = vld [vmem:[%s1603_s11 + $0x48] sm:$0xff]  }
  0x13   : > { %1413 = vmatprep.subr.bf16.mxu0 %v1500_v2  ;;  %1459 = vmatprep.subr.bf16.mxu1 %v1500_v2  ;;  %v381_v23 = vmul.f32 %v1218_v13, %v1612_v5  ;;  %v382_v24 = vmul.f32 %v1221_v14, %v1612_v5  ;;  %v383_v27 = vmul.f32 %v1222_v15, %v1612_v5  ;;  %v1230_v43 = vunpack.c.h.bf16 %v1358_v20  ;;  %v1505_v0 = vld [vmem:[%s1861_s3] sm:$0xff]  }
  0x14   : > { %v417_v25 = vadd.f32 %v1620_v11, %v378_v16  ;;  %v418_v26 = vadd.f32 %v1620_v11, %v379_v17  ;;  %v384_v28 = vmul.f32 %v1225_v18, %v1612_v5  ;;  %v385_v29 = vmul.f32 %v1226_v19, %v1612_v5  ;;  %v1364_v16 = vld [vmem:[%s1603_s11 + $0x50] sm:$0xff]  }
  0x15   : > { %v419_v33 = vadd.f32 %v1620_v11, %v380_v22  ;;  %v420_v36 = vadd.f32 %v1620_v11, %v381_v23  ;;  %v421_v37 = vadd.f32 %v1620_v11, %v382_v24  ;;  %v422_v38 = vadd.f32 %v1620_v11, %v383_v27 }
  0x16   : > { %1414 = vmatpush3.bf16.msra.mxu0 %v1500_v2  ;;  %1467 = vmatpush3.bf16.msra.mxu1 %v1500_v2  ;;  %v449_v31 = vmax.f32 %v417_v25, 0.0  ;;  %v450_v32 = vmax.f32 %v418_v26, 0.0  ;;  %v423_v41 = vadd.f32 %v1620_v11, %v384_v28  ;;  %v424_v42 = vadd.f32 %v1620_v11, %v385_v29 }
  0x17   : > { %1415 = vmatprep.subr.bf16.mxu0 %v1501_v3  ;;  %1460 = vmatprep.subr.bf16.mxu1 %v1501_v3  ;;  %v386_v44 = vmul.f32 %v1229_v30, %v1612_v5  ;;  %v1233_v45 = vunpack.c.l.bf16 %v1359_v34  ;;  %v451_v46 = vmax.f32 %v419_v33, 0.0  ;;  %v387_v47 = vmul.f32 %v1230_v43, %v1612_v5  ;;  %v1366_v30 = vld [vmem:[%s1603_s11 + $0x60] sm:$0xff]  }
  0x18   : > { %v481_v40 = vpack.c.bf16 %v450_v32, %v449_v31  ;;  %v1234_v48 = vunpack.c.h.bf16 %v1359_v34  ;;  %v1237_v49 = vunpack.c.l.bf16 %v1360_v39  ;;  %v452_v51 = vmax.f32 %v420_v36, 0.0 }
  0x19   : > { %v453_v52 = vmax.f32 %v421_v37, 0.0  ;;  %v454_v53 = vmax.f32 %v422_v38, 0.0  ;;  %v388_v54 = vmul.f32 %v1233_v45, %v1612_v5  ;;  %v455_v55 = vmax.f32 %v423_v41, 0.0 }
  0x1a   : > { %1416 = vmatpush3.bf16.msra.mxu0 %v1501_v3  ;;  %1468 = vmatpush3.bf16.msra.mxu1 %v1501_v3  ;;  %v456_v56 = vmax.f32 %v424_v42, 0.0  ;;  %v1654_v57 = vadd.f32 %v1620_v11, %v386_v44  ;;  %v1238_v58 = vunpack.c.h.bf16 %v1360_v39  ;;  %v1661_v61 = vadd.f32 %v1620_v11, %v387_v47  ;;  %v1367_v47 = vld [vmem:[%s1603_s11 + $0x68] sm:$0xff]  }
  0x1b   : > { %1417 = vmatprep.subr.bf16.mxu0 %v1502_v21  ;;  %1461 = vmatprep.subr.bf16.mxu1 %v1502_v21  ;;  %v389_v62 = vmul.f32 %v1234_v48, %v1612_v5  ;;  %v390_v63 = vmul.f32 %v1237_v49, %v1612_v5  ;;  %v482_v1 = vpack.c.bf16 %v452_v51, %v451_v46  ;;  %v1241_v3 = vunpack.c.l.bf16 %v1657_v59 }
  0x1c   : > { %1425 = vmatprep.mubr.bf16.mxu0 %v481_v40  ;;  %v1669_v2 = vadd.f32 %v1620_v11, %v388_v54  ;;  %v1245_v4 = vunpack.c.l.bf16 %v1362_v60  ;;  %v483_v7 = vpack.c.bf16 %v454_v53, %v453_v52  ;;  %v1673_v8 = vpack.c.bf16 %v456_v56, %v455_v55  ;;  %v1368_v52 = vld [vmem:[%s1603_s11 + $0x70] sm:$0xff]  }
  0x1d   : > { %v457_v9 = vmax.f32 %v1654_v57, 0.0  ;;  %v391_v10 = vmul.f32 %v1238_v58, %v1612_v5  ;;  %v458_v12 = vmax.f32 %v1661_v61, 0.0  ;;  %v1242_v13 = vunpack.c.h.bf16 %v1657_v59 }
  0x1e   : > { %1418 = vmatpush3.bf16.msra.mxu0 %v1502_v21  ;;  %1469 = vmatpush3.bf16.msra.mxu1 %v1502_v21  ;;  %v1246_v14 = vunpack.c.h.bf16 %v1362_v60  ;;  %v394_v15 = vmul.f32 %v1245_v4, %v1612_v5  ;;  %v1682_v17 = vadd.f32 %v1620_v11, %v389_v62  ;;  %v1685_v18 = vadd.f32 %v1620_v11, %v390_v63  ;;  %v1365_v21 = vld [vmem:[%s1603_s11 + $0x58] sm:$0xff]  }
  0x1f   : > { %1419 = vmatprep.subr.bf16.mxu0 %v1503_v35  ;;  %1462 = vmatprep.subr.bf16.mxu1 %v1503_v35  ;;  %v1249_v19 = vunpack.c.l.bf16 %v1363_v6  ;;  %v1250_v20 = vunpack.c.h.bf16 %v1363_v6  ;;  %v459_v22 = vmax.f32 %v1669_v2, 0.0  ;;  %v1690_v23 = vmul.f32 %v1241_v3, %v1612_v5  ;;  %v1369_v6 = vld [vmem:[%s1603_s11 + $0x78] sm:$0xff]  }
  0x20   : > { %v395_v24 = vmul.f32 %v1246_v14, %v1612_v5  ;;  %v433_v25 = vadd.f32 %v1620_v11, %v394_v15  ;;  %v1253_v28 = vunpack.c.l.bf16 %v1364_v16  ;;  %v1254_v29 = vunpack.c.h.bf16 %v1364_v16 }
  0x21   : > { %v396_v26 = vmul.f32 %v1249_v19, %v1612_v5  ;;  %v397_v27 = vmul.f32 %v1250_v20, %v1612_v5  ;;  %v1698_v31 = vadd.f32 %v1620_v11, %v391_v10  ;;  %v1257_v34 = vunpack.c.l.bf16 %v1365_v21 }
  0x22   : > { %1420 = vmatpush3.bf16.msra.mxu0 %v1503_v35  ;;  %1470 = vmatpush3.bf16.msra.mxu1 %v1503_v35  ;;  %v434_v32 = vadd.f32 %v1620_v11, %v395_v24  ;;  %v465_v33 = vmax.f32 %v433_v25, 0.0  ;;  %v398_v37 = vmul.f32 %v1253_v28, %v1612_v5  ;;  %v399_v38 = vmul.f32 %v1254_v29, %v1612_v5 }
  0x23   : > { %1421 = vmatprep.subr.bf16.mxu0 %v1504_v50  ;;  %1463 = vmatprep.subr.bf16.mxu1 %v1504_v50  ;;  %v435_v35 = vadd.f32 %v1620_v11, %v396_v26  ;;  %v436_v36 = vadd.f32 %v1620_v11, %v397_v27  ;;  %v1258_v40 = vunpack.c.h.bf16 %v1365_v21  ;;  %v400_v41 = vmul.f32 %v1257_v34, %v1612_v5 }
  0x24   : > { %v466_v39 = vmax.f32 %v434_v32, 0.0  ;;  %v1261_v42 = vunpack.c.l.bf16 %v1366_v30  ;;  %v437_v45 = vadd.f32 %v1620_v11, %v398_v37  ;;  %v438_v46 = vadd.f32 %v1620_v11, %v399_v38 }
  0x25   : > { %v467_v43 = vmax.f32 %v435_v35, 0.0  ;;  %v468_v44 = vmax.f32 %v436_v36, 0.0  ;;  %v401_v49 = vmul.f32 %v1258_v40, %v1612_v5  ;;  %v1262_v51 = vunpack.c.h.bf16 %v1366_v30 }
  0x26   : > { %1422 = vmatpush3.bf16.msra.mxu0 %v1504_v50  ;;  %1471 = vmatpush3.bf16.msra.mxu1 %v1504_v50  ;;  %v489_v48 = vpack.c.bf16 %v466_v39, %v465_v33  ;;  %v439_v50 = vadd.f32 %v1620_v11, %v400_v41  ;;  %v469_v54 = vmax.f32 %v437_v45, 0.0  ;;  %v470_v55 = vmax.f32 %v438_v46, 0.0 }
  0x27   : > { %1423 = vmatprep.subr.bf16.mxu0 %v1505_v0  ;;  %1464 = vmatprep.subr.bf16.mxu1 %v1505_v0  ;;  %v490_v53 = vpack.c.bf16 %v468_v44, %v467_v43  ;;  %v402_v56 = vmul.f32 %v1261_v42, %v1612_v5  ;;  %v440_v58 = vadd.f32 %v1620_v11, %v401_v49  ;;  %v1265_v63 = vunpack.c.l.bf16 %v1367_v47 }
  0x28   : > { %1441 = vmatprep.mubr.bf16.mxu1 %v489_v48  ;;  %v471_v60 = vmax.f32 %v439_v50, 0.0  ;;  %v403_v62 = vmul.f32 %v1262_v51, %v1612_v5  ;;  %v1266_v3 = vunpack.c.h.bf16 %v1367_v47  ;;  %v1269_v4 = vunpack.c.l.bf16 %v1368_v52 }
  0x29   : > { %v404_v14 = vmul.f32 %v1265_v63, %v1612_v5  ;;  %v1270_v15 = vunpack.c.h.bf16 %v1368_v52  ;;  %v485_v16 = vpack.c.bf16 %v458_v12, %v457_v9  ;;  %v393_v24 = vmul.f32 %v1242_v13, %v1612_v5 }
  0x2a   : > { %1424 = vmatpush3.bf16.msra.mxu0 %v1505_v0  ;;  %1472 = vmatpush3.bf16.msra.mxu1 %v1505_v0  ;;  %v491_v0 = vpack.c.bf16 %v470_v55, %v469_v54  ;;  %v442_v10 = vadd.f32 %v1620_v11, %v403_v62  ;;  %v405_v20 = vmul.f32 %v1266_v3, %v1612_v5  ;;  %v1273_v27 = vunpack.c.l.bf16 %v1369_v6 }
  0x2b   : > { %v406_v21 = vmul.f32 %v1269_v4, %v1612_v5  ;;  %v407_v26 = vmul.f32 %v1270_v15, %v1612_v5  ;;  %v443_v57 = vadd.f32 %v1620_v11, %v404_v14  ;;  %v1274_v9 = vunpack.c.h.bf16 %v1369_v6 }
  0x2c   : > { %v474_v25 = vmax.f32 %v442_v10, 0.0  ;;  %v444_v61 = vadd.f32 %v1620_v11, %v405_v20  ;;  %v460_v12 = vmax.f32 %v1682_v17, 0.0  ;;  %v461_v13 = vmax.f32 %v1685_v18, 0.0 }
  0x2d   : > { %1426 = vmatmul.mubr.bf16.vlgmr.msra.gmra.mxu0 %v482_v1  ;;  %1442 = vmatmul.mubr.bf16.vlgmr.msra.gmra.mxu1 %v490_v53  ;;  %v441_v1 = vadd.f32 %v1620_v11, %v402_v56  ;;  %v445_v30 = vadd.f32 %v1620_v11, %v406_v21  ;;  %v446_v59 = vadd.f32 %v1620_v11, %v407_v26  ;;  %v462_v32 = vmax.f32 %v1698_v31, 0.0 }
  0x2e   : > { %1429 = vmatprep.mubr.bf16.mxu0 %v483_v7  ;;  %v472_v7 = vmax.f32 %v440_v58, 0.0  ;;  %1445 = vmatprep.mubr.bf16.mxu1 %v491_v0  ;;  %v431_v33 = vadd.f32 %v1620_v11, %v1690_v23  ;;  %v475_v34 = vmax.f32 %v443_v57, 0.0  ;;  %v476_v35 = vmax.f32 %v444_v61, 0.0 }
  0x2f   : > { %v473_v19 = vmax.f32 %v441_v1, 0.0  ;;  %v409_v17 = vmul.f32 %v1274_v9, %v1612_v5  ;;  %v486_v36 = vpack.c.bf16 %v460_v12, %v459_v22  ;;  %v432_v37 = vadd.f32 %v1620_v11, %v393_v24 }
  0x30   : > { %v492_v28 = vpack.c.bf16 %v472_v7, %v471_v60  ;;  %v477_v38 = vmax.f32 %v445_v30, 0.0  ;;  %v478_v18 = vmax.f32 %v446_v59, 0.0  ;;  %v487_v39 = vpack.c.bf16 %v462_v32, %v461_v13 }
  0x31   : > { %v493_v29 = vpack.c.bf16 %v474_v25, %v473_v19  ;;  %v494_v31 = vpack.c.bf16 %v476_v35, %v475_v34  ;;  %v448_v23 = vadd.f32 %v1620_v11, %v409_v17  ;;  %v463_v41 = vmax.f32 %v431_v33, 0.0 }
  0x32   : > { %v464_v42 = vmax.f32 %v432_v37, 0.0  ;;  %v495_v43 = vpack.c.bf16 %v478_v18, %v477_v38 }
  0x33   : > { %v480_v2 = vmax.f32 %v448_v23, 0.0 }
  0x34   : > { %v488_v22 = vpack.c.bf16 %v464_v42, %v463_v41 }
  0x35   : > { %1430 = vmatmul.mubr.bf16.gmra.mxu0 %v1673_v8  ;;  %1446 = vmatmul.mubr.bf16.gmra.mxu1 %v492_v28  ;;  %v408_v8 = vmul.f32 %v1273_v27, %v1612_v5 }
  0x36   : > { %1433 = vmatprep.mubr.bf16.mxu0 %v485_v16  ;;  %1449 = vmatprep.mubr.bf16.mxu1 %v493_v29 }
  0x37   : > { %v447_v40 = vadd.f32 %v1620_v11, %v408_v8 }
  0x39   : > { %v479_v5 = vmax.f32 %v447_v40, 0.0 }
  0x3b   : > { %v496_v44 = vpack.c.bf16 %v480_v2, %v479_v5 }
  0x3d   : > { %1434 = vmatmul.mubr.bf16.gmra.mxu0 %v486_v36  ;;  %1450 = vmatmul.mubr.bf16.gmra.mxu1 %v494_v31 }
  0x3e   : > { %1437 = vmatprep.mubr.bf16.mxu0 %v487_v39  ;;  %1453 = vmatprep.mubr.bf16.mxu1 %v495_v43 }
  0x45   : > { %1438 = vmatmul.mubr.bf16.gmra.mxu0 %v488_v22  ;;  %1454 = vmatmul.mubr.bf16.gmra.mxu1 %v496_v44 }
  0xed   : > { %v1427_v45 = vpop.f32.mrf.mxu0  ;;  %v1746_v47 = vpop.f32.mrf.mxu1 }
  0xee   : > { %v925_v60 = vmul.f32 %v1427_v45, %v1427_v45 }
  0xef   : > { %v595_v46 = vpop.f32.mrf.mxu0  ;;  %v1755_v49 = vpop.f32.mrf.mxu1 }
  0xf0   : > { %v923_v51 = vmul.f32 %v595_v46, %v595_v46 }
  0xf1   : > { %v1428_v11 = vpop.f32.mrf.mxu0  ;;  %v1758_v55 = vpop.f32.mrf.mxu1 }
  0xf2   : > { %v1283_v48 = vpack.c.bf16 %v1428_v11, %v1427_v45  ;;  %v1323_v58 = vpack.c.bf16 %v1758_v55, %v1746_v47  ;;  %v926_v4 = vmul.f32 %v1428_v11, %v1428_v11 }
  0xf3   : > { %v598_v50 = vpop.f32.mrf.mxu0  ;;  %v1763_v0 = vpop.f32.mrf.mxu1 }
  0xf4   : > { %1370 = vst [vmem:[%s1753_s10 + $0x8] sm:$0xff] %v1283_v48   ;;  %v1278_v52 = vpack.c.bf16 %v598_v50, %v595_v46  ;;  %v883_v53 = vadd.f32 %v598_v50, %v595_v46  ;;  %v924_v54 = vmul.f32 %v598_v50, %v598_v50  ;;  %1378 = vst [vmem:[%s1753_s10 + $0x48] sm:$0xff] %v1323_v58  }
  0xf5   : > { %v1431_v56 = vpop.f32.mrf.mxu0  ;;  %v1318_v3 = vpack.c.bf16 %v1763_v0, %v1755_v49  ;;  %v1768_v10 = vpop.f32.mrf.mxu1 }
  0xf6   : > { %1279 = vst [vmem:[%s1753_s10] sm:$0xff] %v1278_v52   ;;  %v884_v62 = vadd.f32 %v1427_v45, %v883_v53  ;;  %v955_v63 = vadd.f32 %v924_v54, %v923_v51  ;;  %v929_v12 = vmul.f32 %v1431_v56, %v1431_v56 }
  0xf7   : > { %v611_v1 = vpop.f32.mrf.mxu0  ;;  %1377 = vst [vmem:[%s1753_s10 + $0x40] sm:$0xff] %v1318_v3   ;;  %v1771_v21 = vpop.f32.mrf.mxu1 }
  0xf8   : > { %v956_v6 = vadd.f32 %v955_v63, %v925_v60  ;;  %v885_v7 = vadd.f32 %v1428_v11, %v884_v62  ;;  %v927_v16 = vmul.f32 %v611_v1, %v611_v1 }
  0xf9   : > { %v1432_v14 = vpop.f32.mrf.mxu0  ;;  %v1774_v57 = vpop.f32.mrf.mxu1 }
  0xfa   : > { %v886_v15 = vadd.f32 %v885_v7, %v611_v1  ;;  %v957_v19 = vadd.f32 %v956_v6, %v926_v4  ;;  %v1293_v20 = vpack.c.bf16 %v1432_v14, %v1431_v56  ;;  %v1333_v9 = vpack.c.bf16 %v1774_v57, %v1768_v10 }
  0xfb   : > { %v614_v24 = vpop.f32.mrf.mxu0  ;;  %v1779_v59 = vpop.f32.mrf.mxu1  ;;  %v930_v33 = vmul.f32 %v1432_v14, %v1432_v14 }
  0xfc   : > { %v958_v25 = vadd.f32 %v957_v19, %v927_v16  ;;  %1372 = vst [vmem:[%s1753_s10 + $0x18] sm:$0xff] %v1293_v20   ;;  %v1288_v26 = vpack.c.bf16 %v614_v24, %v611_v1  ;;  %v887_v27 = vadd.f32 %v886_v15, %v614_v24  ;;  %v928_v28 = vmul.f32 %v614_v24, %v614_v24 }
  0xfd   : > { %v1435_v61 = vpop.f32.mrf.mxu0  ;;  %1380 = vst [vmem:[%s1753_s10 + $0x58] sm:$0xff] %v1333_v9   ;;  %v1328_v32 = vpack.c.bf16 %v1779_v59, %v1771_v21  ;;  %v1784_v8 = vpop.f32.mrf.mxu1 }
  0xfe   : > { %1371 = vst [vmem:[%s1753_s10 + $0x10] sm:$0xff] %v1288_v26   ;;  %v888_v29 = vadd.f32 %v1431_v56, %v887_v27  ;;  %v959_v30 = vadd.f32 %v958_v25, %v928_v28  ;;  %v933_v22 = vmul.f32 %v1435_v61, %v1435_v61 }
  0xff   : > { %v627_v13 = vpop.f32.mrf.mxu0  ;;  %1379 = vst [vmem:[%s1753_s10 + $0x50] sm:$0xff] %v1328_v32   ;;  %v1787_v39 = vpop.f32.mrf.mxu1  ;;  %v941_v32 = vmul.f32 %v1746_v47, %v1746_v47 }
 0x100   : > { %v960_v34 = vadd.f32 %v959_v30, %v929_v12  ;;  %v889_v35 = vadd.f32 %v1432_v14, %v888_v29  ;;  %v931_v37 = vmul.f32 %v627_v13, %v627_v13  ;;  %v940_v30 = vmul.f32 %v1763_v0, %v1763_v0 }
 0x101   : > { %v1436_v17 = vpop.f32.mrf.mxu0  ;;  %v1790_v43 = vpop.f32.mrf.mxu1 }
 0x102   : > { %v890_v36 = vadd.f32 %v889_v35, %v627_v13  ;;  %v961_v38 = vadd.f32 %v960_v34, %v930_v33  ;;  %v1303_v18 = vpack.c.bf16 %v1436_v17, %v1435_v61  ;;  %v1343_v2 = vpack.c.bf16 %v1790_v43, %v1784_v8 }
 0x103   : > { %v630_v31 = vpop.f32.mrf.mxu0  ;;  %v694_v46 = vpop.f32.mrf.mxu1  ;;  %v934_v50 = vmul.f32 %v1436_v17, %v1436_v17  ;;  %v942_v35 = vmul.f32 %v1758_v55, %v1758_v55 }
 0x104   : > { %v962_v40 = vadd.f32 %v961_v38, %v931_v37  ;;  %1374 = vst [vmem:[%s1753_s10 + $0x28] sm:$0xff] %v1303_v18   ;;  %v1298_v23 = vpack.c.bf16 %v630_v31, %v627_v13  ;;  %v891_v41 = vadd.f32 %v890_v36, %v630_v31  ;;  %v932_v42 = vmul.f32 %v630_v31, %v630_v31 }
 0x105   : > { %v1439_v5 = vpop.f32.mrf.mxu0  ;;  %1382 = vst [vmem:[%s1753_s10 + $0x68] sm:$0xff] %v1343_v2   ;;  %v1338_v48 = vpack.c.bf16 %v694_v46, %v1787_v39  ;;  %v1797_v53 = vpop.f32.mrf.mxu1  ;;  %v943_v37 = vmul.f32 %v1771_v21, %v1771_v21  ;;  %v944_v31 = vmul.f32 %v1779_v59, %v1779_v59 }
 0x106   : > { %1373 = vst [vmem:[%s1753_s10 + $0x20] sm:$0xff] %v1298_v23   ;;  %v892_v44 = vadd.f32 %v1435_v61, %v891_v41  ;;  %v963_v45 = vadd.f32 %v962_v40, %v932_v42  ;;  %v937_v16 = vmul.f32 %v1439_v5, %v1439_v5  ;;  %v939_v61 = vmul.f32 %v1755_v49, %v1755_v49 }
 0x107   : > { %v643_v11 = vpop.f32.mrf.mxu0  ;;  %1381 = vst [vmem:[%s1753_s10 + $0x60] sm:$0xff] %v1338_v48   ;;  %v707_v63 = vpop.f32.mrf.mxu1  ;;  %v950_v48 = vmul.f32 %v1790_v43, %v1790_v43 }
 0x108   : > { %v964_v51 = vadd.f32 %v963_v45, %v933_v22  ;;  %v893_v52 = vadd.f32 %v1436_v17, %v892_v44  ;;  %v935_v58 = vmul.f32 %v643_v11, %v643_v11  ;;  %v948_v44 = vmul.f32 %v694_v46, %v694_v46 }
 0x109   : > { %v1440_v54 = vpop.f32.mrf.mxu0  ;;  %v1456_v14 = vpop.f32.mrf.mxu1  ;;  %v949_v45 = vmul.f32 %v1784_v8, %v1784_v8 }
 0x10a   : > { %v894_v56 = vadd.f32 %v893_v52, %v643_v11  ;;  %v965_v60 = vadd.f32 %v964_v51, %v934_v50  ;;  %v1313_v62 = vpack.c.bf16 %v1440_v54, %v1439_v5  ;;  %v1353_v15 = vpack.c.bf16 %v1456_v14, %v1797_v53 }
 0x10b   : > { %v646_v1 = vpop.f32.mrf.mxu0  ;;  %v710_v24 = vpop.f32.mrf.mxu1  ;;  %v938_v26 = vmul.f32 %v1440_v54, %v1440_v54  ;;  %v951_v52 = vmul.f32 %v707_v63, %v707_v63 }
 0x10c   : > { %v966_v3 = vadd.f32 %v965_v60, %v935_v58  ;;  %1376 = vst [vmem:[%s1753_s10 + $0x38] sm:$0xff] %v1313_v62   ;;  %v1308_v4 = vpack.c.bf16 %v646_v1, %v643_v11  ;;  %v895_v6 = vadd.f32 %v894_v56, %v646_v1  ;;  %v936_v7 = vmul.f32 %v646_v1, %v646_v1 }
 0x10d   : > { %1384 = vst [vmem:[%s1753_s10 + $0x78] sm:$0xff] %v1353_v15   ;;  %v1348_v25 = vpack.c.bf16 %v710_v24, %v707_v63  ;;  %v953_v58 = vmul.f32 %v1797_v53, %v1797_v53  ;;  %v954_v62 = vmul.f32 %v1456_v14, %v1456_v14 }
 0x10e   : > { %1375 = vst [vmem:[%s1753_s10 + $0x30] sm:$0xff] %v1308_v4   ;;  %v896_v19 = vadd.f32 %v1439_v5, %v895_v6  ;;  %v967_v20 = vadd.f32 %v966_v3, %v936_v7  ;;  %v947_v5 = vmul.f32 %v1787_v39, %v1787_v39 }
 0x10f   : > { %1383 = vst [vmem:[%s1753_s10 + $0x70] sm:$0xff] %v1348_v25  }
 0x110   : > { %v897_v27 = vadd.f32 %v1440_v54, %v896_v19  ;;  %v968_v28 = vadd.f32 %v967_v20, %v937_v16 }
 0x112   : > { %v969_v9 = vadd.f32 %v968_v28, %v938_v26  ;;  %v898_v12 = vadd.f32 %v897_v27, %v1755_v49 }
 0x114   : > { %v899_v29 = vadd.f32 %v898_v12, %v1763_v0  ;;  %v970_v13 = vadd.f32 %v969_v9, %v939_v61 }
 0x116   : > { %v900_v33 = vadd.f32 %v1746_v47, %v899_v29  ;;  %v971_v34 = vadd.f32 %v970_v13, %v940_v30  ;;  %v945_v47 = vmul.f32 %v1768_v10, %v1768_v10 }
 0x118   : > { %v972_v17 = vadd.f32 %v971_v34, %v941_v32  ;;  %v901_v36 = vadd.f32 %v1758_v55, %v900_v33  ;;  %v946_v55 = vmul.f32 %v1774_v57, %v1774_v57 }
 0x11a   : > { %v902_v49 = vadd.f32 %v901_v36, %v1771_v21  ;;  %v973_v38 = vadd.f32 %v972_v17, %v942_v35 }
 0x11c   : > { %v974_v0 = vadd.f32 %v973_v38, %v943_v37  ;;  %v903_v18 = vadd.f32 %v902_v49, %v1779_v59 }
 0x11e   : > { %v904_v40 = vadd.f32 %v1768_v10, %v903_v18  ;;  %v975_v23 = vadd.f32 %v974_v0, %v944_v31 }
 0x120   : > { %v976_v41 = vadd.f32 %v975_v23, %v945_v47  ;;  %v905_v42 = vadd.f32 %v1774_v57, %v904_v40 }
 0x122   : > { %v906_v21 = vadd.f32 %v905_v42, %v1787_v39  ;;  %v977_v2 = vadd.f32 %v976_v41, %v946_v55 }
 0x124   : > { %v978_v22 = vadd.f32 %v977_v2, %v947_v5  ;;  %v907_v59 = vadd.f32 %v906_v21, %v694_v46  ;;  %v952_v46 = vmul.f32 %v710_v24, %v710_v24 }
 0x126   : > { %v908_v10 = vadd.f32 %v1784_v8, %v907_v59  ;;  %v979_v11 = vadd.f32 %v978_v22, %v948_v44 }
 0x128   : > { %v980_v57 = vadd.f32 %v979_v11, %v949_v45  ;;  %v909_v50 = vadd.f32 %v1790_v43, %v908_v10 }
 0x12a   : > { %v910_v51 = vadd.f32 %v909_v50, %v707_v63  ;;  %v981_v39 = vadd.f32 %v980_v57, %v950_v48 }
 0x12c   : > { %v982_v54 = vadd.f32 %v981_v39, %v951_v52  ;;  %v911_v56 = vadd.f32 %v910_v51, %v710_v24 }
 0x12e   : > { %v912_v8 = vadd.f32 %v1797_v53, %v911_v56  ;;  %v983_v60 = vadd.f32 %v982_v54, %v952_v46 }
 0x130   : > { %v913_v1 = vadd.f32 %v1456_v14, %v912_v8  ;;  %v984_v3 = vadd.f32 %v983_v60, %v953_v58 }
 0x132   : > { %v914_v4 = vrot.slane %v913_v1, 4  ;;  %v985_v6 = vadd.f32 %v984_v3, %v954_v62 }
 0x134   : > { %v915_v43 = vadd.f32 %v914_v4, %v913_v1  ;;  %v986_v7 = vrot.slane %v985_v6, 4 }
 0x136   : > { %v916_v63 = vrot.slane %v915_v43, 2  ;;  %v987_v15 = vadd.f32 %v986_v7, %v985_v6 }
 0x138   : > { %v917_v16 = vadd.f32 %v916_v63, %v915_v43  ;;  %v988_v19 = vrot.slane %v987_v15, 2 }
 0x13a   : > { %v918_v20 = vrot.slane %v917_v16, 1  ;;  %v989_v24 = vadd.f32 %v988_v19, %v987_v15 }
 0x13c   : > { %v919_v25 = vadd.f32 %v918_v20, %v917_v16  ;;  %v990_v26 = vrot.slane %v989_v24, 1 }
 0x13e   : > { %v991_v53 = vadd.f32 %v990_v26, %v989_v24  ;;  %921 = vst [vmem:[%s295_s12] sm:$0xff] %v919_v25 }
 0x140   : > { %993 = vst [vmem:[%s299_s15] sm:$0xff] %v991_v53 }
 0x141 PF: > { %s17_s23 = sadd.s32 1, %s1528_s23   ;;  %s1865_s21 = smov %s1524_s22 }
 0x142   : > { %p14_p6 = scmp.ge.s32.totalorder %s17_s23, 4   ;;  %s1866_s22 = smov %s1868_s24 }
 0x144   :  { %16 = sbr.rel (!%p14_p6) target bundleno = 2 (0x2), region = 94 }

// kernel: bottleneck_forward.7
= control target key start
LH: loop header
LB: loop body
LE: loop exit
PB: predicated region body
PF: predicated region fallthrough
CT: control target
= control target key end

     0   :  { %s1094_s15 = smov 0   ;;  %s1296_s0 = inlined_call_operand.vmem [shape: bf16[512,128], index: 0, kind: input, shape index: {}, may-alias: {0,4}]   ;;  %s1297_s1 = inlined_call_operand.vmem [shape: bf16[512,128], index: 1, kind: input, shape index: {}]   ;;  %s1298_s2 = inlined_call_operand.vmem [shape: f32[1,128], index: 2, kind: input, shape index: {}]   ;;  %s1299_s3 = inlined_call_operand.vmem [shape: f32[1,128], index: 3, kind: input, shape index: {}]   ;;  %s1300_s4 = inlined_call_operand.vmem [shape: bf16[512,128], index: 4, kind: output, shape index: {}, may-alias: {0,4}]  }
   0x1 LB: > { %s721_s16 = sadd.s32 4294967295, %s1067_s15   ;;  %p725_p0 = scmp.ge.s32.totalorder %s1067_s15, 1  ;;  %s1067_s15 = sphi %s1094_s15, %s14_s15  }
   0x2   : > { %p174_p1 = scmp.lt.s32.totalorder %s1067_s15, 3 }
   0x4   : > { %p175_p2 = pnand %p725_p0, %p174_p1 }
   0x6   : > { %178 = sbr.rel (%p175_p2) target bundleno = 77 (0x4d), region = 36 }
   0xb   : > { %s726_s17 = sshll.u32 %s721_s16, 5  ;;  %v732_v40 = vld [vmem:[%s1298_s2] ss:$0 sm:$0xff] }
   0xc   : > { %p206_p3 = scmp.lt.s32.totalorder %s726_s17, 63 }
   0xe   : > { %s1320_s17 = smov (!%p206_p3, %s726_s17), 63 }
   0xf   : > { %s1102_s18 = sshll.u32 %s1320_s17, 2 }
  0x10   : > { %s1108_s21 = scalar_lea.vmem %s1296_s0, %s1102_s18  ;;  %s1152_s28 = scalar_lea.vmem %s1297_s1, %s1102_s18 }
  0x11   : > { %v801_v0 = vld [vmem:[%s1108_s21] sm:$0xff]   ;;  %v1008_v1 = vld [vmem:[%s1108_s21 + $0x8] sm:$0xff]   ;;  %v1009_v2 = vld [vmem:[%s1108_s21 + $0x10] sm:$0xff]   ;;  %s1275_s5 = scalar_lea.vmem %s1300_s4, %s1102_s18 }
  0x12   : > { %v802_v3 = vunpack.c.l.bf16 %v801_v0  ;;  %v803_v4 = vunpack.c.h.bf16 %v801_v0  ;;  %v806_v5 = vunpack.c.l.bf16 %v1008_v1  ;;  %v807_v6 = vunpack.c.h.bf16 %v1008_v1  ;;  %v1010_v7 = vld [vmem:[%s1108_s21 + $0x18] sm:$0xff]   ;;  %v1011_v8 = vld [vmem:[%s1108_s21 + $0x20] sm:$0xff]   ;;  %v1012_v9 = vld [vmem:[%s1108_s21 + $0x28] sm:$0xff]  }
  0x13   : > { %v810_v10 = vunpack.c.l.bf16 %v1009_v2  ;;  %v811_v11 = vunpack.c.h.bf16 %v1009_v2  ;;  %v814_v12 = vunpack.c.l.bf16 %v1010_v7  ;;  %v815_v13 = vunpack.c.h.bf16 %v1010_v7  ;;  %v1013_v14 = vld [vmem:[%s1108_s21 + $0x30] sm:$0xff]   ;;  %v1014_v15 = vld [vmem:[%s1108_s21 + $0x38] sm:$0xff]   ;;  %v1015_v16 = vld [vmem:[%s1108_s21 + $0x40] sm:$0xff]  }
  0x14   : > { %v818_v17 = vunpack.c.l.bf16 %v1011_v8  ;;  %v819_v18 = vunpack.c.h.bf16 %v1011_v8  ;;  %v822_v19 = vunpack.c.l.bf16 %v1012_v9  ;;  %v823_v20 = vunpack.c.h.bf16 %v1012_v9  ;;  %v1016_v21 = vld [vmem:[%s1108_s21 + $0x48] sm:$0xff]   ;;  %v1017_v22 = vld [vmem:[%s1108_s21 + $0x50] sm:$0xff]   ;;  %v1018_v23 = vld [vmem:[%s1108_s21 + $0x58] sm:$0xff]  }
  0x15   : > { %v826_v24 = vunpack.c.l.bf16 %v1013_v14  ;;  %v827_v25 = vunpack.c.h.bf16 %v1013_v14  ;;  %v830_v26 = vunpack.c.l.bf16 %v1014_v15  ;;  %v831_v27 = vunpack.c.h.bf16 %v1014_v15  ;;  %v1019_v28 = vld [vmem:[%s1108_s21 + $0x60] sm:$0xff]   ;;  %v1020_v29 = vld [vmem:[%s1108_s21 + $0x68] sm:$0xff]   ;;  %v1021_v34 = vld [vmem:[%s1108_s21 + $0x70] sm:$0xff]  }
  0x16   : > { %v834_v30 = vunpack.c.l.bf16 %v1015_v16  ;;  %v835_v31 = vunpack.c.h.bf16 %v1015_v16  ;;  %v838_v32 = vunpack.c.l.bf16 %v1016_v21  ;;  %v839_v33 = vunpack.c.h.bf16 %v1016_v21  ;;  %v1022_v35 = vld [vmem:[%s1108_s21 + $0x78] sm:$0xff]   ;;  %v733_v9 = vld [vmem:[%s1299_s3] ss:$0 sm:$0xff] }
  0x17   : > { %v842_v36 = vunpack.c.l.bf16 %v1017_v22  ;;  %v843_v37 = vunpack.c.h.bf16 %v1017_v22  ;;  %v846_v38 = vunpack.c.l.bf16 %v1018_v23  ;;  %v847_v39 = vunpack.c.h.bf16 %v1018_v23 }
  0x18   : > { %v850_v41 = vunpack.c.l.bf16 %v1019_v28  ;;  %v851_v42 = vunpack.c.h.bf16 %v1019_v28  ;;  %v854_v43 = vunpack.c.l.bf16 %v1020_v29  ;;  %v855_v44 = vunpack.c.h.bf16 %v1020_v29 }
  0x19   : > { %v858_v45 = vunpack.c.l.bf16 %v1021_v34  ;;  %v859_v46 = vunpack.c.h.bf16 %v1021_v34  ;;  %v862_v47 = vunpack.c.l.bf16 %v1022_v35  ;;  %v863_v48 = vunpack.c.h.bf16 %v1022_v35 }
  0x1a   : > { %v294_v49 = vmul.f32 %v802_v3, %v732_v40  ;;  %v295_v50 = vmul.f32 %v803_v4, %v732_v40  ;;  %v296_v51 = vmul.f32 %v806_v5, %v732_v40  ;;  %v297_v52 = vmul.f32 %v807_v6, %v732_v40 }
  0x1b   : > { %v298_v53 = vmul.f32 %v810_v10, %v732_v40  ;;  %v299_v54 = vmul.f32 %v811_v11, %v732_v40  ;;  %v300_v55 = vmul.f32 %v814_v12, %v732_v40  ;;  %v301_v56 = vmul.f32 %v815_v13, %v732_v40 }
  0x1c   : > { %v302_v57 = vmul.f32 %v818_v17, %v732_v40  ;;  %v303_v58 = vmul.f32 %v819_v18, %v732_v40  ;;  %v304_v59 = vmul.f32 %v822_v19, %v732_v40  ;;  %v305_v60 = vmul.f32 %v823_v20, %v732_v40 }
  0x1d   : > { %v306_v61 = vmul.f32 %v826_v24, %v732_v40  ;;  %v307_v62 = vmul.f32 %v827_v25, %v732_v40  ;;  %v308_v63 = vmul.f32 %v830_v26, %v732_v40  ;;  %v309_v0 = vmul.f32 %v831_v27, %v732_v40 }
  0x1e   : > { %v310_v1 = vmul.f32 %v834_v30, %v732_v40  ;;  %v311_v2 = vmul.f32 %v835_v31, %v732_v40  ;;  %v312_v7 = vmul.f32 %v838_v32, %v732_v40  ;;  %v313_v8 = vmul.f32 %v839_v33, %v732_v40 }
  0x1f   : > { %v314_v3 = vmul.f32 %v842_v36, %v732_v40  ;;  %v315_v4 = vmul.f32 %v843_v37, %v732_v40  ;;  %v316_v5 = vmul.f32 %v846_v38, %v732_v40  ;;  %v317_v6 = vmul.f32 %v847_v39, %v732_v40 }
  0x20   : > { %v318_v10 = vmul.f32 %v850_v41, %v732_v40  ;;  %v319_v11 = vmul.f32 %v851_v42, %v732_v40  ;;  %v320_v12 = vmul.f32 %v854_v43, %v732_v40  ;;  %v321_v13 = vmul.f32 %v855_v44, %v732_v40  ;;  %v865_v42 = vld [vmem:[%s1152_s28] sm:$0xff]   ;;  %v1023_v43 = vld [vmem:[%s1152_s28 + $0x8] sm:$0xff]  }
  0x21   : > { %v322_v14 = vmul.f32 %v858_v45, %v732_v40  ;;  %v323_v15 = vmul.f32 %v859_v46, %v732_v40  ;;  %v324_v16 = vmul.f32 %v862_v47, %v732_v40  ;;  %v325_v17 = vmul.f32 %v863_v48, %v732_v40  ;;  %v1024_v48 = vld [vmem:[%s1152_s28 + $0x10] sm:$0xff]  }
  0x22   : > { %v1132_v18 = vadd.f32 %v733_v9, %v294_v49  ;;  %v1134_v19 = vadd.f32 %v733_v9, %v295_v50  ;;  %v1136_v20 = vadd.f32 %v733_v9, %v296_v51  ;;  %v1138_v21 = vadd.f32 %v733_v9, %v297_v52  ;;  %v1025_v49 = vld [vmem:[%s1152_s28 + $0x18] sm:$0xff]  }
  0x23   : > { %v1140_v22 = vadd.f32 %v733_v9, %v298_v53  ;;  %v1142_v23 = vadd.f32 %v733_v9, %v299_v54  ;;  %v1144_v24 = vadd.f32 %v733_v9, %v300_v55  ;;  %v1146_v25 = vadd.f32 %v733_v9, %v301_v56  ;;  %v1026_v54 = vld [vmem:[%s1152_s28 + $0x20] sm:$0xff]   ;;  %v1027_v55 = vld [vmem:[%s1152_s28 + $0x28] sm:$0xff]  }
  0x24   : > { %v1154_v26 = vadd.f32 %v733_v9, %v302_v57  ;;  %v1156_v27 = vadd.f32 %v733_v9, %v303_v58  ;;  %v1158_v28 = vadd.f32 %v733_v9, %v304_v59  ;;  %v1160_v29 = vadd.f32 %v733_v9, %v305_v60  ;;  %v1028_v60 = vld [vmem:[%s1152_s28 + $0x30] sm:$0xff]  }
  0x25   : > { %v1162_v30 = vadd.f32 %v733_v9, %v306_v61  ;;  %v1164_v31 = vadd.f32 %v733_v9, %v307_v62  ;;  %v1166_v32 = vadd.f32 %v733_v9, %v308_v63  ;;  %v1168_v33 = vadd.f32 %v733_v9, %v309_v0  ;;  %v1029_v61 = vld [vmem:[%s1152_s28 + $0x38] sm:$0xff]  }
  0x26   : > { %v1170_v34 = vadd.f32 %v733_v9, %v310_v1  ;;  %v1172_v35 = vadd.f32 %v733_v9, %v311_v2  ;;  %v1174_v36 = vadd.f32 %v733_v9, %v312_v7  ;;  %v1176_v37 = vadd.f32 %v733_v9, %v313_v8  ;;  %v1030_v2 = vld [vmem:[%s1152_s28 + $0x40] sm:$0xff]   ;;  %v1031_v7 = vld [vmem:[%s1152_s28 + $0x48] sm:$0xff]  }
  0x27   : > { %v1178_v38 = vadd.f32 %v733_v9, %v314_v3  ;;  %v1180_v39 = vadd.f32 %v733_v9, %v315_v4  ;;  %v1182_v40 = vadd.f32 %v733_v9, %v316_v5  ;;  %v1184_v41 = vadd.f32 %v733_v9, %v317_v6  ;;  %v1032_v6 = vld [vmem:[%s1152_s28 + $0x50] sm:$0xff]  }
  0x28   : > { %v1188_v44 = vadd.f32 %v733_v9, %v318_v10  ;;  %v1190_v45 = vadd.f32 %v733_v9, %v319_v11  ;;  %v1192_v46 = vadd.f32 %v733_v9, %v320_v12  ;;  %v1194_v47 = vadd.f32 %v733_v9, %v321_v13 }
  0x29   : > { %1301 = vst [vmem:[#allocation2_spill] sm:$0xff] %v1184_v41  ;;  %v1198_v50 = vadd.f32 %v733_v9, %v322_v14  ;;  %v1200_v51 = vadd.f32 %v733_v9, %v323_v15  ;;  %v1202_v52 = vadd.f32 %v733_v9, %v324_v16  ;;  %v1204_v53 = vadd.f32 %v733_v9, %v325_v17  ;;  %v1033_v9 = vld [vmem:[%s1152_s28 + $0x58] sm:$0xff]   ;;  %v1034_v14 = vld [vmem:[%s1152_s28 + $0x60] sm:$0xff]   ;;  %v1035_v15 = vld [vmem:[%s1152_s28 + $0x68] sm:$0xff]  }
  0x2a   : > { %1302 = vst [vmem:[#allocation3_spill] sm:$0xff] %v1188_v44  ;;  %1303 = vst [vmem:[#allocation4_spill] sm:$0xff] %v1190_v45  ;;  %v866_v56 = vunpack.c.l.bf16 %v865_v42  ;;  %v867_v57 = vunpack.c.h.bf16 %v865_v42  ;;  %v870_v58 = vunpack.c.l.bf16 %v1023_v43  ;;  %v871_v59 = vunpack.c.h.bf16 %v1023_v43 }
  0x2b   : > { %1304 = vst [vmem:[#allocation5_spill] sm:$0xff] %v1192_v46  ;;  %1305 = vst [vmem:[#allocation6_spill] sm:$0xff] %v1194_v47  ;;  %v874_v62 = vunpack.c.l.bf16 %v1024_v48  ;;  %v875_v63 = vunpack.c.h.bf16 %v1024_v48  ;;  %v878_v0 = vunpack.c.l.bf16 %v1025_v49  ;;  %v879_v1 = vunpack.c.h.bf16 %v1025_v49  ;;  %v1036_v48 = vld [vmem:[%s1152_s28 + $0x70] sm:$0xff]   ;;  %v1037_v49 = vld [vmem:[%s1152_s28 + $0x78] sm:$0xff]  }
  0x2c   : > { %1306 = vst [vmem:[#allocation7_spill] sm:$0xff] %v1198_v50  ;;  %1307 = vst [vmem:[#allocation8_spill] sm:$0xff] %v1200_v51  ;;  %v882_v8 = vunpack.c.l.bf16 %v1026_v54  ;;  %v883_v3 = vunpack.c.h.bf16 %v1026_v54  ;;  %v886_v4 = vunpack.c.l.bf16 %v1027_v55  ;;  %v887_v5 = vunpack.c.h.bf16 %v1027_v55 }
  0x2d   : > { %1308 = vst [vmem:[#allocation9_spill] sm:$0xff] %v1202_v52  ;;  %1309 = vst [vmem:[#allocation10_spill] sm:$0xff] %v1204_v53  ;;  %v890_v10 = vunpack.c.l.bf16 %v1028_v60  ;;  %v891_v11 = vunpack.c.h.bf16 %v1028_v60  ;;  %v894_v12 = vunpack.c.l.bf16 %v1029_v61  ;;  %v895_v13 = vunpack.c.h.bf16 %v1029_v61 }
  0x2e   : > { %v898_v16 = vunpack.c.l.bf16 %v1030_v2  ;;  %v899_v17 = vunpack.c.h.bf16 %v1030_v2  ;;  %v902_v42 = vunpack.c.l.bf16 %v1031_v7  ;;  %v903_v43 = vunpack.c.h.bf16 %v1031_v7 }
  0x2f   : > { %v906_v53 = vunpack.c.l.bf16 %v1032_v6  ;;  %v907_v52 = vunpack.c.h.bf16 %v1032_v6  ;;  %v910_v54 = vunpack.c.l.bf16 %v1033_v9  ;;  %v911_v51 = vunpack.c.h.bf16 %v1033_v9 }
  0x30   : > { %v914_v50 = vunpack.c.l.bf16 %v1034_v14  ;;  %v915_v55 = vunpack.c.h.bf16 %v1034_v14  ;;  %v918_v47 = vunpack.c.l.bf16 %v1035_v15  ;;  %v919_v46 = vunpack.c.h.bf16 %v1035_v15 }
  0x31   : > { %v922_v45 = vunpack.c.l.bf16 %v1036_v48  ;;  %v923_v60 = vunpack.c.h.bf16 %v1036_v48  ;;  %v926_v44 = vunpack.c.l.bf16 %v1037_v49  ;;  %v927_v61 = vunpack.c.h.bf16 %v1037_v49 }
  0x32   : > { %v1219_v41 = vadd.f32 %v866_v56, %v1132_v18  ;;  %v1222_v2 = vadd.f32 %v867_v57, %v1134_v19  ;;  %v1225_v7 = vadd.f32 %v870_v58, %v1136_v20  ;;  %v1228_v6 = vadd.f32 %v871_v59, %v1138_v21  ;;  %v1310_v59 = vld [vmem:[#allocation2_spill] sm:$0xff] }
  0x33   : > { %v1231_v9 = vadd.f32 %v874_v62, %v1140_v22  ;;  %v1234_v14 = vadd.f32 %v875_v63, %v1142_v23  ;;  %v1237_v15 = vadd.f32 %v878_v0, %v1144_v24  ;;  %v436_v18 = vadd.f32 %v879_v1, %v1146_v25  ;;  %v1311_v62 = vld [vmem:[#allocation3_spill] sm:$0xff]  ;;  %v1312_v63 = vld [vmem:[#allocation4_spill] sm:$0xff]  ;;  %v1313_v0 = vld [vmem:[#allocation5_spill] sm:$0xff] }
  0x34   : > { %v437_v19 = vadd.f32 %v882_v8, %v1154_v26  ;;  %v438_v56 = vadd.f32 %v883_v3, %v1156_v27  ;;  %v439_v20 = vadd.f32 %v886_v4, %v1158_v28  ;;  %v440_v21 = vadd.f32 %v887_v5, %v1160_v29  ;;  %v1314_v1 = vld [vmem:[#allocation6_spill] sm:$0xff]  ;;  %v1315_v8 = vld [vmem:[#allocation7_spill] sm:$0xff]  ;;  %v1316_v3 = vld [vmem:[#allocation8_spill] sm:$0xff] }
  0x35   : > { %v441_v57 = vadd.f32 %v890_v10, %v1162_v30  ;;  %v442_v22 = vadd.f32 %v891_v11, %v1164_v31  ;;  %v443_v23 = vadd.f32 %v894_v12, %v1166_v32  ;;  %v444_v58 = vadd.f32 %v895_v13, %v1168_v33  ;;  %v1317_v4 = vld [vmem:[#allocation9_spill] sm:$0xff] }
  0x36   : > { %v445_v24 = vadd.f32 %v898_v16, %v1170_v34  ;;  %v446_v25 = vadd.f32 %v899_v17, %v1172_v35  ;;  %v447_v26 = vadd.f32 %v902_v42, %v1174_v36  ;;  %v448_v27 = vadd.f32 %v903_v43, %v1176_v37 }
  0x37   : > { %v449_v28 = vadd.f32 %v906_v53, %v1178_v38  ;;  %v450_v29 = vadd.f32 %v907_v52, %v1180_v39  ;;  %v451_v30 = vadd.f32 %v910_v54, %v1182_v40  ;;  %v452_v31 = vadd.f32 %v911_v51, %v1310_v59  ;;  %v1318_v53 = vld [vmem:[#allocation10_spill] sm:$0xff] }
  0x38   : > { %v453_v32 = vadd.f32 %v914_v50, %v1311_v62  ;;  %v454_v33 = vadd.f32 %v915_v55, %v1312_v63  ;;  %v455_v34 = vadd.f32 %v918_v47, %v1313_v0  ;;  %v456_v35 = vadd.f32 %v919_v46, %v1314_v1 }
  0x39   : > { %v457_v36 = vadd.f32 %v922_v45, %v1315_v8  ;;  %v458_v37 = vadd.f32 %v923_v60, %v1316_v3  ;;  %v459_v38 = vadd.f32 %v926_v44, %v1317_v4  ;;  %v460_v39 = vadd.f32 %v927_v61, %v1318_v53 }
  0x3a   : > { %v461_v40 = vmax.f32 %v1219_v41, 0.0  ;;  %v462_v51 = vmax.f32 %v1222_v2, 0.0  ;;  %v463_v50 = vmax.f32 %v1225_v7, 0.0  ;;  %v464_v52 = vmax.f32 %v1228_v6, 0.0 }
  0x3b   : > { %v465_v47 = vmax.f32 %v1231_v9, 0.0  ;;  %v466_v46 = vmax.f32 %v1234_v14, 0.0  ;;  %v467_v45 = vmax.f32 %v1237_v15, 0.0  ;;  %v468_v5 = vmax.f32 %v436_v18, 0.0 }
  0x3c   : > { %v469_v10 = vmax.f32 %v437_v19, 0.0  ;;  %v470_v11 = vmax.f32 %v438_v56, 0.0  ;;  %v471_v44 = vmax.f32 %v439_v20, 0.0  ;;  %v472_v12 = vmax.f32 %v440_v21, 0.0 }
  0x3d   : > { %v473_v13 = vmax.f32 %v441_v57, 0.0  ;;  %v474_v41 = vmax.f32 %v442_v22, 0.0  ;;  %v475_v16 = vmax.f32 %v443_v23, 0.0  ;;  %v476_v17 = vmax.f32 %v444_v58, 0.0 }
  0x3e   : > { %v477_v42 = vmax.f32 %v445_v24, 0.0  ;;  %v478_v43 = vmax.f32 %v446_v25, 0.0  ;;  %v479_v48 = vmax.f32 %v447_v26, 0.0  ;;  %v480_v49 = vmax.f32 %v448_v27, 0.0 }
  0x3f   : > { %v481_v54 = vmax.f32 %v449_v28, 0.0  ;;  %v482_v55 = vmax.f32 %v450_v29, 0.0  ;;  %v483_v60 = vmax.f32 %v451_v30, 0.0  ;;  %v484_v61 = vmax.f32 %v452_v31, 0.0 }
  0x40   : > { %v485_v2 = vmax.f32 %v453_v32, 0.0  ;;  %v486_v7 = vmax.f32 %v454_v33, 0.0  ;;  %v487_v6 = vmax.f32 %v455_v34, 0.0  ;;  %v488_v9 = vmax.f32 %v456_v35, 0.0 }
  0x41   : > { %v489_v14 = vmax.f32 %v457_v36, 0.0  ;;  %v490_v15 = vmax.f32 %v458_v37, 0.0  ;;  %v491_v18 = vmax.f32 %v459_v38, 0.0  ;;  %v492_v19 = vmax.f32 %v460_v39, 0.0 }
  0x42   : > { %v931_v56 = vpack.c.bf16 %v462_v51, %v461_v40  ;;  %v936_v20 = vpack.c.bf16 %v464_v52, %v463_v50  ;;  %v941_v21 = vpack.c.bf16 %v466_v46, %v465_v47  ;;  %v946_v57 = vpack.c.bf16 %v468_v5, %v467_v45 }
  0x43   : > { %v951_v22 = vpack.c.bf16 %v470_v11, %v469_v10  ;;  %v956_v23 = vpack.c.bf16 %v472_v12, %v471_v44  ;;  %v961_v58 = vpack.c.bf16 %v474_v41, %v473_v13  ;;  %v966_v24 = vpack.c.bf16 %v476_v17, %v475_v16 }
  0x44   : > { %932 = vst [vmem:[%s1275_s5] sm:$0xff] %v931_v56   ;;  %v971_v25 = vpack.c.bf16 %v478_v43, %v477_v42  ;;  %v976_v26 = vpack.c.bf16 %v480_v49, %v479_v48  ;;  %v981_v27 = vpack.c.bf16 %v482_v55, %v481_v54  ;;  %v986_v28 = vpack.c.bf16 %v484_v61, %v483_v60 }
  0x45   : > { %1038 = vst [vmem:[%s1275_s5 + $0x8] sm:$0xff] %v936_v20   ;;  %1039 = vst [vmem:[%s1275_s5 + $0x10] sm:$0xff] %v941_v21   ;;  %v991_v29 = vpack.c.bf16 %v486_v7, %v485_v2  ;;  %v996_v30 = vpack.c.bf16 %v488_v9, %v487_v6  ;;  %v1001_v59 = vpack.c.bf16 %v490_v15, %v489_v14 }
  0x46   : > { %1040 = vst [vmem:[%s1275_s5 + $0x18] sm:$0xff] %v946_v57   ;;  %v1006_v31 = vpack.c.bf16 %v492_v19, %v491_v18  ;;  %1041 = vst [vmem:[%s1275_s5 + $0x20] sm:$0xff] %v951_v22  }
  0x47   : > { %1042 = vst [vmem:[%s1275_s5 + $0x28] sm:$0xff] %v956_v23   ;;  %1043 = vst [vmem:[%s1275_s5 + $0x30] sm:$0xff] %v961_v58  }
  0x48   : > { %1044 = vst [vmem:[%s1275_s5 + $0x38] sm:$0xff] %v966_v24   ;;  %1045 = vst [vmem:[%s1275_s5 + $0x40] sm:$0xff] %v971_v25  }
  0x49   : > { %1046 = vst [vmem:[%s1275_s5 + $0x48] sm:$0xff] %v976_v26   ;;  %1047 = vst [vmem:[%s1275_s5 + $0x50] sm:$0xff] %v981_v27  }
  0x4a   : > { %1048 = vst [vmem:[%s1275_s5 + $0x58] sm:$0xff] %v986_v28   ;;  %1049 = vst [vmem:[%s1275_s5 + $0x60] sm:$0xff] %v991_v29  }
  0x4b   : > { %1050 = vst [vmem:[%s1275_s5 + $0x68] sm:$0xff] %v996_v30   ;;  %1051 = vst [vmem:[%s1275_s5 + $0x70] sm:$0xff] %v1001_v59  }
  0x4c   : > { %1052 = vst [vmem:[%s1275_s5 + $0x78] sm:$0xff] %v1006_v31  }
  0x4d PF: > { %s14_s15 = sadd.s32 1, %s1067_s15  }
  0x4e   : > { %p11_p4 = scmp.ge.s32.totalorder %s14_s15, 4  }
  0x50   :  { %13 = sbr.rel (!%p11_p4) target bundleno = 1 (0x1), region = 69 }

// kernel: bottleneck_forward.5
= control target key start
LH: loop header
LB: loop body
LE: loop exit
PB: predicated region body
PF: predicated region fallthrough
CT: control target
= control target key end

     0   :  { %s8564_s27 = smov 0   ;;  %s8566_s28 = smov 0   ;;  %s10157_s0 = inlined_call_operand.vmem [shape: bf16[2,4,8,8,128], index: 0, kind: input, shape index: {}, may-alias: {0,1,2}]   ;;  %s10158_s1 = inlined_call_operand.vmem [shape: bf16[2,4,8,8,128], index: 1, kind: input, shape index: {}, may-alias: {0,1,2}]   ;;  %s10159_s2 = inlined_call_operand.vmem [shape: bf16[2,4,8,8,128], index: 2, kind: input, shape index: {}, may-alias: {0,1,2}]   ;;  %s10160_s3 = inlined_call_operand.vmem [shape: f32[1,128], index: 3, kind: input, shape index: {}]   ;;  %s10161_s4 = inlined_call_operand.vmem [shape: f32[1,128], index: 4, kind: input, shape index: {}]   ;;  %s10162_s5 = inlined_call_operand.vmem [shape: bf16[3,3,384,128], index: 5, kind: input, shape index: {}]   ;;  %s10163_s6 = inlined_call_operand.vmem [shape: bf16[2,4,8,8,128], index: 6, kind: output, shape index: {0}]   ;;  %s10164_s7 = inlined_call_operand.vmem [shape: f32[16,128], index: 7, kind: output, shape index: {1}]   ;;  %s10165_s8 = inlined_call_operand.vmem [shape: f32[16,128], index: 8, kind: output, shape index: {2}]  }
   0x1   :  { %s8568_s29 = smov 0   ;;  %s8570_s30 = smov 0  }
   0x2   :  { %s8572_s9 = smov 0  }
   0x3 LB: > { %10171 = sst [smem:[#allocation4_spill]] %s8510_s30  ;;  %s31_s10 = sadd.s32 1, %s8506_s29  ;;  %s8514_s9 = sphi %s8572_s9, %s19_s9   ;;  %s8510_s30 = sphi %s8570_s30, %s10209_s30   ;;  %s8506_s29 = sphi %s8568_s29, %s10208_s29   ;;  %s8502_s28 = sphi %s8566_s28, %s10204_s28   ;;  %s8498_s27 = sphi %s8564_s27, %s10207_s27  }
   0x4   : > { %s38_s11 = sadd.s32 1, %s8510_s30  ;;  %p32_p0 = scmp.ge.s32.totalorder %s31_s10, 4 }
   0x5   : > { %p6335_p1 = scmp.ge.s32.totalorder %s8514_s9, 1  ;;  %p364_p2 = scmp.lt.s32.totalorder %s8514_s9, 9 }
   0x6   : > { %s10211_s10 = smov (%p32_p0, %s31_s10), 0  ;;  %s10213_s11 = smov (!%p32_p0, %s38_s11), %s8510_s30 }
   0x7   : > { %10172 = sst [smem:[#allocation5_spill]] %s10211_s10  ;;  %p365_p3 = pnand %p6335_p1, %p364_p2 }
   0x8   : > { %p40_p4 = scmp.ge.s32.totalorder %s10213_s11, 2 }
   0x9   : > { %368 = sbr.rel (%p365_p3) target bundleno = 1107 (0x453), region = 44 }
   0xa   : > { %s10215_s11 = smov (%p40_p4, %s10213_s11), 0 }
   0xb   : > { %10173 = sst [smem:[#allocation6_spill]] %s10215_s11 }
   0xe   : > { %s6336_s12 = sadd.s32 4294967295, %s8498_s27  ;;  %p446_p5 = scmp.lt.s32.totalorder %s8502_s28, 1 }
   0xf   : > { %p444_p6 = scmp.gt.s32.totalorder %s6336_s12, 0  ;;  %p6337_p7 = scmp.lt.s32.totalorder %s6336_s12, 3 }
  0x10   : > { %s10217_s28 = smov (!%p446_p5, %s8502_s28), 1  ;;  %p462_p8 = scmp.lt.s32.totalorder %s8498_s27, 3 }
  0x11   : > { %s10219_s12 = smov (!%p444_p6, %s6336_s12), 0  ;;  %s6343_s13 = sshll.u32 %s10217_s28, 5 }
  0x12   : > { %s10221_s12 = smov (!%p6337_p7, %s10219_s12), 3  ;;  %s471_s16 = sadd.s32 1, %s8498_s27 }
  0x13   : > { %s463_s14 = scalar_select %p462_p8, %s8498_s27, 3 }
  0x14   : > { %s6342_s15 = sshll.u32 %s10221_s12, 3  ;;  %p472_p9 = scmp.lt.s32.totalorder %s471_s16, 3 }
  0x15   : > { %s452_s17 = sadd.s32 %s6343_s13, %s6342_s15  ;;  %s6345_s18 = sshll.u32 %s463_s14, 3 }
  0x16   : > { %s6344_s19 = sshll.u32 %s452_s17, 2  ;;  %s466_s20 = sadd.s32 %s6345_s18, %s6343_s13 }
  0x17   : > { %s8603_s23 = scalar_lea.vmem %s10157_s0, %s6344_s19  ;;  %s6347_s24 = sshll.u32 %s466_s20, 2 }
  0x18   : > { %s8608_s11 = scalar_lea.vmem %s10158_s1, %s6347_s24  ;;  %s8613_s30 = scalar_lea.vmem %s10163_s6, %s6347_s24 }
  0x19   : > { %s6357_s14 = sshll.u32 %s10217_s28, 3  ;;  %s10223_s16 = smov (!%p472_p9, %s471_s16), 3 }
  0x1a   : > { %s8618_s18 = scalar_lea.vmem %s10164_s7, %s6357_s14  ;;  %s8623_s21 = scalar_lea.vmem %s10165_s8, %s6357_s14 }
  0x1b   : > { %s10225_s16 = smov (!%p472_p9, %s10223_s16), 3  ;;  %p508_p10 = scmp.eq.s32.totalorder %s8498_s27, 0 }
  0x1c   : > { %s6351_s22 = sshll.u32 %s10225_s16, 3  ;;  %v8516_v0 = vmov (%p508_p10), 0.0   ;;  %v8517_v1 = vmov (%p508_p10), 0  }
  0x1d   : > { %s480_s25 = sadd.s32 %s6351_s22, %s6343_s13  ;;  %512 = sbr.rel (!%p508_p10) target bundleno = 40 (0x28), region = 48  ;;  %513 = vst [vmem:[%s8618_s18] sm:$0xff] (%p508_p10), %v8516_v0  ;;  %514 = vst [vmem:[%s8623_s21] sm:$0xff] (%p508_p10), %v8516_v0 }
  0x1e   : > { %s6353_s26 = sshll.u32 %s480_s25, 2  ;;  %515 = vst [vmem:[#allocation2] sm:$0xf] (%p508_p10), %v8517_v1  ;;  %516 = vst [vmem:[#allocation2 + $0x4] sm:$0x1] (%p508_p10), %v8517_v1 }
  0x1f   : > { %s8629_s28 = scalar_lea.vmem %s10159_s2, %s6353_s26  ;;  %517 = vst [vmem:[#allocation2 + $0x8] sm:$0xf] (%p508_p10), %v8517_v1  ;;  %518 = vst [vmem:[#allocation2 + $0xc] sm:$0x1] (%p508_p10), %v8517_v1 }
  0x20   : > { %519 = vst [vmem:[#allocation2 + $0x10] sm:$0xf] (%p508_p10), %v8517_v1  ;;  %520 = vst [vmem:[#allocation2 + $0x14] sm:$0x1] (%p508_p10), %v8517_v1 }
  0x21   : > { %521 = vst [vmem:[#allocation2 + $0x18] sm:$0xf] (%p508_p10), %v8517_v1  ;;  %522 = vst [vmem:[#allocation2 + $0x1c] sm:$0x1] (%p508_p10), %v8517_v1 }
  0x22   : > { %523 = vst [vmem:[#allocation2 + $0x20] sm:$0xf] %v8517_v1  ;;  %524 = vst [vmem:[#allocation2 + $0x24] sm:$0x1] %v8517_v1 }
  0x23   : > { %525 = vst [vmem:[#allocation2 + $0x28] sm:$0xf] %v8517_v1  ;;  %526 = vst [vmem:[#allocation2 + $0x2c] sm:$0x1] %v8517_v1 }
  0x24   : > { %527 = vst [vmem:[#allocation2 + $0x30] sm:$0xf] %v8517_v1  ;;  %528 = vst [vmem:[#allocation2 + $0x34] sm:$0x1] %v8517_v1 }
  0x25   : > { %529 = vst [vmem:[#allocation2 + $0x38] sm:$0xf] %v8517_v1  ;;  %530 = vst [vmem:[#allocation2 + $0x3c] sm:$0x1] %v8517_v1 }
  0x26   : > { %531 = vst [vmem:[#allocation2 + $0x40] sm:$0xf] %v8517_v1  ;;  %532 = vst [vmem:[#allocation2 + $0x44] sm:$0x1] %v8517_v1 }
  0x27   : > { %533 = vst [vmem:[#allocation2 + $0x48] sm:$0xf] %v8517_v1  ;;  %534 = vst [vmem:[#allocation2 + $0x4c] sm:$0x1] %v8517_v1 }
  0x28 PF: > { %v8518_v2 = vmov 0.0   ;;  %p6360_p11 = scmp.le.s32.totalorder %s8498_s27, 0 }
  0x29   : > { %535 = vst [vmem:[#allocation3 + $0x30] sm:$0xff] %v8518_v2  ;;  %536 = vst [vmem:[#allocation3] sm:$0xff] %v8518_v2 }
  0x2a   : > { %537 = vst [vmem:[#allocation3 + $0x18] sm:$0xff] %v8518_v2  ;;  %538 = vst [vmem:[#allocation3 + $0x10] sm:$0xff] %v8518_v2  ;;  %546 = sbr.rel (%p6360_p11) target bundleno = 390 (0x186), region = 52 }
  0x2b   : > { %539 = vst [vmem:[#allocation3 + $0x8] sm:$0xff] %v8518_v2  ;;  %540 = vst [vmem:[#allocation3 + $0x20] sm:$0xff] %v8518_v2 }
  0x2c   : > { %541 = vst [vmem:[#allocation3 + $0x28] sm:$0xff] %v8518_v2  ;;  %542 = vst [vmem:[#allocation3 + $0x38] sm:$0xff] %v8518_v2 }
  0x2f   : > { %v8080_v3 = vld [vmem:[%s10162_s5 + $0x78] sm:$0xff]   ;;  %v8083_v6 = vld [vmem:[%s10162_s5 + $0x70] sm:$0xff]   ;;  %v8086_v9 = vld [vmem:[%s10162_s5 + $0x68] sm:$0xff]   ;;  %vm714_vm0 = vcmask 1043456   ;;  %vm715_vm1 = vsmask.f32 7938 }
  0x30   : > { %v8081_v4 = vld [vmem:[%s10162_s5 + $0x38] sm:$0xff]   ;;  %7353 = vmatprep.subr.bf16.mxu0 %v8080_v3  ;;  %v8084_v7 = vld [vmem:[%s10162_s5 + $0x30] sm:$0xff]   ;;  %v8087_v10 = vld [vmem:[%s10162_s5 + $0x28] sm:$0xff]   ;;  %vm720_vm2 = vcmask 1040384   ;;  %vm721_vm3 = vsmask.f32 256 }
  0x31   : > { %v8082_v5 = vld [vmem:[%s10162_s5 + $0xb8] sm:$0xff]   ;;  %7354 = vmatpush3.bf16.msra.mxu0 %v8081_v4  ;;  %v8085_v8 = vld [vmem:[%s10162_s5 + $0xb0] sm:$0xff]   ;;  %v8088_v11 = vld [vmem:[%s10162_s5 + $0xa8] sm:$0xff]  }
  0x32   : > { %7821 = vmatprep.subr.bf16.mxu1 %v8082_v5  ;;  %7355 = vmatprep.subr.bf16.mxu0 %v8083_v6  ;;  %v8089_v12 = vld [vmem:[%s10162_s5 + $0x60] sm:$0xff]   ;;  %v8092_v15 = vld [vmem:[%s10162_s5 + $0x58] sm:$0xff]   ;;  %v8095_v18 = vld [vmem:[%s10162_s5 + $0x50] sm:$0xff]  }
  0x33   : > { %7822 = vmatpush3.bf16.msra.mxu1 %v8082_v5  ;;  %v8090_v13 = vld [vmem:[%s10162_s5 + $0x20] sm:$0xff]   ;;  %v8094_v16 = vld [vmem:[%s10162_s5 + $0x98] sm:$0xff]   ;;  %v8097_v19 = vld [vmem:[%s10162_s5 + $0x90] sm:$0xff]  }
  0x34   : > { %7823 = vmatprep.subr.bf16.mxu1 %v8085_v8  ;;  %v8091_v14 = vld [vmem:[%s10162_s5 + $0xa0] sm:$0xff]   ;;  %v8093_v17 = vld [vmem:[%s10162_s5 + $0x18] sm:$0xff]   ;;  %v8096_v20 = vld [vmem:[%s10162_s5 + $0x10] sm:$0xff]  }
  0x35   : > { %7356 = vmatpush3.bf16.msra.mxu0 %v8084_v7  ;;  %v8098_v21 = vld [vmem:[%s10162_s5 + $0x48] sm:$0xff]   ;;  %v8101_v24 = vld [vmem:[%s10162_s5 + $0x40] sm:$0xff]   ;;  %v8106_v34 = vld [vmem:[%s10162_s5 + $0x138] sm:$0xff]  }
  0x36   : > { %7357 = vmatprep.subr.bf16.mxu0 %v8086_v9  ;;  %v8100_v22 = vld [vmem:[%s10162_s5 + $0x88] sm:$0xff]   ;;  %v7274_v25 = vld [vmem:[%s8603_s23] sm:$0xff]   ;;  %v8728_v38 = vld [vmem:[%s10162_s5 + $0x178] sm:$0xff]  }
  0x37   : > { %7824 = vmatpush3.bf16.msra.mxu1 %v8085_v8  ;;  %v8099_v23 = vld [vmem:[%s10162_s5 + $0x8] sm:$0xff]   ;;  %v8704_v26 = vld [vmem:[%s10160_s3] ss:$0 sm:$0xff]  ;;  %v7275_v27 = vunpack.c.l.bf16 %v7274_v25  ;;  %v7276_v28 = vunpack.c.h.bf16 %v7274_v25  ;;  %v8732_v44 = vld [vmem:[#allocation2 + $0x4] sm:$0x1] }
  0x38   : > { %7825 = vmatprep.subr.bf16.mxu1 %v8088_v11  ;;  %v8103_v29 = vld [vmem:[%s10162_s5 + $0x80] sm:$0xff]   ;;  %v7341_v37 = vld [vmem:[%s8603_s23 + $0x8] sm:$0xff]   ;;  %vm8745_vm4 = vmand %vm714_vm0, %vm715_vm1 }
  0x39   : > { %7358 = vmatpush3.bf16.msra.mxu0 %v8087_v10  ;;  %v8712_v30 = vld [vmem:[%s10161_s4] ss:$0 sm:$0xff]  ;;  %v570_v32 = vmul.f32 %v7275_v27, %v8704_v26  ;;  %v571_v33 = vmul.f32 %v7276_v28, %v8704_v26  ;;  %v7279_v40 = vunpack.c.l.bf16 %v7341_v37  ;;  %v7280_v41 = vunpack.c.h.bf16 %v7341_v37  ;;  %v717_v53 = vld [vmem:[#allocation2 + $0x8] sm:$0xf]  ;;  %v723_v54 = vld [vmem:[#allocation2 + $0xc] sm:$0x1] }
  0x3a   : > { %7359 = vmatprep.subr.bf16.mxu0 %v8089_v12  ;;  %v8102_v31 = vld [vmem:[%s10162_s5] sm:$0xff]   ;;  %v726_v62 = vld [vmem:[#allocation2 + $0x10] sm:$0xf]  ;;  %v729_v63 = vld [vmem:[#allocation2 + $0x14] sm:$0x1] }
  0x3b   : > { %7826 = vmatpush3.bf16.msra.mxu1 %v8088_v11  ;;  %v585_v35 = vadd.f32 %v8712_v30, %v570_v32  ;;  %v586_v36 = vadd.f32 %v8712_v30, %v571_v33  ;;  %v8730_v43 = vld [vmem:[#allocation2] sm:$0xf]  ;;  %v572_v46 = vmul.f32 %v7279_v40, %v8704_v26  ;;  %v573_v48 = vmul.f32 %v7280_v41, %v8704_v26  ;;  %vm8751_vm5 = vmand %vm720_vm2, %vm721_vm3  ;;  %v741_v33 = vld [vmem:[#allocation2 + $0x24] sm:$0x1] }
  0x3c   : > { %7827 = vmatprep.subr.bf16.mxu1 %v8091_v14  ;;  %v8740_v55 = vcombine.low %v8730_v43, %v8732_v44  ;;  %v784_v1 = vld [vmem:[#allocation2] sm:$0xe]  ;;  %v7343_v37 = vld [vmem:[%s8603_s23 + $0x18] sm:$0xff]   ;;  %v8159_v0 = vld [vmem:[%s10162_s5 + $0x1b0] sm:$0xff]  }
  0x3d   : > { %7360 = vmatpush3.bf16.msra.mxu0 %v8090_v13  ;;  %v593_v39 = vmax.f32 %v585_v35, 0.0  ;;  %v594_v42 = vmax.f32 %v586_v36, 0.0  ;;  %v587_v51 = vadd.f32 %v8712_v30, %v572_v46  ;;  %v588_v57 = vadd.f32 %v8712_v30, %v573_v48  ;;  %v738_v27 = vld [vmem:[#allocation2 + $0x20] sm:$0xf] }
  0x3e   : > { %7361 = vmatprep.subr.bf16.mxu0 %v8092_v15  ;;  %v835_v7 = vshll.u32 %v8740_v55, 16 }
  0x3f   : > { %7828 = vmatpush3.bf16.msra.mxu1 %v8091_v14  ;;  %v7249_v45 = vpack.c.bf16 %v593_v39, %v593_v39  ;;  %v7250_v47 = vpack.c.bf16 %v594_v42, %v594_v42  ;;  %v595_v60 = vmax.f32 %v587_v51, 0.0  ;;  %v596_v2 = vmax.f32 %v588_v57, 0.0 }
  0x40   : > { %7829 = vmatprep.subr.bf16.mxu1 %v8094_v16 }
  0x41   : > { %7362 = vmatpush3.bf16.msra.mxu0 %v8093_v17  ;;  %v634_v49 = vshrl.u32 %v7249_v45, 16  ;;  %v637_v50 = vshll.u32 %v7249_v45, 16  ;;  %v642_v52 = vshrl.u32 %v7250_v47, 16  ;;  %v645_v56 = vshll.u32 %v7250_v47, 16 }
  0x42   : > { %7363 = vmatprep.subr.bf16.mxu0 %v8095_v18  ;;  %v7251_v5 = vpack.c.bf16 %v595_v60, %v595_v60  ;;  %v7252_v9 = vpack.c.bf16 %v596_v2, %v596_v2  ;;  %v6379_v17 = vcombine.low %v784_v1, %v8732_v44  ;;  %v7287_v44 = vunpack.c.l.bf16 %v7343_v37 }
  0x43   : > { %7830 = vmatpush3.bf16.msra.mxu1 %v8094_v16  ;;  %v636_v58 = vrot.slane %v634_v49, 7  ;;  %v644_v61 = vrot.slane %v642_v52, 7 }
  0x44   : > { %7831 = vmatprep.subr.bf16.mxu1 %v8097_v19  ;;  %v650_v12 = vshrl.u32 %v7251_v5, 16  ;;  %v653_v13 = vshll.u32 %v7251_v5, 16  ;;  %v658_v16 = vshrl.u32 %v7252_v9, 16  ;;  %v912_v40 = vrot.slane %v6379_v17, 1 }
  0x45   : > { %7364 = vmatpush3.bf16.msra.mxu0 %v8096_v20  ;;  %v639_v3 = vor.u32 %v637_v50, %v636_v58  ;;  %v640_v4 = vrot.slane %v636_v58, 4  ;;  %v647_v6 = vor.u32 %v645_v56, %v644_v61  ;;  %v648_v8 = vrot.slane %v644_v61, 4  ;;  %v7342_v20 = vld [vmem:[%s8603_s23 + $0x10] sm:$0xff]  }
  0x46   : > { %7365 = vmatprep.subr.bf16.mxu0 %v8098_v21  ;;  %v652_v18 = vrot.slane %v650_v12, 7  ;;  %v661_v21 = vshll.u32 %v7252_v9, 16  ;;  %v660_v25 = vrot.slane %v658_v16, 7  ;;  %v7284_v28 = vunpack.c.h.bf16 %v7342_v20 }
  0x47   : > { %7832 = vmatpush3.bf16.msra.mxu1 %v8097_v19  ;;  %v718_v10 = vsel %vm8745_vm4, %v639_v3, %v717_v53  ;;  %v724_v11 = vsel %vm8751_vm5, %v640_v4, %v723_v54  ;;  %v727_v14 = vsel %vm8745_vm4, %v647_v6, %v726_v62  ;;  %v730_v15 = vsel %vm8751_vm5, %v648_v8, %v729_v63  ;;  %v732_v19 = vld [vmem:[#allocation2 + $0x18] sm:$0xf] }
  0x48   : > { %7833 = vmatprep.subr.bf16.mxu1 %v8100_v22  ;;  %719 = vst [vmem:[#allocation2 + $0x8] sm:$0xf] %v718_v10  ;;  %725 = vst [vmem:[#allocation2 + $0xc] sm:$0x1] %v724_v11  ;;  %v656_v32 = vrot.slane %v652_v18, 4  ;;  %v663_v35 = vor.u32 %v661_v21, %v660_v25  ;;  %v664_v36 = vrot.slane %v660_v25, 4  ;;  %v575_v39 = vmul.f32 %v7284_v28, %v8704_v26 }
  0x49   : > { %7366 = vmatpush3.bf16.msra.mxu0 %v8099_v23  ;;  %728 = vst [vmem:[#allocation2 + $0x10] sm:$0xf] %v727_v14  ;;  %731 = vst [vmem:[#allocation2 + $0x14] sm:$0x1] %v730_v15  ;;  %v735_v23 = vld [vmem:[#allocation2 + $0x1c] sm:$0x1]  ;;  %v576_v52 = vmul.f32 %v7287_v44, %v8704_v26  ;;  %v7288_v58 = vunpack.c.h.bf16 %v7343_v37 }
  0x4a   : > { %7367 = vmatprep.subr.bf16.mxu0 %v8101_v24  ;;  %v7283_v24 = vunpack.c.l.bf16 %v7342_v20  ;;  %v736_v42 = vsel %vm8751_vm5, %v656_v32, %v735_v23  ;;  %v739_v46 = vsel %vm8745_vm4, %v663_v35, %v738_v27  ;;  %v742_v47 = vsel %vm8751_vm5, %v664_v36, %v741_v33  ;;  %v747_v32 = vld [vmem:[#allocation2 + $0x2c] sm:$0x1]  ;;  %v8116_v33 = vld [vmem:[%s10162_s5 + $0x130] sm:$0xff]  }
  0x4b   : > { %7834 = vmatpush3.bf16.msra.mxu1 %v8100_v22  ;;  %v833_v22 = vshrl.u32 %v8740_v55, 16  ;;  %737 = vst [vmem:[#allocation2 + $0x1c] sm:$0x1] %v736_v42  ;;  %v590_v48 = vadd.f32 %v8712_v30, %v575_v39  ;;  %740 = vst [vmem:[#allocation2 + $0x20] sm:$0xf] %v739_v46  ;;  %v591_v63 = vadd.f32 %v8712_v30, %v576_v52  ;;  %v8117_v39 = vld [vmem:[%s10162_s5 + $0xf0] sm:$0xff]  }
  0x4c   : > { %7835 = vmatprep.subr.bf16.mxu1 %v8103_v29  ;;  %743 = vst [vmem:[#allocation2 + $0x24] sm:$0x1] %v742_v47  ;;  %v577_v17 = vmul.f32 %v7288_v58, %v8704_v26 }
  0x4d   : > { %7368 = vmatpush3.bf16.msra.mxu0 %v8102_v31  ;;  %v655_v31 = vor.u32 %v653_v13, %v652_v18  ;;  %v598_v4 = vmax.f32 %v590_v48, 0.0  ;;  %v599_v12 = vmax.f32 %v591_v63, 0.0  ;;  %v759_v63 = vld [vmem:[#allocation2 + $0x3c] sm:$0x1] }
  0x4e   : > { %7405 = vmatprep.subr.bf16.mxu0 %v8106_v34  ;;  %v574_v34 = vmul.f32 %v7283_v24, %v8704_v26 }
  0x4f   : > { %7836 = vmatpush3.bf16.msra.mxu1 %v8103_v29  ;;  %v837_v29 = vrot.slane %v835_v7, 1  ;;  %v733_v41 = vsel %vm8745_vm4, %v655_v31, %v732_v19  ;;  %v769_v49 = vld [vmem:[#allocation2 + $0x8] sm:$0xf]  ;;  %v777_v50 = vld [vmem:[#allocation2 + $0xc] sm:$0x1]  ;;  %v7254_v16 = vpack.c.bf16 %v598_v4, %v598_v4  ;;  %v7255_v42 = vpack.c.bf16 %v599_v12, %v599_v12 }
  0x50   : > { %7845 = vmatprep.subr.bf16.mxu1 %v8728_v38  ;;  %734 = vst [vmem:[#allocation2 + $0x18] sm:$0xf] %v733_v41  ;;  %v589_v45 = vadd.f32 %v8712_v30, %v574_v34  ;;  %v785_v51 = vld [vmem:[#allocation2 + $0x8] sm:$0xe]  ;;  %v6372_v53 = vcombine.low %v769_v49, %v777_v50  ;;  %v8781_v55 = vld [vmem:[#allocation2 + $0x10] sm:$0xf]  ;;  %v6387_v23 = vcombine.low %v8730_v43, %v769_v49 }
  0x51   : > { %v6380_v54 = vcombine.low %v785_v51, %v777_v50  ;;  %v778_v56 = vld [vmem:[#allocation2 + $0x14] sm:$0x1]  ;;  %v786_v57 = vld [vmem:[#allocation2 + $0x10] sm:$0xe]  ;;  %v838_v5 = vor.u32 %v837_v29, %v833_v22  ;;  %v8108_v29 = vld [vmem:[%s10162_s5 + $0xf8] sm:$0xff]   ;;  %v592_v43 = vadd.f32 %v8712_v30, %v577_v17  ;;  %v674_v44 = vshrl.u32 %v7254_v16, 16 }
  0x52   : > { %v6373_v60 = vcombine.low %v8781_v55, %v778_v56  ;;  %v6381_v61 = vcombine.low %v786_v57, %v778_v56  ;;  %v597_v62 = vmax.f32 %v589_v45, 0.0  ;;  %v840_v1 = vshrl.u32 %v6372_v53, 16  ;;  %v779_v14 = vld [vmem:[#allocation2 + $0x1c] sm:$0x1]  ;;  %v8789_v22 = vld [vmem:[#allocation2 + $0x20] sm:$0xf] }
  0x53   : > { %v842_v2 = vshll.u32 %v6372_v53, 16  ;;  %v913_v3 = vrot.slane %v6380_v54, 1  ;;  %v8792_v27 = vld [vmem:[#allocation2 + $0x24] sm:$0x1]  ;;  %v744_v31 = vld [vmem:[#allocation2 + $0x28] sm:$0xf] }
  0x54   : > { %v914_v6 = vrot.slane %v6381_v61, 1  ;;  %v849_v7 = vshll.u32 %v6373_v60, 16  ;;  %v7253_v8 = vpack.c.bf16 %v597_v62, %v597_v62  ;;  %v847_v11 = vshrl.u32 %v6373_v60, 16  ;;  %v788_v48 = vld [vmem:[#allocation2 + $0x20] sm:$0xe]  ;;  %v8119_v51 = vld [vmem:[%s10162_s5 + $0x128] sm:$0xff]  }
  0x55   : > { %v844_v9 = vrot.slane %v842_v2, 1  ;;  %v6389_v10 = vcombine.low %v912_v40, %v913_v3  ;;  %v8118_v40 = vld [vmem:[%s10162_s5 + $0x170] sm:$0xff]   ;;  %v8809_v41 = vcombine.low %v8789_v22, %v8792_v27  ;;  %v676_v52 = vrot.slane %v674_v44, 7  ;;  %v8122_v57 = vld [vmem:[%s10162_s5 + $0x168] sm:$0xff]   ;;  %v756_v62 = vld [vmem:[#allocation2 + $0x38] sm:$0xf] }
  0x56   : > { %v851_v21 = vrot.slane %v849_v7, 1  ;;  %v666_v24 = vshrl.u32 %v7253_v8, 16  ;;  %v669_v25 = vshll.u32 %v7253_v8, 16  ;;  %v750_v49 = vld [vmem:[#allocation2 + $0x30] sm:$0xf]  ;;  %v677_v53 = vshll.u32 %v7254_v16, 16 }
  0x57   : > { %v8785_v13 = vld [vmem:[#allocation2 + $0x18] sm:$0xf]  ;;  %v845_v18 = vor.u32 %v844_v9, %v840_v1  ;;  %7837 = vmatprep.mubr.bf16.mxu1 %v6389_v10  ;;  %v753_v50 = vld [vmem:[#allocation2 + $0x34] sm:$0x1]  ;;  %v682_v54 = vshrl.u32 %v7255_v42, 16  ;;  %v685_v61 = vshll.u32 %v7255_v42, 16  ;;  %v6383_v7 = vcombine.low %v788_v48, %v8792_v27 }
  0x58   : > { %v787_v15 = vld [vmem:[#allocation2 + $0x18] sm:$0xe]  ;;  %v6374_v19 = vcombine.low %v8785_v13, %v779_v14  ;;  %v668_v36 = vrot.slane %v666_v24, 7  ;;  %v852_v45 = vor.u32 %v851_v21, %v847_v11  ;;  %v6390_v1 = vcombine.low %v8781_v55, %v8785_v13  ;;  %v8123_v55 = vld [vmem:[%s10162_s5 + $0x120] sm:$0xff]   ;;  %v8836_v13 = vld [vmem:[#allocation2 + $0x8] sm:$0xf] }
  0x59   : > { %v6382_v20 = vcombine.low %v787_v15, %v779_v14  ;;  %v6388_v28 = vcombine.low %v838_v5, %v845_v18  ;;  %v679_v2 = vor.u32 %v677_v53, %v676_v52  ;;  %v680_v3 = vrot.slane %v676_v52, 4  ;;  %v8838_v14 = vld [vmem:[#allocation2 + $0x10] sm:$0xf]  ;;  %v1314_v15 = vld [vmem:[#allocation2 + $0xc] sm:$0x1]  ;;  %v8124_v17 = vld [vmem:[%s10162_s5 + $0xe0] sm:$0xff]  }
  0x5a   : > { %v854_v34 = vshrl.u32 %v6374_v19, 16  ;;  %v856_v35 = vshll.u32 %v6374_v19, 16  ;;  %v671_v30 = vor.u32 %v669_v25, %v668_v36  ;;  %v672_v47 = vrot.slane %v668_v36, 4  ;;  %v1315_v16 = vld [vmem:[#allocation2 + $0x14] sm:$0x1]  ;;  %v8125_v21 = vld [vmem:[%s10162_s5 + $0x160] sm:$0xff]  }
  0x5b   : > { %v915_v26 = vrot.slane %v6382_v20, 1  ;;  %1192 = vmatprep.mubr.bf16.mxu0 %v6388_v28  ;;  %v684_v4 = vrot.slane %v682_v54, 7  ;;  %v600_v8 = vmax.f32 %v592_v43, 0.0  ;;  %v751_v11 = vsel %vm8745_vm4, %v679_v2, %v750_v49  ;;  %v1322_v25 = vld [vmem:[#allocation2 + $0x8] sm:$0xe]  ;;  %v8137_v42 = vld [vmem:[%s10162_s5 + $0x158] sm:$0xff]  }
  0x5c   : > { %1193 = vmatmul.mubr.bf16.vlgmr.msra.gmra.mxu0 %v6387_v23  ;;  %v858_v46 = vrot.slane %v856_v35, 1  ;;  %v745_v58 = vsel %vm8745_vm4, %v671_v30, %v744_v31  ;;  %v748_v60 = vsel %vm8751_vm5, %v672_v47, %v747_v32  ;;  %v754_v12 = vsel %vm8751_vm5, %v680_v3, %v753_v50  ;;  %752 = vst [vmem:[#allocation2 + $0x30] sm:$0xf] %v751_v11  ;;  %v1323_v31 = vld [vmem:[#allocation2 + $0x10] sm:$0xe] }
  0x5d   : > { %v6392_v37 = vcombine.low %v914_v6, %v915_v26  ;;  %7406 = vmatpush3.bf16.msra.mxu0 %v8108_v29  ;;  %746 = vst [vmem:[#allocation2 + $0x28] sm:$0xf] %v745_v58  ;;  %749 = vst [vmem:[#allocation2 + $0x2c] sm:$0x1] %v748_v60  ;;  %v863_v6 = vshll.u32 %v8809_v41, 16  ;;  %v687_v9 = vor.u32 %v685_v61, %v684_v4  ;;  %v688_v10 = vrot.slane %v684_v4, 4 }
  0x5e   : > { %7407 = vmatprep.subr.bf16.mxu0 %v8116_v33  ;;  %v859_v56 = vor.u32 %v858_v46, %v854_v34  ;;  %755 = vst [vmem:[#allocation2 + $0x34] sm:$0x1] %v754_v12  ;;  %v8847_v20 = vpack.c.bf16 %v600_v8, %v600_v8  ;;  %v8853_v23 = vcombine.low %v8836_v13, %v1314_v15  ;;  %v861_v27 = vshrl.u32 %v8809_v41, 16  ;;  %v8128_v29 = vld [vmem:[%s10162_s5 + $0x118] sm:$0xff]   ;;  %v8138_v44 = vld [vmem:[%s10162_s5 + $0x110] sm:$0xff]  }
  0x5f   : > { %7838 = vmatmul.mubr.bf16.vlgmr.msra.gmra.mxu1 %v6392_v37  ;;  %v757_v18 = vsel %vm8745_vm4, %v687_v9, %v756_v62  ;;  %v760_v19 = vsel %vm8751_vm5, %v688_v10, %v759_v63  ;;  %v8856_v24 = vcombine.low %v8838_v14, %v1315_v16  ;;  %v865_v28 = vrot.slane %v863_v6, 1  ;;  %v8130_v37 = vld [vmem:[%s10162_s5 + $0xd8] sm:$0xff]   ;;  %v8139_v2 = vld [vmem:[%s10162_s5 + $0xd0] sm:$0xff]   ;;  %v1317_v4 = vld [vmem:[#allocation2 + $0x24] sm:$0x1] }
  0x60   : > { %7846 = vmatpush3.bf16.msra.mxu1 %v8728_v38  ;;  %v8121_v38 = vld [vmem:[%s10162_s5 + $0xe8] sm:$0xff]   ;;  %v6391_v5 = vcombine.low %v852_v45, %v859_v56  ;;  %758 = vst [vmem:[#allocation2 + $0x38] sm:$0xf] %v757_v18  ;;  %761 = vst [vmem:[#allocation2 + $0x3c] sm:$0x1] %v760_v19  ;;  %v916_v26 = vrot.slane %v6383_v7, 1  ;;  %v6431_v35 = vcombine.low %v1322_v25, %v1314_v15 }
  0x61   : > { %7847 = vmatprep.subr.bf16.mxu1 %v8118_v40  ;;  %7408 = vmatpush3.bf16.msra.mxu0 %v8117_v39  ;;  %v6432_v36 = vcombine.low %v1323_v31, %v1315_v16  ;;  %v690_v41 = vshrl.u32 %v8847_v20, 16  ;;  %v1373_v45 = vshll.u32 %v8853_v23, 16  ;;  %v1378_v46 = vshrl.u32 %v8856_v24, 16  ;;  %v1324_v58 = vld [vmem:[#allocation2 + $0x18] sm:$0xe]  ;;  %v8140_v3 = vld [vmem:[%s10162_s5 + $0x150] sm:$0xff]  }
  0x62   : > { %1200 = vmatprep.mubr.bf16.mxu0 %v6391_v5  ;;  %7409 = vmatprep.subr.bf16.mxu0 %v8119_v51  ;;  %v1380_v30 = vshll.u32 %v8856_v24, 16  ;;  %v8879_v47 = vrot.slane %v6431_v35, 1  ;;  %v866_v53 = vor.u32 %v865_v28, %v861_v27  ;;  %v1325_v5 = vld [vmem:[#allocation2 + $0x20] sm:$0xe]  ;;  %v8144_v25 = vld [vmem:[%s10162_s5 + $0x148] sm:$0xff]  }
  0x63   : > { %v8881_v51 = vld [vmem:[#allocation2 + $0x30] sm:$0xf]  ;;  %v8883_v52 = vrot.slane %v6432_v36, 1  ;;  %v1375_v12 = vrot.slane %v1373_v45, 1  ;;  %v8910_v35 = vld [vmem:[#allocation2 + $0x20] sm:$0xf] }
  0x64   : > { %7848 = vmatpush3.bf16.msra.mxu1 %v8118_v40  ;;  %1201 = vmatmul.mubr.bf16.gmra.mxu0 %v6390_v1  ;;  %v8862_v32 = vld [vmem:[#allocation2 + $0x28] sm:$0xf]  ;;  %v781_v33 = vld [vmem:[#allocation2 + $0x2c] sm:$0x1]  ;;  %v1371_v40 = vshrl.u32 %v8853_v23, 16  ;;  %v1382_v27 = vrot.slane %v1380_v30, 1 }
  0x65   : > { %7849 = vmatprep.subr.bf16.mxu1 %v8122_v57  ;;  %7410 = vmatpush3.bf16.msra.mxu0 %v8121_v38  ;;  %v789_v34 = vld [vmem:[#allocation2 + $0x28] sm:$0xe]  ;;  %v6376_v43 = vcombine.low %v8862_v32, %v781_v33  ;;  %v782_v54 = vld [vmem:[#allocation2 + $0x34] sm:$0x1]  ;;  %v790_v56 = vld [vmem:[#allocation2 + $0x30] sm:$0xe]  ;;  %v6393_v6 = vcombine.low %v8789_v22, %v8862_v32  ;;  %v6489_v31 = vcombine.low %v8879_v47, %v8883_v52 }
  0x66   : > { %7411 = vmatprep.subr.bf16.mxu0 %v8123_v55  ;;  %v6384_v39 = vcombine.low %v789_v34, %v781_v33  ;;  %v6377_v1 = vcombine.low %v8881_v51, %v782_v54  ;;  %v6385_v38 = vcombine.low %v790_v56, %v782_v54  ;;  %v8141_v55 = vld [vmem:[%s10162_s5 + $0x108] sm:$0xff]   ;;  %v6434_v32 = vcombine.low %v1325_v5, %v1317_v4  ;;  %v8908_v33 = vld [vmem:[#allocation2 + $0x18] sm:$0xf]  ;;  %v8147_v45 = vld [vmem:[%s10162_s5 + $0x140] sm:$0xff]  }
  0x67   : > { %v868_v48 = vshrl.u32 %v6376_v43, 16  ;;  %v870_v49 = vshll.u32 %v6376_v43, 16  ;;  %v8885_v62 = vld [vmem:[#allocation2 + $0x38] sm:$0xf]  ;;  %v783_v63 = vld [vmem:[#allocation2 + $0x3c] sm:$0x1]  ;;  %v1376_v30 = vor.u32 %v1375_v12, %v1371_v40  ;;  %v1383_v47 = vor.u32 %v1382_v27, %v1378_v46 }
  0x68   : > { %7850 = vmatpush3.bf16.msra.mxu1 %v8122_v57  ;;  %v917_v50 = vrot.slane %v6384_v39, 1  ;;  %v1316_v57 = vld [vmem:[#allocation2 + $0x1c] sm:$0x1]  ;;  %v791_v7 = vld [vmem:[#allocation2 + $0x38] sm:$0xe]  ;;  %v6378_v8 = vcombine.low %v8885_v62, %v783_v63  ;;  %v918_v11 = vrot.slane %v6385_v38, 1  ;;  %v6396_v24 = vcombine.low %v8881_v51, %v8885_v62 }
  0x69   : > { %7851 = vmatprep.subr.bf16.mxu1 %v8125_v21  ;;  %7412 = vmatpush3.bf16.msra.mxu0 %v8124_v17  ;;  %v872_v60 = vrot.slane %v870_v49, 1  ;;  %v6386_v10 = vcombine.low %v791_v7, %v783_v63  ;;  %v875_v15 = vshrl.u32 %v6377_v1, 16  ;;  %v877_v16 = vshll.u32 %v6377_v1, 16  ;;  %v8145_v39 = vld [vmem:[%s10162_s5 + $0x100] sm:$0xff]   ;;  %v8150_v52 = vld [vmem:[%s10162_s5 + $0x1f8] sm:$0xff]  }
  0x6a   : > { %7413 = vmatprep.subr.bf16.mxu0 %v8128_v29  ;;  %v6395_v61 = vcombine.low %v916_v26, %v917_v50  ;;  %v882_v17 = vshrl.u32 %v6378_v8, 16  ;;  %v884_v18 = vshll.u32 %v6378_v8, 16  ;;  %v6433_v28 = vcombine.low %v1324_v58, %v1316_v57  ;;  %v8939_v63 = vld [vmem:[#allocation2 + $0x30] sm:$0xf]  ;;  %v1318_v1 = vld [vmem:[#allocation2 + $0x2c] sm:$0x1] }
  0x6b   : > { %v873_v9 = vor.u32 %v872_v60, %v868_v48  ;;  %v919_v19 = vrot.slane %v6386_v10, 1  ;;  %v879_v29 = vrot.slane %v877_v16, 1  ;;  %v6425_v36 = vcombine.low %v8908_v33, %v1316_v57  ;;  %v8936_v60 = vld [vmem:[#allocation2 + $0x28] sm:$0xf]  ;;  %v1319_v38 = vld [vmem:[#allocation2 + $0x34] sm:$0x1] }
  0x6c   : > { %7852 = vmatpush3.bf16.msra.mxu1 %v8125_v21  ;;  %7841 = vmatprep.mubr.bf16.mxu1 %v6395_v61  ;;  %v8143_v21 = vld [vmem:[%s10162_s5 + $0xc8] sm:$0xff]   ;;  %v886_v26 = vrot.slane %v884_v18, 1  ;;  %v8927_v48 = vrot.slane %v6433_v28, 1  ;;  %v692_v23 = vrot.slane %v690_v41, 7  ;;  %v6488_v57 = vcombine.low %v1376_v30, %v1383_v47  ;;  %v8157_v41 = vld [vmem:[%s10162_s5 + $0x238] sm:$0xff]  }
  0x6d   : > { %7853 = vmatprep.subr.bf16.mxu1 %v8137_v42  ;;  %7414 = vmatpush3.bf16.msra.mxu0 %v8130_v37  ;;  %v6394_v22 = vcombine.low %v866_v53, %v873_v9  ;;  %v6398_v34 = vcombine.low %v918_v11, %v919_v19  ;;  %v880_v43 = vor.u32 %v879_v29, %v875_v15  ;;  %v1387_v49 = vshll.u32 %v6425_v36, 16  ;;  %v1327_v10 = vld [vmem:[#allocation2 + $0x30] sm:$0xe]  ;;  %v762_v12 = vld [vmem:[#allocation2 + $0x40] sm:$0xf]  ;;  %v8152_v16 = vld [vmem:[%s10162_s5 + $0x1b8] sm:$0xff]  }
  0x6e   : > { %7415 = vmatprep.subr.bf16.mxu0 %v8138_v44  ;;  %v887_v37 = vor.u32 %v886_v26, %v882_v17  ;;  %v8146_v44 = vld [vmem:[%s10162_s5 + $0xc0] sm:$0xff]   ;;  %v1453_v53 = vrot.slane %v6434_v32, 1  ;;  %v1385_v56 = vshrl.u32 %v6425_v36, 16  ;;  %v693_v61 = vshll.u32 %v8847_v20, 16  ;;  %v1328_v29 = vld [vmem:[#allocation2 + $0x38] sm:$0xe] }
  0x6f   : > { %1208 = vmatprep.mubr.bf16.mxu0 %v6394_v22  ;;  %7842 = vmatmul.mubr.bf16.gmra.mxu1 %v6398_v34  ;;  %v1389_v40 = vrot.slane %v1387_v49, 1  ;;  %v6427_v51 = vcombine.low %v8936_v60, %v1318_v1  ;;  %v6428_v62 = vcombine.low %v8939_v63, %v1319_v38  ;;  %v6487_v9 = vcombine.low %v8836_v13, %v8838_v14  ;;  %v765_v15 = vld [vmem:[#allocation2 + $0x44] sm:$0x1]  ;;  %v8158_v13 = vld [vmem:[%s10162_s5 + $0x1f0] sm:$0xff]   ;;  %v8166_v34 = vld [vmem:[%s10162_s5 + $0x228] sm:$0xff]  }
  0x70   : > { %7854 = vmatpush3.bf16.msra.mxu1 %v8137_v42  ;;  %1209 = vmatmul.mubr.bf16.gmra.mxu0 %v6393_v6  ;;  %v6426_v42 = vcombine.low %v8910_v35, %v1317_v4  ;;  %v6397_v50 = vcombine.low %v880_v43, %v887_v37  ;;  %v695_v20 = vor.u32 %v693_v61, %v692_v23  ;;  %v8160_v4 = vld [vmem:[%s10162_s5 + $0x230] sm:$0xff]   ;;  %v8163_v43 = vld [vmem:[%s10162_s5 + $0x1e8] sm:$0xff]  }
  0x71   : > { %7855 = vmatprep.subr.bf16.mxu1 %v8140_v3  ;;  %7416 = vmatpush3.bf16.msra.mxu0 %v8139_v2  ;;  %v6492_v2 = vcombine.low %v8927_v48, %v1453_v53  ;;  %v1390_v5 = vor.u32 %v1389_v40, %v1385_v56  ;;  %v1401_v7 = vshll.u32 %v6427_v51, 16  ;;  %v1408_v8 = vshll.u32 %v6428_v62, 16  ;;  %v8165_v53 = vld [vmem:[%s10162_s5 + $0x1a8] sm:$0xff]   ;;  %v8167_v40 = vld [vmem:[%s10162_s5 + $0x1e0] sm:$0xff]  }
  0x72   : > { %7417 = vmatprep.subr.bf16.mxu0 %v8141_v55  ;;  %7861 = vmatprep.mubr.bf16.mxu1 %v6489_v31  ;;  %v1394_v54 = vshll.u32 %v6426_v42, 16  ;;  %v1392_v46 = vshrl.u32 %v6426_v42, 16  ;;  %v1326_v55 = vld [vmem:[#allocation2 + $0x28] sm:$0xe]  ;;  %v1399_v17 = vshrl.u32 %v6427_v51, 16  ;;  %v1406_v18 = vshrl.u32 %v6428_v62, 16 }
  0x73   : > { %1216 = vmatprep.mubr.bf16.mxu0 %v6397_v50  ;;  %v6435_v11 = vcombine.low %v1326_v55, %v1318_v1  ;;  %v6436_v22 = vcombine.low %v1327_v10, %v1319_v38  ;;  %v763_v19 = vsel %vm8745_vm4, %v695_v20, %v762_v12  ;;  %v1403_v14 = vrot.slane %v1401_v7, 1  ;;  %v8993_v1 = vld [vmem:[#allocation2 + $0x18] sm:$0xf]  ;;  %v1854_v38 = vld [vmem:[#allocation2 + $0x14] sm:$0x1]  ;;  %v8168_v51 = vld [vmem:[%s10162_s5 + $0x1a0] sm:$0xff]  }
  0x74   : > { %7856 = vmatpush3.bf16.msra.mxu1 %v8140_v3  ;;  %v1396_v58 = vrot.slane %v1394_v54, 1  ;;  %v696_v3 = vrot.slane %v692_v23, 4  ;;  %764 = vst [vmem:[#allocation2 + $0x40] sm:$0xf] %v763_v19  ;;  %v1410_v59 = vrot.slane %v1408_v8, 1  ;;  %v6490_v50 = vcombine.low %v8908_v33, %v8910_v35  ;;  %v8181_v33 = vld [vmem:[%s10162_s5 + $0x218] sm:$0xff]  }
  0x75   : > { %7418 = vmatpush3.bf16.msra.mxu0 %v8143_v21  ;;  %7857 = vmatprep.subr.bf16.mxu1 %v8144_v25  ;;  %v8957_v21 = vld [vmem:[#allocation2 + $0x38] sm:$0xf]  ;;  %v1454_v27 = vrot.slane %v6435_v11, 1  ;;  %v1455_v32 = vrot.slane %v6436_v22, 1  ;;  %v1856_v55 = vld [vmem:[#allocation2 + $0x24] sm:$0x1]  ;;  %v6493_v10 = vcombine.low %v8936_v60, %v8939_v63 }
  0x76   : > { %7419 = vmatprep.subr.bf16.mxu0 %v8145_v39  ;;  %v1397_v6 = vor.u32 %v1396_v58, %v1392_v46  ;;  %v766_v28 = vsel %vm8751_vm5, %v696_v3, %v765_v15  ;;  %v1404_v39 = vor.u32 %v1403_v14, %v1399_v17  ;;  %v1411_v42 = vor.u32 %v1410_v59, %v1406_v18  ;;  %v8991_v58 = vld [vmem:[#allocation2 + $0x10] sm:$0xf]  ;;  %v1865_v17 = vld [vmem:[#allocation2 + $0x28] sm:$0xe]  ;;  %v8174_v60 = vld [vmem:[%s10162_s5 + $0x198] sm:$0xff]  }
  0x77   : > { %767 = vst [vmem:[#allocation2 + $0x44] sm:$0x1] %v766_v28  ;;  %v6495_v36 = vcombine.low %v1454_v27, %v1455_v32  ;;  %v6523_v20 = vcombine.low %v8991_v58, %v1854_v38  ;;  %v8184_v11 = vld [vmem:[%s10162_s5 + $0x210] sm:$0xff]   ;;  %v9013_v28 = vld [vmem:[#allocation2 + $0x28] sm:$0xf] }
  0x78   : > { %7858 = vmatpush3.bf16.msra.mxu1 %v8144_v25  ;;  %1217 = vmatmul.mubr.bf16.gmra.mxu0 %v6396_v24  ;;  %v1320_v25 = vld [vmem:[#allocation2 + $0x3c] sm:$0x1]  ;;  %v6491_v31 = vcombine.low %v1390_v5, %v1397_v6  ;;  %v6494_v54 = vcombine.low %v1404_v39, %v1411_v42  ;;  %v1863_v5 = vld [vmem:[#allocation2 + $0x18] sm:$0xe]  ;;  %v1866_v39 = vld [vmem:[#allocation2 + $0x30] sm:$0xe] }
  0x79   : > { %7420 = vmatpush3.bf16.msra.mxu0 %v8146_v44  ;;  %7859 = vmatprep.subr.bf16.mxu1 %v8147_v45  ;;  %v6429_v26 = vcombine.low %v8957_v21, %v1320_v25  ;;  %v6437_v44 = vcombine.low %v1328_v29, %v1320_v25  ;;  %v8172_v6 = vld [vmem:[%s10162_s5 + $0x1d8] sm:$0xff]   ;;  %v1913_v15 = vshll.u32 %v6523_v20, 16  ;;  %v1911_v18 = vshrl.u32 %v6523_v20, 16  ;;  %v8183_v42 = vld [vmem:[%s10162_s5 + $0x190] sm:$0xff]  }
  0x7a   : > { %7457 = vmatprep.subr.bf16.mxu0 %v8150_v52  ;;  %1731 = vmatprep.mubr.bf16.mxu0 %v6488_v57 }
  0x7b   : > { %v1415_v37 = vshll.u32 %v6429_v26, 16  ;;  %v8977_v30 = vld [vmem:[#allocation2 + $0x40] sm:$0xf]  ;;  %v1413_v48 = vshrl.u32 %v6429_v26, 16  ;;  %v1456_v24 = vrot.slane %v6437_v44, 1  ;;  %v1915_v14 = vrot.slane %v1913_v15, 1 }
  0x7c   : > { %7860 = vmatpush3.bf16.msra.mxu1 %v8147_v45  ;;  %v8169_v45 = vld [vmem:[%s10162_s5 + $0x220] sm:$0xff]   ;;  %v8182_v26 = vld [vmem:[%s10162_s5 + $0x1d0] sm:$0xff]  }
  0x7d   : > { %7869 = vmatprep.subr.bf16.mxu1 %v8157_v41  ;;  %v1329_v47 = vld [vmem:[#allocation2 + $0x40] sm:$0xe]  ;;  %v1417_v49 = vrot.slane %v1415_v37, 1  ;;  %v9023_v37 = vld [vmem:[#allocation2 + $0x30] sm:$0xf]  ;;  %v1916_v44 = vor.u32 %v1915_v14, %v1911_v18  ;;  %v6587_v18 = vcombine.low %v8991_v58, %v8993_v1 }
  0x7e   : > { %v1321_v52 = vld [vmem:[#allocation2 + $0x44] sm:$0x1] }
  0x7f   : > { %7862 = vmatmul.mubr.bf16.vlgmr.msra.gmra.mxu1 %v6492_v2  ;;  %v6430_v56 = vcombine.low %v8977_v30, %v1321_v52  ;;  %v6438_v23 = vcombine.low %v1329_v47, %v1321_v52  ;;  %v1418_v61 = vor.u32 %v1417_v49, %v1413_v48  ;;  %v1858_v48 = vld [vmem:[#allocation2 + $0x34] sm:$0x1]  ;;  %v1867_v49 = vld [vmem:[#allocation2 + $0x38] sm:$0xe] }
  0x80   : > { %7870 = vmatpush3.bf16.msra.mxu1 %v8157_v41  ;;  %1732 = vmatmul.mubr.bf16.vlgmr.msra.gmra.mxu0 %v6487_v9  ;;  %v1855_v41 = vld [vmem:[#allocation2 + $0x1c] sm:$0x1]  ;;  %v1857_v9 = vld [vmem:[#allocation2 + $0x2c] sm:$0x1]  ;;  %v9031_v52 = vld [vmem:[#allocation2 + $0x38] sm:$0xf] }
  0x81   : > { %7871 = vmatprep.subr.bf16.mxu1 %v8160_v4  ;;  %7458 = vmatpush3.bf16.msra.mxu0 %v8152_v16  ;;  %v1457_v46 = vrot.slane %v6438_v23, 1  ;;  %v1420_v35 = vshrl.u32 %v6430_v56, 16  ;;  %v1422_v57 = vshll.u32 %v6430_v56, 16  ;;  %v6524_v3 = vcombine.low %v8993_v1, %v1855_v41  ;;  %v1864_v16 = vld [vmem:[#allocation2 + $0x20] sm:$0xe] }
  0x82   : > { %1739 = vmatprep.mubr.bf16.mxu0 %v6491_v31  ;;  %7459 = vmatprep.subr.bf16.mxu0 %v8158_v13  ;;  %v6532_v8 = vcombine.low %v1863_v5, %v1855_v41  ;;  %v9008_v13 = vld [vmem:[#allocation2 + $0x20] sm:$0xf]  ;;  %v6526_v32 = vcombine.low %v9013_v28, %v1857_v9  ;;  %v6496_v56 = vcombine.low %v8957_v21, %v8977_v30  ;;  %v1869_v5 = vld [vmem:[#allocation2 + $0x48] sm:$0xe] }
  0x83   : > { %7865 = vmatprep.mubr.bf16.mxu1 %v6495_v36  ;;  %v6498_v62 = vcombine.low %v1456_v24, %v1457_v46  ;;  %v1424_v2 = vrot.slane %v1422_v57, 1  ;;  %v1920_v22 = vshll.u32 %v6524_v3, 16  ;;  %v1918_v27 = vshrl.u32 %v6524_v3, 16  ;;  %v8191_v23 = vld [vmem:[%s10162_s5 + $0x200] sm:$0xff]   ;;  %v8187_v46 = vld [vmem:[%s10162_s5 + $0x188] sm:$0xff]  }
  0x84   : > { %7872 = vmatpush3.bf16.msra.mxu1 %v8160_v4  ;;  %v1862_v4 = vld [vmem:[#allocation2 + $0x10] sm:$0xe]  ;;  %v1991_v25 = vrot.slane %v6532_v8, 1  ;;  %v6525_v29 = vcombine.low %v9008_v13, %v1856_v55  ;;  %v6533_v36 = vcombine.low %v1864_v16, %v1856_v55  ;;  %v1934_v47 = vshll.u32 %v6526_v32, 16  ;;  %v8190_v55 = vld [vmem:[%s10162_s5 + $0x180] sm:$0xff]  }
  0x85   : > { %7873 = vmatprep.subr.bf16.mxu1 %v8166_v34  ;;  %7460 = vmatpush3.bf16.msra.mxu0 %v8159_v0  ;;  %v6531_v7 = vcombine.low %v1862_v4, %v1854_v38  ;;  %v1425_v12 = vor.u32 %v1424_v2, %v1420_v35  ;;  %v1922_v31 = vrot.slane %v1920_v22, 1  ;;  %v6534_v0 = vcombine.low %v1865_v17, %v1857_v9  ;;  %v1861_v2 = vld [vmem:[#allocation2 + $0x4c] sm:$0x1]  ;;  %v1868_v4 = vld [vmem:[#allocation2 + $0x40] sm:$0xe] }
  0x86   : > { %7461 = vmatprep.subr.bf16.mxu0 %v8163_v43  ;;  %v1927_v43 = vshll.u32 %v6525_v29, 16  ;;  %v1992_v24 = vrot.slane %v6533_v36, 1  ;;  %v1925_v35 = vshrl.u32 %v6525_v29, 16  ;;  %v1932_v38 = vshrl.u32 %v6526_v32, 16 }
  0x87   : > { %7866 = vmatmul.mubr.bf16.gmra.mxu1 %v6498_v62  ;;  %v1990_v19 = vrot.slane %v6531_v7, 1  ;;  %v6497_v63 = vcombine.low %v1418_v61, %v1425_v12  ;;  %v6527_v61 = vcombine.low %v9023_v37, %v1858_v48  ;;  %v1936_v41 = vrot.slane %v1934_v47, 1  ;;  %v1860_v62 = vld [vmem:[#allocation2 + $0x44] sm:$0x1]  ;;  %v1853_v12 = vld [vmem:[#allocation2 + $0x48] sm:$0xf] }
  0x88   : > { %7874 = vmatpush3.bf16.msra.mxu1 %v8166_v34  ;;  %1740 = vmatmul.mubr.bf16.gmra.mxu0 %v6490_v50  ;;  %v8188_v34 = vld [vmem:[%s10162_s5 + $0x208] sm:$0xff]   ;;  %v1929_v57 = vrot.slane %v1927_v43, 1  ;;  %v6537_v15 = vcombine.low %v1868_v4, %v1860_v62  ;;  %v6538_v16 = vcombine.low %v1869_v5, %v1861_v2  ;;  %v6590_v58 = vcombine.low %v9008_v13, %v9013_v28 }
  0x89   : > { %7875 = vmatprep.subr.bf16.mxu1 %v8169_v45  ;;  %7462 = vmatpush3.bf16.msra.mxu0 %v8165_v53  ;;  %v6589_v59 = vcombine.low %v1990_v19, %v1991_v25  ;;  %v8185_v50 = vld [vmem:[%s10162_s5 + $0x1c8] sm:$0xff]   ;;  %v1859_v53 = vld [vmem:[#allocation2 + $0x3c] sm:$0x1]  ;;  %v1941_v8 = vshll.u32 %v6527_v61, 16  ;;  %v1937_v9 = vor.u32 %v1936_v41, %v1932_v38  ;;  %v1939_v22 = vshrl.u32 %v6527_v61, 16 }
  0x8a   : > { %1747 = vmatprep.mubr.bf16.mxu0 %v6494_v54  ;;  %7463 = vmatprep.subr.bf16.mxu0 %v8167_v40  ;;  %v6535_v54 = vcombine.low %v1866_v39, %v1858_v48  ;;  %v1993_v40 = vrot.slane %v6534_v0, 1  ;;  %v6536_v21 = vcombine.low %v1867_v49, %v1859_v53  ;;  %v1930_v7 = vor.u32 %v1929_v57, %v1925_v35 }
  0x8b   : > { %7885 = vmatprep.mubr.bf16.mxu1 %v6589_v59  ;;  %v1943_v19 = vrot.slane %v1941_v8, 1  ;;  %v1996_v29 = vrot.slane %v6537_v15, 1  ;;  %v6593_v47 = vcombine.low %v9023_v37, %v9031_v52 }
  0x8c   : > { %7876 = vmatpush3.bf16.msra.mxu1 %v8169_v45  ;;  %v1923_v45 = vor.u32 %v1922_v31, %v1918_v27  ;;  %v1994_v20 = vrot.slane %v6535_v54, 1  ;;  %v1995_v3 = vrot.slane %v6536_v21, 1  ;;  %v6591_v14 = vcombine.low %v1930_v7, %v1937_v9 }
  0x8d   : > { %7877 = vmatprep.subr.bf16.mxu1 %v8181_v33  ;;  %7464 = vmatpush3.bf16.msra.mxu0 %v8168_v51  ;;  %v6528_v51 = vcombine.low %v9031_v52, %v1859_v53  ;;  %v1944_v31 = vor.u32 %v1943_v19, %v1939_v22 }
  0x8e   : > { %7465 = vmatprep.subr.bf16.mxu0 %v8172_v6  ;;  %v6588_v30 = vcombine.low %v1916_v44, %v1923_v45  ;;  %v6592_v6 = vcombine.low %v1992_v24, %v1993_v40  ;;  %v6595_v17 = vcombine.low %v1994_v20, %v1995_v3 }
  0x8f   : > { %v1946_v25 = vshrl.u32 %v6528_v51, 16 }
  0x90   : > { %7878 = vmatpush3.bf16.msra.mxu1 %v8181_v33  ;;  %1748 = vmatmul.mubr.bf16.gmra.mxu0 %v6493_v10  ;;  %v8189_v33 = vld [vmem:[%s10162_s5 + $0x1c0] sm:$0xff]   ;;  %v1948_v10 = vshll.u32 %v6528_v51, 16 }
  0x91   : > { %7879 = vmatprep.subr.bf16.mxu1 %v8184_v11  ;;  %7466 = vmatpush3.bf16.msra.mxu0 %v8174_v60 }
  0x92   : > { %1755 = vmatprep.mubr.bf16.mxu0 %v6497_v63  ;;  %7467 = vmatprep.subr.bf16.mxu0 %v8182_v26  ;;  %v6530_v63 = vcombine.low %v1853_v12, %v1861_v2  ;;  %v1950_v27 = vrot.slane %v1948_v10, 1  ;;  %v1997_v26 = vrot.slane %v6538_v16, 1 }
  0x94   : > { %7880 = vmatpush3.bf16.msra.mxu1 %v8184_v11  ;;  %v1852_v11 = vld [vmem:[#allocation2 + $0x40] sm:$0xf]  ;;  %v1951_v59 = vor.u32 %v1950_v27, %v1946_v25  ;;  %v6598_v32 = vcombine.low %v1996_v29, %v1997_v26  ;;  %v1962_v36 = vshll.u32 %v6530_v63, 16  ;;  %v1960_v39 = vshrl.u32 %v6530_v63, 16 }
  0x95   : > { %7881 = vmatprep.subr.bf16.mxu1 %v8188_v34  ;;  %7468 = vmatpush3.bf16.msra.mxu0 %v8183_v42  ;;  %v6529_v60 = vcombine.low %v1852_v11, %v1860_v62  ;;  %v6596_v49 = vcombine.low %v1852_v11, %v1853_v12 }
  0x96   : > { %7469 = vmatprep.subr.bf16.mxu0 %v8185_v50  ;;  %v6594_v0 = vcombine.low %v1944_v31, %v1951_v59  ;;  %v1964_v42 = vrot.slane %v1962_v36, 1 }
  0x97   : > { %v1953_v1 = vshrl.u32 %v6529_v60, 16 }
  0x98   : > { %7882 = vmatpush3.bf16.msra.mxu1 %v8188_v34  ;;  %1756 = vmatmul.mubr.bf16.gmra.mxu0 %v6496_v56  ;;  %v1955_v34 = vshll.u32 %v6529_v60, 16  ;;  %v1965_v45 = vor.u32 %v1964_v42, %v1960_v39 }
  0x99   : > { %7883 = vmatprep.subr.bf16.mxu1 %v8191_v23  ;;  %7470 = vmatpush3.bf16.msra.mxu0 %v8187_v46 }
  0x9a   : > { %2271 = vmatprep.mubr.bf16.mxu0 %v6588_v30  ;;  %7471 = vmatprep.subr.bf16.mxu0 %v8189_v33  ;;  %v1957_v43 = vrot.slane %v1955_v34, 1 }
  0x9c   : > { %7884 = vmatpush3.bf16.msra.mxu1 %v8191_v23  ;;  %v1958_v44 = vor.u32 %v1957_v43, %v1953_v1  ;;  %v920_v1 = vld [vmem:[#allocation3 + $0x30] sm:$0xff] }
  0x9d   : > { %7472 = vmatpush3.bf16.msra.mxu0 %v8190_v55 }
  0x9e   : > { %v6597_v48 = vcombine.low %v1958_v44, %v1965_v45 }
  0x9f   : > { %7886 = vmatmul.mubr.bf16.vlgmr.msra.gmra.mxu1 %v6592_v6 }
  0xa0   : > { %7889 = vmatprep.mubr.bf16.mxu1 %v6595_v17  ;;  %2272 = vmatmul.mubr.bf16.vlgmr.msra.gmra.mxu0 %v6587_v18 }
  0xa1   : > { %2279 = vmatprep.mubr.bf16.mxu0 %v6591_v14 }
  0xa7   : > { %7890 = vmatmul.mubr.bf16.gmra.mxu1 %v6598_v32 }
  0xa8   : > { %2280 = vmatmul.mubr.bf16.gmra.mxu0 %v6590_v58 }
  0xa9   : > { %2287 = vmatprep.mubr.bf16.mxu0 %v6594_v0 }
  0xb0   : > { %2288 = vmatmul.mubr.bf16.gmra.mxu0 %v6593_v47 }
  0xb1   : > { %2295 = vmatprep.mubr.bf16.mxu0 %v6597_v48 }
  0xb8   : > { %2296 = vmatmul.mubr.bf16.gmra.mxu0 %v6596_v49 }
 0x11c   : > { %v7369_v50 = vpop.f32.mrf.mxu0 }
 0x11e   : > { %v7370_v13 = vpop.f32.mrf.mxu0 }
 0x11f   : > { %v9055_v23 = vpop.f32.mrf.mxu1  ;;  %v7371_v27 = vadd.f32 %v7370_v13, %v7369_v50  ;;  %v921_v50 = vld [vmem:[#allocation3] sm:$0xff] }
 0x120   : > { %v7372_v28 = vpop.f32.mrf.mxu0 }
 0x121   : > { %v1259_v40 = vpop.f32.mrf.mxu1 }
 0x122   : > { %v7373_v53 = vpop.f32.mrf.mxu0  ;;  %v1260_v34 = vadd.f32 %v7371_v27, %v1259_v40 }
 0x123   : > { %v9061_v33 = vpop.f32.mrf.mxu1  ;;  %v7374_v36 = vadd.f32 %v7373_v53, %v7372_v28 }
 0x124   : > { %v7375_v54 = vpop.f32.mrf.mxu0  ;;  %v1290_v47 = vadd.f32 %v1260_v34, %v920_v1 }
 0x125   : > { %v1262_v52 = vpop.f32.mrf.mxu1 }
 0x126   : > { %v7376_v56 = vpop.f32.mrf.mxu0  ;;  %v1263_v48 = vadd.f32 %v7374_v36, %v1262_v52 }
 0x127   : > { %v7377_v42 = vadd.f32 %v7376_v56, %v7375_v54 }
 0x128   : > { %v9057_v24 = vpop.f32.mrf.mxu0  ;;  %v1291_v27 = vadd.f32 %v1263_v48, %v921_v50  ;;  %v925_v48 = vld [vmem:[#allocation3 + $0x20] sm:$0xff] }
 0x129   : > { %v1268_v40 = vadd.f32 %v9055_v23, %v7377_v42 }
 0x12a   : > { %v9059_v46 = vpop.f32.mrf.mxu0 }
 0x12b   : > { %v7380_v54 = vadd.f32 %v9059_v46, %v9057_v24  ;;  %v923_v24 = vld [vmem:[#allocation3 + $0x10] sm:$0xff] }
 0x12d   : > { %v1271_v23 = vadd.f32 %v9061_v33, %v7380_v54 }
 0x12f   : > { %v9067_v57 = vpop.f32.mrf.mxu1 }
 0x130   : > { %v9063_v37 = vpop.f32.mrf.mxu0 }
 0x131   : > { %v9073_v30 = vpop.f32.mrf.mxu1 }
 0x132   : > { %v9065_v35 = vpop.f32.mrf.mxu0 }
 0x133   : > { %v9079_v51 = vpop.f32.mrf.mxu1  ;;  %v7383_v36 = vadd.f32 %v9065_v35, %v9063_v37  ;;  %v924_v35 = vld [vmem:[#allocation3 + $0x8] sm:$0xff] }
 0x134   : > { %v9069_v61 = vpop.f32.mrf.mxu0  ;;  %10178 = vst [vmem:[#allocation7_spill] sm:$0xff] %v9079_v51 }
 0x135   : > { %v9085_v20 = vpop.f32.mrf.mxu1  ;;  %v1276_v33 = vadd.f32 %v7383_v36, %v9073_v30 }
 0x136   : > { %v9071_v21 = vpop.f32.mrf.mxu0 }
 0x138   : > { %v9075_v38 = vpop.f32.mrf.mxu0 }
 0x13a   : > { %v9077_v41 = vpop.f32.mrf.mxu0 }
 0x13b   : > { %v7389_v30 = vadd.f32 %v9077_v41, %v9075_v38 }
 0x13c   : > { %v9081_v62 = vpop.f32.mrf.mxu0 }
 0x13e   : > { %v9083_v2 = vpop.f32.mrf.mxu0 }
 0x13f   : > { %v7863_v4 = vpop.f32.mrf.mxu1 }
 0x140   : > { %v7421_v3 = vpop.f32.mrf.mxu0 }
 0x141   : > { %v1798_v7 = vpop.f32.mrf.mxu1 }
 0x142   : > { %v7422_v5 = vpop.f32.mrf.mxu0 }
 0x143   : > { %v9087_v9 = vpop.f32.mrf.mxu1  ;;  %v7423_v31 = vadd.f32 %v7422_v5, %v7421_v3 }
 0x144   : > { %v7424_v6 = vpop.f32.mrf.mxu0 }
 0x145   : > { %v1801_v12 = vpop.f32.mrf.mxu1  ;;  %v1799_v43 = vadd.f32 %v7423_v31, %v1798_v7 }
 0x146   : > { %v7425_v8 = vpop.f32.mrf.mxu0 }
 0x147   : > { %v9089_v16 = vpop.f32.mrf.mxu1  ;;  %v7426_v39 = vadd.f32 %v7425_v8, %v7424_v6 }
 0x148   : > { %v7427_v55 = vpop.f32.mrf.mxu0 }
 0x149   : > { %v9091_v22 = vpop.f32.mrf.mxu1  ;;  %v1802_v3 = vadd.f32 %v7426_v39, %v1801_v12 }
 0x14a   : > { %v7428_v10 = vpop.f32.mrf.mxu0 }
 0x14b   : > { %v9097_v60 = vpop.f32.mrf.mxu1  ;;  %v7429_v5 = vadd.f32 %v7428_v10, %v7427_v55  ;;  %v1830_v52 = vadd.f32 %v1802_v3, %v1291_v27 }
 0x14c   : > { %v7430_v11 = vpop.f32.mrf.mxu0  ;;  %10179 = vst [vmem:[#allocation8_spill] sm:$0xff] %v9097_v60  ;;  %v1829_v60 = vadd.f32 %v1799_v43, %v1290_v47  ;;  %v1293_v43 = vadd.f32 %v1271_v23, %v923_v24 }
 0x14d   : > { %v9103_v29 = vpop.f32.mrf.mxu1  ;;  %v1807_v8 = vadd.f32 %v7863_v4, %v7429_v5 }
 0x14e   : > { %v7431_v15 = vpop.f32.mrf.mxu0 }
 0x14f   : > { %v7432_v31 = vadd.f32 %v7431_v15, %v7430_v11  ;;  %v7386_v15 = vadd.f32 %v9071_v21, %v9069_v61 }
 0x150   : > { %v7433_v17 = vpop.f32.mrf.mxu0 }
 0x152   : > { %v7434_v18 = vpop.f32.mrf.mxu0 }
 0x153   : > { %v7435_v4 = vadd.f32 %v7434_v18, %v7433_v17  ;;  %v1279_v18 = vadd.f32 %v7386_v15, %v9085_v20 }
 0x154   : > { %v9093_v19 = vpop.f32.mrf.mxu0 }
 0x155   : > { %v1815_v47 = vadd.f32 %v7435_v4, %v9091_v22 }
 0x156   : > { %v9095_v25 = vpop.f32.mrf.mxu0 }
 0x158   : > { %v9099_v63 = vpop.f32.mrf.mxu0 }
 0x15a   : > { %v9101_v14 = vpop.f32.mrf.mxu0 }
 0x15c   : > { %v9105_v26 = vpop.f32.mrf.mxu0 }
 0x15e   : > { %v9107_v32 = vpop.f32.mrf.mxu0 }
 0x15f   : > { %v7887_v59 = vpop.f32.mrf.mxu1  ;;  %10180 = vst [vmem:[#allocation9_spill] sm:$0xff] %v9107_v32  ;;  %v922_v32 = vld [vmem:[#allocation3 + $0x18] sm:$0xff] }
 0x160   : > { %v7473_v0 = vpop.f32.mrf.mxu0  ;;  %v1292_v12 = vadd.f32 %v1268_v40, %v922_v32  ;;  %v1284_v40 = vadd.f32 %v9067_v57, %v7389_v30 }
 0x161   : > { %v2338_v58 = vpop.f32.mrf.mxu1 }
 0x162   : > { %v7474_v44 = vpop.f32.mrf.mxu0 }
 0x163   : > { %v7888_v45 = vpop.f32.mrf.mxu1  ;;  %v7475_v49 = vadd.f32 %v7474_v44, %v7473_v0 }
 0x164   : > { %v7476_v13 = vpop.f32.mrf.mxu0 }
 0x165   : > { %v2339_v51 = vadd.f32 %v7475_v49, %v2338_v58  ;;  %v2341_v53 = vpop.f32.mrf.mxu1 }
 0x166   : > { %v7477_v28 = vpop.f32.mrf.mxu0 }
 0x167   : > { %v2369_v56 = vadd.f32 %v2339_v51, %v1829_v60  ;;  %v7478_v6 = vadd.f32 %v7477_v28, %v7476_v13  ;;  %v9112_v10 = vpop.f32.mrf.mxu1  ;;  %v1831_v51 = vadd.f32 %v1807_v8, %v1292_v12  ;;  %v1810_v60 = vadd.f32 %v9087_v9, %v7432_v31  ;;  %v10183_v12 = vld [vmem:[#allocation8_spill] sm:$0xff] }
 0x168   : > { %v7479_v7 = vpop.f32.mrf.mxu0  ;;  %v7438_v9 = vadd.f32 %v9095_v25, %v9093_v19  ;;  %v7441_v19 = vadd.f32 %v9101_v14, %v9099_v63  ;;  %v7392_v28 = vadd.f32 %v9083_v2, %v9081_v62 }
 0x169   : > { %2377 = vst [vmem:[#allocation3 + $0x30] sm:$0xff] %v2369_v56  ;;  %v2342_v34 = vadd.f32 %v7478_v6, %v2341_v53  ;;  %v2354_v0 = vpop.f32.mrf.mxu1  ;;  %v1832_v44 = vadd.f32 %v1810_v60, %v1293_v43  ;;  %v926_v53 = vld [vmem:[#allocation3 + $0x28] sm:$0xff]  ;;  %v10181_v56 = vld [vmem:[#allocation9_spill] sm:$0xff] }
 0x16a   : > { %v7480_v55 = vpop.f32.mrf.mxu0  ;;  %v1818_v22 = vadd.f32 %v7438_v9, %v9103_v29  ;;  %v1823_v29 = vadd.f32 %v9089_v16, %v7441_v19  ;;  %v7444_v63 = vadd.f32 %v10181_v56, %v9105_v26 }
 0x16b   : > { %v2370_v58 = vadd.f32 %v2342_v34, %v1830_v52  ;;  %v7481_v1 = vadd.f32 %v7480_v55, %v7479_v7  ;;  %v7892_v21 = vpop.f32.mrf.mxu1  ;;  %v1296_v7 = vadd.f32 %v1284_v40, %v926_v53  ;;  %v10182_v52 = vld [vmem:[#allocation7_spill] sm:$0xff]  ;;  %v927_v34 = vld [vmem:[#allocation3 + $0x38] sm:$0xff] }
 0x16c   : > { %v7482_v46 = vpop.f32.mrf.mxu0  ;;  %v1287_v8 = vadd.f32 %v10182_v52, %v7392_v28  ;;  %v1826_v55 = vadd.f32 %v10183_v12, %v7444_v63 }
 0x16d   : > { %2378 = vst [vmem:[#allocation3] sm:$0xff] %v2370_v58  ;;  %v2347_v11 = vadd.f32 %v7887_v59, %v7481_v1  ;;  %v1294_v59 = vadd.f32 %v1276_v33, %v924_v35  ;;  %v2357_v5 = vpop.f32.mrf.mxu1  ;;  %v1835_v2 = vadd.f32 %v1823_v29, %v1296_v7 }
 0x16e   : > { %v7483_v32 = vpop.f32.mrf.mxu0  ;;  %v1297_v36 = vadd.f32 %v1287_v8, %v927_v34 }
 0x16f   : > { %v2371_v39 = vadd.f32 %v2347_v11, %v1831_v51  ;;  %v7484_v37 = vadd.f32 %v7483_v32, %v7482_v46  ;;  %v1833_v3 = vadd.f32 %v1815_v47, %v1294_v59 }
 0x170   : > { %v7485_v42 = vpop.f32.mrf.mxu0  ;;  %v1836_v1 = vadd.f32 %v1826_v55, %v1297_v36 }
 0x171   : > { %2379 = vst [vmem:[#allocation3 + $0x18] sm:$0xff] %v2371_v39  ;;  %v2350_v17 = vadd.f32 %v7888_v45, %v7484_v37  ;;  %v1295_v45 = vadd.f32 %v1279_v18, %v925_v48 }
 0x172   : > { %v7486_v61 = vpop.f32.mrf.mxu0 }
 0x173   : > { %v2372_v49 = vadd.f32 %v2350_v17, %v1832_v44  ;;  %v7487_v50 = vadd.f32 %v7486_v61, %v7485_v42  ;;  %v1834_v54 = vadd.f32 %v1818_v22, %v1295_v45 }
 0x174   : > { %v7488_v13 = vpop.f32.mrf.mxu0 }
 0x175   : > { %2380 = vst [vmem:[#allocation3 + $0x10] sm:$0xff] %v2372_v49  ;;  %v2355_v25 = vadd.f32 %v7487_v50, %v2354_v0 }
 0x176   : > { %v7489_v20 = vpop.f32.mrf.mxu0 }
 0x177   : > { %v2373_v38 = vadd.f32 %v2355_v25, %v1833_v3  ;;  %v7490_v41 = vadd.f32 %v7489_v20, %v7488_v13 }
 0x178   : > { %v7491_v27 = vpop.f32.mrf.mxu0 }
 0x179   : > { %2381 = vst [vmem:[#allocation3 + $0x8] sm:$0xff] %v2373_v38  ;;  %v2358_v14 = vadd.f32 %v7490_v41, %v2357_v5 }
 0x17a   : > { %v7492_v6 = vpop.f32.mrf.mxu0 }
 0x17b   : > { %v2374_v57 = vadd.f32 %v2358_v14, %v1834_v54  ;;  %v7493_v31 = vadd.f32 %v7492_v6, %v7491_v27 }
 0x17c   : > { %v7494_v62 = vpop.f32.mrf.mxu0 }
 0x17d   : > { %2382 = vst [vmem:[#allocation3 + $0x20] sm:$0xff] %v2374_v57  ;;  %v2363_v23 = vadd.f32 %v9112_v10, %v7493_v31 }
 0x17e   : > { %v7495_v16 = vpop.f32.mrf.mxu0 }
 0x17f   : > { %v2375_v58 = vadd.f32 %v2363_v23, %v1835_v2  ;;  %v7496_v26 = vadd.f32 %v7495_v16, %v7494_v62 }
 0x181   : > { %2383 = vst [vmem:[#allocation3 + $0x28] sm:$0xff] %v2375_v58  ;;  %v2366_v24 = vadd.f32 %v7892_v21, %v7496_v26 }
 0x183   : > { %v2376_v46 = vadd.f32 %v2366_v24, %v1836_v1 }
 0x185   : > { %2384 = vst [vmem:[#allocation3 + $0x38] sm:$0xff] %v2376_v46 }
 0x186 PF: > { %v8212_v51 = vld [vmem:[%s10162_s5 + $0x2b8] sm:$0xff]   ;;  %v8215_v4 = vld [vmem:[%s10162_s5 + $0x2b0] sm:$0xff]   ;;  %v8218_v32 = vld [vmem:[%s10162_s5 + $0x2a8] sm:$0xff]   ;;  %vm2552_vm6 = vcmask 1043456   ;;  %vm2553_vm7 = vsmask.f32 7938 }
 0x187   : > { %v8213_v60 = vld [vmem:[%s10162_s5 + $0x278] sm:$0xff]   ;;  %7509 = vmatprep.subr.bf16.mxu0 %v8212_v51  ;;  %v8216_v11 = vld [vmem:[%s10162_s5 + $0x270] sm:$0xff]   ;;  %v8219_v0 = vld [vmem:[%s10162_s5 + $0x268] sm:$0xff]   ;;  %vm2558_vm8 = vcmask 1040384   ;;  %vm2559_vm9 = vsmask.f32 256 }
 0x188   : > { %v8214_v10 = vld [vmem:[%s10162_s5 + $0x2f8] sm:$0xff]   ;;  %7510 = vmatpush3.bf16.msra.mxu0 %v8213_v60  ;;  %v8217_v15 = vld [vmem:[%s10162_s5 + $0x2f0] sm:$0xff]   ;;  %v8220_v43 = vld [vmem:[%s10162_s5 + $0x2e8] sm:$0xff]   ;;  %v10184_v23 = vmov 0  ;;  %v10187_v1 = vmov 0  ;;  %p6933_p12 = scmp.ge.s32.totalorder %s8498_s27, 3 }
 0x189   : > { %7893 = vmatprep.subr.bf16.mxu1 %v8214_v10  ;;  %7511 = vmatprep.subr.bf16.mxu0 %v8215_v4  ;;  %v8221_v33 = vld [vmem:[%s10162_s5 + $0x2a0] sm:$0xff]   ;;  %v8224_v35 = vld [vmem:[%s10162_s5 + $0x298] sm:$0xff]   ;;  %v8227_v47 = vld [vmem:[%s10162_s5 + $0x290] sm:$0xff]  }
 0x18a   : > { %7894 = vmatpush3.bf16.msra.mxu1 %v8214_v10  ;;  %v8222_v39 = vld [vmem:[%s10162_s5 + $0x260] sm:$0xff]   ;;  %v8226_v42 = vld [vmem:[%s10162_s5 + $0x2d8] sm:$0xff]   ;;  %v8229_v9 = vld [vmem:[%s10162_s5 + $0x2d0] sm:$0xff]  }
 0x18b   : > { %7895 = vmatprep.subr.bf16.mxu1 %v8217_v15  ;;  %v8223_v37 = vld [vmem:[%s10162_s5 + $0x2e0] sm:$0xff]   ;;  %v8225_v44 = vld [vmem:[%s10162_s5 + $0x258] sm:$0xff]   ;;  %v8228_v17 = vld [vmem:[%s10162_s5 + $0x250] sm:$0xff]  }
 0x18c   : > { %7512 = vmatpush3.bf16.msra.mxu0 %v8216_v11  ;;  %v8230_v18 = vld [vmem:[%s10162_s5 + $0x288] sm:$0xff]   ;;  %v8233_v59 = vld [vmem:[%s10162_s5 + $0x280] sm:$0xff]   ;;  %v8238_v45 = vld [vmem:[%s10162_s5 + $0x378] sm:$0xff]  }
 0x18d   : > { %7513 = vmatprep.subr.bf16.mxu0 %v8218_v32  ;;  %v8232_v61 = vld [vmem:[%s10162_s5 + $0x2c8] sm:$0xff]   ;;  %v7290_v48 = vld [vmem:[%s8608_s11] sm:$0xff]   ;;  %v9233_v28 = vld [vmem:[%s10162_s5 + $0x3b8] sm:$0xff]  }
 0x18e   : > { %7896 = vmatpush3.bf16.msra.mxu1 %v8217_v15  ;;  %v8231_v21 = vld [vmem:[%s10162_s5 + $0x248] sm:$0xff]   ;;  %v9209_v30 = vld [vmem:[%s10160_s3] ss:$0 sm:$0xff]  ;;  %v7291_v49 = vunpack.c.l.bf16 %v7290_v48  ;;  %v7292_v50 = vunpack.c.h.bf16 %v7290_v48  ;;  %v9237_v29 = vld [vmem:[#allocation2 + $0x4] sm:$0x1] }
 0x18f   : > { %7897 = vmatprep.subr.bf16.mxu1 %v8220_v43  ;;  %v8235_v13 = vld [vmem:[%s10162_s5 + $0x2c0] sm:$0xff]   ;;  %v7344_v40 = vld [vmem:[%s8608_s11 + $0x8] sm:$0xff]   ;;  %vm9250_vm10 = vmand %vm2552_vm6, %vm2553_vm7 }
 0x190   : > { %7514 = vmatpush3.bf16.msra.mxu0 %v8219_v0  ;;  %v9217_v3 = vld [vmem:[%s10161_s4] ss:$0 sm:$0xff]  ;;  %v2408_v19 = vmul.f32 %v7291_v49, %v9209_v30  ;;  %v2409_v25 = vmul.f32 %v7292_v50, %v9209_v30  ;;  %v7295_v41 = vunpack.c.l.bf16 %v7344_v40  ;;  %v7296_v53 = vunpack.c.h.bf16 %v7344_v40  ;;  %v2555_v31 = vld [vmem:[#allocation2 + $0x8] sm:$0xf]  ;;  %v2561_v34 = vld [vmem:[#allocation2 + $0xc] sm:$0x1] }
 0x191   : > { %7515 = vmatprep.subr.bf16.mxu0 %v8221_v33  ;;  %v8234_v22 = vld [vmem:[%s10162_s5 + $0x240] sm:$0xff]   ;;  %v10185_v23 = vsel %vm9250_vm10, 4294967295, %v10184_v23  ;;  %v2564_v58 = vld [vmem:[#allocation2 + $0x10] sm:$0xf]  ;;  %v2567_v26 = vld [vmem:[#allocation2 + $0x14] sm:$0x1] }
 0x192   : > { %7898 = vmatpush3.bf16.msra.mxu1 %v8220_v43  ;;  %v2423_v20 = vadd.f32 %v9217_v3, %v2408_v19  ;;  %v2424_v5 = vadd.f32 %v9217_v3, %v2409_v25  ;;  %v9235_v54 = vld [vmem:[#allocation2] sm:$0xf]  ;;  %v2410_v63 = vmul.f32 %v7295_v41, %v9209_v30  ;;  %v2411_v6 = vmul.f32 %v7296_v53, %v9209_v30  ;;  %vm9256_vm11 = vmand %vm2558_vm8, %vm2559_vm9  ;;  %v2579_v25 = vld [vmem:[#allocation2 + $0x24] sm:$0x1] }
 0x193   : > { %7899 = vmatprep.subr.bf16.mxu1 %v8223_v37  ;;  %v9245_v62 = vcombine.low %v9235_v54, %v9237_v29  ;;  %10186 = vst [vmem:[#allocation10_spill] sm:$0xff] %v10185_v23  ;;  %v10188_v1 = vsel %vm9256_vm11, 4294967295, %v10187_v1  ;;  %v2622_v24 = vld [vmem:[#allocation2] sm:$0xe]  ;;  %v7346_v40 = vld [vmem:[%s8608_s11 + $0x18] sm:$0xff]  }
 0x194   : > { %7516 = vmatpush3.bf16.msra.mxu0 %v8222_v39  ;;  %v2431_v38 = vmax.f32 %v2423_v20, 0.0  ;;  %v2432_v27 = vmax.f32 %v2424_v5, 0.0  ;;  %v2425_v8 = vadd.f32 %v9217_v3, %v2410_v63  ;;  %v2426_v12 = vadd.f32 %v9217_v3, %v2411_v6  ;;  %10189 = vst [vmem:[#allocation11_spill] sm:$0xff] %v10188_v1  ;;  %v2576_v49 = vld [vmem:[#allocation2 + $0x20] sm:$0xf]  ;;  %v2759_v1 = vld [vmem:[#allocation3] sm:$0xff] }
 0x195   : > { %7517 = vmatprep.subr.bf16.mxu0 %v8224_v35  ;;  %v2673_v11 = vshll.u32 %v9245_v62, 16 }
 0x196   : > { %7900 = vmatpush3.bf16.msra.mxu1 %v8223_v37  ;;  %v7257_v56 = vpack.c.bf16 %v2431_v38, %v2431_v38  ;;  %v7258_v14 = vpack.c.bf16 %v2432_v27, %v2432_v27  ;;  %v2433_v16 = vmax.f32 %v2425_v8, 0.0  ;;  %v2434_v46 = vmax.f32 %v2426_v12, 0.0 }
 0x197   : > { %7901 = vmatprep.subr.bf16.mxu1 %v8226_v42 }
 0x198   : > { %7518 = vmatpush3.bf16.msra.mxu0 %v8225_v44  ;;  %v2472_v7 = vshrl.u32 %v7257_v56, 16  ;;  %v2475_v52 = vshll.u32 %v7257_v56, 16  ;;  %v2480_v57 = vshrl.u32 %v7258_v14, 16  ;;  %v2483_v2 = vshll.u32 %v7258_v14, 16 }
 0x199   : > { %7519 = vmatprep.subr.bf16.mxu0 %v8227_v47  ;;  %v7259_v10 = vpack.c.bf16 %v2433_v16, %v2433_v16  ;;  %v7260_v32 = vpack.c.bf16 %v2434_v46, %v2434_v46  ;;  %v6641_v44 = vcombine.low %v2622_v24, %v9237_v29  ;;  %v7303_v29 = vunpack.c.l.bf16 %v7346_v40 }
 0x19a   : > { %7902 = vmatpush3.bf16.msra.mxu1 %v8226_v42  ;;  %v2474_v55 = vrot.slane %v2472_v7, 7  ;;  %v2482_v36 = vrot.slane %v2480_v57, 7 }
 0x19b   : > { %7903 = vmatprep.subr.bf16.mxu1 %v8229_v9  ;;  %v2488_v33 = vshrl.u32 %v7259_v10, 16  ;;  %v2491_v39 = vshll.u32 %v7259_v10, 16  ;;  %v2496_v42 = vshrl.u32 %v7260_v32, 16  ;;  %v2750_v41 = vrot.slane %v6641_v44, 1 }
 0x19c   : > { %7520 = vmatpush3.bf16.msra.mxu0 %v8228_v17  ;;  %v2477_v51 = vor.u32 %v2475_v52, %v2474_v55  ;;  %v2478_v60 = vrot.slane %v2474_v55, 4  ;;  %v2485_v4 = vor.u32 %v2483_v2, %v2482_v36  ;;  %v2486_v15 = vrot.slane %v2482_v36, 4  ;;  %v7345_v17 = vld [vmem:[%s8608_s11 + $0x10] sm:$0xff]  }
 0x19d   : > { %7521 = vmatprep.subr.bf16.mxu0 %v8230_v18  ;;  %v2490_v47 = vrot.slane %v2488_v33, 7  ;;  %v2499_v18 = vshll.u32 %v7260_v32, 16  ;;  %v2498_v48 = vrot.slane %v2496_v42, 7  ;;  %v7300_v50 = vunpack.c.h.bf16 %v7345_v17 }
 0x19e   : > { %7904 = vmatpush3.bf16.msra.mxu1 %v8229_v9  ;;  %v2556_v0 = vsel %vm9250_vm10, %v2477_v51, %v2555_v31  ;;  %v2562_v43 = vsel %vm9256_vm11, %v2478_v60, %v2561_v34  ;;  %v2565_v37 = vsel %vm9250_vm10, %v2485_v4, %v2564_v58  ;;  %v2568_v35 = vsel %vm9256_vm11, %v2486_v15, %v2567_v26  ;;  %v2570_v9 = vld [vmem:[#allocation2 + $0x18] sm:$0xf] }
 0x19f   : > { %7905 = vmatprep.subr.bf16.mxu1 %v8232_v61  ;;  %2557 = vst [vmem:[#allocation2 + $0x8] sm:$0xf] %v2556_v0  ;;  %2563 = vst [vmem:[#allocation2 + $0xc] sm:$0x1] %v2562_v43  ;;  %v2494_v19 = vrot.slane %v2490_v47, 4  ;;  %v2501_v20 = vor.u32 %v2499_v18, %v2498_v48  ;;  %v2502_v5 = vrot.slane %v2498_v48, 4  ;;  %v2413_v38 = vmul.f32 %v7300_v50, %v9209_v30 }
 0x1a0   : > { %7522 = vmatpush3.bf16.msra.mxu0 %v8231_v21  ;;  %2566 = vst [vmem:[#allocation2 + $0x10] sm:$0xf] %v2565_v37  ;;  %2569 = vst [vmem:[#allocation2 + $0x14] sm:$0x1] %v2568_v35  ;;  %v2573_v21 = vld [vmem:[#allocation2 + $0x1c] sm:$0x1]  ;;  %v2414_v57 = vmul.f32 %v7303_v29, %v9209_v30  ;;  %v7304_v55 = vunpack.c.h.bf16 %v7346_v40 }
 0x1a1   : > { %7523 = vmatprep.subr.bf16.mxu0 %v8233_v59  ;;  %v7299_v59 = vunpack.c.l.bf16 %v7345_v17  ;;  %v2574_v27 = vsel %vm9256_vm11, %v2494_v19, %v2573_v21  ;;  %v2577_v63 = vsel %vm9250_vm10, %v2501_v20, %v2576_v49  ;;  %v2580_v14 = vsel %vm9256_vm11, %v2502_v5, %v2579_v25  ;;  %v2585_v19 = vld [vmem:[#allocation2 + $0x2c] sm:$0x1]  ;;  %v8248_v25 = vld [vmem:[%s10162_s5 + $0x370] sm:$0xff]  }
 0x1a2   : > { %7906 = vmatpush3.bf16.msra.mxu1 %v8232_v61  ;;  %v2671_v61 = vshrl.u32 %v9245_v62, 16  ;;  %2575 = vst [vmem:[#allocation2 + $0x1c] sm:$0x1] %v2574_v27  ;;  %v2428_v6 = vadd.f32 %v9217_v3, %v2413_v38  ;;  %2578 = vst [vmem:[#allocation2 + $0x20] sm:$0xf] %v2577_v63  ;;  %v2429_v26 = vadd.f32 %v9217_v3, %v2414_v57  ;;  %v8249_v38 = vld [vmem:[%s10162_s5 + $0x330] sm:$0xff]  }
 0x1a3   : > { %7907 = vmatprep.subr.bf16.mxu1 %v8235_v13  ;;  %2581 = vst [vmem:[#allocation2 + $0x24] sm:$0x1] %v2580_v14  ;;  %v2415_v44 = vmul.f32 %v7304_v55, %v9209_v30 }
 0x1a4   : > { %7524 = vmatpush3.bf16.msra.mxu0 %v8234_v22  ;;  %v2493_v22 = vor.u32 %v2491_v39, %v2490_v47  ;;  %v2436_v60 = vmax.f32 %v2428_v6, 0.0  ;;  %v2437_v33 = vmax.f32 %v2429_v26, 0.0  ;;  %v2597_v26 = vld [vmem:[#allocation2 + $0x3c] sm:$0x1] }
 0x1a5   : > { %7561 = vmatprep.subr.bf16.mxu0 %v8238_v45  ;;  %v2412_v45 = vmul.f32 %v7299_v59, %v9209_v30 }
 0x1a6   : > { %7908 = vmatpush3.bf16.msra.mxu1 %v8235_v13  ;;  %v2675_v13 = vrot.slane %v2673_v11, 1  ;;  %v2571_v53 = vsel %vm9250_vm10, %v2493_v22, %v2570_v9  ;;  %v2607_v7 = vld [vmem:[#allocation2 + $0x8] sm:$0xf]  ;;  %v2615_v52 = vld [vmem:[#allocation2 + $0xc] sm:$0x1]  ;;  %v7262_v42 = vpack.c.bf16 %v2436_v60, %v2436_v60  ;;  %v7263_v27 = vpack.c.bf16 %v2437_v33, %v2437_v33 }
 0x1a7   : > { %7917 = vmatprep.subr.bf16.mxu1 %v9233_v28  ;;  %2572 = vst [vmem:[#allocation2 + $0x18] sm:$0xf] %v2571_v53  ;;  %v2427_v56 = vadd.f32 %v9217_v3, %v2412_v45  ;;  %v2623_v8 = vld [vmem:[#allocation2 + $0x8] sm:$0xe]  ;;  %v6634_v31 = vcombine.low %v2607_v7, %v2615_v52  ;;  %v9286_v62 = vld [vmem:[#allocation2 + $0x10] sm:$0xf]  ;;  %v6697_v21 = vcombine.low %v9235_v54, %v2607_v7 }
 0x1a8   : > { %v6642_v34 = vcombine.low %v2623_v8, %v2615_v52  ;;  %v2616_v2 = vld [vmem:[#allocation2 + $0x14] sm:$0x1]  ;;  %v2624_v12 = vld [vmem:[#allocation2 + $0x10] sm:$0xe]  ;;  %v2676_v10 = vor.u32 %v2675_v13, %v2671_v61  ;;  %v8240_v13 = vld [vmem:[%s10162_s5 + $0x338] sm:$0xff]   ;;  %v2430_v54 = vadd.f32 %v9217_v3, %v2415_v44  ;;  %v2512_v29 = vshrl.u32 %v7262_v42, 16 }
 0x1a9   : > { %v6635_v16 = vcombine.low %v9286_v62, %v2616_v2  ;;  %v6643_v36 = vcombine.low %v2624_v12, %v2616_v2  ;;  %v2435_v58 = vmax.f32 %v2427_v56, 0.0  ;;  %v2678_v24 = vshrl.u32 %v6634_v31, 16  ;;  %v2617_v37 = vld [vmem:[#allocation2 + $0x1c] sm:$0x1]  ;;  %v9294_v61 = vld [vmem:[#allocation2 + $0x20] sm:$0xf] }
 0x1aa   : > { %v2680_v46 = vshll.u32 %v6634_v31, 16  ;;  %v2751_v51 = vrot.slane %v6642_v34, 1  ;;  %v9297_v49 = vld [vmem:[#allocation2 + $0x24] sm:$0x1]  ;;  %v2582_v22 = vld [vmem:[#allocation2 + $0x28] sm:$0xf] }
 0x1ab   : > { %v2752_v4 = vrot.slane %v6643_v36, 1  ;;  %v2687_v11 = vshll.u32 %v6635_v16, 16  ;;  %v7261_v15 = vpack.c.bf16 %v2435_v58, %v2435_v58  ;;  %v2685_v43 = vshrl.u32 %v6635_v16, 16  ;;  %v2626_v6 = vld [vmem:[#allocation2 + $0x20] sm:$0xe]  ;;  %v8251_v8 = vld [vmem:[%s10162_s5 + $0x368] sm:$0xff]  }
 0x1ac   : > { %v2682_v32 = vrot.slane %v2680_v46, 1  ;;  %v6699_v0 = vcombine.low %v2750_v41, %v2751_v51  ;;  %v8250_v41 = vld [vmem:[%s10162_s5 + $0x3b0] sm:$0xff]   ;;  %v9314_v53 = vcombine.low %v9294_v61, %v9297_v49  ;;  %v2514_v57 = vrot.slane %v2512_v29, 7  ;;  %v8254_v12 = vld [vmem:[%s10162_s5 + $0x3a8] sm:$0xff]   ;;  %v2594_v58 = vld [vmem:[#allocation2 + $0x38] sm:$0xf] }
 0x1ad   : > { %v2689_v18 = vrot.slane %v2687_v11, 1  ;;  %v2504_v59 = vshrl.u32 %v7261_v15, 16  ;;  %v2507_v48 = vshll.u32 %v7261_v15, 16  ;;  %v2588_v7 = vld [vmem:[#allocation2 + $0x30] sm:$0xf]  ;;  %v2515_v31 = vshll.u32 %v7262_v42, 16 }
 0x1ae   : > { %v9290_v39 = vld [vmem:[#allocation2 + $0x18] sm:$0xf]  ;;  %v2683_v47 = vor.u32 %v2682_v32, %v2678_v24  ;;  %7909 = vmatprep.mubr.bf16.mxu1 %v6699_v0  ;;  %v2591_v52 = vld [vmem:[#allocation2 + $0x34] sm:$0x1]  ;;  %v2520_v34 = vshrl.u32 %v7263_v27, 16  ;;  %v2523_v36 = vshll.u32 %v7263_v27, 16  ;;  %v6645_v11 = vcombine.low %v2626_v6, %v9297_v49 }
 0x1af   : > { %v2625_v35 = vld [vmem:[#allocation2 + $0x18] sm:$0xe]  ;;  %v6636_v9 = vcombine.low %v9290_v39, %v2617_v37  ;;  %v2506_v5 = vrot.slane %v2504_v59, 7  ;;  %v2690_v56 = vor.u32 %v2689_v18, %v2685_v43  ;;  %v6700_v24 = vcombine.low %v9286_v62, %v9290_v39  ;;  %v8255_v62 = vld [vmem:[%s10162_s5 + $0x360] sm:$0xff]   ;;  %v9341_v39 = vld [vmem:[#allocation2 + $0x8] sm:$0xf] }
 0x1b0   : > { %v6644_v17 = vcombine.low %v2625_v35, %v2617_v37  ;;  %v6698_v50 = vcombine.low %v2676_v10, %v2683_v47  ;;  %v2517_v46 = vor.u32 %v2515_v31, %v2514_v57  ;;  %v2518_v51 = vrot.slane %v2514_v57, 4  ;;  %v9343_v37 = vld [vmem:[#allocation2 + $0x10] sm:$0xf]  ;;  %v3153_v35 = vld [vmem:[#allocation2 + $0xc] sm:$0x1]  ;;  %v8256_v44 = vld [vmem:[%s10162_s5 + $0x320] sm:$0xff]  }
 0x1b1   : > { %v2692_v45 = vshrl.u32 %v6636_v9, 16  ;;  %v2694_v20 = vshll.u32 %v6636_v9, 16  ;;  %v2509_v3 = vor.u32 %v2507_v48, %v2506_v5  ;;  %v2510_v14 = vrot.slane %v2506_v5, 4  ;;  %v3154_v42 = vld [vmem:[#allocation2 + $0x14] sm:$0x1]  ;;  %v8257_v18 = vld [vmem:[%s10162_s5 + $0x3a0] sm:$0xff]  }
 0x1b2   : > { %v2753_v30 = vrot.slane %v6644_v17, 1  ;;  %3031 = vmatprep.mubr.bf16.mxu0 %v6698_v50  ;;  %v2522_v60 = vrot.slane %v2520_v34, 7  ;;  %v2438_v15 = vmax.f32 %v2430_v54, 0.0  ;;  %v2589_v43 = vsel %vm9250_vm10, %v2517_v46, %v2588_v7  ;;  %v3161_v48 = vld [vmem:[#allocation2 + $0x8] sm:$0xe]  ;;  %v8269_v27 = vld [vmem:[%s10162_s5 + $0x398] sm:$0xff]  }
 0x1b3   : > { %3032 = vmatmul.mubr.bf16.vlgmr.msra.gmra.mxu0 %v6697_v21  ;;  %v2696_v63 = vrot.slane %v2694_v20, 1  ;;  %v2583_v55 = vsel %vm9250_vm10, %v2509_v3, %v2582_v22  ;;  %v2586_v16 = vsel %vm9256_vm11, %v2510_v14, %v2585_v19  ;;  %v2592_v33 = vsel %vm9256_vm11, %v2518_v51, %v2591_v52  ;;  %2590 = vst [vmem:[#allocation2 + $0x30] sm:$0xf] %v2589_v43  ;;  %v3162_v22 = vld [vmem:[#allocation2 + $0x10] sm:$0xe] }
 0x1b4   : > { %v6702_v40 = vcombine.low %v2752_v4, %v2753_v30  ;;  %7562 = vmatpush3.bf16.msra.mxu0 %v8240_v13  ;;  %2584 = vst [vmem:[#allocation2 + $0x28] sm:$0xf] %v2583_v55  ;;  %2587 = vst [vmem:[#allocation2 + $0x2c] sm:$0x1] %v2586_v16  ;;  %v2701_v4 = vshll.u32 %v9314_v53, 16  ;;  %v2525_v32 = vor.u32 %v2523_v36, %v2522_v60  ;;  %v2526_v0 = vrot.slane %v2522_v60, 4 }
 0x1b5   : > { %7563 = vmatprep.subr.bf16.mxu0 %v8248_v25  ;;  %v2697_v2 = vor.u32 %v2696_v63, %v2692_v45  ;;  %2593 = vst [vmem:[#allocation2 + $0x34] sm:$0x1] %v2592_v33  ;;  %v9352_v17 = vpack.c.bf16 %v2438_v15, %v2438_v15  ;;  %v9358_v21 = vcombine.low %v9341_v39, %v3153_v35  ;;  %v2699_v49 = vshrl.u32 %v9314_v53, 16  ;;  %v8260_v13 = vld [vmem:[%s10162_s5 + $0x358] sm:$0xff]   ;;  %v8270_v29 = vld [vmem:[%s10162_s5 + $0x350] sm:$0xff]  }
 0x1b6   : > { %7910 = vmatmul.mubr.bf16.vlgmr.msra.gmra.mxu1 %v6702_v40  ;;  %v2595_v47 = vsel %vm9250_vm10, %v2525_v32, %v2594_v58  ;;  %v2598_v9 = vsel %vm9256_vm11, %v2526_v0, %v2597_v26  ;;  %v9361_v59 = vcombine.low %v9343_v37, %v3154_v42  ;;  %v2703_v50 = vrot.slane %v2701_v4, 1  ;;  %v8262_v40 = vld [vmem:[%s10162_s5 + $0x318] sm:$0xff]   ;;  %v8271_v46 = vld [vmem:[%s10162_s5 + $0x310] sm:$0xff]   ;;  %v3156_v60 = vld [vmem:[#allocation2 + $0x24] sm:$0x1] }
 0x1b7   : > { %7918 = vmatpush3.bf16.msra.mxu1 %v9233_v28  ;;  %v8253_v28 = vld [vmem:[%s10162_s5 + $0x328] sm:$0xff]   ;;  %v6701_v10 = vcombine.low %v2690_v56, %v2697_v2  ;;  %2596 = vst [vmem:[#allocation2 + $0x38] sm:$0xf] %v2595_v47  ;;  %2599 = vst [vmem:[#allocation2 + $0x3c] sm:$0x1] %v2598_v9  ;;  %v2754_v30 = vrot.slane %v6645_v11, 1  ;;  %v6741_v20 = vcombine.low %v3161_v48, %v3153_v35 }
 0x1b8   : > { %7919 = vmatprep.subr.bf16.mxu1 %v8250_v41  ;;  %7564 = vmatpush3.bf16.msra.mxu0 %v8249_v38  ;;  %v6742_v5 = vcombine.low %v3162_v22, %v3154_v42  ;;  %v2528_v53 = vshrl.u32 %v9352_v17, 16  ;;  %v3212_v56 = vshll.u32 %v9358_v21, 16  ;;  %v3217_v63 = vshrl.u32 %v9361_v59, 16  ;;  %v3163_v55 = vld [vmem:[#allocation2 + $0x18] sm:$0xe]  ;;  %v8272_v51 = vld [vmem:[%s10162_s5 + $0x390] sm:$0xff]  }
 0x1b9   : > { %3039 = vmatprep.mubr.bf16.mxu0 %v6701_v10  ;;  %7565 = vmatprep.subr.bf16.mxu0 %v8251_v8  ;;  %v3219_v3 = vshll.u32 %v9361_v59, 16  ;;  %v9384_v14 = vrot.slane %v6741_v20, 1  ;;  %v2704_v31 = vor.u32 %v2703_v50, %v2699_v49  ;;  %v3164_v10 = vld [vmem:[#allocation2 + $0x20] sm:$0xe]  ;;  %v8276_v48 = vld [vmem:[%s10162_s5 + $0x388] sm:$0xff]  }
 0x1ba   : > { %v9386_v8 = vld [vmem:[#allocation2 + $0x30] sm:$0xf]  ;;  %v9388_v57 = vrot.slane %v6742_v5, 1  ;;  %v3214_v33 = vrot.slane %v3212_v56, 1  ;;  %v9415_v20 = vld [vmem:[#allocation2 + $0x20] sm:$0xf] }
 0x1bb   : > { %7920 = vmatpush3.bf16.msra.mxu1 %v8250_v41  ;;  %3040 = vmatmul.mubr.bf16.gmra.mxu0 %v6700_v24  ;;  %v9367_v19 = vld [vmem:[#allocation2 + $0x28] sm:$0xf]  ;;  %v2619_v25 = vld [vmem:[#allocation2 + $0x2c] sm:$0x1]  ;;  %v3210_v41 = vshrl.u32 %v9358_v21, 16  ;;  %v3221_v49 = vrot.slane %v3219_v3, 1 }
 0x1bc   : > { %7921 = vmatprep.subr.bf16.mxu1 %v8254_v12  ;;  %7566 = vmatpush3.bf16.msra.mxu0 %v8253_v28  ;;  %v2627_v45 = vld [vmem:[#allocation2 + $0x28] sm:$0xe]  ;;  %v6638_v54 = vcombine.low %v9367_v19, %v2619_v25  ;;  %v2620_v34 = vld [vmem:[#allocation2 + $0x34] sm:$0x1]  ;;  %v2628_v2 = vld [vmem:[#allocation2 + $0x30] sm:$0xe]  ;;  %v6703_v4 = vcombine.low %v9294_v61, %v9367_v19  ;;  %v6799_v22 = vcombine.low %v9384_v14, %v9388_v57 }
 0x1bd   : > { %7567 = vmatprep.subr.bf16.mxu0 %v8255_v62  ;;  %v6646_v38 = vcombine.low %v2627_v45, %v2619_v25  ;;  %v6639_v24 = vcombine.low %v9386_v8, %v2620_v34  ;;  %v6647_v28 = vcombine.low %v2628_v2, %v2620_v34  ;;  %v8273_v62 = vld [vmem:[%s10162_s5 + $0x348] sm:$0xff]   ;;  %v6744_v19 = vcombine.low %v3164_v10, %v3156_v60  ;;  %v9413_v25 = vld [vmem:[#allocation2 + $0x18] sm:$0xf]  ;;  %v8279_v56 = vld [vmem:[%s10162_s5 + $0x380] sm:$0xff]  }
 0x1be   : > { %v2706_v6 = vshrl.u32 %v6638_v54, 16  ;;  %v2708_v7 = vshll.u32 %v6638_v54, 16  ;;  %v9390_v58 = vld [vmem:[#allocation2 + $0x38] sm:$0xf]  ;;  %v2621_v26 = vld [vmem:[#allocation2 + $0x3c] sm:$0x1]  ;;  %v3215_v3 = vor.u32 %v3214_v33, %v3210_v41  ;;  %v3222_v14 = vor.u32 %v3221_v49, %v3217_v63 }
 0x1bf   : > { %7922 = vmatpush3.bf16.msra.mxu1 %v8254_v12  ;;  %v2755_v52 = vrot.slane %v6646_v38, 1  ;;  %v3155_v12 = vld [vmem:[#allocation2 + $0x1c] sm:$0x1]  ;;  %v2629_v11 = vld [vmem:[#allocation2 + $0x38] sm:$0xe]  ;;  %v6640_v15 = vcombine.low %v9390_v58, %v2621_v26  ;;  %v2756_v43 = vrot.slane %v6647_v28, 1  ;;  %v6706_v59 = vcombine.low %v9386_v8, %v9390_v58 }
 0x1c0   : > { %7923 = vmatprep.subr.bf16.mxu1 %v8257_v18  ;;  %7568 = vmatpush3.bf16.msra.mxu0 %v8256_v44  ;;  %v2710_v16 = vrot.slane %v2708_v7, 1  ;;  %v6648_v0 = vcombine.low %v2629_v11, %v2621_v26  ;;  %v2713_v35 = vshrl.u32 %v6639_v24, 16  ;;  %v2715_v42 = vshll.u32 %v6639_v24, 16  ;;  %v8277_v38 = vld [vmem:[%s10162_s5 + $0x340] sm:$0xff]   ;;  %v8282_v57 = vld [vmem:[%s10162_s5 + $0x438] sm:$0xff]  }
 0x1c1   : > { %7569 = vmatprep.subr.bf16.mxu0 %v8260_v13  ;;  %v6705_v36 = vcombine.low %v2754_v30, %v2755_v52  ;;  %v2720_v44 = vshrl.u32 %v6640_v15, 16  ;;  %v2722_v47 = vshll.u32 %v6640_v15, 16  ;;  %v6743_v50 = vcombine.low %v3163_v55, %v3155_v12  ;;  %v9444_v26 = vld [vmem:[#allocation2 + $0x30] sm:$0xf]  ;;  %v3157_v24 = vld [vmem:[#allocation2 + $0x2c] sm:$0x1] }
 0x1c2   : > { %v2711_v32 = vor.u32 %v2710_v16, %v2706_v6  ;;  %v2757_v9 = vrot.slane %v6648_v0, 1  ;;  %v2717_v13 = vrot.slane %v2715_v42, 1  ;;  %v6735_v5 = vcombine.low %v9413_v25, %v3155_v12  ;;  %v9441_v16 = vld [vmem:[#allocation2 + $0x28] sm:$0xf]  ;;  %v3158_v28 = vld [vmem:[#allocation2 + $0x34] sm:$0x1] }
 0x1c3   : > { %7924 = vmatpush3.bf16.msra.mxu1 %v8257_v18  ;;  %7913 = vmatprep.mubr.bf16.mxu1 %v6705_v36  ;;  %v8275_v18 = vld [vmem:[%s10162_s5 + $0x308] sm:$0xff]   ;;  %v2724_v30 = vrot.slane %v2722_v47, 1  ;;  %v9432_v6 = vrot.slane %v6743_v50, 1  ;;  %v2530_v21 = vrot.slane %v2528_v53, 7  ;;  %v6798_v12 = vcombine.low %v3215_v3, %v3222_v14  ;;  %v8289_v53 = vld [vmem:[%s10162_s5 + $0x478] sm:$0xff]   ;;  %v8301_v14 = vld [vmem:[%s10162_s5 + $0x460] sm:$0xff]  }
 0x1c4   : > { %7925 = vmatprep.subr.bf16.mxu1 %v8269_v27  ;;  %7570 = vmatpush3.bf16.msra.mxu0 %v8262_v40  ;;  %v6704_v61 = vcombine.low %v2704_v31, %v2711_v32  ;;  %v6708_v45 = vcombine.low %v2756_v43, %v2757_v9  ;;  %v2718_v54 = vor.u32 %v2717_v13, %v2713_v35  ;;  %v3226_v7 = vshll.u32 %v6735_v5, 16  ;;  %v3166_v0 = vld [vmem:[#allocation2 + $0x30] sm:$0xe]  ;;  %v2600_v33 = vld [vmem:[#allocation2 + $0x40] sm:$0xf]  ;;  %v8284_v42 = vld [vmem:[%s10162_s5 + $0x3f8] sm:$0xff]  }
 0x1c5   : > { %7571 = vmatprep.subr.bf16.mxu0 %v8270_v29  ;;  %v2725_v40 = vor.u32 %v2724_v30, %v2720_v44  ;;  %v8278_v29 = vld [vmem:[%s10162_s5 + $0x300] sm:$0xff]   ;;  %v3292_v31 = vrot.slane %v6744_v19, 1  ;;  %v3224_v2 = vshrl.u32 %v6735_v5, 16  ;;  %v2531_v36 = vshll.u32 %v9352_v17, 16  ;;  %v3167_v13 = vld [vmem:[#allocation2 + $0x38] sm:$0xe] }
 0x1c6   : > { %3047 = vmatprep.mubr.bf16.mxu0 %v6704_v61  ;;  %7914 = vmatmul.mubr.bf16.gmra.mxu1 %v6708_v45  ;;  %v3228_v41 = vrot.slane %v3226_v7, 1  ;;  %v6737_v8 = vcombine.low %v9441_v16, %v3157_v24  ;;  %v6738_v58 = vcombine.low %v9444_v26, %v3158_v28  ;;  %v6797_v32 = vcombine.low %v9341_v39, %v9343_v37  ;;  %v2603_v35 = vld [vmem:[#allocation2 + $0x44] sm:$0x1]  ;;  %v8290_v39 = vld [vmem:[%s10162_s5 + $0x430] sm:$0xff]   ;;  %v8298_v5 = vld [vmem:[%s10162_s5 + $0x468] sm:$0xff]  }
 0x1c7   : > { %7926 = vmatpush3.bf16.msra.mxu1 %v8269_v27  ;;  %3048 = vmatmul.mubr.bf16.gmra.mxu0 %v6703_v4  ;;  %v6736_v27 = vcombine.low %v9415_v20, %v3156_v60  ;;  %v6707_v52 = vcombine.low %v2718_v54, %v2725_v40  ;;  %v2533_v17 = vor.u32 %v2531_v36, %v2530_v21  ;;  %v8292_v60 = vld [vmem:[%s10162_s5 + $0x470] sm:$0xff]  }
 0x1c8   : > { %7927 = vmatprep.subr.bf16.mxu1 %v8272_v51  ;;  %7572 = vmatpush3.bf16.msra.mxu0 %v8271_v46  ;;  %v6802_v46 = vcombine.low %v9432_v6, %v3292_v31  ;;  %v3229_v10 = vor.u32 %v3228_v41, %v3224_v2  ;;  %v3240_v11 = vshll.u32 %v6737_v8, 16  ;;  %v3247_v15 = vshll.u32 %v6738_v58, 16  ;;  %v8291_v40 = vld [vmem:[%s10162_s5 + $0x3f0] sm:$0xff]   ;;  %v8297_v2 = vld [vmem:[%s10162_s5 + $0x3e8] sm:$0xff]  }
 0x1c9   : > { %7573 = vmatprep.subr.bf16.mxu0 %v8273_v62  ;;  %7933 = vmatprep.mubr.bf16.mxu1 %v6799_v22  ;;  %v3233_v34 = vshll.u32 %v6736_v27, 16  ;;  %v3231_v63 = vshrl.u32 %v6736_v27, 16  ;;  %v3165_v62 = vld [vmem:[#allocation2 + $0x28] sm:$0xe]  ;;  %v3238_v44 = vshrl.u32 %v6737_v8, 16  ;;  %v3245_v47 = vshrl.u32 %v6738_v58, 16 }
 0x1ca   : > { %3055 = vmatprep.mubr.bf16.mxu0 %v6707_v52  ;;  %v6745_v43 = vcombine.low %v3165_v62, %v3157_v24  ;;  %v6746_v61 = vcombine.low %v3166_v0, %v3158_v28  ;;  %v2601_v9 = vsel %vm9250_vm10, %v2533_v17, %v2600_v33  ;;  %v3242_v37 = vrot.slane %v3240_v11, 1  ;;  %v9496_v24 = vld [vmem:[#allocation2 + $0x10] sm:$0xf]  ;;  %v3693_v8 = vld [vmem:[#allocation2 + $0x14] sm:$0x1] }
 0x1cb   : > { %7928 = vmatpush3.bf16.msra.mxu1 %v8272_v51  ;;  %v3235_v55 = vrot.slane %v3233_v34, 1  ;;  %v2534_v51 = vrot.slane %v2530_v21, 4  ;;  %2602 = vst [vmem:[#allocation2 + $0x40] sm:$0xf] %v2601_v9  ;;  %v3249_v19 = vrot.slane %v3247_v15, 1  ;;  %v6800_v31 = vcombine.low %v9413_v25, %v9415_v20  ;;  %v8313_v25 = vld [vmem:[%s10162_s5 + $0x458] sm:$0xff]  }
 0x1cc   : > { %7574 = vmatpush3.bf16.msra.mxu0 %v8275_v18  ;;  %7929 = vmatprep.subr.bf16.mxu1 %v8276_v48  ;;  %v9462_v18 = vld [vmem:[#allocation2 + $0x38] sm:$0xf]  ;;  %v3293_v49 = vrot.slane %v6745_v43, 1  ;;  %v3294_v45 = vrot.slane %v6746_v61, 1  ;;  %v3694_v58 = vld [vmem:[#allocation2 + $0x1c] sm:$0x1]  ;;  %v6803_v33 = vcombine.low %v9441_v16, %v9444_v26 }
 0x1cd   : > { %7575 = vmatprep.subr.bf16.mxu0 %v8277_v38  ;;  %v3236_v4 = vor.u32 %v3235_v55, %v3231_v63  ;;  %v2604_v50 = vsel %vm9256_vm11, %v2534_v51, %v2603_v35  ;;  %v8295_v38 = vld [vmem:[%s10162_s5 + $0x428] sm:$0xff]   ;;  %v3702_v11 = vld [vmem:[#allocation2 + $0x18] sm:$0xe]  ;;  %v3695_v0 = vld [vmem:[#allocation2 + $0x24] sm:$0x1] }
 0x1ce   : > { %2605 = vst [vmem:[#allocation2 + $0x44] sm:$0x1] %v2604_v50  ;;  %v6805_v54 = vcombine.low %v3293_v49, %v3294_v45  ;;  %v8304_v15 = vld [vmem:[%s10162_s5 + $0x418] sm:$0xff]   ;;  %v3696_v43 = vld [vmem:[#allocation2 + $0x2c] sm:$0x1]  ;;  %v8316_v35 = vld [vmem:[%s10162_s5 + $0x450] sm:$0xff]  }
 0x1cf   : > { %7930 = vmatpush3.bf16.msra.mxu1 %v8276_v48  ;;  %3056 = vmatmul.mubr.bf16.gmra.mxu0 %v6706_v59  ;;  %v3159_v48 = vld [vmem:[#allocation2 + $0x3c] sm:$0x1]  ;;  %v6801_v22 = vcombine.low %v3229_v10, %v3236_v4  ;;  %v3701_v4 = vld [vmem:[#allocation2 + $0x10] sm:$0xe]  ;;  %v3704_v61 = vld [vmem:[#allocation2 + $0x28] sm:$0xe] }
 0x1d0   : > { %7576 = vmatpush3.bf16.msra.mxu0 %v8278_v29  ;;  %7931 = vmatprep.subr.bf16.mxu1 %v8279_v56  ;;  %v6739_v30 = vcombine.low %v9462_v18, %v3159_v48  ;;  %v3243_v29 = vor.u32 %v3242_v37, %v3238_v44  ;;  %v6747_v3 = vcombine.low %v3167_v13, %v3159_v48  ;;  %v9513_v49 = vld [vmem:[#allocation2 + $0x20] sm:$0xf]  ;;  %v8306_v16 = vld [vmem:[%s10162_s5 + $0x3d8] sm:$0xff]  }
 0x1d1   : > { %7613 = vmatprep.subr.bf16.mxu0 %v8282_v57  ;;  %3570 = vmatprep.mubr.bf16.mxu0 %v6798_v12  ;;  %v8299_v12 = vld [vmem:[%s10162_s5 + $0x420] sm:$0xff]   ;;  %v6841_v62 = vcombine.low %v3701_v4, %v3693_v8 }
 0x1d2   : > { %v3254_v27 = vshll.u32 %v6739_v30, 16  ;;  %v9482_v6 = vld [vmem:[#allocation2 + $0x40] sm:$0xf]  ;;  %v3252_v52 = vshrl.u32 %v6739_v30, 16  ;;  %v3295_v63 = vrot.slane %v6747_v3, 1 }
 0x1d3   : > { %7932 = vmatpush3.bf16.msra.mxu1 %v8279_v56  ;;  %v3250_v56 = vor.u32 %v3249_v19, %v3245_v47  ;;  %v3168_v7 = vld [vmem:[#allocation2 + $0x40] sm:$0xe]  ;;  %v9518_v30 = vld [vmem:[#allocation2 + $0x28] sm:$0xf]  ;;  %v8314_v19 = vld [vmem:[%s10162_s5 + $0x410] sm:$0xff]  }
 0x1d4   : > { %7941 = vmatprep.subr.bf16.mxu1 %v8289_v53  ;;  %v3256_v57 = vrot.slane %v3254_v27, 1  ;;  %v3703_v47 = vld [vmem:[#allocation2 + $0x20] sm:$0xe]  ;;  %v6844_v27 = vcombine.low %v3704_v61, %v3696_v43  ;;  %v3705_v3 = vld [vmem:[#allocation2 + $0x30] sm:$0xe] }
 0x1d5   : > { %v3160_v34 = vld [vmem:[#allocation2 + $0x44] sm:$0x1]  ;;  %v6804_v21 = vcombine.low %v3243_v29, %v3250_v56  ;;  %v9528_v56 = vld [vmem:[#allocation2 + $0x30] sm:$0xf] }
 0x1d6   : > { %7934 = vmatmul.mubr.bf16.vlgmr.msra.gmra.mxu1 %v6802_v46  ;;  %v6740_v59 = vcombine.low %v9482_v6, %v3160_v34  ;;  %v6748_v41 = vcombine.low %v3168_v7, %v3160_v34  ;;  %v3257_v28 = vor.u32 %v3256_v57, %v3252_v52  ;;  %v8300_v46 = vld [vmem:[%s10162_s5 + $0x3e0] sm:$0xff]   ;;  %v3706_v34 = vld [vmem:[#allocation2 + $0x38] sm:$0xe] }
 0x1d7   : > { %7942 = vmatpush3.bf16.msra.mxu1 %v8289_v53  ;;  %3571 = vmatmul.mubr.bf16.vlgmr.msra.gmra.mxu0 %v6797_v32  ;;  %v9498_v53 = vld [vmem:[#allocation2 + $0x18] sm:$0xf]  ;;  %v6842_v32 = vcombine.low %v3702_v11, %v3694_v58 }
 0x1d8   : > { %7943 = vmatprep.subr.bf16.mxu1 %v8292_v60  ;;  %7614 = vmatpush3.bf16.msra.mxu0 %v8284_v42  ;;  %v3296_v55 = vrot.slane %v6748_v41, 1  ;;  %v3259_v20 = vshrl.u32 %v6740_v59, 16  ;;  %v3261_v36 = vshll.u32 %v6740_v59, 16  ;;  %v6834_v10 = vcombine.low %v9498_v53, %v3694_v58  ;;  %v3698_v59 = vld [vmem:[#allocation2 + $0x3c] sm:$0x1] }
 0x1d9   : > { %3578 = vmatprep.mubr.bf16.mxu0 %v6801_v22  ;;  %7615 = vmatprep.subr.bf16.mxu0 %v8290_v39  ;;  %v3829_v39 = vrot.slane %v6841_v62, 1  ;;  %v3830_v37 = vrot.slane %v6842_v32, 1  ;;  %v6835_v22 = vcombine.low %v9513_v49, %v3695_v0  ;;  %v3708_v62 = vld [vmem:[#allocation2 + $0x48] sm:$0xe] }
 0x1da   : > { %7937 = vmatprep.mubr.bf16.mxu1 %v6805_v54  ;;  %v6808_v17 = vcombine.low %v3295_v63, %v3296_v55  ;;  %v3263_v51 = vrot.slane %v3261_v36, 1  ;;  %v3759_v48 = vshll.u32 %v6834_v10, 16  ;;  %v3757_v13 = vshrl.u32 %v6834_v10, 16  ;;  %v8321_v36 = vld [vmem:[%s10162_s5 + $0x400] sm:$0xff]   ;;  %v3700_v10 = vld [vmem:[#allocation2 + $0x4c] sm:$0x1] }
 0x1db   : > { %7944 = vmatpush3.bf16.msra.mxu1 %v8292_v60  ;;  %v6833_v60 = vcombine.low %v9496_v24, %v3693_v8  ;;  %v6836_v54 = vcombine.low %v9518_v30, %v3696_v43  ;;  %v3766_v29 = vshll.u32 %v6835_v22, 16  ;;  %v6806_v63 = vcombine.low %v9462_v18, %v9482_v6 }
 0x1dc   : > { %7945 = vmatprep.subr.bf16.mxu1 %v8298_v5  ;;  %7616 = vmatpush3.bf16.msra.mxu0 %v8291_v40  ;;  %v3264_v42 = vor.u32 %v3263_v51, %v3259_v20  ;;  %v3761_v45 = vrot.slane %v3759_v48, 1  ;;  %v8320_v40 = vld [vmem:[%s10162_s5 + $0x448] sm:$0xff]   ;;  %v6846_v18 = vcombine.low %v3706_v34, %v3698_v59 }
 0x1dd   : > { %7617 = vmatprep.subr.bf16.mxu0 %v8295_v38  ;;  %v3752_v44 = vshll.u32 %v6833_v60, 16  ;;  %v3750_v9 = vshrl.u32 %v6833_v60, 16  ;;  %v6843_v38 = vcombine.low %v3703_v47, %v3695_v0  ;;  %v3773_v57 = vshll.u32 %v6836_v54, 16  ;;  %v8319_v20 = vld [vmem:[%s10162_s5 + $0x3c8] sm:$0xff]   ;;  %v3699_v60 = vld [vmem:[#allocation2 + $0x44] sm:$0x1] }
 0x1de   : > { %7938 = vmatmul.mubr.bf16.gmra.mxu1 %v6808_v17  ;;  %v6807_v26 = vcombine.low %v3257_v28, %v3264_v42  ;;  %v3762_v52 = vor.u32 %v3761_v45, %v3757_v13  ;;  %v3764_v28 = vshrl.u32 %v6835_v22, 16  ;;  %v3768_v8 = vrot.slane %v3766_v29, 1  ;;  %v3692_v47 = vld [vmem:[#allocation2 + $0x48] sm:$0xf] }
 0x1df   : > { %7946 = vmatpush3.bf16.msra.mxu1 %v8298_v5  ;;  %3579 = vmatmul.mubr.bf16.gmra.mxu0 %v6800_v31  ;;  %v3754_v50 = vrot.slane %v3752_v44, 1  ;;  %v6899_v5 = vcombine.low %v3829_v39, %v3830_v37  ;;  %v3697_v31 = vld [vmem:[#allocation2 + $0x34] sm:$0x1]  ;;  %v3831_v55 = vrot.slane %v6843_v38, 1  ;;  %v3775_v17 = vrot.slane %v3773_v57, 1 }
 0x1e0   : > { %7947 = vmatprep.subr.bf16.mxu1 %v8301_v14  ;;  %7618 = vmatpush3.bf16.msra.mxu0 %v8297_v2  ;;  %v8317_v2 = vld [vmem:[%s10162_s5 + $0x408] sm:$0xff]   ;;  %v6845_v41 = vcombine.low %v3705_v3, %v3697_v31  ;;  %v6837_v58 = vcombine.low %v9528_v56, %v3697_v31  ;;  %v3834_v11 = vrot.slane %v6846_v18, 1  ;;  %v3769_v0 = vor.u32 %v3768_v8, %v3764_v28  ;;  %v3691_v44 = vld [vmem:[#allocation2 + $0x40] sm:$0xf] }
 0x1e1   : > { %3586 = vmatprep.mubr.bf16.mxu0 %v6804_v21  ;;  %7619 = vmatprep.subr.bf16.mxu0 %v8299_v12  ;;  %v3755_v7 = vor.u32 %v3754_v50, %v3750_v9  ;;  %v9536_v21 = vld [vmem:[#allocation2 + $0x38] sm:$0xf]  ;;  %v8323_v12 = vld [vmem:[%s10162_s5 + $0x440] sm:$0xff]   ;;  %v6848_v9 = vcombine.low %v3708_v62, %v3700_v10  ;;  %v6897_v39 = vcombine.low %v9496_v24, %v9498_v53 }
 0x1e2   : > { %7957 = vmatprep.mubr.bf16.mxu1 %v6899_v5  ;;  %v6838_v51 = vcombine.low %v9536_v21, %v3698_v59  ;;  %v3833_v4 = vrot.slane %v6845_v41, 1  ;;  %v3780_v43 = vshll.u32 %v6837_v58, 16  ;;  %v3778_v37 = vshrl.u32 %v6837_v58, 16 }
 0x1e3   : > { %7948 = vmatpush3.bf16.msra.mxu1 %v8301_v14  ;;  %v8315_v14 = vld [vmem:[%s10162_s5 + $0x3d0] sm:$0xff]   ;;  %v6898_v6 = vcombine.low %v3755_v7, %v3762_v52  ;;  %v6839_v50 = vcombine.low %v3691_v44, %v3699_v60  ;;  %v6840_v13 = vcombine.low %v3692_v47, %v3700_v10  ;;  %v3836_v5 = vrot.slane %v6848_v9, 1 }
 0x1e4   : > { %7949 = vmatprep.subr.bf16.mxu1 %v8313_v25  ;;  %7620 = vmatpush3.bf16.msra.mxu0 %v8300_v46  ;;  %v3771_v46 = vshrl.u32 %v6836_v54, 16  ;;  %v3787_v42 = vshll.u32 %v6838_v51, 16  ;;  %v6905_v48 = vcombine.low %v3833_v4, %v3834_v11  ;;  %v6900_v24 = vcombine.low %v9513_v49, %v9518_v30 }
 0x1e5   : > { %7621 = vmatprep.subr.bf16.mxu0 %v8304_v15  ;;  %v3707_v15 = vld [vmem:[#allocation2 + $0x40] sm:$0xe]  ;;  %v3801_v29 = vshll.u32 %v6840_v13, 16  ;;  %v3792_v53 = vshrl.u32 %v6839_v50, 16  ;;  %v3799_v7 = vshrl.u32 %v6840_v13, 16  ;;  %v6903_v34 = vcombine.low %v9528_v56, %v9536_v21 }
 0x1e6   : > { %v6847_v61 = vcombine.low %v3707_v15, %v3699_v60  ;;  %v6906_v59 = vcombine.low %v3691_v44, %v3692_v47 }
 0x1e7   : > { %7950 = vmatpush3.bf16.msra.mxu1 %v8313_v25  ;;  %3587 = vmatmul.mubr.bf16.gmra.mxu0 %v6803_v33  ;;  %v3832_v25 = vrot.slane %v6844_v27, 1  ;;  %v8322_v33 = vld [vmem:[%s10162_s5 + $0x3c0] sm:$0xff]   ;;  %v3794_v27 = vshll.u32 %v6839_v50, 16  ;;  %v3803_v52 = vrot.slane %v3801_v29, 1 }
 0x1e8   : > { %7951 = vmatprep.subr.bf16.mxu1 %v8316_v35  ;;  %7622 = vmatpush3.bf16.msra.mxu0 %v8306_v16  ;;  %v3782_v16 = vrot.slane %v3780_v43, 1  ;;  %v3835_v45 = vrot.slane %v6847_v61, 1 }
 0x1e9   : > { %3594 = vmatprep.mubr.bf16.mxu0 %v6807_v26  ;;  %7623 = vmatprep.subr.bf16.mxu0 %v8314_v19  ;;  %v6902_v32 = vcombine.low %v3831_v55, %v3832_v25  ;;  %v3785_v26 = vshrl.u32 %v6838_v51, 16  ;;  %v3789_v19 = vrot.slane %v3787_v42, 1  ;;  %v3804_v31 = vor.u32 %v3803_v52, %v3799_v7 }
 0x1ea   : > { %v3783_v54 = vor.u32 %v3782_v16, %v3778_v37  ;;  %v6908_v38 = vcombine.low %v3835_v45, %v3836_v5 }
 0x1eb   : > { %7952 = vmatpush3.bf16.msra.mxu1 %v8316_v35  ;;  %v3776_v35 = vor.u32 %v3775_v17, %v3771_v46 }
 0x1ec   : > { %7953 = vmatprep.subr.bf16.mxu1 %v8320_v40  ;;  %7624 = vmatpush3.bf16.msra.mxu0 %v8315_v14  ;;  %v3796_v14 = vrot.slane %v3794_v27, 1 }
 0x1ed   : > { %7625 = vmatprep.subr.bf16.mxu0 %v8317_v2  ;;  %v6901_v22 = vcombine.low %v3769_v0, %v3776_v35 }
 0x1ee   : > { %v3797_v57 = vor.u32 %v3796_v14, %v3792_v53  ;;  %v2758_v14 = vld [vmem:[#allocation3 + $0x30] sm:$0xff] }
 0x1ef   : > { %7954 = vmatpush3.bf16.msra.mxu1 %v8320_v40  ;;  %3595 = vmatmul.mubr.bf16.gmra.mxu0 %v6806_v63  ;;  %v3790_v40 = vor.u32 %v3789_v19, %v3785_v26 }
 0x1f0   : > { %7955 = vmatprep.subr.bf16.mxu1 %v8323_v12  ;;  %7626 = vmatpush3.bf16.msra.mxu0 %v8319_v20  ;;  %v6907_v2 = vcombine.low %v3797_v57, %v3804_v31 }
 0x1f1   : > { %4110 = vmatprep.mubr.bf16.mxu0 %v6898_v6  ;;  %7627 = vmatprep.subr.bf16.mxu0 %v8321_v36  ;;  %v6904_v3 = vcombine.low %v3783_v54, %v3790_v40 }
 0x1f3   : > { %7956 = vmatpush3.bf16.msra.mxu1 %v8323_v12 }
 0x1f4   : > { %7628 = vmatpush3.bf16.msra.mxu0 %v8322_v33 }
 0x1f6   : > { %7958 = vmatmul.mubr.bf16.vlgmr.msra.gmra.mxu1 %v6902_v32 }
 0x1f7   : > { %7961 = vmatprep.mubr.bf16.mxu1 %v6905_v48  ;;  %4111 = vmatmul.mubr.bf16.vlgmr.msra.gmra.mxu0 %v6897_v39 }
 0x1f8   : > { %4118 = vmatprep.mubr.bf16.mxu0 %v6901_v22 }
 0x1fe   : > { %7962 = vmatmul.mubr.bf16.gmra.mxu1 %v6908_v38 }
 0x1ff   : > { %4119 = vmatmul.mubr.bf16.gmra.mxu0 %v6900_v24 }
 0x200   : > { %4126 = vmatprep.mubr.bf16.mxu0 %v6904_v3 }
 0x207   : > { %4127 = vmatmul.mubr.bf16.gmra.mxu0 %v6903_v34 }
 0x208   : > { %4134 = vmatprep.mubr.bf16.mxu0 %v6907_v2 }
 0x20f   : > { %4135 = vmatmul.mubr.bf16.gmra.mxu0 %v6906_v59 }
 0x273   : > { %v7525_v41 = vpop.f32.mrf.mxu0 }
 0x275   : > { %v7526_v49 = vpop.f32.mrf.mxu0 }
 0x276   : > { %v9560_v25 = vpop.f32.mrf.mxu1  ;;  %v7527_v5 = vadd.f32 %v7526_v49, %v7525_v41 }
 0x277   : > { %v7528_v30 = vpop.f32.mrf.mxu0 }
 0x278   : > { %v3098_v36 = vpop.f32.mrf.mxu1 }
 0x279   : > { %v7529_v63 = vpop.f32.mrf.mxu0  ;;  %v3099_v24 = vadd.f32 %v7527_v5, %v3098_v36 }
 0x27a   : > { %v9566_v8 = vpop.f32.mrf.mxu1  ;;  %v7530_v53 = vadd.f32 %v7529_v63, %v7528_v30 }
 0x27b   : > { %v7531_v12 = vpop.f32.mrf.mxu0  ;;  %v3129_v59 = vadd.f32 %v3099_v24, %v2758_v14 }
 0x27c   : > { %v3101_v21 = vpop.f32.mrf.mxu1 }
 0x27d   : > { %v7532_v55 = vpop.f32.mrf.mxu0  ;;  %v3102_v41 = vadd.f32 %v7530_v53, %v3101_v21 }
 0x27e   : > { %v7533_v31 = vadd.f32 %v7532_v55, %v7531_v12 }
 0x27f   : > { %v9562_v20 = vpop.f32.mrf.mxu0  ;;  %v3130_v5 = vadd.f32 %v3102_v41, %v2759_v1 }
 0x280   : > { %v3107_v36 = vadd.f32 %v9560_v25, %v7533_v31 }
 0x281   : > { %v9564_v28 = vpop.f32.mrf.mxu0 }
 0x282   : > { %v7536_v12 = vadd.f32 %v9564_v28, %v9562_v20  ;;  %v2761_v20 = vld [vmem:[#allocation3 + $0x10] sm:$0xff] }
 0x284   : > { %v3110_v25 = vadd.f32 %v9566_v8, %v7536_v12 }
 0x286   : > { %v9572_v18 = vpop.f32.mrf.mxu1  ;;  %v3132_v14 = vadd.f32 %v3110_v25, %v2761_v20 }
 0x287   : > { %v9568_v56 = vpop.f32.mrf.mxu0 }
 0x288   : > { %v9578_v17 = vpop.f32.mrf.mxu1 }
 0x289   : > { %v9570_v58 = vpop.f32.mrf.mxu0 }
 0x28a   : > { %v9584_v10 = vpop.f32.mrf.mxu1  ;;  %v7539_v1 = vadd.f32 %v9570_v58, %v9568_v56  ;;  %v2762_v58 = vld [vmem:[#allocation3 + $0x8] sm:$0xff] }
 0x28b   : > { %v9574_v6 = vpop.f32.mrf.mxu0  ;;  %10190 = vst [vmem:[#allocation12_spill] sm:$0xff] %v9584_v10 }
 0x28c   : > { %v9590_v15 = vpop.f32.mrf.mxu1  ;;  %v3115_v8 = vadd.f32 %v7539_v1, %v9578_v17 }
 0x28d   : > { %v9576_v46 = vpop.f32.mrf.mxu0 }
 0x28f   : > { %v9580_v51 = vpop.f32.mrf.mxu0 }
 0x291   : > { %v9582_v60 = vpop.f32.mrf.mxu0 }
 0x292   : > { %v7545_v17 = vadd.f32 %v9582_v60, %v9580_v51 }
 0x293   : > { %v9586_v4 = vpop.f32.mrf.mxu0 }
 0x295   : > { %v9588_v11 = vpop.f32.mrf.mxu0 }
 0x296   : > { %v7935_v32 = vpop.f32.mrf.mxu1 }
 0x297   : > { %v7577_v62 = vpop.f32.mrf.mxu0 }
 0x298   : > { %v3637_v33 = vpop.f32.mrf.mxu1 }
 0x299   : > { %v7578_v0 = vpop.f32.mrf.mxu0 }
 0x29a   : > { %v9592_v44 = vpop.f32.mrf.mxu1  ;;  %v7579_v38 = vadd.f32 %v7578_v0, %v7577_v62 }
 0x29b   : > { %v7580_v43 = vpop.f32.mrf.mxu0 }
 0x29c   : > { %v3640_v9 = vpop.f32.mrf.mxu1  ;;  %v3638_v52 = vadd.f32 %v7579_v38, %v3637_v33 }
 0x29d   : > { %v7581_v35 = vpop.f32.mrf.mxu0 }
 0x29e   : > { %v9594_v39 = vpop.f32.mrf.mxu1  ;;  %v7582_v57 = vadd.f32 %v7581_v35, %v7580_v43 }
 0x29f   : > { %v7583_v42 = vpop.f32.mrf.mxu0 }
 0x2a0   : > { %v9596_v26 = vpop.f32.mrf.mxu1  ;;  %v3641_v62 = vadd.f32 %v7582_v57, %v3640_v9 }
 0x2a1   : > { %v7584_v47 = vpop.f32.mrf.mxu0 }
 0x2a2   : > { %v9602_v22 = vpop.f32.mrf.mxu1  ;;  %v7585_v0 = vadd.f32 %v7584_v47, %v7583_v42  ;;  %v3669_v21 = vadd.f32 %v3641_v62, %v3130_v5 }
 0x2a3   : > { %v7586_v61 = vpop.f32.mrf.mxu0  ;;  %10191 = vst [vmem:[#allocation13_spill] sm:$0xff] %v9602_v22  ;;  %v3668_v22 = vadd.f32 %v3638_v52, %v3129_v59 }
 0x2a4   : > { %v9608_v54 = vpop.f32.mrf.mxu1  ;;  %v3646_v35 = vadd.f32 %v7935_v32, %v7585_v0 }
 0x2a5   : > { %v7587_v48 = vpop.f32.mrf.mxu0 }
 0x2a6   : > { %v7588_v38 = vadd.f32 %v7587_v48, %v7586_v61  ;;  %v7542_v48 = vadd.f32 %v9576_v46, %v9574_v6 }
 0x2a7   : > { %v7589_v37 = vpop.f32.mrf.mxu0 }
 0x2a9   : > { %v7590_v16 = vpop.f32.mrf.mxu0 }
 0x2aa   : > { %v7591_v32 = vadd.f32 %v7590_v16, %v7589_v37  ;;  %v3118_v16 = vadd.f32 %v7542_v48, %v9590_v15 }
 0x2ab   : > { %v9598_v50 = vpop.f32.mrf.mxu0 }
 0x2ac   : > { %v3654_v31 = vadd.f32 %v7591_v32, %v9596_v26 }
 0x2ad   : > { %v9600_v13 = vpop.f32.mrf.mxu0 }
 0x2af   : > { %v9604_v19 = vpop.f32.mrf.mxu0 }
 0x2b1   : > { %v9606_v45 = vpop.f32.mrf.mxu0 }
 0x2b3   : > { %v9610_v40 = vpop.f32.mrf.mxu0 }
 0x2b5   : > { %v9612_v29 = vpop.f32.mrf.mxu0 }
 0x2b6   : > { %v7959_v27 = vpop.f32.mrf.mxu1  ;;  %10192 = vst [vmem:[#allocation14_spill] sm:$0xff] %v9612_v29  ;;  %v2760_v29 = vld [vmem:[#allocation3 + $0x18] sm:$0xff] }
 0x2b7   : > { %v7629_v7 = vpop.f32.mrf.mxu0  ;;  %v3131_v9 = vadd.f32 %v3107_v36, %v2760_v29  ;;  %v3123_v36 = vadd.f32 %v9572_v18, %v7545_v17 }
 0x2b8   : > { %v4177_v3 = vpop.f32.mrf.mxu1 }
 0x2b9   : > { %v7630_v34 = vpop.f32.mrf.mxu0 }
 0x2ba   : > { %v7960_v2 = vpop.f32.mrf.mxu1  ;;  %v7631_v49 = vadd.f32 %v7630_v34, %v7629_v7  ;;  %v2763_v34 = vld [vmem:[#allocation3 + $0x20] sm:$0xff] }
 0x2bb   : > { %v7632_v23 = vpop.f32.mrf.mxu0 }
 0x2bc   : > { %v4178_v10 = vadd.f32 %v7631_v49, %v4177_v3  ;;  %v4180_v63 = vpop.f32.mrf.mxu1 }
 0x2bd   : > { %v7633_v30 = vpop.f32.mrf.mxu0 }
 0x2be   : > { %v4208_v55 = vadd.f32 %v4178_v10, %v3668_v22  ;;  %v7634_v43 = vadd.f32 %v7633_v30, %v7632_v23  ;;  %v9617_v47 = vpop.f32.mrf.mxu1  ;;  %v3670_v23 = vadd.f32 %v3646_v35, %v3131_v9  ;;  %v3649_v10 = vadd.f32 %v9592_v44, %v7588_v38  ;;  %v10195_v9 = vld [vmem:[#allocation13_spill] sm:$0xff] }
 0x2bf   : > { %v7635_v33 = vpop.f32.mrf.mxu0  ;;  %v7594_v44 = vadd.f32 %v9600_v13, %v9598_v50  ;;  %v7597_v50 = vadd.f32 %v9606_v45, %v9604_v19  ;;  %v7548_v30 = vadd.f32 %v9588_v11, %v9586_v4 }
 0x2c0   : > { %4216 = vst [vmem:[#allocation3 + $0x30] sm:$0xff] %v4208_v55  ;;  %v4181_v24 = vadd.f32 %v7634_v43, %v4180_v63  ;;  %v4193_v29 = vpop.f32.mrf.mxu1  ;;  %v3671_v57 = vadd.f32 %v3649_v10, %v3132_v14  ;;  %v2764_v63 = vld [vmem:[#allocation3 + $0x28] sm:$0xff]  ;;  %v10193_v55 = vld [vmem:[#allocation14_spill] sm:$0xff] }
 0x2c1   : > { %v7636_v42 = vpop.f32.mrf.mxu0  ;;  %v3657_v26 = vadd.f32 %v7594_v44, %v9608_v54  ;;  %v3662_v54 = vadd.f32 %v9594_v39, %v7597_v50  ;;  %v7600_v19 = vadd.f32 %v10193_v55, %v9610_v40 }
 0x2c2   : > { %v4209_v53 = vadd.f32 %v4181_v24, %v3669_v21  ;;  %v7637_v3 = vadd.f32 %v7636_v42, %v7635_v33  ;;  %v7964_v46 = vpop.f32.mrf.mxu1  ;;  %v3135_v33 = vadd.f32 %v3123_v36, %v2764_v63  ;;  %v10194_v21 = vld [vmem:[#allocation12_spill] sm:$0xff]  ;;  %v2765_v24 = vld [vmem:[#allocation3 + $0x38] sm:$0xff] }
 0x2c3   : > { %v7638_v28 = vpop.f32.mrf.mxu0  ;;  %v3126_v35 = vadd.f32 %v10194_v21, %v7548_v30  ;;  %v3665_v42 = vadd.f32 %v10195_v9, %v7600_v19 }
 0x2c4   : > { %4217 = vst [vmem:[#allocation3] sm:$0xff] %v4209_v53  ;;  %v4186_v61 = vadd.f32 %v7959_v27, %v7637_v3  ;;  %v3133_v27 = vadd.f32 %v3115_v8, %v2762_v58  ;;  %v4196_v0 = vpop.f32.mrf.mxu1  ;;  %v3674_v11 = vadd.f32 %v3662_v54, %v3135_v33 }
 0x2c5   : > { %v7639_v22 = vpop.f32.mrf.mxu0  ;;  %v3136_v1 = vadd.f32 %v3126_v35, %v2765_v24 }
 0x2c6   : > { %v4210_v7 = vadd.f32 %v4186_v61, %v3670_v23  ;;  %v7640_v56 = vadd.f32 %v7639_v22, %v7638_v28  ;;  %v3672_v62 = vadd.f32 %v3654_v31, %v3133_v27 }
 0x2c7   : > { %v7641_v52 = vpop.f32.mrf.mxu0  ;;  %v3675_v3 = vadd.f32 %v3665_v42, %v3136_v1 }
 0x2c8   : > { %4218 = vst [vmem:[#allocation3 + $0x18] sm:$0xff] %v4210_v7  ;;  %v4189_v37 = vadd.f32 %v7960_v2, %v7640_v56  ;;  %v3134_v2 = vadd.f32 %v3118_v16, %v2763_v34 }
 0x2c9   : > { %v7642_v6 = vpop.f32.mrf.mxu0 }
 0x2ca   : > { %v4211_v59 = vadd.f32 %v4189_v37, %v3671_v57  ;;  %v7643_v41 = vadd.f32 %v7642_v6, %v7641_v52  ;;  %v3673_v12 = vadd.f32 %v3657_v26, %v3134_v2 }
 0x2cb   : > { %v7644_v49 = vpop.f32.mrf.mxu0 }
 0x2cc   : > { %4219 = vst [vmem:[#allocation3 + $0x10] sm:$0xff] %v4211_v59  ;;  %v4194_v13 = vadd.f32 %v7643_v41, %v4193_v29 }
 0x2cd   : > { %v7645_v15 = vpop.f32.mrf.mxu0 }
 0x2ce   : > { %v4212_v51 = vadd.f32 %v4194_v13, %v3672_v62  ;;  %v7646_v60 = vadd.f32 %v7645_v15, %v7644_v49 }
 0x2cf   : > { %v7647_v5 = vpop.f32.mrf.mxu0 }
 0x2d0   : > { %4220 = vst [vmem:[#allocation3 + $0x8] sm:$0xff] %v4212_v51  ;;  %v4197_v45 = vadd.f32 %v7646_v60, %v4196_v0 }
 0x2d1   : > { %v7648_v43 = vpop.f32.mrf.mxu0 }
 0x2d2   : > { %v4213_v18 = vadd.f32 %v4197_v45, %v3673_v12  ;;  %v7649_v38 = vadd.f32 %v7648_v43, %v7647_v5 }
 0x2d3   : > { %v7650_v4 = vpop.f32.mrf.mxu0 }
 0x2d4   : > { %4221 = vst [vmem:[#allocation3 + $0x20] sm:$0xff] %v4213_v18  ;;  %v4202_v25 = vadd.f32 %v9617_v47, %v7649_v38 }
 0x2d5   : > { %v7651_v39 = vpop.f32.mrf.mxu0 }
 0x2d6   : > { %v4214_v53 = vadd.f32 %v4202_v25, %v3674_v11  ;;  %v7652_v40 = vadd.f32 %v7651_v39, %v7650_v4 }
 0x2d8   : > { %4222 = vst [vmem:[#allocation3 + $0x28] sm:$0xff] %v4214_v53  ;;  %v4205_v20 = vadd.f32 %v7964_v46, %v7652_v40  ;;  %4227 = sbr.rel (%p6933_p12) target bundleno = 1075 (0x433), region = 56 }
 0x2da   : > { %v4215_v28 = vadd.f32 %v4205_v20, %v3675_v3 }
 0x2dc   : > { %4223 = vst [vmem:[#allocation3 + $0x38] sm:$0xff] %v4215_v28 }
 0x2dd   : > { %v8344_v23 = vld [vmem:[%s10162_s5 + $0x4f8] sm:$0xff]   ;;  %v8347_v32 = vld [vmem:[%s10162_s5 + $0x4f0] sm:$0xff]   ;;  %v8350_v22 = vld [vmem:[%s10162_s5 + $0x4e8] sm:$0xff]  }
 0x2de   : > { %v8345_v47 = vld [vmem:[%s10162_s5 + $0x4b8] sm:$0xff]   ;;  %7665 = vmatprep.subr.bf16.mxu0 %v8344_v23  ;;  %v8348_v61 = vld [vmem:[%s10162_s5 + $0x4b0] sm:$0xff]   ;;  %v8351_v29 = vld [vmem:[%s10162_s5 + $0x4a8] sm:$0xff]  }
 0x2df   : > { %v8346_v10 = vld [vmem:[%s10162_s5 + $0x538] sm:$0xff]   ;;  %7666 = vmatpush3.bf16.msra.mxu0 %v8345_v47  ;;  %v8349_v48 = vld [vmem:[%s10162_s5 + $0x530] sm:$0xff]   ;;  %v8352_v14 = vld [vmem:[%s10162_s5 + $0x528] sm:$0xff]  }
 0x2e0   : > { %7965 = vmatprep.subr.bf16.mxu1 %v8346_v10  ;;  %7667 = vmatprep.subr.bf16.mxu0 %v8347_v32  ;;  %v8353_v8 = vld [vmem:[%s10162_s5 + $0x4e0] sm:$0xff]   ;;  %v8356_v58 = vld [vmem:[%s10162_s5 + $0x4d8] sm:$0xff]   ;;  %v8359_v31 = vld [vmem:[%s10162_s5 + $0x4d0] sm:$0xff]  }
 0x2e1   : > { %7966 = vmatpush3.bf16.msra.mxu1 %v8346_v10  ;;  %v8354_v7 = vld [vmem:[%s10162_s5 + $0x4a0] sm:$0xff]   ;;  %v8358_v52 = vld [vmem:[%s10162_s5 + $0x518] sm:$0xff]   ;;  %v8361_v44 = vld [vmem:[%s10162_s5 + $0x510] sm:$0xff]  }
 0x2e2   : > { %7967 = vmatprep.subr.bf16.mxu1 %v8349_v48  ;;  %v8355_v56 = vld [vmem:[%s10162_s5 + $0x520] sm:$0xff]   ;;  %v8357_v57 = vld [vmem:[%s10162_s5 + $0x498] sm:$0xff]   ;;  %v8360_v37 = vld [vmem:[%s10162_s5 + $0x490] sm:$0xff]  }
 0x2e3   : > { %7668 = vmatpush3.bf16.msra.mxu0 %v8348_v61  ;;  %v8362_v16 = vld [vmem:[%s10162_s5 + $0x4c8] sm:$0xff]   ;;  %v8365_v27 = vld [vmem:[%s10162_s5 + $0x4c0] sm:$0xff]   ;;  %v8370_v2 = vld [vmem:[%s10162_s5 + $0x5b8] sm:$0xff]  }
 0x2e4   : > { %7669 = vmatprep.subr.bf16.mxu0 %v8350_v22  ;;  %v8364_v6 = vld [vmem:[%s10162_s5 + $0x508] sm:$0xff]   ;;  %v7306_v34 = vld [vmem:[%s8629_s28] sm:$0xff]   ;;  %v9739_v63 = vld [vmem:[%s10162_s5 + $0x5f8] sm:$0xff]  }
 0x2e5   : > { %7968 = vmatpush3.bf16.msra.mxu1 %v8349_v48  ;;  %v8363_v46 = vld [vmem:[%s10162_s5 + $0x488] sm:$0xff]   ;;  %v9715_v17 = vld [vmem:[%s10160_s3] ss:$0 sm:$0xff]  ;;  %v7307_v41 = vunpack.c.l.bf16 %v7306_v34  ;;  %v7308_v49 = vunpack.c.h.bf16 %v7306_v34  ;;  %v4450_v45 = vld [vmem:[#allocation2 + $0x4] sm:$0x1] }
 0x2e6   : > { %7969 = vmatprep.subr.bf16.mxu1 %v8352_v14  ;;  %v8367_v59 = vld [vmem:[%s10162_s5 + $0x500] sm:$0xff]   ;;  %v7347_v15 = vld [vmem:[%s8629_s28 + $0x8] sm:$0xff]   ;;  %v4400_v25 = vld [vmem:[#allocation2 + $0x10] sm:$0xf] }
 0x2e7   : > { %7670 = vmatpush3.bf16.msra.mxu0 %v8351_v29  ;;  %v9723_v62 = vld [vmem:[%s10161_s4] ss:$0 sm:$0xff]  ;;  %v4251_v50 = vmul.f32 %v7307_v41, %v9715_v17  ;;  %v4252_v13 = vmul.f32 %v7308_v49, %v9715_v17  ;;  %v7311_v36 = vunpack.c.l.bf16 %v7347_v15  ;;  %v7312_v30 = vunpack.c.h.bf16 %v7347_v15  ;;  %v4394_v18 = vld [vmem:[#allocation2 + $0x8] sm:$0xf]  ;;  %v4397_v38 = vld [vmem:[#allocation2 + $0xc] sm:$0x1] }
 0x2e8   : > { %7671 = vmatprep.subr.bf16.mxu0 %v8353_v8  ;;  %v8366_v26 = vld [vmem:[%s10162_s5 + $0x480] sm:$0xff]   ;;  %v4403_v39 = vld [vmem:[#allocation2 + $0x14] sm:$0x1]  ;;  %v8445_v22 = vld [vmem:[%s10162_s5 + $0x698] sm:$0xff]  }
 0x2e9   : > { %7970 = vmatpush3.bf16.msra.mxu1 %v8352_v14  ;;  %v4266_v0 = vadd.f32 %v9723_v62, %v4251_v50  ;;  %v4267_v51 = vadd.f32 %v9723_v62, %v4252_v13  ;;  %v4253_v5 = vmul.f32 %v7311_v36, %v9715_v17  ;;  %v9742_v55 = vld [vmem:[#allocation2] sm:$0xf]  ;;  %v4254_v19 = vmul.f32 %v7312_v30, %v9715_v17  ;;  %v9760_v50 = vld [vmem:[%s8629_s28 + $0x18] sm:$0xff]  }
 0x2ea   : > { %7971 = vmatprep.subr.bf16.mxu1 %v8355_v56  ;;  %v6944_v42 = vcombine.low %v9742_v55, %v4450_v45  ;;  %v4458_v53 = vld [vmem:[#allocation2] sm:$0xe]  ;;  %v7319_v15 = vunpack.c.l.bf16 %v9760_v50 }
 0x2eb   : > { %7672 = vmatpush3.bf16.msra.mxu0 %v8354_v7  ;;  %v4274_v60 = vmax.f32 %v4266_v0, 0.0  ;;  %v4275_v12 = vmax.f32 %v4267_v51, 0.0  ;;  %v4268_v43 = vadd.f32 %v9723_v62, %v4253_v5  ;;  %v4269_v1 = vadd.f32 %v9723_v62, %v4254_v19 }
 0x2ec   : > { %7673 = vmatprep.subr.bf16.mxu0 %v8356_v58  ;;  %v4509_v14 = vshll.u32 %v6944_v42, 16  ;;  %v4257_v5 = vmul.f32 %v7319_v15, %v9715_v17 }
 0x2ed   : > { %7972 = vmatpush3.bf16.msra.mxu1 %v8355_v56  ;;  %v7265_v54 = vpack.c.bf16 %v4274_v60, %v4274_v60  ;;  %v7266_v33 = vpack.c.bf16 %v4275_v12, %v4275_v12  ;;  %v4276_v24 = vmax.f32 %v4268_v43, 0.0  ;;  %v4277_v8 = vmax.f32 %v4269_v1, 0.0  ;;  %v4412_v60 = vld [vmem:[#allocation2 + $0x20] sm:$0xf] }
 0x2ee   : > { %7973 = vmatprep.subr.bf16.mxu1 %v8358_v52 }
 0x2ef   : > { %7674 = vmatpush3.bf16.msra.mxu0 %v8357_v57  ;;  %v4315_v21 = vshrl.u32 %v7265_v54, 16  ;;  %v4318_v35 = vshll.u32 %v7265_v54, 16  ;;  %v4323_v4 = vshrl.u32 %v7266_v33, 16  ;;  %v4326_v11 = vshll.u32 %v7266_v33, 16 }
 0x2f0   : > { %7675 = vmatprep.subr.bf16.mxu0 %v8359_v31  ;;  %v7267_v40 = vpack.c.bf16 %v4276_v24, %v4276_v24  ;;  %v6952_v57 = vcombine.low %v4458_v53, %v4450_v45  ;;  %v4406_v31 = vld [vmem:[#allocation2 + $0x18] sm:$0xf] }
 0x2f1   : > { %7974 = vmatpush3.bf16.msra.mxu1 %v8358_v52  ;;  %v4317_v9 = vrot.slane %v4315_v21, 7  ;;  %v4325_v3 = vrot.slane %v4323_v4, 7  ;;  %v7348_v52 = vld [vmem:[%s8629_s28 + $0x10] sm:$0xff]   ;;  %v4272_v4 = vadd.f32 %v9723_v62, %v4257_v5 }
 0x2f2   : > { %7975 = vmatprep.subr.bf16.mxu1 %v8361_v44  ;;  %v4331_v10 = vshrl.u32 %v7267_v40, 16  ;;  %v4334_v32 = vshll.u32 %v7267_v40, 16  ;;  %v4586_v36 = vrot.slane %v6952_v57, 1 }
 0x2f3   : > { %7676 = vmatpush3.bf16.msra.mxu0 %v8360_v37  ;;  %v4320_v20 = vor.u32 %v4318_v35, %v4317_v9  ;;  %v4321_v28 = vrot.slane %v4317_v9, 4  ;;  %v4328_v23 = vor.u32 %v4326_v11, %v4325_v3  ;;  %v4329_v47 = vrot.slane %v4325_v3, 4 }
 0x2f4   : > { %7677 = vmatprep.subr.bf16.mxu0 %v8362_v16  ;;  %v4333_v7 = vrot.slane %v4331_v10, 7  ;;  %v7315_v37 = vunpack.c.l.bf16 %v7348_v52  ;;  %v7268_v16 = vpack.c.bf16 %v4277_v8, %v4277_v8 }
 0x2f5   : > { %7976 = vmatpush3.bf16.msra.mxu1 %v8361_v44  ;;  %v4395_v48 = vsel %vm9250_vm10, %v4320_v20, %v4394_v18  ;;  %v4398_v29 = vsel %vm9256_vm11, %v4321_v28, %v4397_v38  ;;  %v4401_v56 = vsel %vm9250_vm10, %v4328_v23, %v4400_v25  ;;  %v4404_v58 = vsel %vm9256_vm11, %v4329_v47, %v4403_v39  ;;  %v4409_v44 = vld [vmem:[#allocation2 + $0x1c] sm:$0x1]  ;;  %v4415_v39 = vld [vmem:[#allocation2 + $0x24] sm:$0x1] }
 0x2f6   : > { %7977 = vmatprep.subr.bf16.mxu1 %v8364_v6  ;;  %4396 = vst [vmem:[#allocation2 + $0x8] sm:$0xf] %v4395_v48  ;;  %4399 = vst [vmem:[#allocation2 + $0xc] sm:$0x1] %v4398_v29  ;;  %v4337_v34 = vrot.slane %v4333_v7, 4  ;;  %v4255_v41 = vmul.f32 %v7315_v37, %v9715_v17  ;;  %v4339_v49 = vshrl.u32 %v7268_v16, 16 }
 0x2f7   : > { %7678 = vmatpush3.bf16.msra.mxu0 %v8363_v46  ;;  %4402 = vst [vmem:[#allocation2 + $0x10] sm:$0xf] %v4401_v56  ;;  %4405 = vst [vmem:[#allocation2 + $0x14] sm:$0x1] %v4404_v58  ;;  %v4507_v46 = vshrl.u32 %v6944_v42, 16 }
 0x2f8   : > { %7679 = vmatprep.subr.bf16.mxu0 %v8365_v27  ;;  %v4336_v27 = vor.u32 %v4334_v32, %v4333_v7  ;;  %v4270_v30 = vadd.f32 %v9723_v62, %v4255_v41  ;;  %v4341_v51 = vrot.slane %v4339_v49, 7 }
 0x2f9   : > { %7978 = vmatpush3.bf16.msra.mxu1 %v8364_v6  ;;  %v7316_v6 = vunpack.c.h.bf16 %v7348_v52 }
 0x2fa   : > { %7979 = vmatprep.subr.bf16.mxu1 %v8367_v59  ;;  %v4407_v13 = vsel %vm9250_vm10, %v4336_v27, %v4406_v31  ;;  %v4278_v42 = vmax.f32 %v4270_v30, 0.0  ;;  %v4345_v25 = vrot.slane %v4341_v51, 4  ;;  %v8372_v31 = vld [vmem:[%s10162_s5 + $0x578] sm:$0xff]  }
 0x2fb   : > { %7680 = vmatpush3.bf16.msra.mxu0 %v8366_v26  ;;  %v4342_v26 = vshll.u32 %v7268_v16, 16  ;;  %v4256_v0 = vmul.f32 %v7316_v6, %v9715_v17  ;;  %4408 = vst [vmem:[#allocation2 + $0x18] sm:$0xf] %v4407_v13  ;;  %v4418_v16 = vld [vmem:[#allocation2 + $0x28] sm:$0xf] }
 0x2fc   : > { %7717 = vmatprep.subr.bf16.mxu0 %v8370_v2  ;;  %v4410_v2 = vsel %vm9256_vm11, %v4337_v34, %v4409_v44  ;;  %v7269_v47 = vpack.c.bf16 %v4278_v42, %v4278_v42  ;;  %v4421_v6 = vld [vmem:[#allocation2 + $0x2c] sm:$0x1]  ;;  %v8380_v34 = vld [vmem:[%s10162_s5 + $0x5b0] sm:$0xff]   ;;  %v4430_v42 = vld [vmem:[#allocation2 + $0x38] sm:$0xf] }
 0x2fd   : > { %7980 = vmatpush3.bf16.msra.mxu1 %v8367_v59  ;;  %v4511_v59 = vrot.slane %v4509_v14, 1  ;;  %4411 = vst [vmem:[#allocation2 + $0x1c] sm:$0x1] %v4410_v2  ;;  %v9770_v12 = vld [vmem:[#allocation2 + $0x8] sm:$0xf]  ;;  %v4344_v43 = vor.u32 %v4342_v26, %v4341_v51  ;;  %v4271_v24 = vadd.f32 %v9723_v62, %v4256_v0  ;;  %v4416_v14 = vsel %vm9256_vm11, %v4345_v25, %v4415_v39  ;;  %v8382_v2 = vld [vmem:[%s10162_s5 + $0x5f0] sm:$0xff]  }
 0x2fe   : > { %7989 = vmatprep.subr.bf16.mxu1 %v9739_v63  ;;  %v4451_v54 = vld [vmem:[#allocation2 + $0xc] sm:$0x1]  ;;  %v4459_v45 = vld [vmem:[#allocation2 + $0x8] sm:$0xe]  ;;  %v9773_v35 = vld [vmem:[#allocation2 + $0x10] sm:$0xf]  ;;  %v7008_v27 = vcombine.low %v9742_v55, %v9770_v12 }
 0x2ff   : > { %v4512_v19 = vor.u32 %v4511_v59, %v4507_v46  ;;  %v6945_v33 = vcombine.low %v9770_v12, %v4451_v54  ;;  %v6953_v21 = vcombine.low %v4459_v45, %v4451_v54  ;;  %v4452_v18 = vld [vmem:[#allocation2 + $0x14] sm:$0x1]  ;;  %v4460_v38 = vld [vmem:[#allocation2 + $0x10] sm:$0xe]  ;;  %v4413_v3 = vsel %vm9250_vm10, %v4344_v43, %v4412_v60  ;;  %4417 = vst [vmem:[#allocation2 + $0x24] sm:$0x1] %v4416_v14 }
 0x300   : > { %v6946_v11 = vcombine.low %v9773_v35, %v4452_v18  ;;  %v6954_v9 = vcombine.low %v4460_v38, %v4452_v18  ;;  %4414 = vst [vmem:[#allocation2 + $0x20] sm:$0xf] %v4413_v3  ;;  %v4279_v8 = vmax.f32 %v4271_v24, 0.0  ;;  %v4347_v52 = vshrl.u32 %v7269_v47, 16  ;;  %v4424_v38 = vld [vmem:[#allocation2 + $0x30] sm:$0xf] }
 0x301   : > { %v4514_v1 = vshrl.u32 %v6945_v33, 16  ;;  %v4516_v53 = vshll.u32 %v6945_v33, 16  ;;  %v4587_v40 = vrot.slane %v6953_v21, 1  ;;  %v4350_v37 = vshll.u32 %v7269_v47, 16  ;;  %v4427_v24 = vld [vmem:[#allocation2 + $0x34] sm:$0x1] }
 0x302   : > { %v4588_v20 = vrot.slane %v6954_v9, 1  ;;  %v4521_v28 = vshrl.u32 %v6946_v11, 16  ;;  %v4523_v23 = vshll.u32 %v6946_v11, 16  ;;  %v9780_v48 = vld [vmem:[#allocation2 + $0x18] sm:$0xf]  ;;  %v4280_v46 = vmax.f32 %v4272_v4, 0.0 }
 0x303   : > { %v4518_v10 = vrot.slane %v4516_v53, 1  ;;  %v7010_v32 = vcombine.low %v4586_v36, %v4587_v40  ;;  %v4461_v7 = vld [vmem:[#allocation2 + $0x18] sm:$0xe]  ;;  %v4349_v49 = vrot.slane %v4347_v52, 7  ;;  %v7270_v15 = vpack.c.bf16 %v4279_v8, %v4279_v8  ;;  %v8383_v39 = vld [vmem:[%s10162_s5 + $0x5a8] sm:$0xff]  }
 0x304   : > { %v4453_v29 = vld [vmem:[#allocation2 + $0x1c] sm:$0x1]  ;;  %v4525_v58 = vrot.slane %v4523_v23, 1  ;;  %v7271_v0 = vpack.c.bf16 %v4280_v46, %v4280_v46  ;;  %v8386_v40 = vld [vmem:[%s10162_s5 + $0x5e8] sm:$0xff]   ;;  %v9826_v14 = vld [vmem:[#allocation2 + $0x10] sm:$0xf] }
 0x305   : > { %v6947_v56 = vcombine.low %v9780_v48, %v4453_v29  ;;  %v4519_v57 = vor.u32 %v4518_v10, %v4514_v1  ;;  %7981 = vmatprep.mubr.bf16.mxu1 %v7010_v32  ;;  %v6955_v44 = vcombine.low %v4461_v7, %v4453_v29  ;;  %v4352_v51 = vor.u32 %v4350_v37, %v4349_v49  ;;  %v9817_v23 = vld [vmem:[#allocation2 + $0x8] sm:$0xf]  ;;  %v4989_v8 = vld [vmem:[#allocation2 + $0xc] sm:$0x1]  ;;  %v8387_v7 = vld [vmem:[%s10162_s5 + $0x5a0] sm:$0xff]  }
 0x306   : > { %v4526_v36 = vor.u32 %v4525_v58, %v4521_v28  ;;  %v4353_v60 = vrot.slane %v4349_v49, 4  ;;  %v4355_v54 = vshrl.u32 %v7270_v15, 16  ;;  %v4358_v45 = vshll.u32 %v7270_v15, 16  ;;  %v4454_v4 = vld [vmem:[#allocation2 + $0x24] sm:$0x1]  ;;  %v8385_v47 = vld [vmem:[%s10162_s5 + $0x568] sm:$0xff]  }
 0x307   : > { %v4528_v59 = vshrl.u32 %v6947_v56, 16  ;;  %v4530_v41 = vshll.u32 %v6947_v56, 16  ;;  %v7009_v26 = vcombine.low %v4512_v19, %v4519_v57  ;;  %v4589_v13 = vrot.slane %v6955_v44, 1  ;;  %v9796_v5 = vld [vmem:[#allocation2 + $0x20] sm:$0xf]  ;;  %v8381_v19 = vld [vmem:[%s10162_s5 + $0x570] sm:$0xff]  }
 0x308   : > { %v9798_v12 = vld [vmem:[#allocation2 + $0x20] sm:$0xe]  ;;  %v4419_v33 = vsel %vm9250_vm10, %v4352_v51, %v4418_v16  ;;  %v4422_v21 = vsel %vm9256_vm11, %v4353_v60, %v4421_v6  ;;  %v4363_v18 = vshrl.u32 %v7271_v0, 16  ;;  %v4357_v11 = vrot.slane %v4355_v54, 7  ;;  %v4433_v28 = vld [vmem:[#allocation2 + $0x3c] sm:$0x1] }
 0x309   : > { %v4532_v30 = vrot.slane %v4530_v41, 1  ;;  %4867 = vmatprep.mubr.bf16.mxu0 %v7009_v26  ;;  %v7013_v55 = vcombine.low %v4588_v20, %v4589_v13  ;;  %4420 = vst [vmem:[#allocation2 + $0x28] sm:$0xf] %v4419_v33  ;;  %4423 = vst [vmem:[#allocation2 + $0x2c] sm:$0x1] %v4422_v21  ;;  %v4366_v9 = vshll.u32 %v7271_v0, 16  ;;  %v9812_v1 = vcombine.low %v9796_v5, %v4454_v4 }
 0x30a   : > { %4868 = vmatmul.mubr.bf16.vlgmr.msra.gmra.mxu0 %v7008_v27  ;;  %v4365_v53 = vrot.slane %v4363_v18, 7  ;;  %v4360_v3 = vor.u32 %v4358_v45, %v4357_v11  ;;  %v4361_v20 = vrot.slane %v4357_v11, 4  ;;  %v6956_v32 = vcombine.low %v9798_v12, %v4454_v4  ;;  %v4990_v58 = vld [vmem:[#allocation2 + $0x14] sm:$0x1]  ;;  %v8389_v57 = vld [vmem:[%s10162_s5 + $0x5e0] sm:$0xff]   ;;  %v8394_v12 = vld [vmem:[%s10162_s5 + $0x558] sm:$0xff]  }
 0x30b   : > { %v4533_v43 = vor.u32 %v4532_v30, %v4528_v59  ;;  %7718 = vmatpush3.bf16.msra.mxu0 %v8372_v31  ;;  %7982 = vmatmul.mubr.bf16.vlgmr.msra.gmra.mxu1 %v7013_v55  ;;  %v4537_v10 = vshll.u32 %v9812_v1, 16  ;;  %v9836_v52 = vcombine.low %v9817_v23, %v4989_v8  ;;  %v4535_v44 = vshrl.u32 %v9812_v1, 16  ;;  %v4997_v6 = vld [vmem:[#allocation2 + $0x8] sm:$0xe]  ;;  %v8388_v49 = vld [vmem:[%s10162_s5 + $0x560] sm:$0xff]   ;;  %v8401_v45 = vld [vmem:[%s10162_s5 + $0x5d8] sm:$0xff]  }
 0x30c   : > { %7719 = vmatprep.subr.bf16.mxu0 %v8380_v34  ;;  %7990 = vmatpush3.bf16.msra.mxu1 %v9739_v63  ;;  %v7011_v63 = vcombine.low %v9773_v35, %v9780_v48  ;;  %v4368_v29 = vor.u32 %v4366_v9, %v4365_v53  ;;  %v4369_v56 = vrot.slane %v4365_v53, 4  ;;  %v4425_v35 = vsel %vm9250_vm10, %v4360_v3, %v4424_v38  ;;  %v4998_v0 = vld [vmem:[#allocation2 + $0x10] sm:$0xe]  ;;  %v4991_v3 = vld [vmem:[#allocation2 + $0x1c] sm:$0x1] }
 0x30d   : > { %v7012_v25 = vcombine.low %v4526_v36, %v4533_v43  ;;  %7991 = vmatprep.subr.bf16.mxu1 %v8382_v2  ;;  %v4428_v48 = vsel %vm9256_vm11, %v4361_v20, %v4427_v24  ;;  %4426 = vst [vmem:[#allocation2 + $0x30] sm:$0xf] %v4425_v35  ;;  %v5048_v16 = vshll.u32 %v9836_v52, 16  ;;  %v9850_v59 = vcombine.low %v9826_v14, %v4990_v58  ;;  %v8392_v36 = vld [vmem:[%s10162_s5 + $0x598] sm:$0xff]   ;;  %v8402_v43 = vld [vmem:[%s10162_s5 + $0x590] sm:$0xff]  }
 0x30e   : > { %4429 = vst [vmem:[#allocation2 + $0x34] sm:$0x1] %v4428_v48  ;;  %v4431_v31 = vsel %vm9250_vm10, %v4368_v29, %v4430_v42  ;;  %v4434_v37 = vsel %vm9256_vm11, %v4369_v56, %v4433_v28  ;;  %v7052_v41 = vcombine.low %v4997_v6, %v4989_v8  ;;  %v4539_v13 = vrot.slane %v4537_v10, 1  ;;  %v8404_v42 = vld [vmem:[%s10162_s5 + $0x5d0] sm:$0xff]   ;;  %v4992_v20 = vld [vmem:[#allocation2 + $0x24] sm:$0x1] }
 0x30f   : > { %4875 = vmatprep.mubr.bf16.mxu0 %v7012_v25  ;;  %7720 = vmatpush3.bf16.msra.mxu0 %v8381_v19  ;;  %4432 = vst [vmem:[#allocation2 + $0x38] sm:$0xf] %v4431_v31  ;;  %4435 = vst [vmem:[#allocation2 + $0x3c] sm:$0x1] %v4434_v37  ;;  %v4590_v15 = vrot.slane %v6956_v32, 1  ;;  %v7053_v30 = vcombine.low %v4998_v0, %v4990_v58  ;;  %v7320_v51 = vunpack.c.h.bf16 %v9760_v50  ;;  %v5046_v19 = vshrl.u32 %v9836_v52, 16 }
 0x310   : > { %7721 = vmatprep.subr.bf16.mxu0 %v8383_v39  ;;  %7992 = vmatpush3.bf16.msra.mxu1 %v8382_v2  ;;  %v9847_v46 = vld [vmem:[#allocation2 + $0x28] sm:$0xf]  ;;  %v4455_v27 = vld [vmem:[#allocation2 + $0x2c] sm:$0x1]  ;;  %v5050_v33 = vrot.slane %v5048_v16, 1  ;;  %v5053_v50 = vshrl.u32 %v9850_v59, 16  ;;  %v4540_v38 = vor.u32 %v4539_v13, %v4535_v44 }
 0x311   : > { %7993 = vmatprep.subr.bf16.mxu1 %v8386_v40  ;;  %v4463_v34 = vld [vmem:[#allocation2 + $0x28] sm:$0xe]  ;;  %v6949_v26 = vcombine.low %v9847_v46, %v4455_v27  ;;  %v5055_v21 = vshll.u32 %v9850_v59, 16  ;;  %v9872_v18 = vrot.slane %v7052_v41, 1  ;;  %v5126_v25 = vrot.slane %v7053_v30, 1  ;;  %v8403_v29 = vld [vmem:[%s10162_s5 + $0x550] sm:$0xff]  }
 0x312   : > { %4876 = vmatmul.mubr.bf16.gmra.mxu0 %v7011_v63  ;;  %v6957_v2 = vcombine.low %v4463_v34, %v4455_v27  ;;  %v4999_v28 = vld [vmem:[#allocation2 + $0x18] sm:$0xe]  ;;  %v5000_v8 = vld [vmem:[#allocation2 + $0x20] sm:$0xe]  ;;  %v8405_v58 = vld [vmem:[%s10162_s5 + $0x588] sm:$0xff]   ;;  %v4258_v31 = vmul.f32 %v7320_v51, %v9715_v17  ;;  %v5051_v0 = vor.u32 %v5050_v33, %v5046_v19 }
 0x313   : > { %7722 = vmatpush3.bf16.msra.mxu0 %v8385_v47  ;;  %v4542_v60 = vshrl.u32 %v6949_v26, 16  ;;  %v4544_v55 = vshll.u32 %v6949_v26, 16  ;;  %v7014_v47 = vcombine.low %v9796_v5, %v9847_v46  ;;  %v8407_v46 = vld [vmem:[%s10162_s5 + $0x548] sm:$0xff]   ;;  %v7110_v27 = vcombine.low %v9872_v18, %v5126_v25  ;;  %v9896_v41 = vld [vmem:[#allocation2 + $0x18] sm:$0xf] }
 0x314   : > { %7723 = vmatprep.subr.bf16.mxu0 %v8387_v7  ;;  %7994 = vmatpush3.bf16.msra.mxu1 %v8386_v40  ;;  %v4591_v54 = vrot.slane %v6957_v2, 1  ;;  %v9874_v11 = vld [vmem:[#allocation2 + $0x30] sm:$0xf]  ;;  %v7054_v34 = vcombine.low %v4999_v28, %v4991_v3  ;;  %v7055_v59 = vcombine.low %v5000_v8, %v4992_v20  ;;  %v8408_v2 = vld [vmem:[%s10162_s5 + $0x5c8] sm:$0xff]   ;;  %v4273_v33 = vadd.f32 %v9723_v62, %v4258_v31  ;;  %v8414_v18 = vld [vmem:[%s10162_s5 + $0x678] sm:$0xff]  }
 0x315   : > { %7995 = vmatprep.subr.bf16.mxu1 %v8389_v57  ;;  %v4546_v24 = vrot.slane %v4544_v55, 1  ;;  %v4456_v9 = vld [vmem:[#allocation2 + $0x34] sm:$0x1]  ;;  %v4464_v1 = vld [vmem:[#allocation2 + $0x30] sm:$0xe] }
 0x316   : > { %v7016_v4 = vcombine.low %v4590_v15, %v4591_v54  ;;  %v9879_v39 = vld [vmem:[#allocation2 + $0x38] sm:$0xf]  ;;  %v6950_v40 = vcombine.low %v9874_v11, %v4456_v9  ;;  %v4457_v10 = vld [vmem:[#allocation2 + $0x3c] sm:$0x1]  ;;  %v6958_v32 = vcombine.low %v4464_v1, %v4456_v9  ;;  %v7046_v15 = vcombine.low %v9896_v41, %v4991_v3  ;;  %v8411_v54 = vld [vmem:[%s10162_s5 + $0x5c0] sm:$0xff]  }
 0x317   : > { %7724 = vmatpush3.bf16.msra.mxu0 %v8388_v49  ;;  %v4465_v53 = vld [vmem:[#allocation2 + $0x38] sm:$0xe]  ;;  %v4547_v63 = vor.u32 %v4546_v24, %v4542_v60  ;;  %v6951_v7 = vcombine.low %v9879_v39, %v4457_v10  ;;  %v9898_v49 = vld [vmem:[#allocation2 + $0x20] sm:$0xf]  ;;  %v5128_v19 = vrot.slane %v7055_v59, 1  ;;  %v4281_v3 = vmax.f32 %v4273_v33, 0.0 }
 0x318   : > { %7725 = vmatprep.subr.bf16.mxu0 %v8392_v36  ;;  %7996 = vmatpush3.bf16.msra.mxu1 %v8389_v57  ;;  %v6959_v56 = vcombine.low %v4465_v53, %v4457_v10  ;;  %v4549_v35 = vshrl.u32 %v6950_v40, 16  ;;  %v4551_v48 = vshll.u32 %v6950_v40, 16  ;;  %v4592_v5 = vrot.slane %v6958_v32, 1  ;;  %v8409_v60 = vld [vmem:[%s10162_s5 + $0x580] sm:$0xff]   ;;  %v9920_v25 = vld [vmem:[#allocation2 + $0x28] sm:$0xf] }
 0x319   : > { %7985 = vmatprep.mubr.bf16.mxu1 %v7016_v4  ;;  %7997 = vmatprep.subr.bf16.mxu1 %v8401_v45  ;;  %v7015_v52 = vcombine.low %v4540_v38, %v4547_v63  ;;  %v5057_v57 = vrot.slane %v5055_v21, 1  ;;  %v4556_v16 = vshrl.u32 %v6951_v7, 16  ;;  %v4558_v6 = vshll.u32 %v6951_v7, 16  ;;  %v9922_v62 = vld [vmem:[#allocation2 + $0x30] sm:$0xf]  ;;  %v8421_v53 = vld [vmem:[%s10162_s5 + $0x6b8] sm:$0xff]  }
 0x31a   : > { %v4593_v44 = vrot.slane %v6959_v56, 1  ;;  %v4553_v37 = vrot.slane %v4551_v48, 1  ;;  %v7047_v30 = vcombine.low %v9898_v49, %v4992_v20  ;;  %v5062_v55 = vshll.u32 %v7046_v15, 16  ;;  %v4993_v1 = vld [vmem:[#allocation2 + $0x2c] sm:$0x1]  ;;  %v8423_v59 = vld [vmem:[%s10162_s5 + $0x630] sm:$0xff]  }
 0x31b   : > { %7726 = vmatpush3.bf16.msra.mxu0 %v8394_v12  ;;  %4883 = vmatprep.mubr.bf16.mxu0 %v7015_v52  ;;  %v4560_v13 = vrot.slane %v4558_v6, 1  ;;  %v5058_v36 = vor.u32 %v5057_v57, %v5053_v50  ;;  %v8410_v12 = vld [vmem:[%s10162_s5 + $0x540] sm:$0xff]   ;;  %v7017_v21 = vcombine.low %v9874_v11, %v9879_v39  ;;  %v5060_v38 = vshrl.u32 %v7046_v15, 16  ;;  %v4994_v11 = vld [vmem:[#allocation2 + $0x34] sm:$0x1]  ;;  %v8427_v15 = vld [vmem:[%s10162_s5 + $0x668] sm:$0xff]  }
 0x31c   : > { %7727 = vmatprep.subr.bf16.mxu0 %v8402_v43  ;;  %7998 = vmatpush3.bf16.msra.mxu1 %v8401_v45  ;;  %v7019_v17 = vcombine.low %v4592_v5, %v4593_v44  ;;  %v4554_v26 = vor.u32 %v4553_v37, %v4549_v35  ;;  %v5127_v45 = vrot.slane %v7054_v34, 1  ;;  %v5069_v43 = vshll.u32 %v7047_v30, 16  ;;  %v5002_v10 = vld [vmem:[#allocation2 + $0x30] sm:$0xe]  ;;  %v8416_v35 = vld [vmem:[%s10162_s5 + $0x638] sm:$0xff]   ;;  %v8431_v33 = vld [vmem:[%s10162_s5 + $0x660] sm:$0xff]  }
 0x31d   : > { %7999 = vmatprep.subr.bf16.mxu1 %v8404_v42  ;;  %4884 = vmatmul.mubr.bf16.gmra.mxu0 %v7014_v47  ;;  %v4561_v51 = vor.u32 %v4560_v13, %v4556_v16  ;;  %v5067_v24 = vshrl.u32 %v7047_v30, 16  ;;  %v7109_v4 = vcombine.low %v5051_v0, %v5058_v36  ;;  %v5064_v9 = vrot.slane %v5062_v55, 1  ;;  %v5001_v47 = vld [vmem:[#allocation2 + $0x28] sm:$0xe]  ;;  %v8422_v5 = vld [vmem:[%s10162_s5 + $0x670] sm:$0xff]  }
 0x31e   : > { %7986 = vmatmul.mubr.bf16.gmra.mxu1 %v7019_v17  ;;  %v7048_v39 = vcombine.low %v9920_v25, %v4993_v1  ;;  %v7049_v40 = vcombine.low %v9922_v62, %v4994_v11  ;;  %v7113_v32 = vcombine.low %v5127_v45, %v5128_v19  ;;  %v7056_v8 = vcombine.low %v5001_v47, %v4993_v1  ;;  %v8424_v57 = vld [vmem:[%s10162_s5 + $0x6b0] sm:$0xff]   ;;  %v4436_v34 = vld [vmem:[#allocation2 + $0x40] sm:$0xf]  ;;  %v8430_v17 = vld [vmem:[%s10162_s5 + $0x6a8] sm:$0xff]  }
 0x31f   : > { %7728 = vmatpush3.bf16.msra.mxu0 %v8403_v29  ;;  %8005 = vmatprep.mubr.bf16.mxu1 %v7110_v27  ;;  %v7018_v50 = vcombine.low %v4554_v26, %v4561_v51  ;;  %v5065_v20 = vor.u32 %v5064_v9, %v5060_v38  ;;  %v7057_v7 = vcombine.low %v5002_v10, %v4994_v11  ;;  %v4995_v13 = vld [vmem:[#allocation2 + $0x3c] sm:$0x1]  ;;  %v5537_v9 = vld [vmem:[#allocation2 + $0x18] sm:$0xe]  ;;  %v9988_v10 = vld [vmem:[#allocation2 + $0x20] sm:$0xf] }
 0x320   : > { %7729 = vmatprep.subr.bf16.mxu0 %v8405_v58  ;;  %8000 = vmatpush3.bf16.msra.mxu1 %v8404_v42  ;;  %v5071_v42 = vrot.slane %v5069_v43, 1  ;;  %v5076_v63 = vshll.u32 %v7048_v39, 16  ;;  %v5083_v29 = vshll.u32 %v7049_v40, 16  ;;  %v7108_v56 = vcombine.low %v9817_v23, %v9826_v14  ;;  %v8433_v43 = vld [vmem:[%s10162_s5 + $0x6a0] sm:$0xff]   ;;  %v5529_v38 = vld [vmem:[#allocation2 + $0x1c] sm:$0x1] }
 0x321   : > { %8001 = vmatprep.subr.bf16.mxu1 %v8408_v2  ;;  %4891 = vmatprep.mubr.bf16.mxu0 %v7018_v50  ;;  %v5074_v48 = vshrl.u32 %v7048_v39, 16  ;;  %v5081_v58 = vshrl.u32 %v7049_v40, 16  ;;  %v7272_v52 = vpack.c.bf16 %v4281_v3, %v4281_v3  ;;  %v5129_v37 = vrot.slane %v7056_v8, 1  ;;  %v8436_v1 = vld [vmem:[%s10162_s5 + $0x658] sm:$0xff]   ;;  %v9985_v3 = vld [vmem:[#allocation2 + $0x24] sm:$0x1] }
 0x322   : > { %v5072_v28 = vor.u32 %v5071_v42, %v5067_v24  ;;  %v5078_v31 = vrot.slane %v5076_v63, 1  ;;  %v5085_v44 = vrot.slane %v5083_v29, 1  ;;  %v5130_v23 = vrot.slane %v7057_v7, 1  ;;  %v8432_v42 = vld [vmem:[%s10162_s5 + $0x620] sm:$0xff]  }
 0x323   : > { %7730 = vmatpush3.bf16.msra.mxu0 %v8407_v46  ;;  %v4371_v16 = vshrl.u32 %v7272_v52, 16  ;;  %v4374_v6 = vshll.u32 %v7272_v52, 16  ;;  %v9940_v46 = vld [vmem:[#allocation2 + $0x38] sm:$0xf]  ;;  %v7111_v19 = vcombine.low %v9896_v41, %v9898_v49  ;;  %v9973_v49 = vld [vmem:[#allocation2 + $0x10] sm:$0xf]  ;;  %v7153_v40 = vcombine.low %v5537_v9, %v5529_v38 }
 0x324   : > { %7731 = vmatprep.subr.bf16.mxu0 %v8409_v60  ;;  %8002 = vmatpush3.bf16.msra.mxu1 %v8408_v2  ;;  %v7112_v14 = vcombine.low %v5065_v20, %v5072_v28  ;;  %v7116_v27 = vcombine.low %v5129_v37, %v5130_v23  ;;  %v4439_v2 = vld [vmem:[#allocation2 + $0x44] sm:$0x1]  ;;  %v5079_v0 = vor.u32 %v5078_v31, %v5074_v48  ;;  %v5003_v60 = vld [vmem:[#allocation2 + $0x38] sm:$0xe]  ;;  %v10007_v37 = vld [vmem:[#allocation2 + $0x28] sm:$0xf] }
 0x325   : > { %4892 = vmatmul.mubr.bf16.gmra.mxu0 %v7017_v21  ;;  %8003 = vmatprep.subr.bf16.mxu1 %v8411_v54  ;;  %v4373_v26 = vrot.slane %v4371_v16, 7  ;;  %v5086_v36 = vor.u32 %v5085_v44, %v5081_v58  ;;  %v9952_v55 = vcombine.low %v9940_v46, %v4995_v13  ;;  %v7058_v50 = vcombine.low %v5003_v60, %v4995_v13  ;;  %v9975_v21 = vld [vmem:[#allocation2 + $0x18] sm:$0xf]  ;;  %v8448_v58 = vld [vmem:[%s10162_s5 + $0x690] sm:$0xff]  }
 0x326   : > { %5406 = vmatprep.mubr.bf16.mxu0 %v7109_v4  ;;  %v5536_v4 = vld [vmem:[#allocation2 + $0x10] sm:$0xe]  ;;  %v7145_v39 = vcombine.low %v9975_v21, %v5529_v38  ;;  %v5665_v44 = vrot.slane %v7153_v40, 1  ;;  %v5541_v38 = vld [vmem:[#allocation2 + $0x38] sm:$0xe] }
 0x327   : > { %7732 = vmatpush3.bf16.msra.mxu0 %v8410_v12  ;;  %v4376_v30 = vor.u32 %v4374_v6, %v4373_v26  ;;  %v4377_v51 = vrot.slane %v4373_v26, 4  ;;  %v8429_v12 = vld [vmem:[%s10162_s5 + $0x628] sm:$0xff]   ;;  %v7115_v61 = vcombine.low %v5079_v0, %v5086_v36  ;;  %v5090_v41 = vshll.u32 %v9952_v55, 16 }
 0x328   : > { %7769 = vmatprep.subr.bf16.mxu0 %v8414_v18  ;;  %8004 = vmatpush3.bf16.msra.mxu1 %v8411_v54  ;;  %v5528_v18 = vld [vmem:[#allocation2 + $0x14] sm:$0x1]  ;;  %v5131_v11 = vrot.slane %v7058_v50, 1  ;;  %v5088_v20 = vshrl.u32 %v9952_v55, 16  ;;  %v5539_v26 = vld [vmem:[#allocation2 + $0x28] sm:$0xe] }
 0x329   : > { %8013 = vmatprep.subr.bf16.mxu1 %v8421_v53  ;;  %v4437_v54 = vsel %vm9250_vm10, %v4376_v30, %v4436_v34  ;;  %v4440_v45 = vsel %vm9256_vm11, %v4377_v51, %v4439_v2  ;;  %v7144_v24 = vcombine.low %v9973_v49, %v5528_v18  ;;  %v5092_v28 = vrot.slane %v5090_v41, 1  ;;  %v10017_v30 = vld [vmem:[#allocation2 + $0x30] sm:$0xf]  ;;  %v5533_v50 = vld [vmem:[#allocation2 + $0x3c] sm:$0x1] }
 0x32a   : > { %4438 = vst [vmem:[#allocation2 + $0x40] sm:$0xf] %v4437_v54  ;;  %4441 = vst [vmem:[#allocation2 + $0x44] sm:$0x1] %v4440_v45  ;;  %v8447_v51 = vld [vmem:[%s10162_s5 + $0x610] sm:$0xff]  }
 0x32b   : > { %8006 = vmatmul.mubr.bf16.vlgmr.msra.gmra.mxu1 %v7113_v32  ;;  %v5585_v63 = vshrl.u32 %v7144_v24, 16  ;;  %v5587_v47 = vshll.u32 %v7144_v24, 16  ;;  %v7114_v32 = vcombine.low %v9920_v25, %v9922_v62  ;;  %v10005_v25 = vcombine.low %v9988_v10, %v9985_v3  ;;  %v5532_v54 = vld [vmem:[#allocation2 + $0x34] sm:$0x1] }
 0x32c   : > { %8014 = vmatpush3.bf16.msra.mxu1 %v8421_v53  ;;  %8009 = vmatprep.mubr.bf16.mxu1 %v7116_v27  ;;  %v7152_v53 = vcombine.low %v5536_v4, %v5528_v18  ;;  %v5592_v62 = vshrl.u32 %v7145_v39, 16  ;;  %v5093_v27 = vor.u32 %v5092_v28, %v5088_v20  ;;  %v8455_v4 = vld [vmem:[%s10162_s5 + $0x680] sm:$0xff]  }
 0x32d   : > { %5407 = vmatmul.mubr.bf16.vlgmr.msra.gmra.mxu0 %v7108_v56  ;;  %8015 = vmatprep.subr.bf16.mxu1 %v8424_v57  ;;  %v8438_v56 = vld [vmem:[%s10162_s5 + $0x618] sm:$0xff]   ;;  %v5589_v52 = vrot.slane %v5587_v47, 1  ;;  %v5601_v55 = vshll.u32 %v10005_v25, 16  ;;  %v5599_v18 = vshrl.u32 %v10005_v25, 16 }
 0x32e   : > { %7770 = vmatpush3.bf16.msra.mxu0 %v8416_v35  ;;  %5414 = vmatprep.mubr.bf16.mxu0 %v7112_v14  ;;  %v5664_v31 = vrot.slane %v7152_v53, 1  ;;  %v8446_v14 = vld [vmem:[%s10162_s5 + $0x650] sm:$0xff]  }
 0x32f   : > { %7771 = vmatprep.subr.bf16.mxu0 %v8422_v5  ;;  %v10001_v5 = vld [vmem:[#allocation2 + $0x2c] sm:$0x1]  ;;  %v5590_v0 = vor.u32 %v5589_v52, %v5585_v63  ;;  %v7157_v63 = vcombine.low %v5541_v38, %v5533_v50 }
 0x330   : > { %8016 = vmatpush3.bf16.msra.mxu1 %v8424_v57  ;;  %v5594_v57 = vshll.u32 %v7145_v39, 16  ;;  %v7147_v36 = vcombine.low %v10007_v37, %v10001_v5  ;;  %v5603_v39 = vrot.slane %v5601_v55, 1 }
 0x331   : > { %8017 = vmatprep.subr.bf16.mxu1 %v8430_v17  ;;  %v9992_v29 = vld [vmem:[#allocation2 + $0x40] sm:$0xf]  ;;  %v4996_v8 = vld [vmem:[#allocation2 + $0x44] sm:$0x1] }
 0x332   : > { %7772 = vmatpush3.bf16.msra.mxu0 %v8423_v59  ;;  %v5004_v7 = vld [vmem:[#allocation2 + $0x40] sm:$0xe]  ;;  %v7051_v35 = vcombine.low %v9992_v29, %v4996_v8  ;;  %v5596_v34 = vrot.slane %v5594_v57, 1  ;;  %v7210_v59 = vcombine.low %v5664_v31, %v5665_v44  ;;  %v7117_v41 = vcombine.low %v9940_v46, %v9992_v29  ;;  %v5534_v47 = vld [vmem:[#allocation2 + $0x44] sm:$0x1] }
 0x333   : > { %7773 = vmatprep.subr.bf16.mxu0 %v8427_v15  ;;  %v7059_v48 = vcombine.low %v5004_v7, %v4996_v8  ;;  %v8452_v15 = vld [vmem:[%s10162_s5 + $0x688] sm:$0xff]   ;;  %v8453_v46 = vld [vmem:[%s10162_s5 + $0x640] sm:$0xff]  }
 0x334   : > { %8018 = vmatpush3.bf16.msra.mxu1 %v8430_v17  ;;  %v5095_v16 = vshrl.u32 %v7051_v35, 16  ;;  %v5097_v6 = vshll.u32 %v7051_v35, 16  ;;  %v5538_v17 = vld [vmem:[#allocation2 + $0x20] sm:$0xe]  ;;  %v5597_v60 = vor.u32 %v5596_v34, %v5592_v62  ;;  %v5543_v7 = vld [vmem:[#allocation2 + $0x48] sm:$0xe] }
 0x335   : > { %5415 = vmatmul.mubr.bf16.gmra.mxu0 %v7111_v19  ;;  %8019 = vmatprep.subr.bf16.mxu1 %v8433_v43  ;;  %v5132_v23 = vrot.slane %v7059_v48, 1  ;;  %v8449_v19 = vld [vmem:[%s10162_s5 + $0x648] sm:$0xff]   ;;  %v5542_v8 = vld [vmem:[#allocation2 + $0x40] sm:$0xe]  ;;  %v5669_v35 = vrot.slane %v7157_v63, 1 }
 0x336   : > { %7774 = vmatpush3.bf16.msra.mxu0 %v8429_v12  ;;  %5422 = vmatprep.mubr.bf16.mxu0 %v7115_v61  ;;  %v5099_v2 = vrot.slane %v5097_v6, 1  ;;  %v10023_v12 = vld [vmem:[#allocation2 + $0x38] sm:$0xf]  ;;  %v5608_v61 = vshll.u32 %v7147_v36, 16  ;;  %v7209_v9 = vcombine.low %v5590_v0, %v5597_v60  ;;  %v8454_v48 = vld [vmem:[%s10162_s5 + $0x600] sm:$0xff]   ;;  %v7158_v31 = vcombine.low %v5542_v8, %v5534_v47 }
 0x337   : > { %7775 = vmatprep.subr.bf16.mxu0 %v8431_v33  ;;  %v7119_v13 = vcombine.low %v5131_v11, %v5132_v23  ;;  %v7155_v33 = vcombine.low %v5539_v26, %v10001_v5  ;;  %v8451_v11 = vld [vmem:[%s10162_s5 + $0x608] sm:$0xff]   ;;  %v7149_v40 = vcombine.low %v10023_v12, %v5533_v50  ;;  %v5526_v62 = vld [vmem:[#allocation2 + $0x40] sm:$0xf] }
 0x338   : > { %8020 = vmatpush3.bf16.msra.mxu1 %v8433_v43  ;;  %v5100_v45 = vor.u32 %v5099_v2, %v5095_v16  ;;  %v7154_v43 = vcombine.low %v5538_v17, %v9985_v3  ;;  %v5610_v53 = vrot.slane %v5608_v61, 1  ;;  %v5527_v57 = vld [vmem:[#allocation2 + $0x48] sm:$0xf]  ;;  %v7150_v17 = vcombine.low %v5526_v62, %v5534_v47 }
 0x339   : > { %8021 = vmatprep.subr.bf16.mxu1 %v8445_v22  ;;  %8010 = vmatmul.mubr.bf16.gmra.mxu1 %v7119_v13  ;;  %v5667_v28 = vrot.slane %v7155_v33, 1  ;;  %v5622_v5 = vshll.u32 %v7149_v40, 16  ;;  %v5670_v13 = vrot.slane %v7158_v31, 1  ;;  %v7214_v61 = vcombine.low %v10017_v30, %v10023_v12 }
 0x33a   : > { %7776 = vmatpush3.bf16.msra.mxu0 %v8432_v42  ;;  %8029 = vmatprep.mubr.bf16.mxu1 %v7210_v59  ;;  %v7118_v24 = vcombine.low %v5093_v27, %v5100_v45  ;;  %v5606_v42 = vshrl.u32 %v7147_v36, 16  ;;  %v5666_v20 = vrot.slane %v7154_v43, 1  ;;  %v5620_v27 = vshrl.u32 %v7149_v40, 16 }
 0x33b   : > { %7777 = vmatprep.subr.bf16.mxu0 %v8436_v1  ;;  %v7148_v1 = vcombine.low %v10017_v30, %v5532_v54  ;;  %v5624_v59 = vrot.slane %v5622_v5, 1  ;;  %v5629_v36 = vshll.u32 %v7150_v17, 16 }
 0x33c   : > { %8022 = vmatpush3.bf16.msra.mxu1 %v8445_v22  ;;  %v5540_v22 = vld [vmem:[#allocation2 + $0x30] sm:$0xe]  ;;  %v5611_v52 = vor.u32 %v5610_v53, %v5606_v42  ;;  %v7213_v25 = vcombine.low %v5666_v20, %v5667_v28 }
 0x33d   : > { %5423 = vmatmul.mubr.bf16.gmra.mxu0 %v7114_v32  ;;  %8023 = vmatprep.subr.bf16.mxu1 %v8448_v58  ;;  %v7156_v3 = vcombine.low %v5540_v22, %v5532_v54  ;;  %v5535_v32 = vld [vmem:[#allocation2 + $0x4c] sm:$0x1]  ;;  %v5613_v16 = vshrl.u32 %v7148_v1, 16  ;;  %v5625_v0 = vor.u32 %v5624_v59, %v5620_v27  ;;  %v5631_v54 = vrot.slane %v5629_v36, 1 }
 0x33e   : > { %7778 = vmatpush3.bf16.msra.mxu0 %v8438_v56  ;;  %5430 = vmatprep.mubr.bf16.mxu0 %v7118_v24  ;;  %v5615_v56 = vshll.u32 %v7148_v1, 16  ;;  %v7159_v44 = vcombine.low %v5543_v7, %v5535_v32  ;;  %v7151_v26 = vcombine.low %v5527_v57, %v5535_v32  ;;  %v7217_v22 = vcombine.low %v5526_v62, %v5527_v57 }
 0x33f   : > { %7779 = vmatprep.subr.bf16.mxu0 %v8446_v14  ;;  %v5668_v29 = vrot.slane %v7156_v3, 1  ;;  %v7208_v14 = vcombine.low %v9973_v49, %v9975_v21  ;;  %v7211_v49 = vcombine.low %v9988_v10, %v10007_v37  ;;  %v5627_v21 = vshrl.u32 %v7150_v17, 16 }
 0x340   : > { %8024 = vmatpush3.bf16.msra.mxu1 %v8448_v58  ;;  %v5604_v58 = vor.u32 %v5603_v39, %v5599_v18  ;;  %v5617_v6 = vrot.slane %v5615_v56, 1  ;;  %v5671_v2 = vrot.slane %v7159_v44, 1  ;;  %v5634_v45 = vshrl.u32 %v7151_v26, 16 }
 0x341   : > { %8025 = vmatprep.subr.bf16.mxu1 %v8452_v15  ;;  %v7216_v23 = vcombine.low %v5668_v29, %v5669_v35  ;;  %v5632_v43 = vor.u32 %v5631_v54, %v5627_v21 }
 0x342   : > { %7780 = vmatpush3.bf16.msra.mxu0 %v8447_v51  ;;  %v7212_v34 = vcombine.low %v5604_v58, %v5611_v52  ;;  %v5636_v51 = vshll.u32 %v7151_v26, 16  ;;  %v7219_v60 = vcombine.low %v5670_v13, %v5671_v2 }
 0x343   : > { %7781 = vmatprep.subr.bf16.mxu0 %v8449_v19 }
 0x344   : > { %8026 = vmatpush3.bf16.msra.mxu1 %v8452_v15  ;;  %v5618_v15 = vor.u32 %v5617_v6, %v5613_v16  ;;  %v5638_v19 = vrot.slane %v5636_v51, 1 }
 0x345   : > { %5431 = vmatmul.mubr.bf16.gmra.mxu0 %v7117_v41  ;;  %8027 = vmatprep.subr.bf16.mxu1 %v8455_v4 }
 0x346   : > { %7782 = vmatpush3.bf16.msra.mxu0 %v8451_v11  ;;  %5945 = vmatprep.mubr.bf16.mxu0 %v7209_v9  ;;  %v7215_v55 = vcombine.low %v5618_v15, %v5625_v0  ;;  %v5639_v33 = vor.u32 %v5638_v19, %v5634_v45 }
 0x347   : > { %7783 = vmatprep.subr.bf16.mxu0 %v8453_v46 }
 0x348   : > { %8028 = vmatpush3.bf16.msra.mxu1 %v8455_v4  ;;  %v7218_v50 = vcombine.low %v5632_v43, %v5639_v33 }
 0x34a   : > { %7784 = vmatpush3.bf16.msra.mxu0 %v8454_v48 }
 0x34b   : > { %8030 = vmatmul.mubr.bf16.vlgmr.msra.gmra.mxu1 %v7213_v25 }
 0x34c   : > { %8033 = vmatprep.mubr.bf16.mxu1 %v7216_v23 }
 0x34d   : > { %5946 = vmatmul.mubr.bf16.vlgmr.msra.gmra.mxu0 %v7208_v14 }
 0x34e   : > { %5953 = vmatprep.mubr.bf16.mxu0 %v7212_v34 }
 0x353   : > { %8034 = vmatmul.mubr.bf16.gmra.mxu1 %v7219_v60 }
 0x355   : > { %5954 = vmatmul.mubr.bf16.gmra.mxu0 %v7211_v49  ;;  %v4594_v49 = vld [vmem:[#allocation3 + $0x30] sm:$0xff] }
 0x356   : > { %5961 = vmatprep.mubr.bf16.mxu0 %v7215_v55 }
 0x35d   : > { %5962 = vmatmul.mubr.bf16.gmra.mxu0 %v7214_v61 }
 0x35e   : > { %5969 = vmatprep.mubr.bf16.mxu0 %v7218_v50 }
 0x365   : > { %5970 = vmatmul.mubr.bf16.gmra.mxu0 %v7217_v22 }
 0x3ca   : > { %v7681_v41 = vpop.f32.mrf.mxu0 }
 0x3cb   : > { %v10053_v4 = vpop.f32.mrf.mxu1 }
 0x3cc   : > { %v7682_v10 = vpop.f32.mrf.mxu0 }
 0x3cd   : > { %v4934_v42 = vpop.f32.mrf.mxu1  ;;  %v7683_v26 = vadd.f32 %v7682_v10, %v7681_v41  ;;  %v4595_v41 = vld [vmem:[#allocation3] sm:$0xff] }
 0x3ce   : > { %v7684_v37 = vpop.f32.mrf.mxu0 }
 0x3cf   : > { %v10059_v11 = vpop.f32.mrf.mxu1  ;;  %v4935_v51 = vadd.f32 %v7683_v26, %v4934_v42 }
 0x3d0   : > { %v7685_v18 = vpop.f32.mrf.mxu0 }
 0x3d1   : > { %v4937_v46 = vpop.f32.mrf.mxu1  ;;  %v7686_v60 = vadd.f32 %v7685_v18, %v7684_v37  ;;  %v4965_v61 = vadd.f32 %v4935_v51, %v4594_v49 }
 0x3d2   : > { %v7687_v38 = vpop.f32.mrf.mxu0 }
 0x3d3   : > { %v4938_v50 = vadd.f32 %v7686_v60, %v4937_v46 }
 0x3d4   : > { %v7688_v24 = vpop.f32.mrf.mxu0 }
 0x3d5   : > { %v7689_v19 = vadd.f32 %v7688_v24, %v7687_v38  ;;  %v4966_v26 = vadd.f32 %v4938_v50, %v4595_v41  ;;  %v4599_v50 = vld [vmem:[#allocation3 + $0x20] sm:$0xff] }
 0x3d6   : > { %v10055_v9 = vpop.f32.mrf.mxu0 }
 0x3d7   : > { %v4943_v42 = vadd.f32 %v10053_v4, %v7689_v19 }
 0x3d8   : > { %v10057_v1 = vpop.f32.mrf.mxu0 }
 0x3d9   : > { %v7692_v38 = vadd.f32 %v10057_v1, %v10055_v9  ;;  %v4597_v9 = vld [vmem:[#allocation3 + $0x10] sm:$0xff] }
 0x3db   : > { %v4946_v4 = vadd.f32 %v10059_v11, %v7692_v38 }
 0x3dd   : > { %v10061_v30 = vpop.f32.mrf.mxu0 }
 0x3de   : > { %v10067_v53 = vpop.f32.mrf.mxu1 }
 0x3df   : > { %v10063_v12 = vpop.f32.mrf.mxu0 }
 0x3e0   : > { %v10073_v20 = vpop.f32.mrf.mxu1  ;;  %v7695_v60 = vadd.f32 %v10063_v12, %v10061_v30  ;;  %v4598_v30 = vld [vmem:[#allocation3 + $0x8] sm:$0xff] }
 0x3e1   : > { %v10065_v39 = vpop.f32.mrf.mxu0 }
 0x3e2   : > { %v10079_v47 = vpop.f32.mrf.mxu1  ;;  %v4951_v11 = vadd.f32 %v7695_v60, %v10073_v20 }
 0x3e3   : > { %v10069_v40 = vpop.f32.mrf.mxu0  ;;  %10198 = vst [vmem:[#allocation15_spill] sm:$0xff] %v10079_v47 }
 0x3e4   : > { %v10083_v8 = vpop.f32.mrf.mxu1 }
 0x3e5   : > { %v10071_v3 = vpop.f32.mrf.mxu0 }
 0x3e7   : > { %v10075_v28 = vpop.f32.mrf.mxu0 }
 0x3e8   : > { %v7701_v20 = vadd.f32 %v10075_v28, %v10071_v3 }
 0x3e9   : > { %v10077_v63 = vpop.f32.mrf.mxu0 }
 0x3eb   : > { %v10081_v32 = vpop.f32.mrf.mxu0  ;;  %v8007_v56 = vpop.f32.mrf.mxu1 }
 0x3ed   : > { %v7733_v29 = vpop.f32.mrf.mxu0  ;;  %v5473_v58 = vpop.f32.mrf.mxu1 }
 0x3ef   : > { %v7734_v7 = vpop.f32.mrf.mxu0  ;;  %v8008_v25 = vpop.f32.mrf.mxu1 }
 0x3f0   : > { %v7735_v15 = vadd.f32 %v7734_v7, %v7733_v29 }
 0x3f1   : > { %v7736_v35 = vpop.f32.mrf.mxu0  ;;  %v5476_v31 = vpop.f32.mrf.mxu1 }
 0x3f2   : > { %v5474_v54 = vadd.f32 %v7735_v15, %v5473_v58 }
 0x3f3   : > { %v7737_v48 = vpop.f32.mrf.mxu0 }
 0x3f4   : > { %v7738_v45 = vadd.f32 %v7737_v48, %v7736_v35 }
 0x3f5   : > { %v7739_v52 = vpop.f32.mrf.mxu0 }
 0x3f6   : > { %v5477_v29 = vadd.f32 %v7738_v45, %v5476_v31 }
 0x3f7   : > { %v7740_v5 = vpop.f32.mrf.mxu0 }
 0x3f8   : > { %v7741_v7 = vadd.f32 %v7740_v5, %v7739_v52  ;;  %v5505_v46 = vadd.f32 %v5477_v29, %v4966_v26 }
 0x3f9   : > { %v7742_v62 = vpop.f32.mrf.mxu0  ;;  %v10085_v14 = vpop.f32.mrf.mxu1 }
 0x3fa   : > { %v5482_v58 = vadd.f32 %v8007_v56, %v7741_v7 }
 0x3fb   : > { %v7743_v57 = vpop.f32.mrf.mxu0  ;;  %v10089_v6 = vpop.f32.mrf.mxu1 }
 0x3fc   : > { %v7744_v15 = vadd.f32 %v7743_v57, %v7742_v62  ;;  %v7698_v62 = vadd.f32 %v10069_v40, %v10065_v39 }
 0x3fd   : > { %v7745_v44 = vpop.f32.mrf.mxu0  ;;  %v10093_v34 = vpop.f32.mrf.mxu1 }
 0x3fe   : > { %10199 = vst [vmem:[#allocation16_spill] sm:$0xff] %v10093_v34  ;;  %v5504_v34 = vadd.f32 %v5474_v54, %v4965_v61  ;;  %v4968_v54 = vadd.f32 %v4946_v4, %v4597_v9 }
 0x3ff   : > { %v7746_v23 = vpop.f32.mrf.mxu0  ;;  %v10099_v13 = vpop.f32.mrf.mxu1 }
 0x401   : > { %v10087_v16 = vpop.f32.mrf.mxu0 }
 0x403   : > { %v10091_v27 = vpop.f32.mrf.mxu0 }
 0x405   : > { %v10095_v59 = vpop.f32.mrf.mxu0 }
 0x407   : > { %v10097_v17 = vpop.f32.mrf.mxu0 }
 0x409   : > { %v10101_v2 = vpop.f32.mrf.mxu0 }
 0x40b   : > { %v10103_v0 = vpop.f32.mrf.mxu0  ;;  %v8031_v36 = vpop.f32.mrf.mxu1 }
 0x40c   : > { %10200 = vst [vmem:[#allocation17_spill] sm:$0xff] %v10103_v0  ;;  %v4596_v0 = vld [vmem:[#allocation3 + $0x18] sm:$0xff] }
 0x40d   : > { %v7785_v21 = vpop.f32.mrf.mxu0  ;;  %v6012_v55 = vpop.f32.mrf.mxu1  ;;  %v4967_v31 = vadd.f32 %v4943_v42, %v4596_v0  ;;  %v4959_v42 = vadd.f32 %v10067_v53, %v7701_v20 }
 0x40f   : > { %v7786_v43 = vpop.f32.mrf.mxu0  ;;  %v8032_v33 = vpop.f32.mrf.mxu1 }
 0x410   : > { %v7787_v22 = vadd.f32 %v7786_v43, %v7785_v21 }
 0x411   : > { %v7788_v10 = vpop.f32.mrf.mxu0  ;;  %v6015_v18 = vpop.f32.mrf.mxu1 }
 0x412   : > { %v6013_v47 = vadd.f32 %v7787_v22, %v6012_v55  ;;  %v7747_v55 = vadd.f32 %v7746_v23, %v7745_v44  ;;  %v4954_v23 = vadd.f32 %v7698_v62, %v10083_v8 }
 0x413   : > { %v7789_v37 = vpop.f32.mrf.mxu0  ;;  %v10108_v5 = vpop.f32.mrf.mxu1 }
 0x414   : > { %v6043_v24 = vadd.f32 %v6013_v47, %v5504_v34  ;;  %v7790_v35 = vadd.f32 %v7789_v37, %v7788_v10  ;;  %v5506_v47 = vadd.f32 %v5482_v58, %v4967_v31  ;;  %v5485_v34 = vadd.f32 %v8008_v25, %v7744_v15  ;;  %v10203_v31 = vld [vmem:[#allocation16_spill] sm:$0xff] }
 0x415   : > { %v7791_v48 = vpop.f32.mrf.mxu0  ;;  %v6028_v0 = vpop.f32.mrf.mxu1  ;;  %v5490_v61 = vadd.f32 %v7747_v55, %v10089_v6  ;;  %v7750_v25 = vadd.f32 %v10091_v27, %v10087_v16  ;;  %v7753_v16 = vadd.f32 %v10097_v17, %v10095_v59  ;;  %v7704_v37 = vadd.f32 %v10081_v32, %v10077_v63 }
 0x416   : > { %6051 = vst [vmem:[#allocation3 + $0x30] sm:$0xff] %v6043_v24  ;;  %v6016_v51 = vadd.f32 %v7790_v35, %v6015_v18  ;;  %v5507_v43 = vadd.f32 %v5485_v34, %v4968_v54  ;;  %v4600_v18 = vld [vmem:[#allocation3 + $0x28] sm:$0xff]  ;;  %v10201_v24 = vld [vmem:[#allocation17_spill] sm:$0xff] }
 0x417   : > { %v7792_v52 = vpop.f32.mrf.mxu0  ;;  %v8036_v40 = vpop.f32.mrf.mxu1  ;;  %v5493_v6 = vadd.f32 %v7750_v25, %v10099_v13  ;;  %v5498_v13 = vadd.f32 %v10085_v14, %v7753_v16  ;;  %v7756_v59 = vadd.f32 %v10201_v24, %v10101_v2 }
 0x418   : > { %v6044_v49 = vadd.f32 %v6016_v51, %v5505_v46  ;;  %v7793_v21 = vadd.f32 %v7792_v52, %v7791_v48  ;;  %v4971_v48 = vadd.f32 %v4959_v42, %v4600_v18  ;;  %v10202_v46 = vld [vmem:[#allocation15_spill] sm:$0xff]  ;;  %v4601_v51 = vld [vmem:[#allocation3 + $0x38] sm:$0xff] }
 0x419   : > { %v7794_v1 = vpop.f32.mrf.mxu0  ;;  %v6031_v7 = vpop.f32.mrf.mxu1  ;;  %v4962_v58 = vadd.f32 %v10202_v46, %v7704_v37  ;;  %v5501_v52 = vadd.f32 %v10203_v31, %v7756_v59 }
 0x41a   : > { %6052 = vst [vmem:[#allocation3] sm:$0xff] %v6044_v49  ;;  %v6021_v56 = vadd.f32 %v8031_v36, %v7793_v21  ;;  %v4969_v36 = vadd.f32 %v4951_v11, %v4598_v30  ;;  %v5510_v32 = vadd.f32 %v5498_v13, %v4971_v48 }
 0x41b   : > { %v7795_v57 = vpop.f32.mrf.mxu0  ;;  %v4972_v60 = vadd.f32 %v4962_v58, %v4601_v51 }
 0x41c   : > { %v6045_v45 = vadd.f32 %v6021_v56, %v5506_v47  ;;  %v7796_v19 = vadd.f32 %v7795_v57, %v7794_v1  ;;  %v5508_v29 = vadd.f32 %v5490_v61, %v4969_v36 }
 0x41d   : > { %v7797_v12 = vpop.f32.mrf.mxu0  ;;  %v5511_v21 = vadd.f32 %v5501_v52, %v4972_v60 }
 0x41e   : > { %6053 = vst [vmem:[#allocation3 + $0x18] sm:$0xff] %v6045_v45  ;;  %v6024_v44 = vadd.f32 %v8032_v33, %v7796_v19  ;;  %v4970_v33 = vadd.f32 %v4954_v23, %v4599_v50 }
 0x41f   : > { %v7798_v39 = vpop.f32.mrf.mxu0 }
 0x420   : > { %v6046_v22 = vadd.f32 %v6024_v44, %v5507_v43  ;;  %v7799_v41 = vadd.f32 %v7798_v39, %v7797_v12  ;;  %v5509_v38 = vadd.f32 %v5493_v6, %v4970_v33 }
 0x421   : > { %v7800_v10 = vpop.f32.mrf.mxu0 }
 0x422   : > { %6054 = vst [vmem:[#allocation3 + $0x10] sm:$0xff] %v6046_v22  ;;  %v6029_v27 = vadd.f32 %v7799_v41, %v6028_v0 }
 0x423   : > { %v7801_v8 = vpop.f32.mrf.mxu0 }
 0x424   : > { %v6047_v3 = vadd.f32 %v6029_v27, %v5508_v29  ;;  %v7802_v28 = vadd.f32 %v7801_v8, %v7800_v10 }
 0x425   : > { %v7803_v26 = vpop.f32.mrf.mxu0 }
 0x426   : > { %6055 = vst [vmem:[#allocation3 + $0x8] sm:$0xff] %v6047_v3  ;;  %v6032_v17 = vadd.f32 %v7802_v28, %v6031_v7 }
 0x427   : > { %v7804_v35 = vpop.f32.mrf.mxu0 }
 0x428   : > { %v6048_v53 = vadd.f32 %v6032_v17, %v5509_v38  ;;  %v7805_v15 = vadd.f32 %v7804_v35, %v7803_v26 }
 0x429   : > { %v7806_v63 = vpop.f32.mrf.mxu0 }
 0x42a   : > { %6056 = vst [vmem:[#allocation3 + $0x20] sm:$0xff] %v6048_v53  ;;  %v6037_v4 = vadd.f32 %v10108_v5, %v7805_v15 }
 0x42b   : > { %v7807_v14 = vpop.f32.mrf.mxu0 }
 0x42c   : > { %v6049_v49 = vadd.f32 %v6037_v4, %v5510_v32  ;;  %v7808_v2 = vadd.f32 %v7807_v14, %v7806_v63 }
 0x42e   : > { %6057 = vst [vmem:[#allocation3 + $0x28] sm:$0xff] %v6049_v49  ;;  %v6040_v9 = vadd.f32 %v8036_v40, %v7808_v2 }
 0x430   : > { %v6050_v1 = vadd.f32 %v6040_v9, %v5511_v21 }
 0x432   : > { %6058 = vst [vmem:[#allocation3 + $0x38] sm:$0xff] %v6050_v1 }
 0x433 PF: > { %v6059_v47 = vld [vmem:[#allocation3 + $0x30] sm:$0xff]  ;;  %v6060_v34 = vld [vmem:[#allocation3] sm:$0xff]  ;;  %v6061_v55 = vld [vmem:[#allocation3 + $0x18] sm:$0xff] }
 0x434   : > { %v7324_v56 = vpack.c.bf16 %v6060_v34, %v6059_v47  ;;  %v6084_v62 = vadd.f32 %v6060_v34, %v6059_v47  ;;  %v6100_v57 = vmul.f32 %v6059_v47, %v6059_v47  ;;  %v6101_v5 = vmul.f32 %v6060_v34, %v6060_v34  ;;  %v6062_v0 = vld [vmem:[#allocation3 + $0x10] sm:$0xff]  ;;  %v6063_v54 = vld [vmem:[#allocation3 + $0x8] sm:$0xff]  ;;  %v6064_v11 = vld [vmem:[#allocation3 + $0x20] sm:$0xff] }
 0x435   : > { %v7329_v45 = vpack.c.bf16 %v6062_v0, %v6061_v55  ;;  %v6102_v19 = vmul.f32 %v6061_v55, %v6061_v55  ;;  %v7334_v30 = vpack.c.bf16 %v6064_v11, %v6063_v54  ;;  %v6103_v61 = vmul.f32 %v6062_v0, %v6062_v0  ;;  %v6065_v25 = vld [vmem:[#allocation3 + $0x28] sm:$0xff]  ;;  %v6083_v59 = vld [vmem:[%s8618_s18] sm:$0xff] }
 0x436   : > { %7325 = vst [vmem:[%s8613_s30] sm:$0xff] %v7324_v56   ;;  %v6108_v12 = vadd.f32 %v6101_v5, %v6100_v57  ;;  %v6085_v43 = vadd.f32 %v6084_v62, %v6061_v55  ;;  %v6104_v36 = vmul.f32 %v6063_v54, %v6063_v54  ;;  %v6105_v22 = vmul.f32 %v6064_v11, %v6064_v11  ;;  %v6099_v48 = vld [vmem:[%s8623_s21] sm:$0xff] }
 0x437   : > { %7350 = vst [vmem:[%s8613_s30 + $0x8] sm:$0xff] %v7329_v45   ;;  %7351 = vst [vmem:[%s8613_s30 + $0x10] sm:$0xff] %v7334_v30   ;;  %v6106_v29 = vmul.f32 %v6065_v25, %v6065_v25 }
 0x438   : > { %v6086_v39 = vadd.f32 %v6085_v43, %v6062_v0  ;;  %v6109_v40 = vadd.f32 %v6108_v12, %v6102_v19 }
 0x439   : > { %v6066_v44 = vld [vmem:[#allocation3 + $0x38] sm:$0xff] }
 0x43a   : > { %v7339_v23 = vpack.c.bf16 %v6066_v44, %v6065_v25  ;;  %v6110_v50 = vadd.f32 %v6109_v40, %v6103_v61  ;;  %v6087_v20 = vadd.f32 %v6086_v39, %v6063_v54  ;;  %v6107_v27 = vmul.f32 %v6066_v44, %v6066_v44 }
 0x43c   : > { %7352 = vst [vmem:[%s8613_s30 + $0x18] sm:$0xff] %v7339_v23   ;;  %v6088_v41 = vadd.f32 %v6087_v20, %v6064_v11  ;;  %v6111_v10 = vadd.f32 %v6110_v50, %v6104_v36 }
 0x43e   : > { %v6112_v6 = vadd.f32 %v6111_v10, %v6105_v22  ;;  %v6089_v16 = vadd.f32 %v6088_v41, %v6065_v25 }
 0x440   : > { %v6090_v33 = vadd.f32 %v6089_v16, %v6066_v44  ;;  %v6113_v8 = vadd.f32 %v6112_v6, %v6106_v29 }
 0x442   : > { %v6091_v7 = vrot.slane %v6090_v33, 4  ;;  %v6114_v42 = vadd.f32 %v6113_v8, %v6107_v27 }
 0x444   : > { %v6092_v37 = vadd.f32 %v6091_v7, %v6090_v33  ;;  %v6115_v3 = vrot.slane %v6114_v42, 4 }
 0x446   : > { %v6093_v28 = vrot.slane %v6092_v37, 2  ;;  %v6116_v18 = vadd.f32 %v6115_v3, %v6114_v42 }
 0x448   : > { %v6094_v26 = vadd.f32 %v6093_v28, %v6092_v37  ;;  %v6117_v38 = vrot.slane %v6116_v18, 2 }
 0x44a   : > { %v6095_v13 = vrot.slane %v6094_v26, 1  ;;  %v6118_v24 = vadd.f32 %v6117_v38, %v6116_v18 }
 0x44c   : > { %v6096_v17 = vadd.f32 %v6095_v13, %v6094_v26  ;;  %v6119_v35 = vrot.slane %v6118_v24, 1 }
 0x44e   : > { %v6097_v46 = vadd.f32 %v6096_v17, %v6083_v59  ;;  %v6120_v58 = vadd.f32 %v6119_v35, %v6118_v24 }
 0x450   : > { %6098 = vst [vmem:[%s8618_s18] sm:$0xff] %v6097_v46  ;;  %v6121_v53 = vadd.f32 %v6120_v58, %v6099_v48 }
 0x452   : > { %6122 = vst [vmem:[%s8623_s21] sm:$0xff] %v6121_v53 }
 0x453 PF: > { %s19_s9 = sadd.s32 1, %s8514_s9   ;;  %s10204_s28 = sld [smem:[#allocation4_spill]] }
 0x454   : > { %p16_p13 = scmp.ge.s32.totalorder %s19_s9, 10   ;;  %s10205_s30 = sld [smem:[#allocation5_spill]] }
 0x455   : > { %s10206_s11 = sld [smem:[#allocation6_spill]]  ;;  %s10207_s27 = smov %s8506_s29 }
 0x457   :  { %18 = sbr.rel (!%p16_p13) target bundleno = 3 (0x3), region = 128 }
 0x45a   : > { %s10208_s29 = smov %s10205_s30 }
 0x45b   : > { %s10209_s30 = smov %s10206_s11 }

</bundles_post_ra>
